<compile_context>
chip_gen: v5e
topology: v5e:2x2
jax: 0.10.0
libtpu: 0.0.40
codegen_flags: <defaults>
</compile_context>

<pallas_src>
import functools
import numpy as np
import jax
import jax.numpy as jnp
from jax.experimental import pallas as pl
from jax.experimental.pallas import tpu as pltpu

# ---------------- NAS-Bench-201 arch description ----------------
NAS_BENCH_201 = ['none', 'skip_connect', 'nor_conv_1x1', 'nor_conv_3x3', 'avg_pool_3x3']


def generate_arch(structure):
    strings = []
    for i in range(3):
        string = '|'.join([NAS_BENCH_201[structure[i][k]] + '~{:}'.format(k)
                           for k in range(i + 1)])
        string = '|{:}|'.format(string)
        strings.append(string)
    return '+'.join(strings)


# op index per edge: node i (1..3) receives edges from nodes 0..i-1
STRUCTURE = [[3], [2, 4], [1, 0, 3]]   # exercises conv3x3, conv1x1, avgpool, skip, none
ARCH_STR = generate_arch(STRUCTURE)

STEM_CHANNELS = 8      # backbone_config.stem_out_channels (small demo value)
NUM_CELLS = 2          # cells per stack (NB201 default is 5; reduced for the small demo)
OUT_W, OUT_H = 8, 8    # backbone_config.width / height defaults
BN_EPS = 1e-5

_VMEM_SPEC = pl.BlockSpec(memory_space=pltpu.MemorySpace.VMEM)


# ---------------- Pallas kernels ----------------
def _conv_cm_kernel(xT_ref, w_ref, s_ref, b_ref, *rest, relu_input, has_add):
    """(optional pre-ReLU) -> MXU GEMM in (cout, m) orientation -> folded BN -> (+add).

    m = n*ho*wo sits on the lane axis, so the output store is lane-dense and the
    large dimension feeds the MXU's wide axis."""
    if has_add:
        add_ref, o_ref = rest
    else:
        (o_ref,) = rest
    xT = xT_ref[...]                                   # (Kp, m)
    if relu_input:                                     # pre-activation of ReLUConvBN
        xT = jnp.maximum(xT, 0.0)
    acc = jnp.dot(w_ref[...], xT, preferred_element_type=jnp.float32)   # (cout, m)
    out = acc * s_ref[...] + b_ref[...]                # folded BN, (cout,1) broadcast
    if has_add:
        out = out + add_ref[...]                       # fused residual / skip add
    o_ref[...] = out


def _avgpool3_kernel(xp_ref, inv_ref, *rest, h, w, has_add):
    """3x3 / stride-1 avg pool (count_include_pad=False): whole batch in one block,
    reciprocal counts broadcast in-kernel, optional fused epilogue add."""
    if has_add:
        add_ref, o_ref = rest
    else:
        (o_ref,) = rest
    acc = xp_ref[:, 0:h, 0:w, :]                       # seed from first shifted window
    for dy in range(3):
        for dx in range(3):
            if dy == 0 and dx == 0:
                continue
            acc = acc + xp_ref[:, dy:dy + h, dx:dx + w, :]
    out = acc * inv_ref[...]                           # (1,h,w,1) -> broadcast n & lanes
    if has_add:
        out = out + add_ref[...]                       # fused node accumulation
    o_ref[...] = out


# ---------------- Pallas wrappers ----------------
def _im2col_T(x, kh, kw, stride, pad):
    """im2col directly in the transposed (K, m) orientation; K padded to mult of 8."""
    n, h, w_, c = x.shape
    xp = jnp.pad(x, ((0, 0), (pad, pad), (pad, pad), (0, 0)))
    ho = (h + 2 * pad - kh) // stride + 1
    wo = (w_ + 2 * pad - kw) // stride + 1
    cols = [xp[:, dy:dy + stride * ho:stride, dx:dx + stride * wo:stride, :]
            for dy in range(kh) for dx in range(kw)]
    p = jnp.stack(cols, axis=0)                        # (kh*kw, n, ho, wo, c)
    p = jnp.transpose(p, (0, 4, 1, 2, 3))              # (kh*kw, c, n, ho, wo)
    k = kh * kw * c
    p = p.reshape(k, n * ho * wo)
    kp = -(-k // 8) * 8                                # sublane-align K
    if kp != k:
        p = jnp.pad(p, ((0, kp - k), (0, 0)))
    return p, (n, ho, wo), k, kp


def conv2d_bn_pallas(x, w, scale, bias, *, stride, pad, relu_input,
                     add_cm=None, out_layout='nhwc'):
    """x: (N,H,W,Cin) NHWC; w: (kh,kw,Cin,Cout); scale/bias: (Cout,) folded BN.
    add_cm (optional): residual in (cout, m) layout, added in the kernel epilogue."""
    kh, kw, cin, cout = w.shape
    xT, (n, ho, wo), k, kp = _im2col_T(x, kh, kw, stride, pad)
    m = n * ho * wo
    w_cm = jnp.transpose(w.reshape(kh * kw, cin, cout), (2, 0, 1)).reshape(cout, k)
    if kp != k:
        w_cm = jnp.pad(w_cm, ((0, 0), (0, kp - k)))
    args = [xT, w_cm, scale.reshape(cout, 1), bias.reshape(cout, 1)]
    if add_cm is not None:
        args.append(add_cm)
    kernel = functools.partial(_conv_cm_kernel, relu_input=relu_input,
                               has_add=add_cm is not None)
    out_cm = pl.pallas_call(
        kernel,
        out_shape=jax.ShapeDtypeStruct((cout, m), jnp.float32),
        in_specs=[_VMEM_SPEC] * len(args),
        out_specs=_VMEM_SPEC,
    )(*args)
    if out_layout == 'cm':
        return out_cm
    return jnp.transpose(out_cm.reshape(cout, n, ho, wo), (1, 2, 3, 0))


def avgpool3x3_pallas(x, add=None):
    """nn.AvgPool2d(3, stride=1, padding=1, count_include_pad=False) in NHWC."""
    n, h, w, c = x.shape
    xp = jnp.pad(x, ((0, 0), (1, 1), (1, 1), (0, 0)))
    cy = np.minimum(np.arange(h) + 1, h - 1) - np.maximum(np.arange(h) - 1, 0) + 1
    cx = np.minimum(np.arange(w) + 1, w - 1) - np.maximum(np.arange(w) - 1, 0) + 1
    inv = (1.0 / (cy[:, None] * cx[None, :])).astype(np.float32)[None, :, :, None]
    args = [xp, jnp.asarray(inv)]
    if add is not None:
        args.append(add)
    kernel = functools.partial(_avgpool3_kernel, h=h, w=w, has_add=add is not None)
    return pl.pallas_call(
        kernel,
        out_shape=jax.ShapeDtypeStruct((n, h, w, c), jnp.float32),
        in_specs=[_VMEM_SPEC] * len(args),
        out_specs=_VMEM_SPEC,
    )(*args)


# ---------------- deterministic parameter construction ----------------
def _init_conv(key, kh, kw, cin, cout):
    fan_in = kh * kw * cin
    return jax.random.normal(key, (kh, kw, cin, cout), jnp.float32) / np.sqrt(fan_in)


def _init_bn(key, c):
    k1, k2, k3, k4 = jax.random.split(key, 4)
    gamma = jax.random.uniform(k1, (c,), jnp.float32, 0.8, 1.2)
    beta = 0.05 * jax.random.normal(k2, (c,), jnp.float32)
    mean = 0.05 * jax.random.normal(k3, (c,), jnp.float32)
    var = jax.random.uniform(k4, (c,), jnp.float32, 0.8, 1.2)
    scale = gamma / jnp.sqrt(var + BN_EPS)
    bias = beta - mean * scale
    return scale, bias


def _init_conv_bn(key, cin, cout, k):
    kc, kb = jax.random.split(key)
    scale, bias = _init_bn(kb, cout)
    return {'w': _init_conv(kc, k, k, cin, cout), 'scale': scale, 'bias': bias}


def init_params(key, structure, c0, num_cells):
    params = {}
    key, ks = jax.random.split(key)
    params['stem'] = _init_conv_bn(ks, 3, c0, 3)
    chans = [c0, 2 * c0, 4 * c0]
    for s in range(3):
        c = chans[s]
        cells = []
        for _ in range(num_cells):
            cell_p = {}
            for i in range(1, 4):
                for j in range(i):
                    op = structure[i - 1][j]
                    if op == 2:
                        key, k1 = jax.random.split(key)
                        cell_p[f'e{i}{j}'] = _init_conv_bn(k1, c, c, 1)
                    elif op == 3:
                        key, k1 = jax.random.split(key)
                        cell_p[f'e{i}{j}'] = _init_conv_bn(k1, c, c, 3)
            cells.append(cell_p)
        params[f'stack{s + 1}'] = cells
        if s < 2:
            cin, cout = chans[s], chans[s + 1]
            key, ka, kb_, kr = jax.random.split(key, 4)
            w1x1 = _init_conv(kr, 1, 1, cin, cout)
            # residual branch: AvgPool2d(2,2) followed by Conv1x1 == one 2x2 stride-2 conv
            res_w = jnp.broadcast_to(w1x1 / 4.0, (2, 2, cin, cout))
            params[f'reduction{s + 1}'] = {
                'conv_a': _init_conv_bn(ka, cin, cout, 3),
                'conv_b': _init_conv_bn(kb_, cout, cout, 3),
                'res_w': res_w,
            }
    return params


# ---------------- forward pass ----------------
def _relu_conv_bn(x, p, stride, pad, **kw):
    return conv2d_bn_pallas(x, p['w'], p['scale'], p['bias'],
                            stride=stride, pad=pad, relu_input=True, **kw)


def _run_cell(x, cell_p, structure):
    c = x.shape[-1]
    nodes = [x, None, None, None]
    contrib = {1: [], 2: [], 3: []}

    def emit_convs_from(j):
        # All conv edges leaving node j, fused into one lane-wider GEMM when >1.
        dests = []
        for i in range(j + 1, 4):
            op = structure[i - 1][j]
            if op in (2, 3):
                dests.append((i, op))
        if not dests:
            return
        if len(dests) == 1:
            i, op = dests[0]
            p = cell_p[f'e{i}{j}']
            k = 3 if op == 3 else 1
            contrib[i].append(_relu_conv_bn(nodes[j], p, 1, (k - 1) // 2))
            return
        ws, ss, bs = [], [], []
        for i, op in dests:
            p = cell_p[f'e{i}{j}']
            w = p['w']
            if op == 2:                               # 1x1 -> zero-pad to 3x3 (exact)
                w = jnp.pad(w, ((1, 1), (1, 1), (0, 0), (0, 0)))
            ws.append(w)
            ss.append(p['scale'])
            bs.append(p['bias'])
        out = conv2d_bn_pallas(nodes[j], jnp.concatenate(ws, axis=-1),
                               jnp.concatenate(ss, axis=0), jnp.concatenate(bs, axis=0),
                               stride=1, pad=1, relu_input=True)
        for idx, (i, op) in enumerate(dests):
            contrib[i].append(out[..., idx * c:(idx + 1) * c])

    emit_convs_from(0)
    for i in range(1, 4):
        partial = None
        for t in contrib[i]:                          # conv contributions (fused calls)
            partial = t if partial is None else partial + t
        avg_srcs = []
        for j in range(i):
            op = structure[i - 1][j]
            if op == 1:                               # skip_connect
                partial = nodes[j] if partial is None else partial + nodes[j]
            elif op == 4:                             # avg_pool_3x3
                avg_srcs.append(j)
        for j in avg_srcs:                            # fuse node accumulation in epilogue
            partial = avgpool3x3_pallas(nodes[j], add=partial)
        nodes[i] = partial if partial is not None else jnp.zeros_like(x)
        if i < 3:
            emit_convs_from(i)
    return nodes[3]


def _run_reduction(x, p):
    a = _relu_conv_bn(x, p['conv_a'], 2, 1)
    cout = p['res_w'].shape[-1]
    # residual (AvgPool2x2 s2 + Conv1x1 folded to one 2x2/s2 conv), kept in the
    # (cout, m) kernel layout so it is added inside conv_b's epilogue (no XLA add).
    res_cm = conv2d_bn_pallas(x, p['res_w'], jnp.ones((cout,), jnp.float32),
                              jnp.zeros((cout,), jnp.float32),
                              stride=2, pad=0, relu_input=False, out_layout='cm')
    return _relu_conv_bn(a, p['conv_b'], 1, 1, add_cm=res_cm)


def _interp_nearest(x, oh, ow):
    # F.interpolate(..., mode='nearest'): idx = floor(out_idx * in/out)
    _, h, w, _ = x.shape
    iy = (np.arange(oh) * h) // oh
    ix = (np.arange(ow) * w) // ow
    return x[:, iy][:, :, ix]


def backbone_nb201_forward(x_nchw, params):
    x = jnp.transpose(x_nchw, (0, 2, 3, 1)).astype(jnp.float32)   # NCHW -> NHWC
    p = params['stem']
    x = conv2d_bn_pallas(x, p['w'], p['scale'], p['bias'],
                         stride=1, pad=1, relu_input=False)
    for cp in params['stack1']:
        x = _run_cell(x, cp, STRUCTURE)
    x0 = _interp_nearest(x, OUT_W, OUT_H)
    x = _run_reduction(x, params['reduction1'])
    for cp in params['stack2']:
        x = _run_cell(x, cp, STRUCTURE)
    x1 = _interp_nearest(x, OUT_W, OUT_H)
    x = _run_reduction(x, params['reduction2'])
    for cp in params['stack3']:
        x = _run_cell(x, cp, STRUCTURE)
    x2 = x
    to_nchw = lambda t: jnp.transpose(t, (0, 3, 1, 2))
    return [to_nchw(x2), to_nchw(x1), to_nchw(x0)]


if __name__ == "__main__":
    key = jax.random.PRNGKey(0)
    kx, kp = jax.random.split(key)
    x = jax.random.normal(kx, (2, 3, 16, 16), jnp.float32)
    params = init_params(kp, STRUCTURE, STEM_CHANNELS, NUM_CELLS)

    fwd = jax.jit(backbone_nb201_forward)
    outs = fwd(x, params)
    outs = jax.block_until_ready(outs)

    assert outs[0].shape == (2, 4 * STEM_CHANNELS, 4, 4)          # x2
    assert outs[1].shape == (2, 2 * STEM_CHANNELS, OUT_W, OUT_H)  # x1
    assert outs[2].shape == (2, STEM_CHANNELS, OUT_W, OUT_H)      # x0
    assert all(bool(jnp.all(jnp.isfinite(o))) for o in outs)
    print("KERNEL_OK")
</pallas_src>

<mosaic_0001>
module attributes {stable_mosaic.version = 11 : i64} {
  func.func @_conv_cm_kernel(%arg0: memref<32x512xf32, #tpu.memory_space<vmem>>, %arg1: memref<8x32xf32, #tpu.memory_space<vmem>>, %arg2: memref<8x1xf32, #tpu.memory_space<vmem>>, %arg3: memref<8x1xf32, #tpu.memory_space<vmem>>, %arg4: memref<8x512xf32, #tpu.memory_space<vmem>>) attributes {dimension_semantics = [], scalar_prefetch = 0 : i64, scratch_operands = 0 : i64, tpu.core_type = #tpu.core_type<tc>} {
    %c0 = arith.constant 0 : index
    %c0_0 = arith.constant 0 : index
    %0 = vector.load %arg0[%c0, %c0_0] : memref<32x512xf32, #tpu.memory_space<vmem>>, vector<32x512xf32>
    %c0_1 = arith.constant 0 : index
    %c0_2 = arith.constant 0 : index
    %1 = vector.load %arg1[%c0_1, %c0_2] : memref<8x32xf32, #tpu.memory_space<vmem>>, vector<8x32xf32>
    %cst = arith.constant dense<0.000000e+00> : vector<8x512xf32>
    %2 = tpu.matmul %1, %0, %cst {dimension_numbers = #tpu.dot_dimension_numbers<[1], [0], [0], [1], [0, 0, 1, 1], [], []>} : vector<8x32xf32>, vector<32x512xf32>, vector<8x512xf32> -> vector<8x512xf32>
    %c0_3 = arith.constant 0 : index
    %c0_4 = arith.constant 0 : index
    %3 = vector.load %arg2[%c0_3, %c0_4] : memref<8x1xf32, #tpu.memory_space<vmem>>, vector<8x1xf32>
    %4 = vector.broadcast %3 : vector<8x1xf32> to vector<8x512xf32>
    %5 = arith.mulf %2, %4 : vector<8x512xf32>
    %c0_5 = arith.constant 0 : index
    %c0_6 = arith.constant 0 : index
    %6 = vector.load %arg3[%c0_5, %c0_6] : memref<8x1xf32, #tpu.memory_space<vmem>>, vector<8x1xf32>
    %7 = vector.broadcast %6 : vector<8x1xf32> to vector<8x512xf32>
    %8 = arith.addf %5, %7 : vector<8x512xf32>
    %c0_7 = arith.constant 0 : index
    %c0_8 = arith.constant 0 : index
    %9 = vector.load %arg4[%c0_7, %c0_8] : memref<8x512xf32, #tpu.memory_space<vmem>>, vector<8x512xf32>
    tpu.vector_store %arg4[%c0_7, %c0_8], %8 {strides = array<i32>} : memref<8x512xf32, #tpu.memory_space<vmem>>, vector<8x512xf32>,
    return
  }
}

module attributes {stable_mosaic.version = 11 : i64} {
  func.func @_conv_cm_kernel(%arg0: memref<72x512xf32, #tpu.memory_space<vmem>>, %arg1: memref<16x72xf32, #tpu.memory_space<vmem>>, %arg2: memref<16x1xf32, #tpu.memory_space<vmem>>, %arg3: memref<16x1xf32, #tpu.memory_space<vmem>>, %arg4: memref<16x512xf32, #tpu.memory_space<vmem>>) attributes {dimension_semantics = [], scalar_prefetch = 0 : i64, scratch_operands = 0 : i64, tpu.core_type = #tpu.core_type<tc>} {
    %c0 = arith.constant 0 : index
    %c0_0 = arith.constant 0 : index
    %0 = vector.load %arg0[%c0, %c0_0] : memref<72x512xf32, #tpu.memory_space<vmem>>, vector<72x512xf32>
    %cst = arith.constant 0.000000e+00 : f32
    %1 = vector.broadcast %cst : f32 to vector<72x512xf32>
    %2 = arith.maximumf %0, %1 : vector<72x512xf32>
    %c0_1 = arith.constant 0 : index
    %c0_2 = arith.constant 0 : index
    %3 = vector.load %arg1[%c0_1, %c0_2] : memref<16x72xf32, #tpu.memory_space<vmem>>, vector<16x72xf32>
    %cst_3 = arith.constant dense<0.000000e+00> : vector<16x512xf32>
    %4 = tpu.matmul %3, %2, %cst_3 {dimension_numbers = #tpu.dot_dimension_numbers<[1], [0], [0], [1], [0, 0, 1, 1], [], []>} : vector<16x72xf32>, vector<72x512xf32>, vector<16x512xf32> -> vector<16x512xf32>
    %c0_4 = arith.constant 0 : index
    %c0_5 = arith.constant 0 : index
    %5 = vector.load %arg2[%c0_4, %c0_5] : memref<16x1xf32, #tpu.memory_space<vmem>>, vector<16x1xf32>
    %6 = vector.broadcast %5 : vector<16x1xf32> to vector<16x512xf32>
    %7 = arith.mulf %4, %6 : vector<16x512xf32>
    %c0_6 = arith.constant 0 : index
    %c0_7 = arith.constant 0 : index
    %8 = vector.load %arg3[%c0_6, %c0_7] : memref<16x1xf32, #tpu.memory_space<vmem>>, vector<16x1xf32>
    %9 = vector.broadcast %8 : vector<16x1xf32> to vector<16x512xf32>
    %10 = arith.addf %7, %9 : vector<16x512xf32>
    %c0_8 = arith.constant 0 : index
    %c0_9 = arith.constant 0 : index
    %11 = vector.load %arg4[%c0_8, %c0_9] : memref<16x512xf32, #tpu.memory_space<vmem>>, vector<16x512xf32>
    tpu.vector_store %arg4[%c0_8, %c0_9], %10 {strides = array<i32>} : memref<16x512xf32, #tpu.memory_space<vmem>>, vector<16x512xf32>,
    return
  }
}

module attributes {stable_mosaic.version = 11 : i64} {
  func.func @_avgpool3_kernel(%arg0: memref<2x18x18x8xf32, #tpu.memory_space<vmem>>, %arg1: memref<1x16x16x1xf32, #tpu.memory_space<vmem>>, %arg2: memref<2x16x16x8xf32, #tpu.memory_space<vmem>>, %arg3: memref<2x16x16x8xf32, #tpu.memory_space<vmem>>) attributes {dimension_semantics = [], scalar_prefetch = 0 : i64, scratch_operands = 0 : i64, tpu.core_type = #tpu.core_type<tc>} {
    %c0 = arith.constant 0 : index
    %c0_0 = arith.constant 0 : index
    %c0_1 = arith.constant 0 : index
    %c0_2 = arith.constant 0 : index
    %0 = vector.load %arg0[%c0, %c0_0, %c0_1, %c0_2] : memref<2x18x18x8xf32, #tpu.memory_space<vmem>>, vector<2x16x16x8xf32>
    %c0_3 = arith.constant 0 : index
    %c0_4 = arith.constant 0 : index
    %c1 = arith.constant 1 : index
    %c0_5 = arith.constant 0 : index
    %1 = vector.load %arg0[%c0_3, %c0_4, %c1, %c0_5] : memref<2x18x18x8xf32, #tpu.memory_space<vmem>>, vector<2x16x16x8xf32>
    %2 = arith.addf %0, %1 : vector<2x16x16x8xf32>
    %c0_6 = arith.constant 0 : index
    %c0_7 = arith.constant 0 : index
    %c2 = arith.constant 2 : index
    %c0_8 = arith.constant 0 : index
    %3 = vector.load %arg0[%c0_6, %c0_7, %c2, %c0_8] : memref<2x18x18x8xf32, #tpu.memory_space<vmem>>, vector<2x16x16x8xf32>
    %4 = arith.addf %2, %3 : vector<2x16x16x8xf32>
    %c0_9 = arith.constant 0 : index
    %c1_10 = arith.constant 1 : index
    %c0_11 = arith.constant 0 : index
    %c0_12 = arith.constant 0 : index
    %5 = vector.load %arg0[%c0_9, %c1_10, %c0_11, %c0_12] : memref<2x18x18x8xf32, #tpu.memory_space<vmem>>, vector<2x16x16x8xf32>
    %6 = arith.addf %4, %5 : vector<2x16x16x8xf32>
    %c0_13 = arith.constant 0 : index
    %c1_14 = arith.constant 1 : index
    %c1_15 = arith.constant 1 : index
    %c0_16 = arith.constant 0 : index
    %7 = vector.load %arg0[%c0_13, %c1_14, %c1_15, %c0_16] : memref<2x18x18x8xf32, #tpu.memory_space<vmem>>, vector<2x16x16x8xf32>
    %8 = arith.addf %6, %7 : vector<2x16x16x8xf32>
    %c0_17 = arith.constant 0 : index
    %c1_18 = arith.constant 1 : index
    %c2_19 = arith.constant 2 : index
    %c0_20 = arith.constant 0 : index
    %9 = vector.load %arg0[%c0_17, %c1_18, %c2_19, %c0_20] : memref<2x18x18x8xf32, #tpu.memory_space<vmem>>, vector<2x16x16x8xf32>
    %10 = arith.addf %8, %9 : vector<2x16x16x8xf32>
    %c0_21 = arith.constant 0 : index
    %c2_22 = arith.constant 2 : index
    %c0_23 = arith.constant 0 : index
    %c0_24 = arith.constant 0 : index
    %11 = vector.load %arg0[%c0_21, %c2_22, %c0_23, %c0_24] : memref<2x18x18x8xf32, #tpu.memory_space<vmem>>, vector<2x16x16x8xf32>
    %12 = arith.addf %10, %11 : vector<2x16x16x8xf32>
    %c0_25 = arith.constant 0 : index
    %c2_26 = arith.constant 2 : index
    %c1_27 = arith.constant 1 : index
    %c0_28 = arith.constant 0 : index
    %13 = vector.load %arg0[%c0_25, %c2_26, %c1_27, %c0_28] : memref<2x18x18x8xf32, #tpu.memory_space<vmem>>, vector<2x16x16x8xf32>
    %14 = arith.addf %12, %13 : vector<2x16x16x8xf32>
    %c0_29 = arith.constant 0 : index
    %c2_30 = arith.constant 2 : index
    %c2_31 = arith.constant 2 : index
    %c0_32 = arith.constant 0 : index
    %15 = vector.load %arg0[%c0_29, %c2_30, %c2_31, %c0_32] : memref<2x18x18x8xf32, #tpu.memory_space<vmem>>, vector<2x16x16x8xf32>
    %16 = arith.addf %14, %15 : vector<2x16x16x8xf32>
    %c0_33 = arith.constant 0 : index
    %c0_34 = arith.constant 0 : index
    %c0_35 = arith.constant 0 : index
    %c0_36 = arith.constant 0 : index
    %17 = vector.load %arg1[%c0_33, %c0_34, %c0_35, %c0_36] : memref<1x16x16x1xf32, #tpu.memory_space<vmem>>, vector<1x16x16x1xf32>
    %18 = vector.broadcast %17 : vector<1x16x16x1xf32> to vector<2x16x16x8xf32>
    %19 = arith.mulf %16, %18 : vector<2x16x16x8xf32>
    %c0_37 = arith.constant 0 : index
    %c0_38 = arith.constant 0 : index
    %c0_39 = arith.constant 0 : index
    %c0_40 = arith.constant 0 : index
    %20 = vector.load %arg2[%c0_37, %c0_38, %c0_39, %c0_40] : memref<2x16x16x8xf32, #tpu.memory_space<vmem>>, vector<2x16x16x8xf32>
    %21 = arith.addf %19, %20 : vector<2x16x16x8xf32>
    %c0_41 = arith.constant 0 : index
    %c0_42 = arith.constant 0 : index
    %c0_43 = arith.constant 0 : index
    %c0_44 = arith.constant 0 : index
    %22 = vector.load %arg3[%c0_41, %c0_42, %c0_43, %c0_44] : memref<2x16x16x8xf32, #tpu.memory_space<vmem>>, vector<2x16x16x8xf32>
    tpu.vector_store %arg3[%c0_41, %c0_42, %c0_43, %c0_44], %21 {strides = array<i32>} : memref<2x16x16x8xf32, #tpu.memory_space<vmem>>, vector<2x16x16x8xf32>,
    return
  }
}

module attributes {stable_mosaic.version = 11 : i64} {
  func.func @_conv_cm_kernel(%arg0: memref<72x512xf32, #tpu.memory_space<vmem>>, %arg1: memref<8x72xf32, #tpu.memory_space<vmem>>, %arg2: memref<8x1xf32, #tpu.memory_space<vmem>>, %arg3: memref<8x1xf32, #tpu.memory_space<vmem>>, %arg4: memref<8x512xf32, #tpu.memory_space<vmem>>) attributes {dimension_semantics = [], scalar_prefetch = 0 : i64, scratch_operands = 0 : i64, tpu.core_type = #tpu.core_type<tc>} {
    %c0 = arith.constant 0 : index
    %c0_0 = arith.constant 0 : index
    %0 = vector.load %arg0[%c0, %c0_0] : memref<72x512xf32, #tpu.memory_space<vmem>>, vector<72x512xf32>
    %cst = arith.constant 0.000000e+00 : f32
    %1 = vector.broadcast %cst : f32 to vector<72x512xf32>
    %2 = arith.maximumf %0, %1 : vector<72x512xf32>
    %c0_1 = arith.constant 0 : index
    %c0_2 = arith.constant 0 : index
    %3 = vector.load %arg1[%c0_1, %c0_2] : memref<8x72xf32, #tpu.memory_space<vmem>>, vector<8x72xf32>
    %cst_3 = arith.constant dense<0.000000e+00> : vector<8x512xf32>
    %4 = tpu.matmul %3, %2, %cst_3 {dimension_numbers = #tpu.dot_dimension_numbers<[1], [0], [0], [1], [0, 0, 1, 1], [], []>} : vector<8x72xf32>, vector<72x512xf32>, vector<8x512xf32> -> vector<8x512xf32>
    %c0_4 = arith.constant 0 : index
    %c0_5 = arith.constant 0 : index
    %5 = vector.load %arg2[%c0_4, %c0_5] : memref<8x1xf32, #tpu.memory_space<vmem>>, vector<8x1xf32>
    %6 = vector.broadcast %5 : vector<8x1xf32> to vector<8x512xf32>
    %7 = arith.mulf %4, %6 : vector<8x512xf32>
    %c0_6 = arith.constant 0 : index
    %c0_7 = arith.constant 0 : index
    %8 = vector.load %arg3[%c0_6, %c0_7] : memref<8x1xf32, #tpu.memory_space<vmem>>, vector<8x1xf32>
    %9 = vector.broadcast %8 : vector<8x1xf32> to vector<8x512xf32>
    %10 = arith.addf %7, %9 : vector<8x512xf32>
    %c0_8 = arith.constant 0 : index
    %c0_9 = arith.constant 0 : index
    %11 = vector.load %arg4[%c0_8, %c0_9] : memref<8x512xf32, #tpu.memory_space<vmem>>, vector<8x512xf32>
    tpu.vector_store %arg4[%c0_8, %c0_9], %10 {strides = array<i32>} : memref<8x512xf32, #tpu.memory_space<vmem>>, vector<8x512xf32>,
    return
  }
}

module attributes {stable_mosaic.version = 11 : i64} {
  func.func @_conv_cm_kernel(%arg0: memref<32x128xf32, #tpu.memory_space<vmem>>, %arg1: memref<16x32xf32, #tpu.memory_space<vmem>>, %arg2: memref<16x1xf32, #tpu.memory_space<vmem>>, %arg3: memref<16x1xf32, #tpu.memory_space<vmem>>, %arg4: memref<16x128xf32, #tpu.memory_space<vmem>>) attributes {dimension_semantics = [], scalar_prefetch = 0 : i64, scratch_operands = 0 : i64, tpu.core_type = #tpu.core_type<tc>} {
    %c0 = arith.constant 0 : index
    %c0_0 = arith.constant 0 : index
    %0 = vector.load %arg0[%c0, %c0_0] : memref<32x128xf32, #tpu.memory_space<vmem>>, vector<32x128xf32>
    %c0_1 = arith.constant 0 : index
    %c0_2 = arith.constant 0 : index
    %1 = vector.load %arg1[%c0_1, %c0_2] : memref<16x32xf32, #tpu.memory_space<vmem>>, vector<16x32xf32>
    %cst = arith.constant dense<0.000000e+00> : vector<16x128xf32>
    %2 = tpu.matmul %1, %0, %cst {dimension_numbers = #tpu.dot_dimension_numbers<[1], [0], [0], [1], [0, 0, 1, 1], [], []>} : vector<16x32xf32>, vector<32x128xf32>, vector<16x128xf32> -> vector<16x128xf32>
    %c0_3 = arith.constant 0 : index
    %c0_4 = arith.constant 0 : index
    %3 = vector.load %arg2[%c0_3, %c0_4] : memref<16x1xf32, #tpu.memory_space<vmem>>, vector<16x1xf32>
    %4 = vector.broadcast %3 : vector<16x1xf32> to vector<16x128xf32>
    %5 = arith.mulf %2, %4 : vector<16x128xf32>
    %c0_5 = arith.constant 0 : index
    %c0_6 = arith.constant 0 : index
    %6 = vector.load %arg3[%c0_5, %c0_6] : memref<16x1xf32, #tpu.memory_space<vmem>>, vector<16x1xf32>
    %7 = vector.broadcast %6 : vector<16x1xf32> to vector<16x128xf32>
    %8 = arith.addf %5, %7 : vector<16x128xf32>
    %c0_7 = arith.constant 0 : index
    %c0_8 = arith.constant 0 : index
    %9 = vector.load %arg4[%c0_7, %c0_8] : memref<16x128xf32, #tpu.memory_space<vmem>>, vector<16x128xf32>
    tpu.vector_store %arg4[%c0_7, %c0_8], %8 {strides = array<i32>} : memref<16x128xf32, #tpu.memory_space<vmem>>, vector<16x128xf32>,
    return
  }
}

module attributes {stable_mosaic.version = 11 : i64} {
  func.func @_conv_cm_kernel(%arg0: memref<72x128xf32, #tpu.memory_space<vmem>>, %arg1: memref<16x72xf32, #tpu.memory_space<vmem>>, %arg2: memref<16x1xf32, #tpu.memory_space<vmem>>, %arg3: memref<16x1xf32, #tpu.memory_space<vmem>>, %arg4: memref<16x128xf32, #tpu.memory_space<vmem>>) attributes {dimension_semantics = [], scalar_prefetch = 0 : i64, scratch_operands = 0 : i64, tpu.core_type = #tpu.core_type<tc>} {
    %c0 = arith.constant 0 : index
    %c0_0 = arith.constant 0 : index
    %0 = vector.load %arg0[%c0, %c0_0] : memref<72x128xf32, #tpu.memory_space<vmem>>, vector<72x128xf32>
    %cst = arith.constant 0.000000e+00 : f32
    %1 = vector.broadcast %cst : f32 to vector<72x128xf32>
    %2 = arith.maximumf %0, %1 : vector<72x128xf32>
    %c0_1 = arith.constant 0 : index
    %c0_2 = arith.constant 0 : index
    %3 = vector.load %arg1[%c0_1, %c0_2] : memref<16x72xf32, #tpu.memory_space<vmem>>, vector<16x72xf32>
    %cst_3 = arith.constant dense<0.000000e+00> : vector<16x128xf32>
    %4 = tpu.matmul %3, %2, %cst_3 {dimension_numbers = #tpu.dot_dimension_numbers<[1], [0], [0], [1], [0, 0, 1, 1], [], []>} : vector<16x72xf32>, vector<72x128xf32>, vector<16x128xf32> -> vector<16x128xf32>
    %c0_4 = arith.constant 0 : index
    %c0_5 = arith.constant 0 : index
    %5 = vector.load %arg2[%c0_4, %c0_5] : memref<16x1xf32, #tpu.memory_space<vmem>>, vector<16x1xf32>
    %6 = vector.broadcast %5 : vector<16x1xf32> to vector<16x128xf32>
    %7 = arith.mulf %4, %6 : vector<16x128xf32>
    %c0_6 = arith.constant 0 : index
    %c0_7 = arith.constant 0 : index
    %8 = vector.load %arg3[%c0_6, %c0_7] : memref<16x1xf32, #tpu.memory_space<vmem>>, vector<16x1xf32>
    %9 = vector.broadcast %8 : vector<16x1xf32> to vector<16x128xf32>
    %10 = arith.addf %7, %9 : vector<16x128xf32>
    %c0_8 = arith.constant 0 : index
    %c0_9 = arith.constant 0 : index
    %11 = vector.load %arg4[%c0_8, %c0_9] : memref<16x128xf32, #tpu.memory_space<vmem>>, vector<16x128xf32>
    tpu.vector_store %arg4[%c0_8, %c0_9], %10 {strides = array<i32>} : memref<16x128xf32, #tpu.memory_space<vmem>>, vector<16x128xf32>,
    return
  }
}

module attributes {stable_mosaic.version = 11 : i64} {
  func.func @_conv_cm_kernel(%arg0: memref<144x128xf32, #tpu.memory_space<vmem>>, %arg1: memref<16x144xf32, #tpu.memory_space<vmem>>, %arg2: memref<16x1xf32, #tpu.memory_space<vmem>>, %arg3: memref<16x1xf32, #tpu.memory_space<vmem>>, %arg4: memref<16x128xf32, #tpu.memory_space<vmem>>, %arg5: memref<16x128xf32, #tpu.memory_space<vmem>>) attributes {dimension_semantics = [], scalar_prefetch = 0 : i64, scratch_operands = 0 : i64, tpu.core_type = #tpu.core_type<tc>} {
    %c0 = arith.constant 0 : index
    %c0_0 = arith.constant 0 : index
    %0 = vector.load %arg0[%c0, %c0_0] : memref<144x128xf32, #tpu.memory_space<vmem>>, vector<144x128xf32>
    %cst = arith.constant 0.000000e+00 : f32
    %1 = vector.broadcast %cst : f32 to vector<144x128xf32>
    %2 = arith.maximumf %0, %1 : vector<144x128xf32>
    %c0_1 = arith.constant 0 : index
    %c0_2 = arith.constant 0 : index
    %3 = vector.load %arg1[%c0_1, %c0_2] : memref<16x144xf32, #tpu.memory_space<vmem>>, vector<16x144xf32>
    %cst_3 = arith.constant dense<0.000000e+00> : vector<16x128xf32>
    %4 = tpu.matmul %3, %2, %cst_3 {dimension_numbers = #tpu.dot_dimension_numbers<[1], [0], [0], [1], [0, 0, 1, 1], [], []>} : vector<16x144xf32>, vector<144x128xf32>, vector<16x128xf32> -> vector<16x128xf32>
    %c0_4 = arith.constant 0 : index
    %c0_5 = arith.constant 0 : index
    %5 = vector.load %arg2[%c0_4, %c0_5] : memref<16x1xf32, #tpu.memory_space<vmem>>, vector<16x1xf32>
    %6 = vector.broadcast %5 : vector<16x1xf32> to vector<16x128xf32>
    %7 = arith.mulf %4, %6 : vector<16x128xf32>
    %c0_6 = arith.constant 0 : index
    %c0_7 = arith.constant 0 : index
    %8 = vector.load %arg3[%c0_6, %c0_7] : memref<16x1xf32, #tpu.memory_space<vmem>>, vector<16x1xf32>
    %9 = vector.broadcast %8 : vector<16x1xf32> to vector<16x128xf32>
    %10 = arith.addf %7, %9 : vector<16x128xf32>
    %c0_8 = arith.constant 0 : index
    %c0_9 = arith.constant 0 : index
    %11 = vector.load %arg4[%c0_8, %c0_9] : memref<16x128xf32, #tpu.memory_space<vmem>>, vector<16x128xf32>
    %12 = arith.addf %10, %11 : vector<16x128xf32>
    %c0_10 = arith.constant 0 : index
    %c0_11 = arith.constant 0 : index
    %13 = vector.load %arg5[%c0_10, %c0_11] : memref<16x128xf32, #tpu.memory_space<vmem>>, vector<16x128xf32>
    tpu.vector_store %arg5[%c0_10, %c0_11], %12 {strides = array<i32>} : memref<16x128xf32, #tpu.memory_space<vmem>>, vector<16x128xf32>,
    return
  }
}

module attributes {stable_mosaic.version = 11 : i64} {
  func.func @_conv_cm_kernel(%arg0: memref<144x128xf32, #tpu.memory_space<vmem>>, %arg1: memref<32x144xf32, #tpu.memory_space<vmem>>, %arg2: memref<32x1xf32, #tpu.memory_space<vmem>>, %arg3: memref<32x1xf32, #tpu.memory_space<vmem>>, %arg4: memref<32x128xf32, #tpu.memory_space<vmem>>) attributes {dimension_semantics = [], scalar_prefetch = 0 : i64, scratch_operands = 0 : i64, tpu.core_type = #tpu.core_type<tc>} {
    %c0 = arith.constant 0 : index
    %c0_0 = arith.constant 0 : index
    %0 = vector.load %arg0[%c0, %c0_0] : memref<144x128xf32, #tpu.memory_space<vmem>>, vector<144x128xf32>
    %cst = arith.constant 0.000000e+00 : f32
    %1 = vector.broadcast %cst : f32 to vector<144x128xf32>
    %2 = arith.maximumf %0, %1 : vector<144x128xf32>
    %c0_1 = arith.constant 0 : index
    %c0_2 = arith.constant 0 : index
    %3 = vector.load %arg1[%c0_1, %c0_2] : memref<32x144xf32, #tpu.memory_space<vmem>>, vector<32x144xf32>
    %cst_3 = arith.constant dense<0.000000e+00> : vector<32x128xf32>
    %4 = tpu.matmul %3, %2, %cst_3 {dimension_numbers = #tpu.dot_dimension_numbers<[1], [0], [0], [1], [0, 0, 1, 1], [], []>} : vector<32x144xf32>, vector<144x128xf32>, vector<32x128xf32> -> vector<32x128xf32>
    %c0_4 = arith.constant 0 : index
    %c0_5 = arith.constant 0 : index
    %5 = vector.load %arg2[%c0_4, %c0_5] : memref<32x1xf32, #tpu.memory_space<vmem>>, vector<32x1xf32>
    %6 = vector.broadcast %5 : vector<32x1xf32> to vector<32x128xf32>
    %7 = arith.mulf %4, %6 : vector<32x128xf32>
    %c0_6 = arith.constant 0 : index
    %c0_7 = arith.constant 0 : index
    %8 = vector.load %arg3[%c0_6, %c0_7] : memref<32x1xf32, #tpu.memory_space<vmem>>, vector<32x1xf32>
    %9 = vector.broadcast %8 : vector<32x1xf32> to vector<32x128xf32>
    %10 = arith.addf %7, %9 : vector<32x128xf32>
    %c0_8 = arith.constant 0 : index
    %c0_9 = arith.constant 0 : index
    %11 = vector.load %arg4[%c0_8, %c0_9] : memref<32x128xf32, #tpu.memory_space<vmem>>, vector<32x128xf32>
    tpu.vector_store %arg4[%c0_8, %c0_9], %10 {strides = array<i32>} : memref<32x128xf32, #tpu.memory_space<vmem>>, vector<32x128xf32>,
    return
  }
}

module attributes {stable_mosaic.version = 11 : i64} {
  func.func @_avgpool3_kernel(%arg0: memref<2x10x10x16xf32, #tpu.memory_space<vmem>>, %arg1: memref<1x8x8x1xf32, #tpu.memory_space<vmem>>, %arg2: memref<2x8x8x16xf32, #tpu.memory_space<vmem>>, %arg3: memref<2x8x8x16xf32, #tpu.memory_space<vmem>>) attributes {dimension_semantics = [], scalar_prefetch = 0 : i64, scratch_operands = 0 : i64, tpu.core_type = #tpu.core_type<tc>} {
    %c0 = arith.constant 0 : index
    %c0_0 = arith.constant 0 : index
    %c0_1 = arith.constant 0 : index
    %c0_2 = arith.constant 0 : index
    %0 = vector.load %arg0[%c0, %c0_0, %c0_1, %c0_2] : memref<2x10x10x16xf32, #tpu.memory_space<vmem>>, vector<2x8x8x16xf32>
    %c0_3 = arith.constant 0 : index
    %c0_4 = arith.constant 0 : index
    %c1 = arith.constant 1 : index
    %c0_5 = arith.constant 0 : index
    %1 = vector.load %arg0[%c0_3, %c0_4, %c1, %c0_5] : memref<2x10x10x16xf32, #tpu.memory_space<vmem>>, vector<2x8x8x16xf32>
    %2 = arith.addf %0, %1 : vector<2x8x8x16xf32>
    %c0_6 = arith.constant 0 : index
    %c0_7 = arith.constant 0 : index
    %c2 = arith.constant 2 : index
    %c0_8 = arith.constant 0 : index
    %3 = vector.load %arg0[%c0_6, %c0_7, %c2, %c0_8] : memref<2x10x10x16xf32, #tpu.memory_space<vmem>>, vector<2x8x8x16xf32>
    %4 = arith.addf %2, %3 : vector<2x8x8x16xf32>
    %c0_9 = arith.constant 0 : index
    %c1_10 = arith.constant 1 : index
    %c0_11 = arith.constant 0 : index
    %c0_12 = arith.constant 0 : index
    %5 = vector.load %arg0[%c0_9, %c1_10, %c0_11, %c0_12] : memref<2x10x10x16xf32, #tpu.memory_space<vmem>>, vector<2x8x8x16xf32>
    %6 = arith.addf %4, %5 : vector<2x8x8x16xf32>
    %c0_13 = arith.constant 0 : index
    %c1_14 = arith.constant 1 : index
    %c1_15 = arith.constant 1 : index
    %c0_16 = arith.constant 0 : index
    %7 = vector.load %arg0[%c0_13, %c1_14, %c1_15, %c0_16] : memref<2x10x10x16xf32, #tpu.memory_space<vmem>>, vector<2x8x8x16xf32>
    %8 = arith.addf %6, %7 : vector<2x8x8x16xf32>
    %c0_17 = arith.constant 0 : index
    %c1_18 = arith.constant 1 : index
    %c2_19 = arith.constant 2 : index
    %c0_20 = arith.constant 0 : index
    %9 = vector.load %arg0[%c0_17, %c1_18, %c2_19, %c0_20] : memref<2x10x10x16xf32, #tpu.memory_space<vmem>>, vector<2x8x8x16xf32>
    %10 = arith.addf %8, %9 : vector<2x8x8x16xf32>
    %c0_21 = arith.constant 0 : index
    %c2_22 = arith.constant 2 : index
    %c0_23 = arith.constant 0 : index
    %c0_24 = arith.constant 0 : index
    %11 = vector.load %arg0[%c0_21, %c2_22, %c0_23, %c0_24] : memref<2x10x10x16xf32, #tpu.memory_space<vmem>>, vector<2x8x8x16xf32>
    %12 = arith.addf %10, %11 : vector<2x8x8x16xf32>
    %c0_25 = arith.constant 0 : index
    %c2_26 = arith.constant 2 : index
    %c1_27 = arith.constant 1 : index
    %c0_28 = arith.constant 0 : index
    %13 = vector.load %arg0[%c0_25, %c2_26, %c1_27, %c0_28] : memref<2x10x10x16xf32, #tpu.memory_space<vmem>>, vector<2x8x8x16xf32>
    %14 = arith.addf %12, %13 : vector<2x8x8x16xf32>
    %c0_29 = arith.constant 0 : index
    %c2_30 = arith.constant 2 : index
    %c2_31 = arith.constant 2 : index
    %c0_32 = arith.constant 0 : index
    %15 = vector.load %arg0[%c0_29, %c2_30, %c2_31, %c0_32] : memref<2x10x10x16xf32, #tpu.memory_space<vmem>>, vector<2x8x8x16xf32>
    %16 = arith.addf %14, %15 : vector<2x8x8x16xf32>
    %c0_33 = arith.constant 0 : index
    %c0_34 = arith.constant 0 : index
    %c0_35 = arith.constant 0 : index
    %c0_36 = arith.constant 0 : index
    %17 = vector.load %arg1[%c0_33, %c0_34, %c0_35, %c0_36] : memref<1x8x8x1xf32, #tpu.memory_space<vmem>>, vector<1x8x8x1xf32>
    %18 = vector.broadcast %17 : vector<1x8x8x1xf32> to vector<2x8x8x16xf32>
    %19 = arith.mulf %16, %18 : vector<2x8x8x16xf32>
    %c0_37 = arith.constant 0 : index
    %c0_38 = arith.constant 0 : index
    %c0_39 = arith.constant 0 : index
    %c0_40 = arith.constant 0 : index
    %20 = vector.load %arg2[%c0_37, %c0_38, %c0_39, %c0_40] : memref<2x8x8x16xf32, #tpu.memory_space<vmem>>, vector<2x8x8x16xf32>
    %21 = arith.addf %19, %20 : vector<2x8x8x16xf32>
    %c0_41 = arith.constant 0 : index
    %c0_42 = arith.constant 0 : index
    %c0_43 = arith.constant 0 : index
    %c0_44 = arith.constant 0 : index
    %22 = vector.load %arg3[%c0_41, %c0_42, %c0_43, %c0_44] : memref<2x8x8x16xf32, #tpu.memory_space<vmem>>, vector<2x8x8x16xf32>
    tpu.vector_store %arg3[%c0_41, %c0_42, %c0_43, %c0_44], %21 {strides = array<i32>} : memref<2x8x8x16xf32, #tpu.memory_space<vmem>>, vector<2x8x8x16xf32>,
    return
  }
}

module attributes {stable_mosaic.version = 11 : i64} {
  func.func @_conv_cm_kernel(%arg0: memref<144x128xf32, #tpu.memory_space<vmem>>, %arg1: memref<16x144xf32, #tpu.memory_space<vmem>>, %arg2: memref<16x1xf32, #tpu.memory_space<vmem>>, %arg3: memref<16x1xf32, #tpu.memory_space<vmem>>, %arg4: memref<16x128xf32, #tpu.memory_space<vmem>>) attributes {dimension_semantics = [], scalar_prefetch = 0 : i64, scratch_operands = 0 : i64, tpu.core_type = #tpu.core_type<tc>} {
    %c0 = arith.constant 0 : index
    %c0_0 = arith.constant 0 : index
    %0 = vector.load %arg0[%c0, %c0_0] : memref<144x128xf32, #tpu.memory_space<vmem>>, vector<144x128xf32>
    %cst = arith.constant 0.000000e+00 : f32
    %1 = vector.broadcast %cst : f32 to vector<144x128xf32>
    %2 = arith.maximumf %0, %1 : vector<144x128xf32>
    %c0_1 = arith.constant 0 : index
    %c0_2 = arith.constant 0 : index
    %3 = vector.load %arg1[%c0_1, %c0_2] : memref<16x144xf32, #tpu.memory_space<vmem>>, vector<16x144xf32>
    %cst_3 = arith.constant dense<0.000000e+00> : vector<16x128xf32>
    %4 = tpu.matmul %3, %2, %cst_3 {dimension_numbers = #tpu.dot_dimension_numbers<[1], [0], [0], [1], [0, 0, 1, 1], [], []>} : vector<16x144xf32>, vector<144x128xf32>, vector<16x128xf32> -> vector<16x128xf32>
    %c0_4 = arith.constant 0 : index
    %c0_5 = arith.constant 0 : index
    %5 = vector.load %arg2[%c0_4, %c0_5] : memref<16x1xf32, #tpu.memory_space<vmem>>, vector<16x1xf32>
    %6 = vector.broadcast %5 : vector<16x1xf32> to vector<16x128xf32>
    %7 = arith.mulf %4, %6 : vector<16x128xf32>
    %c0_6 = arith.constant 0 : index
    %c0_7 = arith.constant 0 : index
    %8 = vector.load %arg3[%c0_6, %c0_7] : memref<16x1xf32, #tpu.memory_space<vmem>>, vector<16x1xf32>
    %9 = vector.broadcast %8 : vector<16x1xf32> to vector<16x128xf32>
    %10 = arith.addf %7, %9 : vector<16x128xf32>
    %c0_8 = arith.constant 0 : index
    %c0_9 = arith.constant 0 : index
    %11 = vector.load %arg4[%c0_8, %c0_9] : memref<16x128xf32, #tpu.memory_space<vmem>>, vector<16x128xf32>
    tpu.vector_store %arg4[%c0_8, %c0_9], %10 {strides = array<i32>} : memref<16x128xf32, #tpu.memory_space<vmem>>, vector<16x128xf32>,
    return
  }
}

module attributes {stable_mosaic.version = 11 : i64} {
  func.func @_conv_cm_kernel(%arg0: memref<64x32xf32, #tpu.memory_space<vmem>>, %arg1: memref<32x64xf32, #tpu.memory_space<vmem>>, %arg2: memref<32x1xf32, #tpu.memory_space<vmem>>, %arg3: memref<32x1xf32, #tpu.memory_space<vmem>>, %arg4: memref<32x32xf32, #tpu.memory_space<vmem>>) attributes {dimension_semantics = [], scalar_prefetch = 0 : i64, scratch_operands = 0 : i64, tpu.core_type = #tpu.core_type<tc>} {
    %c0 = arith.constant 0 : index
    %c0_0 = arith.constant 0 : index
    %0 = vector.load %arg0[%c0, %c0_0] : memref<64x32xf32, #tpu.memory_space<vmem>>, vector<64x32xf32>
    %c0_1 = arith.constant 0 : index
    %c0_2 = arith.constant 0 : index
    %1 = vector.load %arg1[%c0_1, %c0_2] : memref<32x64xf32, #tpu.memory_space<vmem>>, vector<32x64xf32>
    %cst = arith.constant dense<0.000000e+00> : vector<32x32xf32>
    %2 = tpu.matmul %1, %0, %cst {dimension_numbers = #tpu.dot_dimension_numbers<[1], [0], [0], [1], [0, 0, 1, 1], [], []>} : vector<32x64xf32>, vector<64x32xf32>, vector<32x32xf32> -> vector<32x32xf32>
    %c0_3 = arith.constant 0 : index
    %c0_4 = arith.constant 0 : index
    %3 = vector.load %arg2[%c0_3, %c0_4] : memref<32x1xf32, #tpu.memory_space<vmem>>, vector<32x1xf32>
    %4 = vector.broadcast %3 : vector<32x1xf32> to vector<32x32xf32>
    %5 = arith.mulf %2, %4 : vector<32x32xf32>
    %c0_5 = arith.constant 0 : index
    %c0_6 = arith.constant 0 : index
    %6 = vector.load %arg3[%c0_5, %c0_6] : memref<32x1xf32, #tpu.memory_space<vmem>>, vector<32x1xf32>
    %7 = vector.broadcast %6 : vector<32x1xf32> to vector<32x32xf32>
    %8 = arith.addf %5, %7 : vector<32x32xf32>
    %c0_7 = arith.constant 0 : index
    %c0_8 = arith.constant 0 : index
    %9 = vector.load %arg4[%c0_7, %c0_8] : memref<32x32xf32, #tpu.memory_space<vmem>>, vector<32x32xf32>
    tpu.vector_store %arg4[%c0_7, %c0_8], %8 {strides = array<i32>} : memref<32x32xf32, #tpu.memory_space<vmem>>, vector<32x32xf32>,
    return
  }
}

module attributes {stable_mosaic.version = 11 : i64} {
  func.func @_conv_cm_kernel(%arg0: memref<144x32xf32, #tpu.memory_space<vmem>>, %arg1: memref<32x144xf32, #tpu.memory_space<vmem>>, %arg2: memref<32x1xf32, #tpu.memory_space<vmem>>, %arg3: memref<32x1xf32, #tpu.memory_space<vmem>>, %arg4: memref<32x32xf32, #tpu.memory_space<vmem>>) attributes {dimension_semantics = [], scalar_prefetch = 0 : i64, scratch_operands = 0 : i64, tpu.core_type = #tpu.core_type<tc>} {
    %c0 = arith.constant 0 : index
    %c0_0 = arith.constant 0 : index
    %0 = vector.load %arg0[%c0, %c0_0] : memref<144x32xf32, #tpu.memory_space<vmem>>, vector<144x32xf32>
    %cst = arith.constant 0.000000e+00 : f32
    %1 = vector.broadcast %cst : f32 to vector<144x32xf32>
    %2 = arith.maximumf %0, %1 : vector<144x32xf32>
    %c0_1 = arith.constant 0 : index
    %c0_2 = arith.constant 0 : index
    %3 = vector.load %arg1[%c0_1, %c0_2] : memref<32x144xf32, #tpu.memory_space<vmem>>, vector<32x144xf32>
    %cst_3 = arith.constant dense<0.000000e+00> : vector<32x32xf32>
    %4 = tpu.matmul %3, %2, %cst_3 {dimension_numbers = #tpu.dot_dimension_numbers<[1], [0], [0], [1], [0, 0, 1, 1], [], []>} : vector<32x144xf32>, vector<144x32xf32>, vector<32x32xf32> -> vector<32x32xf32>
    %c0_4 = arith.constant 0 : index
    %c0_5 = arith.constant 0 : index
    %5 = vector.load %arg2[%c0_4, %c0_5] : memref<32x1xf32, #tpu.memory_space<vmem>>, vector<32x1xf32>
    %6 = vector.broadcast %5 : vector<32x1xf32> to vector<32x32xf32>
    %7 = arith.mulf %4, %6 : vector<32x32xf32>
    %c0_6 = arith.constant 0 : index
    %c0_7 = arith.constant 0 : index
    %8 = vector.load %arg3[%c0_6, %c0_7] : memref<32x1xf32, #tpu.memory_space<vmem>>, vector<32x1xf32>
    %9 = vector.broadcast %8 : vector<32x1xf32> to vector<32x32xf32>
    %10 = arith.addf %7, %9 : vector<32x32xf32>
    %c0_8 = arith.constant 0 : index
    %c0_9 = arith.constant 0 : index
    %11 = vector.load %arg4[%c0_8, %c0_9] : memref<32x32xf32, #tpu.memory_space<vmem>>, vector<32x32xf32>
    tpu.vector_store %arg4[%c0_8, %c0_9], %10 {strides = array<i32>} : memref<32x32xf32, #tpu.memory_space<vmem>>, vector<32x32xf32>,
    return
  }
}

module attributes {stable_mosaic.version = 11 : i64} {
  func.func @_conv_cm_kernel(%arg0: memref<288x32xf32, #tpu.memory_space<vmem>>, %arg1: memref<32x288xf32, #tpu.memory_space<vmem>>, %arg2: memref<32x1xf32, #tpu.memory_space<vmem>>, %arg3: memref<32x1xf32, #tpu.memory_space<vmem>>, %arg4: memref<32x32xf32, #tpu.memory_space<vmem>>, %arg5: memref<32x32xf32, #tpu.memory_space<vmem>>) attributes {dimension_semantics = [], scalar_prefetch = 0 : i64, scratch_operands = 0 : i64, tpu.core_type = #tpu.core_type<tc>} {
    %c0 = arith.constant 0 : index
    %c0_0 = arith.constant 0 : index
    %0 = vector.load %arg0[%c0, %c0_0] : memref<288x32xf32, #tpu.memory_space<vmem>>, vector<288x32xf32>
    %cst = arith.constant 0.000000e+00 : f32
    %1 = vector.broadcast %cst : f32 to vector<288x32xf32>
    %2 = arith.maximumf %0, %1 : vector<288x32xf32>
    %c0_1 = arith.constant 0 : index
    %c0_2 = arith.constant 0 : index
    %3 = vector.load %arg1[%c0_1, %c0_2] : memref<32x288xf32, #tpu.memory_space<vmem>>, vector<32x288xf32>
    %cst_3 = arith.constant dense<0.000000e+00> : vector<32x32xf32>
    %4 = tpu.matmul %3, %2, %cst_3 {dimension_numbers = #tpu.dot_dimension_numbers<[1], [0], [0], [1], [0, 0, 1, 1], [], []>} : vector<32x288xf32>, vector<288x32xf32>, vector<32x32xf32> -> vector<32x32xf32>
    %c0_4 = arith.constant 0 : index
    %c0_5 = arith.constant 0 : index
    %5 = vector.load %arg2[%c0_4, %c0_5] : memref<32x1xf32, #tpu.memory_space<vmem>>, vector<32x1xf32>
    %6 = vector.broadcast %5 : vector<32x1xf32> to vector<32x32xf32>
    %7 = arith.mulf %4, %6 : vector<32x32xf32>
    %c0_6 = arith.constant 0 : index
    %c0_7 = arith.constant 0 : index
    %8 = vector.load %arg3[%c0_6, %c0_7] : memref<32x1xf32, #tpu.memory_space<vmem>>, vector<32x1xf32>
    %9 = vector.broadcast %8 : vector<32x1xf32> to vector<32x32xf32>
    %10 = arith.addf %7, %9 : vector<32x32xf32>
    %c0_8 = arith.constant 0 : index
    %c0_9 = arith.constant 0 : index
    %11 = vector.load %arg4[%c0_8, %c0_9] : memref<32x32xf32, #tpu.memory_space<vmem>>, vector<32x32xf32>
    %12 = arith.addf %10, %11 : vector<32x32xf32>
    %c0_10 = arith.constant 0 : index
    %c0_11 = arith.constant 0 : index
    %13 = vector.load %arg5[%c0_10, %c0_11] : memref<32x32xf32, #tpu.memory_space<vmem>>, vector<32x32xf32>
    tpu.vector_store %arg5[%c0_10, %c0_11], %12 {strides = array<i32>} : memref<32x32xf32, #tpu.memory_space<vmem>>, vector<32x32xf32>,
    return
  }
}

module attributes {stable_mosaic.version = 11 : i64} {
  func.func @_avgpool3_kernel(%arg0: memref<2x6x6x32xf32, #tpu.memory_space<vmem>>, %arg1: memref<1x4x4x1xf32, #tpu.memory_space<vmem>>, %arg2: memref<2x4x4x32xf32, #tpu.memory_space<vmem>>, %arg3: memref<2x4x4x32xf32, #tpu.memory_space<vmem>>) attributes {dimension_semantics = [], scalar_prefetch = 0 : i64, scratch_operands = 0 : i64, tpu.core_type = #tpu.core_type<tc>} {
    %c0 = arith.constant 0 : index
    %c0_0 = arith.constant 0 : index
    %c0_1 = arith.constant 0 : index
    %c0_2 = arith.constant 0 : index
    %0 = vector.load %arg0[%c0, %c0_0, %c0_1, %c0_2] : memref<2x6x6x32xf32, #tpu.memory_space<vmem>>, vector<2x4x4x32xf32>
    %c0_3 = arith.constant 0 : index
    %c0_4 = arith.constant 0 : index
    %c1 = arith.constant 1 : index
    %c0_5 = arith.constant 0 : index
    %1 = vector.load %arg0[%c0_3, %c0_4, %c1, %c0_5] : memref<2x6x6x32xf32, #tpu.memory_space<vmem>>, vector<2x4x4x32xf32>
    %2 = arith.addf %0, %1 : vector<2x4x4x32xf32>
    %c0_6 = arith.constant 0 : index
    %c0_7 = arith.constant 0 : index
    %c2 = arith.constant 2 : index
    %c0_8 = arith.constant 0 : index
    %3 = vector.load %arg0[%c0_6, %c0_7, %c2, %c0_8] : memref<2x6x6x32xf32, #tpu.memory_space<vmem>>, vector<2x4x4x32xf32>
    %4 = arith.addf %2, %3 : vector<2x4x4x32xf32>
    %c0_9 = arith.constant 0 : index
    %c1_10 = arith.constant 1 : index
    %c0_11 = arith.constant 0 : index
    %c0_12 = arith.constant 0 : index
    %5 = vector.load %arg0[%c0_9, %c1_10, %c0_11, %c0_12] : memref<2x6x6x32xf32, #tpu.memory_space<vmem>>, vector<2x4x4x32xf32>
    %6 = arith.addf %4, %5 : vector<2x4x4x32xf32>
    %c0_13 = arith.constant 0 : index
    %c1_14 = arith.constant 1 : index
    %c1_15 = arith.constant 1 : index
    %c0_16 = arith.constant 0 : index
    %7 = vector.load %arg0[%c0_13, %c1_14, %c1_15, %c0_16] : memref<2x6x6x32xf32, #tpu.memory_space<vmem>>, vector<2x4x4x32xf32>
    %8 = arith.addf %6, %7 : vector<2x4x4x32xf32>
    %c0_17 = arith.constant 0 : index
    %c1_18 = arith.constant 1 : index
    %c2_19 = arith.constant 2 : index
    %c0_20 = arith.constant 0 : index
    %9 = vector.load %arg0[%c0_17, %c1_18, %c2_19, %c0_20] : memref<2x6x6x32xf32, #tpu.memory_space<vmem>>, vector<2x4x4x32xf32>
    %10 = arith.addf %8, %9 : vector<2x4x4x32xf32>
    %c0_21 = arith.constant 0 : index
    %c2_22 = arith.constant 2 : index
    %c0_23 = arith.constant 0 : index
    %c0_24 = arith.constant 0 : index
    %11 = vector.load %arg0[%c0_21, %c2_22, %c0_23, %c0_24] : memref<2x6x6x32xf32, #tpu.memory_space<vmem>>, vector<2x4x4x32xf32>
    %12 = arith.addf %10, %11 : vector<2x4x4x32xf32>
    %c0_25 = arith.constant 0 : index
    %c2_26 = arith.constant 2 : index
    %c1_27 = arith.constant 1 : index
    %c0_28 = arith.constant 0 : index
    %13 = vector.load %arg0[%c0_25, %c2_26, %c1_27, %c0_28] : memref<2x6x6x32xf32, #tpu.memory_space<vmem>>, vector<2x4x4x32xf32>
    %14 = arith.addf %12, %13 : vector<2x4x4x32xf32>
    %c0_29 = arith.constant 0 : index
    %c2_30 = arith.constant 2 : index
    %c2_31 = arith.constant 2 : index
    %c0_32 = arith.constant 0 : index
    %15 = vector.load %arg0[%c0_29, %c2_30, %c2_31, %c0_32] : memref<2x6x6x32xf32, #tpu.memory_space<vmem>>, vector<2x4x4x32xf32>
    %16 = arith.addf %14, %15 : vector<2x4x4x32xf32>
    %c0_33 = arith.constant 0 : index
    %c0_34 = arith.constant 0 : index
    %c0_35 = arith.constant 0 : index
    %c0_36 = arith.constant 0 : index
    %17 = vector.load %arg1[%c0_33, %c0_34, %c0_35, %c0_36] : memref<1x4x4x1xf32, #tpu.memory_space<vmem>>, vector<1x4x4x1xf32>
    %18 = vector.broadcast %17 : vector<1x4x4x1xf32> to vector<2x4x4x32xf32>
    %19 = arith.mulf %16, %18 : vector<2x4x4x32xf32>
    %c0_37 = arith.constant 0 : index
    %c0_38 = arith.constant 0 : index
    %c0_39 = arith.constant 0 : index
    %c0_40 = arith.constant 0 : index
    %20 = vector.load %arg2[%c0_37, %c0_38, %c0_39, %c0_40] : memref<2x4x4x32xf32, #tpu.memory_space<vmem>>, vector<2x4x4x32xf32>
    %21 = arith.addf %19, %20 : vector<2x4x4x32xf32>
    %c0_41 = arith.constant 0 : index
    %c0_42 = arith.constant 0 : index
    %c0_43 = arith.constant 0 : index
    %c0_44 = arith.constant 0 : index
    %22 = vector.load %arg3[%c0_41, %c0_42, %c0_43, %c0_44] : memref<2x4x4x32xf32, #tpu.memory_space<vmem>>, vector<2x4x4x32xf32>
    tpu.vector_store %arg3[%c0_41, %c0_42, %c0_43, %c0_44], %21 {strides = array<i32>} : memref<2x4x4x32xf32, #tpu.memory_space<vmem>>, vector<2x4x4x32xf32>,
    return
  }
}

module attributes {stable_mosaic.version = 11 : i64} {
  func.func @_conv_cm_kernel(%arg0: memref<288x32xf32, #tpu.memory_space<vmem>>, %arg1: memref<64x288xf32, #tpu.memory_space<vmem>>, %arg2: memref<64x1xf32, #tpu.memory_space<vmem>>, %arg3: memref<64x1xf32, #tpu.memory_space<vmem>>, %arg4: memref<64x32xf32, #tpu.memory_space<vmem>>) attributes {dimension_semantics = [], scalar_prefetch = 0 : i64, scratch_operands = 0 : i64, tpu.core_type = #tpu.core_type<tc>} {
    %c0 = arith.constant 0 : index
    %c0_0 = arith.constant 0 : index
    %0 = vector.load %arg0[%c0, %c0_0] : memref<288x32xf32, #tpu.memory_space<vmem>>, vector<288x32xf32>
    %cst = arith.constant 0.000000e+00 : f32
    %1 = vector.broadcast %cst : f32 to vector<288x32xf32>
    %2 = arith.maximumf %0, %1 : vector<288x32xf32>
    %c0_1 = arith.constant 0 : index
    %c0_2 = arith.constant 0 : index
    %3 = vector.load %arg1[%c0_1, %c0_2] : memref<64x288xf32, #tpu.memory_space<vmem>>, vector<64x288xf32>
    %cst_3 = arith.constant dense<0.000000e+00> : vector<64x32xf32>
    %4 = tpu.matmul %3, %2, %cst_3 {dimension_numbers = #tpu.dot_dimension_numbers<[1], [0], [0], [1], [0, 0, 1, 1], [], []>} : vector<64x288xf32>, vector<288x32xf32>, vector<64x32xf32> -> vector<64x32xf32>
    %c0_4 = arith.constant 0 : index
    %c0_5 = arith.constant 0 : index
    %5 = vector.load %arg2[%c0_4, %c0_5] : memref<64x1xf32, #tpu.memory_space<vmem>>, vector<64x1xf32>
    %6 = vector.broadcast %5 : vector<64x1xf32> to vector<64x32xf32>
    %7 = arith.mulf %4, %6 : vector<64x32xf32>
    %c0_6 = arith.constant 0 : index
    %c0_7 = arith.constant 0 : index
    %8 = vector.load %arg3[%c0_6, %c0_7] : memref<64x1xf32, #tpu.memory_space<vmem>>, vector<64x1xf32>
    %9 = vector.broadcast %8 : vector<64x1xf32> to vector<64x32xf32>
    %10 = arith.addf %7, %9 : vector<64x32xf32>
    %c0_8 = arith.constant 0 : index
    %c0_9 = arith.constant 0 : index
    %11 = vector.load %arg4[%c0_8, %c0_9] : memref<64x32xf32, #tpu.memory_space<vmem>>, vector<64x32xf32>
    tpu.vector_store %arg4[%c0_8, %c0_9], %10 {strides = array<i32>} : memref<64x32xf32, #tpu.memory_space<vmem>>, vector<64x32xf32>,
    return
  }
}

module attributes {stable_mosaic.version = 11 : i64} {
  func.func @_conv_cm_kernel(%arg0: memref<288x32xf32, #tpu.memory_space<vmem>>, %arg1: memref<32x288xf32, #tpu.memory_space<vmem>>, %arg2: memref<32x1xf32, #tpu.memory_space<vmem>>, %arg3: memref<32x1xf32, #tpu.memory_space<vmem>>, %arg4: memref<32x32xf32, #tpu.memory_space<vmem>>) attributes {dimension_semantics = [], scalar_prefetch = 0 : i64, scratch_operands = 0 : i64, tpu.core_type = #tpu.core_type<tc>} {
    %c0 = arith.constant 0 : index
    %c0_0 = arith.constant 0 : index
    %0 = vector.load %arg0[%c0, %c0_0] : memref<288x32xf32, #tpu.memory_space<vmem>>, vector<288x32xf32>
    %cst = arith.constant 0.000000e+00 : f32
    %1 = vector.broadcast %cst : f32 to vector<288x32xf32>
    %2 = arith.maximumf %0, %1 : vector<288x32xf32>
    %c0_1 = arith.constant 0 : index
    %c0_2 = arith.constant 0 : index
    %3 = vector.load %arg1[%c0_1, %c0_2] : memref<32x288xf32, #tpu.memory_space<vmem>>, vector<32x288xf32>
    %cst_3 = arith.constant dense<0.000000e+00> : vector<32x32xf32>
    %4 = tpu.matmul %3, %2, %cst_3 {dimension_numbers = #tpu.dot_dimension_numbers<[1], [0], [0], [1], [0, 0, 1, 1], [], []>} : vector<32x288xf32>, vector<288x32xf32>, vector<32x32xf32> -> vector<32x32xf32>
    %c0_4 = arith.constant 0 : index
    %c0_5 = arith.constant 0 : index
    %5 = vector.load %arg2[%c0_4, %c0_5] : memref<32x1xf32, #tpu.memory_space<vmem>>, vector<32x1xf32>
    %6 = vector.broadcast %5 : vector<32x1xf32> to vector<32x32xf32>
    %7 = arith.mulf %4, %6 : vector<32x32xf32>
    %c0_6 = arith.constant 0 : index
    %c0_7 = arith.constant 0 : index
    %8 = vector.load %arg3[%c0_6, %c0_7] : memref<32x1xf32, #tpu.memory_space<vmem>>, vector<32x1xf32>
    %9 = vector.broadcast %8 : vector<32x1xf32> to vector<32x32xf32>
    %10 = arith.addf %7, %9 : vector<32x32xf32>
    %c0_8 = arith.constant 0 : index
    %c0_9 = arith.constant 0 : index
    %11 = vector.load %arg4[%c0_8, %c0_9] : memref<32x32xf32, #tpu.memory_space<vmem>>, vector<32x32xf32>
    tpu.vector_store %arg4[%c0_8, %c0_9], %10 {strides = array<i32>} : memref<32x32xf32, #tpu.memory_space<vmem>>, vector<32x32xf32>,
    return
  }
}

</mosaic_0001>

<bundles_post_ra>
// kernel: backbone_nb201_forward.25
= control target key start
LH: loop header
LB: loop body
LE: loop exit
PB: predicated region body
PF: predicated region fallthrough
CT: control target
= control target key end

     0   :  { %v152_v3 = vmov 0   ;;  %vm34_vm0 = vcmask 261120   ;;  %s247_s0 = inlined_call_operand.vmem [shape: f32[32,512], index: 0, kind: input, shape index: {}]   ;;  %s248_s1 = inlined_call_operand.vmem [shape: f32[8,32], index: 1, kind: input, shape index: {}]   ;;  %s249_s2 = inlined_call_operand.vmem [shape: f32[8,1], index: 2, kind: input, shape index: {}]   ;;  %s250_s3 = inlined_call_operand.vmem [shape: f32[8,1], index: 3, kind: input, shape index: {}]   ;;  %s251_s4 = inlined_call_operand.vmem [shape: f32[8,512], index: 4, kind: output, shape index: {}]  }
   0x1   :  { %v29_v0 = vld [vmem:[%s247_s0 + $0x60] sm:$0xff]  ;;  %v30_v1 = vld [vmem:[%s247_s0 + $0x68] sm:$0xff]  ;;  %v31_v2 = vld [vmem:[%s247_s0 + $0x70] sm:$0xff]  ;;  %151 = vset.pattern.permute.xlu0 %v152_v3 }
   0x2   :  { %50 = vmatpush.msra.mxu0 %v29_v0  ;;  %70 = vmatpush.msra.mxu1 %v30_v1  ;;  %v32_v4 = vld [vmem:[%s247_s0 + $0x78] sm:$0xff]  ;;  %v25_v5 = vld [vmem:[%s247_s0 + $0x40] sm:$0xff]  ;;  %v26_v6 = vld [vmem:[%s247_s0 + $0x48] sm:$0xff] }
   0x3   :  { %90 = vmatpush.msra.mxu2 %v31_v2  ;;  %110 = vmatpush.msra.mxu3 %v32_v4  ;;  %v27_v7 = vld [vmem:[%s247_s0 + $0x50] sm:$0xff]  ;;  %v28_v8 = vld [vmem:[%s247_s0 + $0x58] sm:$0xff]  ;;  %v21_v9 = vld [vmem:[%s247_s0 + $0x20] sm:$0xff] }
   0x4   :  { %51 = vmatpush.msra.mxu0 %v25_v5  ;;  %71 = vmatpush.msra.mxu1 %v26_v6  ;;  %v22_v10 = vld [vmem:[%s247_s0 + $0x28] sm:$0xff]  ;;  %v23_v11 = vld [vmem:[%s247_s0 + $0x30] sm:$0xff]  ;;  %v24_v12 = vld [vmem:[%s247_s0 + $0x38] sm:$0xff] }
   0x5   :  { %91 = vmatpush.msra.mxu2 %v27_v7  ;;  %111 = vmatpush.msra.mxu3 %v28_v8  ;;  %v17_v13 = vld [vmem:[%s247_s0] sm:$0xff]  ;;  %v18_v14 = vld [vmem:[%s247_s0 + $0x8] sm:$0xff]  ;;  %v19_v15 = vld [vmem:[%s247_s0 + $0x10] sm:$0xff] }
   0x6   :  { %52 = vmatpush.msra.mxu0 %v21_v9  ;;  %72 = vmatpush.msra.mxu1 %v22_v10  ;;  %v20_v16 = vld [vmem:[%s247_s0 + $0x18] sm:$0xff]  ;;  %v33_v17 = vld [vmem:[%s248_s1] sm:$0xff] }
   0x7   :  { %92 = vmatpush.msra.mxu2 %v23_v11  ;;  %112 = vmatpush.msra.mxu3 %v24_v12  ;;  %v118_v18 = vld [vmem:[%s249_s2] sm:$0xff] }
   0x8   :  { %53 = vmatpush.msra.mxu0 %v17_v13  ;;  %73 = vmatpush.msra.mxu1 %v18_v14  ;;  %v128_v19 = vld [vmem:[%s250_s3] sm:$0xff] }
   0x9   :  { %93 = vmatpush.msra.mxu2 %v19_v15  ;;  %113 = vmatpush.msra.mxu3 %v20_v16 }
   0xa   :  { %146 = vmatmul.msk.f32.vlgmr.msra.gmra.mxu0 %vm34_vm0, %v33_v17  ;;  %147 = vmatmul.msk.f32.vlgmr.msra.gmra.mxu1 %vm34_vm0, %v33_v17 }
   0xb   :  { %148 = vmatmul.msk.f32.vlgmr.msra.gmra.mxu2 %vm34_vm0, %v33_v17  ;;  %149 = vmatmul.msk.f32.vlgmr.msra.gmra.mxu3 %vm34_vm0, %v33_v17 }
   0xc   :  { %121 = vperm.xlu0 %151, %v118_v18  }
  0x14   :  { %131 = vperm.xlu0 %151, %v128_v19  }
  0x7e   :  { %v122_v20 = vpop.permute.xlu0 %121 }
  0x86   :  { %v132_v25 = vpop.permute.xlu0 %131 }
  0x87   :  { %v55_v21 = vpop.f32.mrf.mxu0  ;;  %v75_v22 = vpop.f32.mrf.mxu1 }
  0x88   :  { %v124_v23 = vmul.f32 %v122_v20, %v55_v21  ;;  %v125_v24 = vmul.f32 %v122_v20, %v75_v22 }
  0x8a   :  { %v134_v26 = vadd.f32 %v132_v25, %v124_v23  ;;  %v135_v27 = vadd.f32 %v132_v25, %v125_v24 }
  0x8c   :  { %138 = vst [vmem:[%s251_s4] sm:$0xff] %v134_v26 }
  0x8d   :  { %139 = vst [vmem:[%s251_s4 + $0x8] sm:$0xff] %v135_v27 }
  0x8e   :  { %v95_v28 = vpop.f32.mrf.mxu2  ;;  %v115_v29 = vpop.f32.mrf.mxu3 }
  0x8f   :  { %v126_v30 = vmul.f32 %v122_v20, %v95_v28  ;;  %v127_v31 = vmul.f32 %v122_v20, %v115_v29 }
  0x91   :  { %v136_v32 = vadd.f32 %v132_v25, %v126_v30  ;;  %v137_v33 = vadd.f32 %v132_v25, %v127_v31 }
  0x93   :  { %140 = vst [vmem:[%s251_s4 + $0x10] sm:$0xff] %v136_v32 }
  0x94   :  { %141 = vst [vmem:[%s251_s4 + $0x18] sm:$0xff] %v137_v33 }

// kernel: backbone_nb201_forward.26
= control target key start
LH: loop header
LB: loop body
LE: loop exit
PB: predicated region body
PF: predicated region fallthrough
CT: control target
= control target key end

     0   :  { %v253_v3 = vmov 0   ;;  %vm91_vm0 = vcmask 588800   ;;  %s437_s0 = inlined_call_operand.vmem [shape: f32[72,512], index: 0, kind: input, shape index: {}]   ;;  %s438_s1 = inlined_call_operand.vmem [shape: f32[16,72], index: 1, kind: input, shape index: {}]   ;;  %s439_s2 = inlined_call_operand.vmem [shape: f32[16,1], index: 2, kind: input, shape index: {}]   ;;  %s440_s3 = inlined_call_operand.vmem [shape: f32[16,1], index: 3, kind: input, shape index: {}]   ;;  %s441_s4 = inlined_call_operand.vmem [shape: f32[16,512], index: 4, kind: output, shape index: {}]  }
   0x1   :  { %v49_v0 = vld [vmem:[%s437_s0 + $0x100] sm:$0xff]  ;;  %v50_v1 = vld [vmem:[%s437_s0 + $0x108] sm:$0xff]  ;;  %v51_v2 = vld [vmem:[%s437_s0 + $0x110] sm:$0xff]  ;;  %251 = vset.pattern.permute.xlu0 %v253_v3  ;;  %252 = vset.pattern.permute.xlu1 %v253_v3 }
   0x2   :  { %v85_v4 = vmax.f32 %v49_v0, 0.0  ;;  %v86_v5 = vmax.f32 %v50_v1, 0.0  ;;  %v87_v6 = vmax.f32 %v51_v2, 0.0  ;;  %v52_v7 = vld [vmem:[%s437_s0 + $0x118] sm:$0xff]  ;;  %v45_v8 = vld [vmem:[%s437_s0 + $0xe0] sm:$0xff]  ;;  %v46_v9 = vld [vmem:[%s437_s0 + $0xe8] sm:$0xff] }
   0x3   :  { %v88_v10 = vmax.f32 %v52_v7, 0.0  ;;  %v81_v11 = vmax.f32 %v45_v8, 0.0  ;;  %v82_v12 = vmax.f32 %v46_v9, 0.0  ;;  %v47_v13 = vld [vmem:[%s437_s0 + $0xf0] sm:$0xff]  ;;  %v48_v14 = vld [vmem:[%s437_s0 + $0xf8] sm:$0xff]  ;;  %v41_v15 = vld [vmem:[%s437_s0 + $0xc0] sm:$0xff] }
   0x4   :  { %105 = vmatpush.msra.mxu0 %v85_v4  ;;  %128 = vmatpush.msra.mxu1 %v86_v5  ;;  %v83_v16 = vmax.f32 %v47_v13, 0.0  ;;  %v84_v17 = vmax.f32 %v48_v14, 0.0  ;;  %v77_v18 = vmax.f32 %v41_v15, 0.0  ;;  %v42_v19 = vld [vmem:[%s437_s0 + $0xc8] sm:$0xff]  ;;  %v43_v20 = vld [vmem:[%s437_s0 + $0xd0] sm:$0xff]  ;;  %v44_v21 = vld [vmem:[%s437_s0 + $0xd8] sm:$0xff] }
   0x5   :  { %151 = vmatpush.msra.mxu2 %v87_v6  ;;  %174 = vmatpush.msra.mxu3 %v88_v10  ;;  %v78_v22 = vmax.f32 %v42_v19, 0.0  ;;  %v79_v23 = vmax.f32 %v43_v20, 0.0  ;;  %v80_v24 = vmax.f32 %v44_v21, 0.0  ;;  %v37_v25 = vld [vmem:[%s437_s0 + $0xa0] sm:$0xff]  ;;  %v38_v26 = vld [vmem:[%s437_s0 + $0xa8] sm:$0xff]  ;;  %v39_v27 = vld [vmem:[%s437_s0 + $0xb0] sm:$0xff] }
   0x6   :  { %106 = vmatpush.msra.mxu0 %v81_v11  ;;  %129 = vmatpush.msra.mxu1 %v82_v12  ;;  %v73_v28 = vmax.f32 %v37_v25, 0.0  ;;  %v74_v29 = vmax.f32 %v38_v26, 0.0  ;;  %v40_v30 = vld [vmem:[%s437_s0 + $0xb8] sm:$0xff]  ;;  %v33_v31 = vld [vmem:[%s437_s0 + $0x80] sm:$0xff]  ;;  %v34_v32 = vld [vmem:[%s437_s0 + $0x88] sm:$0xff]  ;;  %v75_v33 = vmax.f32 %v39_v27, 0.0 }
   0x7   :  { %152 = vmatpush.msra.mxu2 %v83_v16  ;;  %175 = vmatpush.msra.mxu3 %v84_v17  ;;  %v76_v34 = vmax.f32 %v40_v30, 0.0  ;;  %v35_v35 = vld [vmem:[%s437_s0 + $0x90] sm:$0xff]  ;;  %v36_v36 = vld [vmem:[%s437_s0 + $0x98] sm:$0xff]  ;;  %v29_v37 = vld [vmem:[%s437_s0 + $0x60] sm:$0xff]  ;;  %v69_v38 = vmax.f32 %v33_v31, 0.0  ;;  %v70_v39 = vmax.f32 %v34_v32, 0.0 }
   0x8   :  { %107 = vmatpush.msra.mxu0 %v77_v18  ;;  %130 = vmatpush.msra.mxu1 %v78_v22  ;;  %v30_v40 = vld [vmem:[%s437_s0 + $0x68] sm:$0xff]  ;;  %v31_v41 = vld [vmem:[%s437_s0 + $0x70] sm:$0xff]  ;;  %v32_v42 = vld [vmem:[%s437_s0 + $0x78] sm:$0xff]  ;;  %v71_v43 = vmax.f32 %v35_v35, 0.0  ;;  %v72_v44 = vmax.f32 %v36_v36, 0.0  ;;  %v65_v47 = vmax.f32 %v29_v37, 0.0 }
   0x9   :  { %153 = vmatpush.msra.mxu2 %v79_v23  ;;  %176 = vmatpush.msra.mxu3 %v80_v24  ;;  %v25_v45 = vld [vmem:[%s437_s0 + $0x40] sm:$0xff]  ;;  %v26_v46 = vld [vmem:[%s437_s0 + $0x48] sm:$0xff]  ;;  %v66_v48 = vmax.f32 %v30_v40, 0.0  ;;  %v27_v49 = vld [vmem:[%s437_s0 + $0x50] sm:$0xff]  ;;  %v67_v51 = vmax.f32 %v31_v41, 0.0  ;;  %v68_v52 = vmax.f32 %v32_v42, 0.0 }
   0xa   :  { %108 = vmatpush.msra.mxu0 %v73_v28  ;;  %131 = vmatpush.msra.mxu1 %v74_v29  ;;  %v28_v50 = vld [vmem:[%s437_s0 + $0x58] sm:$0xff]  ;;  %v21_v53 = vld [vmem:[%s437_s0 + $0x20] sm:$0xff]  ;;  %v22_v54 = vld [vmem:[%s437_s0 + $0x28] sm:$0xff]  ;;  %v61_v55 = vmax.f32 %v25_v45, 0.0  ;;  %v62_v56 = vmax.f32 %v26_v46, 0.0  ;;  %v63_v59 = vmax.f32 %v27_v49, 0.0 }
   0xb   :  { %154 = vmatpush.msra.mxu2 %v75_v33  ;;  %177 = vmatpush.msra.mxu3 %v76_v34  ;;  %v23_v57 = vld [vmem:[%s437_s0 + $0x30] sm:$0xff]  ;;  %v24_v58 = vld [vmem:[%s437_s0 + $0x38] sm:$0xff]  ;;  %v64_v60 = vmax.f32 %v28_v50, 0.0  ;;  %v17_v61 = vld [vmem:[%s437_s0] sm:$0xff]  ;;  %v57_v63 = vmax.f32 %v21_v53, 0.0  ;;  %v58_v0 = vmax.f32 %v22_v54, 0.0 }
   0xc   :  { %109 = vmatpush.msra.mxu0 %v69_v38  ;;  %132 = vmatpush.msra.mxu1 %v70_v39  ;;  %v18_v62 = vld [vmem:[%s437_s0 + $0x8] sm:$0xff]  ;;  %v19_v1 = vld [vmem:[%s437_s0 + $0x10] sm:$0xff]  ;;  %v20_v2 = vld [vmem:[%s437_s0 + $0x18] sm:$0xff]  ;;  %v59_v3 = vmax.f32 %v23_v57, 0.0  ;;  %v60_v4 = vmax.f32 %v24_v58, 0.0  ;;  %v53_v5 = vmax.f32 %v17_v61, 0.0 }
   0xd   :  { %155 = vmatpush.msra.mxu2 %v71_v43  ;;  %178 = vmatpush.msra.mxu3 %v72_v44  ;;  %v54_v6 = vmax.f32 %v18_v62, 0.0  ;;  %v55_v7 = vmax.f32 %v19_v1, 0.0  ;;  %v56_v8 = vmax.f32 %v20_v2, 0.0  ;;  %v89_v9 = vld [vmem:[%s438_s1] sm:$0xff]  ;;  %v90_v12 = vld [vmem:[%s438_s1 + $0x8] sm:$0xff] }
   0xe   :  { %110 = vmatpush.msra.mxu0 %v65_v47  ;;  %133 = vmatpush.msra.mxu1 %v66_v48  ;;  %v190_v10 = vld [vmem:[%s439_s2] sm:$0xff]  ;;  %v191_v13 = vld [vmem:[%s439_s2 + $0x8] sm:$0xff] }
   0xf   :  { %156 = vmatpush.msra.mxu2 %v67_v51  ;;  %179 = vmatpush.msra.mxu3 %v68_v52  ;;  %v210_v11 = vld [vmem:[%s440_s3] sm:$0xff]  ;;  %v211_v14 = vld [vmem:[%s440_s3 + $0x8] sm:$0xff] }
  0x10   :  { %111 = vmatpush.msra.mxu0 %v61_v55  ;;  %134 = vmatpush.msra.mxu1 %v62_v56 }
  0x11   :  { %157 = vmatpush.msra.mxu2 %v63_v59  ;;  %180 = vmatpush.msra.mxu3 %v64_v60 }
  0x12   :  { %112 = vmatpush.msra.mxu0 %v57_v63  ;;  %135 = vmatpush.msra.mxu1 %v58_v0 }
  0x13   :  { %158 = vmatpush.msra.mxu2 %v59_v3  ;;  %181 = vmatpush.msra.mxu3 %v60_v4 }
  0x14   :  { %113 = vmatpush.msra.mxu0 %v53_v5  ;;  %136 = vmatpush.msra.mxu1 %v54_v6 }
  0x15   :  { %159 = vmatpush.msra.mxu2 %v55_v7  ;;  %182 = vmatpush.msra.mxu3 %v56_v8 }
  0x16   :  { %242 = vmatmul.msk.f32.vlgmr.msra.gmra.mxu0 %vm91_vm0, %v89_v9  ;;  %244 = vmatmul.msk.f32.vlgmr.msra.gmra.mxu1 %vm91_vm0, %v89_v9 }
  0x17   :  { %246 = vmatmul.msk.f32.vlgmr.msra.gmra.mxu2 %vm91_vm0, %v89_v9  ;;  %248 = vmatmul.msk.f32.vlgmr.msra.gmra.mxu3 %vm91_vm0, %v89_v9 }
  0x18   :  { %194 = vperm.xlu0 %251, %v190_v10   ;;  %214 = vperm.xlu1 %252, %v210_v11  }
  0x1e   :  { %243 = vmatmul.msk.f32.gmra.mxu0 %vm91_vm0, %v90_v12  ;;  %245 = vmatmul.msk.f32.gmra.mxu1 %vm91_vm0, %v90_v12 }
  0x1f   :  { %247 = vmatmul.msk.f32.gmra.mxu2 %vm91_vm0, %v90_v12  ;;  %249 = vmatmul.msk.f32.gmra.mxu3 %vm91_vm0, %v90_v12 }
  0x20   :  { %199 = vperm.xlu0 %251, %v191_v13   ;;  %219 = vperm.xlu1 %252, %v211_v14  }
  0x8a   :  { %v195_v15 = vpop.permute.xlu0 %194  ;;  %v215_v16 = vpop.permute.xlu1 %214 }
  0x92   :  { %v200_v23 = vpop.permute.xlu0 %199  ;;  %v220_v34 = vpop.permute.xlu1 %219 }
  0x93   :  { %v115_v17 = vpop.f32.mrf.mxu0  ;;  %v138_v18 = vpop.f32.mrf.mxu1 }
  0x94   :  { %v202_v19 = vmul.f32 %v195_v15, %v115_v17  ;;  %v203_v20 = vmul.f32 %v195_v15, %v138_v18 }
  0x96   :  { %v222_v21 = vadd.f32 %v215_v16, %v202_v19  ;;  %v223_v22 = vadd.f32 %v215_v16, %v203_v20 }
  0x98   :  { %230 = vst [vmem:[%s441_s4] sm:$0xff] %v222_v21 }
  0x99   :  { %231 = vst [vmem:[%s441_s4 + $0x8] sm:$0xff] %v223_v22 }
  0x9a   :  { %v161_v24 = vpop.f32.mrf.mxu2  ;;  %v184_v25 = vpop.f32.mrf.mxu3 }
  0x9b   :  { %v204_v26 = vmul.f32 %v195_v15, %v161_v24  ;;  %v205_v27 = vmul.f32 %v195_v15, %v184_v25  ;;  %v118_v28 = vpop.f32.mrf.mxu0  ;;  %v141_v29 = vpop.f32.mrf.mxu1 }
  0x9c   :  { %v206_v30 = vmul.f32 %v200_v23, %v118_v28  ;;  %v207_v31 = vmul.f32 %v200_v23, %v141_v29 }
  0x9d   :  { %v224_v32 = vadd.f32 %v215_v16, %v204_v26  ;;  %v225_v33 = vadd.f32 %v215_v16, %v205_v27 }
  0x9e   :  { %v226_v35 = vadd.f32 %v220_v34, %v206_v30  ;;  %v227_v36 = vadd.f32 %v220_v34, %v207_v31 }
  0x9f   :  { %232 = vst [vmem:[%s441_s4 + $0x10] sm:$0xff] %v224_v32 }
  0xa0   :  { %233 = vst [vmem:[%s441_s4 + $0x18] sm:$0xff] %v225_v33 }
  0xa1   :  { %234 = vst [vmem:[%s441_s4 + $0x20] sm:$0xff] %v226_v35 }
  0xa2   :  { %235 = vst [vmem:[%s441_s4 + $0x28] sm:$0xff] %v227_v36  ;;  %v164_v37 = vpop.f32.mrf.mxu2  ;;  %v187_v38 = vpop.f32.mrf.mxu3 }
  0xa3   :  { %v208_v39 = vmul.f32 %v200_v23, %v164_v37  ;;  %v209_v40 = vmul.f32 %v200_v23, %v187_v38 }
  0xa5   :  { %v228_v41 = vadd.f32 %v220_v34, %v208_v39  ;;  %v229_v42 = vadd.f32 %v220_v34, %v209_v40 }
  0xa7   :  { %236 = vst [vmem:[%s441_s4 + $0x30] sm:$0xff] %v228_v41 }
  0xa8   :  { %237 = vst [vmem:[%s441_s4 + $0x38] sm:$0xff] %v229_v42 }

// kernel: backbone_nb201_forward.28
= control target key start
LH: loop header
LB: loop body
LE: loop exit
PB: predicated region body
PF: predicated region fallthrough
CT: control target
= control target key end

     0   :  { %v208_v3 = vmov 0   ;;  %vm90_vm0 = vcmask 588800   ;;  %s363_s0 = inlined_call_operand.vmem [shape: f32[72,512], index: 0, kind: input, shape index: {}]   ;;  %s364_s1 = inlined_call_operand.vmem [shape: f32[8,72], index: 1, kind: input, shape index: {}]   ;;  %s365_s2 = inlined_call_operand.vmem [shape: f32[8,1], index: 2, kind: input, shape index: {}]   ;;  %s366_s3 = inlined_call_operand.vmem [shape: f32[8,1], index: 3, kind: input, shape index: {}]   ;;  %s367_s4 = inlined_call_operand.vmem [shape: f32[8,512], index: 4, kind: output, shape index: {}]  }
   0x1   :  { %v49_v0 = vld [vmem:[%s363_s0 + $0x100] sm:$0xff]  ;;  %v50_v1 = vld [vmem:[%s363_s0 + $0x108] sm:$0xff]  ;;  %v51_v2 = vld [vmem:[%s363_s0 + $0x110] sm:$0xff]  ;;  %207 = vset.pattern.permute.xlu0 %v208_v3 }
   0x2   :  { %v85_v4 = vmax.f32 %v49_v0, 0.0  ;;  %v86_v5 = vmax.f32 %v50_v1, 0.0  ;;  %v87_v6 = vmax.f32 %v51_v2, 0.0  ;;  %v52_v7 = vld [vmem:[%s363_s0 + $0x118] sm:$0xff]  ;;  %v45_v8 = vld [vmem:[%s363_s0 + $0xe0] sm:$0xff]  ;;  %v46_v9 = vld [vmem:[%s363_s0 + $0xe8] sm:$0xff] }
   0x3   :  { %v88_v10 = vmax.f32 %v52_v7, 0.0  ;;  %v81_v11 = vmax.f32 %v45_v8, 0.0  ;;  %v82_v12 = vmax.f32 %v46_v9, 0.0  ;;  %v47_v13 = vld [vmem:[%s363_s0 + $0xf0] sm:$0xff]  ;;  %v48_v14 = vld [vmem:[%s363_s0 + $0xf8] sm:$0xff]  ;;  %v41_v15 = vld [vmem:[%s363_s0 + $0xc0] sm:$0xff] }
   0x4   :  { %101 = vmatpush.msra.mxu0 %v85_v4  ;;  %121 = vmatpush.msra.mxu1 %v86_v5  ;;  %v83_v16 = vmax.f32 %v47_v13, 0.0  ;;  %v84_v17 = vmax.f32 %v48_v14, 0.0  ;;  %v77_v18 = vmax.f32 %v41_v15, 0.0  ;;  %v42_v19 = vld [vmem:[%s363_s0 + $0xc8] sm:$0xff]  ;;  %v43_v20 = vld [vmem:[%s363_s0 + $0xd0] sm:$0xff]  ;;  %v44_v21 = vld [vmem:[%s363_s0 + $0xd8] sm:$0xff] }
   0x5   :  { %141 = vmatpush.msra.mxu2 %v87_v6  ;;  %161 = vmatpush.msra.mxu3 %v88_v10  ;;  %v78_v22 = vmax.f32 %v42_v19, 0.0  ;;  %v79_v23 = vmax.f32 %v43_v20, 0.0  ;;  %v80_v24 = vmax.f32 %v44_v21, 0.0  ;;  %v37_v25 = vld [vmem:[%s363_s0 + $0xa0] sm:$0xff]  ;;  %v38_v26 = vld [vmem:[%s363_s0 + $0xa8] sm:$0xff]  ;;  %v39_v27 = vld [vmem:[%s363_s0 + $0xb0] sm:$0xff] }
   0x6   :  { %102 = vmatpush.msra.mxu0 %v81_v11  ;;  %122 = vmatpush.msra.mxu1 %v82_v12  ;;  %v73_v28 = vmax.f32 %v37_v25, 0.0  ;;  %v74_v29 = vmax.f32 %v38_v26, 0.0  ;;  %v40_v30 = vld [vmem:[%s363_s0 + $0xb8] sm:$0xff]  ;;  %v33_v31 = vld [vmem:[%s363_s0 + $0x80] sm:$0xff]  ;;  %v34_v32 = vld [vmem:[%s363_s0 + $0x88] sm:$0xff]  ;;  %v75_v33 = vmax.f32 %v39_v27, 0.0 }
   0x7   :  { %142 = vmatpush.msra.mxu2 %v83_v16  ;;  %162 = vmatpush.msra.mxu3 %v84_v17  ;;  %v76_v34 = vmax.f32 %v40_v30, 0.0  ;;  %v35_v35 = vld [vmem:[%s363_s0 + $0x90] sm:$0xff]  ;;  %v36_v36 = vld [vmem:[%s363_s0 + $0x98] sm:$0xff]  ;;  %v29_v37 = vld [vmem:[%s363_s0 + $0x60] sm:$0xff]  ;;  %v69_v38 = vmax.f32 %v33_v31, 0.0  ;;  %v70_v39 = vmax.f32 %v34_v32, 0.0 }
   0x8   :  { %103 = vmatpush.msra.mxu0 %v77_v18  ;;  %123 = vmatpush.msra.mxu1 %v78_v22  ;;  %v30_v40 = vld [vmem:[%s363_s0 + $0x68] sm:$0xff]  ;;  %v31_v41 = vld [vmem:[%s363_s0 + $0x70] sm:$0xff]  ;;  %v32_v42 = vld [vmem:[%s363_s0 + $0x78] sm:$0xff]  ;;  %v71_v43 = vmax.f32 %v35_v35, 0.0  ;;  %v72_v44 = vmax.f32 %v36_v36, 0.0  ;;  %v65_v47 = vmax.f32 %v29_v37, 0.0 }
   0x9   :  { %143 = vmatpush.msra.mxu2 %v79_v23  ;;  %163 = vmatpush.msra.mxu3 %v80_v24  ;;  %v25_v45 = vld [vmem:[%s363_s0 + $0x40] sm:$0xff]  ;;  %v26_v46 = vld [vmem:[%s363_s0 + $0x48] sm:$0xff]  ;;  %v66_v48 = vmax.f32 %v30_v40, 0.0  ;;  %v27_v49 = vld [vmem:[%s363_s0 + $0x50] sm:$0xff]  ;;  %v67_v51 = vmax.f32 %v31_v41, 0.0  ;;  %v68_v52 = vmax.f32 %v32_v42, 0.0 }
   0xa   :  { %104 = vmatpush.msra.mxu0 %v73_v28  ;;  %124 = vmatpush.msra.mxu1 %v74_v29  ;;  %v28_v50 = vld [vmem:[%s363_s0 + $0x58] sm:$0xff]  ;;  %v21_v53 = vld [vmem:[%s363_s0 + $0x20] sm:$0xff]  ;;  %v22_v54 = vld [vmem:[%s363_s0 + $0x28] sm:$0xff]  ;;  %v61_v55 = vmax.f32 %v25_v45, 0.0  ;;  %v62_v56 = vmax.f32 %v26_v46, 0.0  ;;  %v63_v59 = vmax.f32 %v27_v49, 0.0 }
   0xb   :  { %144 = vmatpush.msra.mxu2 %v75_v33  ;;  %164 = vmatpush.msra.mxu3 %v76_v34  ;;  %v23_v57 = vld [vmem:[%s363_s0 + $0x30] sm:$0xff]  ;;  %v24_v58 = vld [vmem:[%s363_s0 + $0x38] sm:$0xff]  ;;  %v64_v60 = vmax.f32 %v28_v50, 0.0  ;;  %v17_v61 = vld [vmem:[%s363_s0] sm:$0xff]  ;;  %v57_v63 = vmax.f32 %v21_v53, 0.0  ;;  %v58_v0 = vmax.f32 %v22_v54, 0.0 }
   0xc   :  { %105 = vmatpush.msra.mxu0 %v69_v38  ;;  %125 = vmatpush.msra.mxu1 %v70_v39  ;;  %v18_v62 = vld [vmem:[%s363_s0 + $0x8] sm:$0xff]  ;;  %v19_v1 = vld [vmem:[%s363_s0 + $0x10] sm:$0xff]  ;;  %v20_v2 = vld [vmem:[%s363_s0 + $0x18] sm:$0xff]  ;;  %v59_v3 = vmax.f32 %v23_v57, 0.0  ;;  %v60_v4 = vmax.f32 %v24_v58, 0.0  ;;  %v53_v5 = vmax.f32 %v17_v61, 0.0 }
   0xd   :  { %145 = vmatpush.msra.mxu2 %v71_v43  ;;  %165 = vmatpush.msra.mxu3 %v72_v44  ;;  %v54_v6 = vmax.f32 %v18_v62, 0.0  ;;  %v55_v7 = vmax.f32 %v19_v1, 0.0  ;;  %v56_v8 = vmax.f32 %v20_v2, 0.0  ;;  %v89_v9 = vld [vmem:[%s364_s1] sm:$0xff] }
   0xe   :  { %106 = vmatpush.msra.mxu0 %v65_v47  ;;  %126 = vmatpush.msra.mxu1 %v66_v48  ;;  %v174_v10 = vld [vmem:[%s365_s2] sm:$0xff] }
   0xf   :  { %146 = vmatpush.msra.mxu2 %v67_v51  ;;  %166 = vmatpush.msra.mxu3 %v68_v52  ;;  %v184_v11 = vld [vmem:[%s366_s3] sm:$0xff] }
  0x10   :  { %107 = vmatpush.msra.mxu0 %v61_v55  ;;  %127 = vmatpush.msra.mxu1 %v62_v56 }
  0x11   :  { %147 = vmatpush.msra.mxu2 %v63_v59  ;;  %167 = vmatpush.msra.mxu3 %v64_v60 }
  0x12   :  { %108 = vmatpush.msra.mxu0 %v57_v63  ;;  %128 = vmatpush.msra.mxu1 %v58_v0 }
  0x13   :  { %148 = vmatpush.msra.mxu2 %v59_v3  ;;  %168 = vmatpush.msra.mxu3 %v60_v4 }
  0x14   :  { %109 = vmatpush.msra.mxu0 %v53_v5  ;;  %129 = vmatpush.msra.mxu1 %v54_v6 }
  0x15   :  { %149 = vmatpush.msra.mxu2 %v55_v7  ;;  %169 = vmatpush.msra.mxu3 %v56_v8 }
  0x16   :  { %202 = vmatmul.msk.f32.vlgmr.msra.gmra.mxu0 %vm90_vm0, %v89_v9  ;;  %203 = vmatmul.msk.f32.vlgmr.msra.gmra.mxu1 %vm90_vm0, %v89_v9 }
  0x17   :  { %204 = vmatmul.msk.f32.vlgmr.msra.gmra.mxu2 %vm90_vm0, %v89_v9  ;;  %205 = vmatmul.msk.f32.vlgmr.msra.gmra.mxu3 %vm90_vm0, %v89_v9 }
  0x18   :  { %177 = vperm.xlu0 %207, %v174_v10  }
  0x20   :  { %187 = vperm.xlu0 %207, %v184_v11  }
  0x8a   :  { %v178_v12 = vpop.permute.xlu0 %177 }
  0x92   :  { %v188_v17 = vpop.permute.xlu0 %187 }
  0x93   :  { %v111_v13 = vpop.f32.mrf.mxu0  ;;  %v131_v14 = vpop.f32.mrf.mxu1 }
  0x94   :  { %v180_v15 = vmul.f32 %v178_v12, %v111_v13  ;;  %v181_v16 = vmul.f32 %v178_v12, %v131_v14 }
  0x96   :  { %v190_v18 = vadd.f32 %v188_v17, %v180_v15  ;;  %v191_v19 = vadd.f32 %v188_v17, %v181_v16 }
  0x98   :  { %194 = vst [vmem:[%s367_s4] sm:$0xff] %v190_v18 }
  0x99   :  { %195 = vst [vmem:[%s367_s4 + $0x8] sm:$0xff] %v191_v19 }
  0x9a   :  { %v151_v20 = vpop.f32.mrf.mxu2  ;;  %v171_v21 = vpop.f32.mrf.mxu3 }
  0x9b   :  { %v182_v22 = vmul.f32 %v178_v12, %v151_v20  ;;  %v183_v23 = vmul.f32 %v178_v12, %v171_v21 }
  0x9d   :  { %v192_v24 = vadd.f32 %v188_v17, %v182_v22  ;;  %v193_v25 = vadd.f32 %v188_v17, %v183_v23 }
  0x9f   :  { %196 = vst [vmem:[%s367_s4 + $0x10] sm:$0xff] %v192_v24 }
  0xa0   :  { %197 = vst [vmem:[%s367_s4 + $0x18] sm:$0xff] %v193_v25 }

// kernel: backbone_nb201_forward.27
= control target key start
LH: loop header
LB: loop body
LE: loop exit
PB: predicated region body
PF: predicated region fallthrough
CT: control target
= control target key end

     0   :  { %v1945_v0 = vmov 0   ;;  %vm1488_vm0 = vcmask 64512   ;;  %s4277_s1 = inlined_call_operand.vmem [shape: f32[1,16,16,1], index: 1, kind: input, shape index: {}]   ;;  %s4278_s0 = inlined_call_operand.vmem [shape: f32[2,18,18,8], index: 0, kind: input, shape index: {}]   ;;  %s4279_s2 = inlined_call_operand.vmem [shape: f32[2,16,16,8], index: 2, kind: input, shape index: {}]   ;;  %s4280_s3 = inlined_call_operand.vmem [shape: f32[2,16,16,8], index: 3, kind: output, shape index: {}]  }
   0x1   :  { %1944 = vset.pattern.permute.xlu2 %v1945_v0  ;;  %1943 = vset.pattern.permute.xlu1 %v1945_v0  ;;  %v1108_v1 = vld [vmem:[%s4277_s1 + $0x20] sm:$0xff]  ;;  %v1106_v2 = vld [vmem:[%s4277_s1 + $0x10] sm:$0xff]  ;;  %v1109_v4 = vld [vmem:[%s4277_s1 + $0x28] sm:$0xff] }
   0x2   :  { %v1104_v3 = vld [vmem:[%s4277_s1] sm:$0xff]  ;;  %1942 = vset.pattern.permute.xlu0 %v1945_v0  ;;  %1158 = vperm.xlu2 %1944, %v1108_v1   ;;  %v1107_v5 = vld [vmem:[%s4277_s1 + $0x18] sm:$0xff]  ;;  %v1105_v6 = vld [vmem:[%s4277_s1 + $0x8] sm:$0xff] }
   0x3   :  { %1148 = vperm.xlu1 %1943, %v1106_v2   ;;  %1138 = vperm.xlu0 %1942, %v1104_v3   ;;  %v1112_v7 = vld [vmem:[%s4277_s1 + $0x40] sm:$0xff]  ;;  %v1111_v8 = vld [vmem:[%s4277_s1 + $0x38] sm:$0xff]  ;;  %v1110_v9 = vld [vmem:[%s4277_s1 + $0x30] sm:$0xff] }
   0x4   :  { %v1115_v10 = vld [vmem:[%s4277_s1 + $0x58] sm:$0xff]  ;;  %v1114_v11 = vld [vmem:[%s4277_s1 + $0x50] sm:$0xff]  ;;  %v1113_v12 = vld [vmem:[%s4277_s1 + $0x48] sm:$0xff] }
   0x5   :  { %v1118_v13 = vld [vmem:[%s4277_s1 + $0x70] sm:$0xff]  ;;  %v1117_v14 = vld [vmem:[%s4277_s1 + $0x68] sm:$0xff]  ;;  %v1116_v15 = vld [vmem:[%s4277_s1 + $0x60] sm:$0xff] }
   0x6   :  { %v1121_v16 = vld [vmem:[%s4277_s1 + $0x88] sm:$0xff]  ;;  %v1120_v17 = vld [vmem:[%s4277_s1 + $0x80] sm:$0xff]  ;;  %v1119_v18 = vld [vmem:[%s4277_s1 + $0x78] sm:$0xff] }
   0x7   :  { %v1124_v19 = vld [vmem:[%s4277_s1 + $0xa0] sm:$0xff]  ;;  %v1123_v20 = vld [vmem:[%s4277_s1 + $0x98] sm:$0xff]  ;;  %v1122_v21 = vld [vmem:[%s4277_s1 + $0x90] sm:$0xff] }
   0x8   :  { %v1127_v22 = vld [vmem:[%s4277_s1 + $0xb8] sm:$0xff]  ;;  %v1126_v23 = vld [vmem:[%s4277_s1 + $0xb0] sm:$0xff]  ;;  %v1125_v24 = vld [vmem:[%s4277_s1 + $0xa8] sm:$0xff] }
   0x9   :  { %v2041_v25 = vld [vmem:[%s4278_s0 + $0x30] sm:$0xff]  ;;  %v2051_v27 = vld [vmem:[%s4278_s0 + $0x1e0] sm:$0xff]  ;;  %v1129_v35 = vld [vmem:[%s4277_s1 + $0xc8] sm:$0xff] }
   0xa   :  { %1163 = vperm.xlu2 %1944, %v1109_v4   ;;  %v2046_v26 = vld [vmem:[%s4278_s0 + $0x31] sm:$0xff]  ;;  %v2056_v28 = vld [vmem:[%s4278_s0 + $0x1e1] sm:$0xff]  ;;  %v2098_v42 = vld [vmem:[%s4278_s0 + $0x49] sm:$0xff] }
   0xb   :  { %1153 = vperm.xlu1 %1943, %v1107_v5   ;;  %1143 = vperm.xlu0 %1942, %v1105_v6   ;;  %v146_v29 = vadd.f32 %v2046_v26, %v2041_v25  ;;  %v178_v30 = vadd.f32 %v2056_v28, %v2051_v27  ;;  %v2065_v31 = vld [vmem:[%s4278_s0 + $0x32] sm:$0xff]  ;;  %v2073_v33 = vld [vmem:[%s4278_s0 + $0x1e2] sm:$0xff]  ;;  %v2134_v51 = vld [vmem:[%s4278_s0 + $0x3a] sm:$0xff] }
   0xc   :  { %v1130_v32 = vld [vmem:[%s4277_s1 + $0xd0] sm:$0xff]  ;;  %v1128_v36 = vld [vmem:[%s4277_s1 + $0xc0] sm:$0xff]  ;;  %v2086_v38 = vld [vmem:[%s4278_s0 + $0x48] sm:$0xff] }
   0xd   :  { %v274_v34 = vadd.f32 %v2065_v31, %v146_v29  ;;  %v306_v37 = vadd.f32 %v2073_v33, %v178_v30  ;;  %v2091_v39 = vld [vmem:[%s4278_s0 + $0x1f8] sm:$0xff]  ;;  %v2113_v45 = vld [vmem:[%s4278_s0 + $0x1e8] sm:$0xff]  ;;  %v1132_v53 = vld [vmem:[%s4277_s1 + $0xe0] sm:$0xff] }
   0xe   :  { %v2103_v43 = vld [vmem:[%s4278_s0 + $0x1f9] sm:$0xff]  ;;  %v1133_v47 = vld [vmem:[%s4277_s1 + $0xe8] sm:$0xff]  ;;  %v2153_v57 = vld [vmem:[%s4278_s0 + $0x50] sm:$0xff] }
   0xf   :  { %v403_v40 = vadd.f32 %v2086_v38, %v274_v34  ;;  %v435_v41 = vadd.f32 %v2091_v39, %v306_v37  ;;  %v2108_v44 = vld [vmem:[%s4278_s0 + $0x38] sm:$0xff]  ;;  %v2127_v49 = vld [vmem:[%s4278_s0 + $0x1e9] sm:$0xff]  ;;  %v2169_v61 = vld [vmem:[%s4278_s0 + $0x200] sm:$0xff] }
  0x10   :  { %v2118_v46 = vld [vmem:[%s4278_s0 + $0x39] sm:$0xff]  ;;  %v2139_v52 = vld [vmem:[%s4278_s0 + $0x1ea] sm:$0xff]  ;;  %v179_v56 = vadd.f32 %v2127_v49, %v2113_v45  ;;  %v2191_v3 = vld [vmem:[%s4278_s0 + $0x61] sm:$0xff] }
  0x11   :  { %v531_v48 = vadd.f32 %v2098_v42, %v403_v40  ;;  %v147_v50 = vadd.f32 %v2118_v46, %v2108_v44  ;;  %v1131_v54 = vld [vmem:[%s4277_s1 + $0xd8] sm:$0xff]  ;;  %v563_v55 = vadd.f32 %v2103_v43, %v435_v41  ;;  %v2158_v58 = vld [vmem:[%s4278_s0 + $0x4a] sm:$0xff]  ;;  %v2174_v62 = vld [vmem:[%s4278_s0 + $0x60] sm:$0xff]  ;;  %4402 = vst [vmem:[#allocation4_spill] sm:$0xff] %v2191_v3 }
  0x12   :  { %1178 = vperm.xlu2 %1944, %v1112_v7   ;;  %v2163_v59 = vld [vmem:[%s4278_s0 + $0x1fa] sm:$0xff]  ;;  %4400 = vst [vmem:[#allocation2_spill] sm:$0xff] %v2174_v62  ;;  %v2179_v63 = vld [vmem:[%s4278_s0 + $0x210] sm:$0xff]  ;;  %v307_v0 = vadd.f32 %v2139_v52, %v179_v56 }
  0x13   :  { %1173 = vperm.xlu1 %1943, %v1111_v8   ;;  %1168 = vperm.xlu0 %1942, %v1110_v9   ;;  %v275_v60 = vadd.f32 %v2134_v51, %v147_v50  ;;  %4401 = vst [vmem:[#allocation3_spill] sm:$0xff] %v2179_v63  ;;  %v2185_v1 = vld [vmem:[%s4278_s0 + $0x51] sm:$0xff]  ;;  %v659_v2 = vadd.f32 %v2158_v58, %v531_v48  ;;  %v2202_v6 = vld [vmem:[%s4278_s0 + $0x201] sm:$0xff]  ;;  %v2282_v40 = vld [vmem:[%s4278_s0 + $0x19] sm:$0xff] }
  0x14   :  { %v2196_v4 = vld [vmem:[%s4278_s0 + $0x211] sm:$0xff]  ;;  %v691_v7 = vadd.f32 %v2163_v59, %v563_v55  ;;  %v436_v8 = vadd.f32 %v2169_v61, %v307_v0  ;;  %v2293_v48 = vld [vmem:[%s4278_s0 + $0x7a] sm:$0xff] }
  0x15   :  { %4403 = vst [vmem:[#allocation5_spill] sm:$0xff] %v2196_v4  ;;  %v404_v5 = vadd.f32 %v2153_v57, %v275_v60  ;;  %v2209_v9 = vld [vmem:[%s4278_s0 + $0x52] sm:$0xff]  ;;  %v2298_v50 = vld [vmem:[%s4278_s0 + $0x22a] sm:$0xff]  ;;  %v2315_v60 = vld [vmem:[%s4278_s0 + $0x80] sm:$0xff] }
  0x16   :  { %v820_v29 = vadd.f32 %v2179_v63, %v691_v7  ;;  %v2277_v37 = vld [vmem:[%s4278_s0 + $0x18] sm:$0xff]  ;;  %4413 = vst [vmem:[#allocation15_spill] sm:$0xff] %v2293_v48  ;;  %v2320_v0 = vld [vmem:[%s4278_s0 + $0x230] sm:$0xff] }
  0x17   :  { %4414 = vst [vmem:[#allocation16_spill] sm:$0xff] %v2298_v50 }
  0x18   :  { %4415 = vst [vmem:[#allocation17_spill] sm:$0xff] %v2315_v60 }
  0x19   :  { %4416 = vst [vmem:[#allocation18_spill] sm:$0xff] %v2320_v0 }
  0x1a   :  { %1193 = vperm.xlu2 %1944, %v1115_v10   ;;  %v2214_v10 = vld [vmem:[%s4278_s0 + $0x62] sm:$0xff] }
  0x1b   :  { %1188 = vperm.xlu1 %1943, %v1114_v11   ;;  %1183 = vperm.xlu0 %1942, %v1113_v12   ;;  %4404 = vst [vmem:[#allocation6_spill] sm:$0xff] %v2214_v10  ;;  %v2219_v11 = vld [vmem:[%s4278_s0 + $0x212] sm:$0xff]  ;;  %v532_v12 = vadd.f32 %v2185_v1, %v404_v5 }
  0x1c   :  { %4405 = vst [vmem:[#allocation7_spill] sm:$0xff] %v2219_v11 }
  0x22   :  { %1208 = vperm.xlu2 %1944, %v1118_v13   ;;  %v2225_v13 = vld [vmem:[%s4278_s0 + $0x202] sm:$0xff] }
  0x23   :  { %1203 = vperm.xlu1 %1943, %v1117_v14   ;;  %1198 = vperm.xlu0 %1942, %v1116_v15   ;;  %v564_v14 = vadd.f32 %v2202_v6, %v436_v8  ;;  %v2231_v15 = vld [vmem:[%s4278_s0 + $0x68] sm:$0xff]  ;;  %v2332_v8 = vld [vmem:[%s4278_s0 + $0x231] sm:$0xff] }
  0x24   :  { %4406 = vst [vmem:[#allocation8_spill] sm:$0xff] %v2231_v15 }
  0x25   :  { %v692_v30 = vadd.f32 %v2225_v13, %v564_v14  ;;  %4418 = vst [vmem:[#allocation20_spill] sm:$0xff] %v2332_v8  ;;  %v2339_v14 = vld [vmem:[%s4278_s0 + $0x82] sm:$0xff] }
  0x26   :  { %4419 = vst [vmem:[#allocation21_spill] sm:$0xff] %v2339_v14 }
  0x2a   :  { %1223 = vperm.xlu2 %1944, %v1121_v16   ;;  %v150_v16 = vadd.f32 %v2191_v3, %v2174_v62 }
  0x2b   :  { %1218 = vperm.xlu1 %1943, %v1120_v17   ;;  %1213 = vperm.xlu0 %1942, %v1119_v18   ;;  %v182_v17 = vadd.f32 %v2196_v4, %v2179_v63  ;;  %v788_v18 = vadd.f32 %v2174_v62, %v659_v2  ;;  %v2325_v2 = vld [vmem:[%s4278_s0 + $0x81] sm:$0xff] }
  0x2c   :  { %v278_v34 = vadd.f32 %v2214_v10, %v150_v16  ;;  %4417 = vst [vmem:[#allocation19_spill] sm:$0xff] %v2325_v2  ;;  %v2344_v16 = vld [vmem:[%s4278_s0 + $0x232] sm:$0xff]  ;;  %v206_v62 = vld [vmem:[%s4278_s0 + $0x2] sm:$0xff] }
  0x2d   :  { %v916_v5 = vadd.f32 %v2191_v3, %v788_v18  ;;  %4420 = vst [vmem:[#allocation22_spill] sm:$0xff] %v2344_v16  ;;  %v2350_v18 = vld [vmem:[%s4278_s0 + $0x219] sm:$0xff] }
  0x2e   :  { %4421 = vst [vmem:[#allocation23_spill] sm:$0xff] %v2350_v18  ;;  %v2406_v3 = vld [vmem:[%s4278_s0 + $0x99] sm:$0xff] }
  0x2f   :  { %4430 = vst [vmem:[#allocation32_spill] sm:$0xff] %v2406_v3 }
  0x32   :  { %1238 = vperm.xlu2 %1944, %v1124_v19   ;;  %v660_v19 = vadd.f32 %v2209_v9, %v532_v12  ;;  %v153_v12 = vadd.f32 %v2325_v2, %v2315_v60  ;;  %v2434_v60 = vld [vmem:[%s4278_s0 + $0x9a] sm:$0xff] }
  0x33   :  { %1233 = vperm.xlu1 %1943, %v1123_v20   ;;  %1228 = vperm.xlu0 %1942, %v1122_v21   ;;  %v2242_v20 = vld [vmem:[%s4278_s0 + $0x218] sm:$0xff]  ;;  %4434 = vst [vmem:[#allocation36_spill] sm:$0xff] %v2434_v60 }
  0x34   :  { %4407 = vst [vmem:[#allocation9_spill] sm:$0xff] %v2242_v20  ;;  %v2247_v21 = vld [vmem:[%s4278_s0 + $0x78] sm:$0xff]  ;;  %v789_v41 = vadd.f32 %v2231_v15, %v660_v19  ;;  %v821_v7 = vadd.f32 %v2242_v20, %v692_v30  ;;  %v2355_v19 = vld [vmem:[%s4278_s0 + $0x6a] sm:$0xff] }
  0x35   :  { %4408 = vst [vmem:[#allocation10_spill] sm:$0xff] %v2247_v21  ;;  %v407_v55 = vadd.f32 %v2247_v21, %v278_v34  ;;  %v2370_v21 = vld [vmem:[%s4278_s0 + $0x90] sm:$0xff] }
  0x36   :  { %4422 = vst [vmem:[#allocation24_spill] sm:$0xff] %v2355_v19 }
  0x37   :  { %4424 = vst [vmem:[#allocation26_spill] sm:$0xff] %v2370_v21 }
  0x3a   :  { %1253 = vperm.xlu2 %1944, %v1127_v22   ;;  %v2252_v22 = vld [vmem:[%s4278_s0 + $0x228] sm:$0xff] }
  0x3b   :  { %1248 = vperm.xlu1 %1943, %v1126_v23   ;;  %1243 = vperm.xlu0 %1942, %v1125_v24   ;;  %4409 = vst [vmem:[#allocation11_spill] sm:$0xff] %v2252_v22  ;;  %v1135_v23 = vld [vmem:[%s4277_s1 + $0xf8] sm:$0xff]  ;;  %v1134_v24 = vld [vmem:[%s4277_s1 + $0xf0] sm:$0xff] }
  0x42   :  { %1268 = vperm.xlu2 %1944, %v1130_v32   ;;  %v2265_v32 = vld [vmem:[%s4278_s0 + $0x69] sm:$0xff] }
  0x43   :  { %1263 = vperm.xlu1 %1943, %v1129_v35   ;;  %1258 = vperm.xlu0 %1942, %v1128_v36   ;;  %4410 = vst [vmem:[#allocation12_spill] sm:$0xff] %v2265_v32  ;;  %v310_v35 = vadd.f32 %v2219_v11, %v182_v17  ;;  %v2272_v36 = vld [vmem:[%s4278_s0 + $0x79] sm:$0xff]  ;;  %v948_v17 = vadd.f32 %v2196_v4, %v820_v29 }
  0x44   :  { %4411 = vst [vmem:[#allocation13_spill] sm:$0xff] %v2272_v36  ;;  %v535_v30 = vadd.f32 %v2272_v36, %v407_v55  ;;  %v2364_v29 = vld [vmem:[%s4278_s0 + $0x98] sm:$0xff]  ;;  %v2375_v55 = vld [vmem:[%s4278_s0 + $0x240] sm:$0xff] }
  0x45   :  { %v439_v56 = vadd.f32 %v2252_v22, %v310_v35  ;;  %v185_v35 = vadd.f32 %v2332_v8, %v2320_v0  ;;  %4423 = vst [vmem:[#allocation25_spill] sm:$0xff] %v2364_v29  ;;  %v917_v22 = vadd.f32 %v2265_v32, %v789_v41  ;;  %v1044_v8 = vadd.f32 %v2214_v10, %v916_v5  ;;  %v2444_v5 = vld [vmem:[%s4278_s0 + $0x1a] sm:$0xff]  ;;  %v46_v10 = vld [vmem:[%s4278_s0 + $0x1b0] sm:$0xff]  ;;  %v1920_v32 = vld [vmem:[%s4278_s0 + $0x262] sm:$0xff] }
  0x46   :  { %4425 = vst [vmem:[#allocation27_spill] sm:$0xff] %v2375_v55  ;;  %v663_v41 = vadd.f32 %v2293_v48, %v535_v30  ;;  %v2419_v48 = vld [vmem:[%s4278_s0 + $0x242] sm:$0xff] }
  0x47   :  { %v313_v4 = vadd.f32 %v2344_v16, %v185_v35  ;;  %4432 = vst [vmem:[#allocation34_spill] sm:$0xff] %v2419_v48  ;;  %v2425_v16 = vld [vmem:[%s4278_s0 + $0x249] sm:$0xff] }
  0x48   :  { %4433 = vst [vmem:[#allocation35_spill] sm:$0xff] %v2425_v16 }
  0x4a   :  { %1283 = vperm.xlu2 %1944, %v1133_v47   ;;  %v2288_v47 = vld [vmem:[%s4278_s0 + $0x229] sm:$0xff] }
  0x4b   :  { %1278 = vperm.xlu1 %1943, %v1132_v53   ;;  %1273 = vperm.xlu0 %1942, %v1131_v54   ;;  %4412 = vst [vmem:[#allocation14_spill] sm:$0xff] %v2288_v47  ;;  %v2303_v53 = vld [vmem:[%s4278_s0 + $0x1c8] sm:$0xff]  ;;  %v567_v34 = vadd.f32 %v2288_v47, %v439_v56  ;;  %v281_v56 = vadd.f32 %v2339_v14, %v153_v12  ;;  %v2395_v12 = vld [vmem:[%s4278_s0 + $0x91] sm:$0xff] }
  0x4c   :  { %v2308_v54 = vld [vmem:[%s4278_s0 + $0x1c9] sm:$0xff]  ;;  %4428 = vst [vmem:[#allocation30_spill] sm:$0xff] %v2395_v12  ;;  %v2400_v14 = vld [vmem:[%s4278_s0 + $0x241] sm:$0xff] }
  0x4d   :  { %v2381_v47 = vld [vmem:[%s4278_s0 + $0x248] sm:$0xff]  ;;  %v695_v36 = vadd.f32 %v2298_v50, %v567_v34  ;;  %4429 = vst [vmem:[#allocation31_spill] sm:$0xff] %v2400_v14  ;;  %v176_v30 = vadd.f32 %v2308_v54, %v2303_v53  ;;  %v949_v34 = vadd.f32 %v2350_v18, %v821_v7  ;;  %v2414_v50 = vld [vmem:[%s4278_s0 + $0x92] sm:$0xff]  ;;  %v410_v35 = vadd.f32 %v2364_v29, %v281_v56  ;;  %v1792_v29 = vld [vmem:[%s4278_s0 + $0x260] sm:$0xff] }
  0x4e   :  { %4426 = vst [vmem:[#allocation28_spill] sm:$0xff] %v2381_v47  ;;  %v792_v7 = vadd.f32 %v2370_v21, %v663_v41  ;;  %v442_v0 = vadd.f32 %v2381_v47, %v313_v4  ;;  %v2439_v56 = vld [vmem:[%s4278_s0 + $0x24a] sm:$0xff]  ;;  %v1076_v41 = vadd.f32 %v2219_v11, %v948_v17  ;;  %v14_v11 = vld [vmem:[%s4278_s0] sm:$0xff] }
  0x4f   :  { %4431 = vst [vmem:[#allocation33_spill] sm:$0xff] %v2414_v50  ;;  %v824_v2 = vadd.f32 %v2375_v55, %v695_v36  ;;  %v2448_v36 = vadd.f32 %v2355_v19, %v917_v22  ;;  %v538_v4 = vadd.f32 %v2406_v3, %v410_v35  ;;  %v1760_v47 = vld [vmem:[%s4278_s0 + $0xb0] sm:$0xff] }
  0x50   :  { %4435 = vst [vmem:[#allocation37_spill] sm:$0xff] %v2439_v56  ;;  %v2460_v55 = vld [vmem:[%s4278_s0 + $0x1ca] sm:$0xff]  ;;  %v920_v22 = vadd.f32 %v2395_v12, %v792_v7  ;;  %v570_v3 = vadd.f32 %v2425_v16, %v442_v0 }
  0x51   :  { %v952_v35 = vadd.f32 %v2400_v14, %v824_v2  ;;  %v304_v21 = vadd.f32 %v2460_v55, %v176_v30  ;;  %v666_v2 = vadd.f32 %v2434_v60, %v538_v4  ;;  %v1824_v0 = vld [vmem:[%s4278_s0 + $0xb1] sm:$0xff]  ;;  %v1856_v30 = vld [vmem:[%s4278_s0 + $0x261] sm:$0xff] }
  0x52   :  { %v110_v14 = vld [vmem:[%s4278_s0 + $0x1b1] sm:$0xff]  ;;  %v698_v60 = vadd.f32 %v2439_v56, %v570_v3  ;;  %v2518_v56 = vld [vmem:[%s4278_s0 + $0xa9] sm:$0xff] }
  0x53   :  { %1293 = vperm.xlu1 %1943, %v1135_v23   ;;  %1288 = vperm.xlu0 %1942, %v1134_v24   ;;  %v144_v23 = vadd.f32 %v2282_v40, %v2277_v37  ;;  %v2388_v24 = vld [vmem:[%s4278_s0 + $0x21a] sm:$0xff]  ;;  %v2494_v4 = vadd.f32 %v2419_v48, %v952_v35  ;;  %v433_v63 = vadd.f32 %v304_v21, %v2051_v27 }
  0x54   :  { %4427 = vst [vmem:[#allocation29_spill] sm:$0xff] %v2388_v24  ;;  %v2477_v7 = vadd.f32 %v2388_v24, %v949_v34  ;;  %v2491_v34 = vadd.f32 %v2414_v50, %v920_v22  ;;  %v795_v22 = vadd.f32 %v1760_v47, %v666_v2  ;;  %v2513_v21 = vld [vmem:[%s4278_s0 + $0x258] sm:$0xff] }
  0x55   :  { %v272_v17 = vadd.f32 %v2444_v5, %v144_v23  ;;  %v78_v23 = vld [vmem:[%s4278_s0 + $0x1] sm:$0xff]  ;;  %4436 = vst [vmem:[#allocation38_spill] sm:$0xff] %v2518_v56  ;;  %v2523_v48 = vld [vmem:[%s4278_s0 + $0x259] sm:$0xff] }
  0x56   :  { %v142_v12 = vadd.f32 %v78_v23, %v14_v11  ;;  %v2507_v11 = vld [vmem:[%s4278_s0 + $0xa8] sm:$0xff]  ;;  %v174_v23 = vadd.f32 %v110_v14, %v46_v10  ;;  %v1364_v10 = vld [vmem:[%s4279_s2 + $0x20] sm:$0xff]  ;;  %v827_v14 = vadd.f32 %v1792_v29, %v698_v60  ;;  %v188_v50 = vadd.f32 %v2523_v48, %v2513_v21 }
  0x57   :  { %v401_v16 = vadd.f32 %v272_v17, %v2041_v25  ;;  %v238_v17 = vld [vmem:[%s4278_s0 + $0x1b2] sm:$0xff]  ;;  %v156_v2 = vadd.f32 %v2518_v56, %v2507_v11  ;;  %v923_v18 = vadd.f32 %v1824_v0, %v795_v22  ;;  %v2548_v56 = vld [vmem:[%s4278_s0 + $0xaa] sm:$0xff] }
  0x58   :  { %v270_v3 = vadd.f32 %v206_v62, %v142_v12  ;;  %v1396_v62 = vld [vmem:[%s4279_s2 + $0x120] sm:$0xff]  ;;  %v561_v12 = vadd.f32 %v433_v63, %v2056_v28  ;;  %v955_v29 = vadd.f32 %v1856_v30, %v827_v14  ;;  %v302_v15 = vadd.f32 %v238_v17, %v174_v23  ;;  %4437 = vst [vmem:[#allocation39_spill] sm:$0xff] %v2548_v56  ;;  %v2612_v14 = vld [vmem:[%s4278_s0 + $0x271] sm:$0xff] }
  0x59   :  { %v529_v35 = vadd.f32 %v401_v16, %v2046_v26  ;;  %v1888_v16 = vld [vmem:[%s4278_s0 + $0xb2] sm:$0xff]  ;;  %4442 = vst [vmem:[#allocation44_spill] sm:$0xff] %v2612_v14 }
  0x5a   :  { %v689_v20 = vadd.f32 %v561_v12, %v2073_v33  ;;  %v399_v63 = vadd.f32 %v270_v3, %v2277_v37  ;;  %v2555_v22 = vadd.f32 %v1888_v16, %v923_v18  ;;  %v431_v17 = vadd.f32 %v302_v15, %v2303_v53  ;;  %v2566_v3 = vld [vmem:[%s4278_s0 + $0xc0] sm:$0xff]  ;;  %v2571_v18 = vld [vmem:[%s4278_s0 + $0x270] sm:$0xff] }
  0x5b   :  { %v657_v60 = vadd.f32 %v529_v35, %v2065_v31  ;;  %v2558_v35 = vadd.f32 %v1920_v32, %v955_v29  ;;  %4439 = vst [vmem:[#allocation41_spill] sm:$0xff] %v2566_v3  ;;  %v284_v15 = vadd.f32 %v2548_v56, %v156_v2  ;;  %v2588_v53 = vld [vmem:[%s4278_s0 + $0x1d0] sm:$0xff]  ;;  %v2617_v16 = vld [vmem:[%s4278_s0 + $0x21] sm:$0xff] }
  0x5c   :  { %v1159_v47 = vpop.permute.xlu2 %1158  ;;  %v818_v37 = vadd.f32 %v2091_v39, %v689_v20  ;;  %v527_v23 = vadd.f32 %v399_v63, %v2282_v40  ;;  %4440 = vst [vmem:[#allocation42_spill] sm:$0xff] %v2571_v18  ;;  %v2583_v40 = vld [vmem:[%s4278_s0 + $0x20] sm:$0xff] }
  0x5d   :  { %v1300_v24 = vmul.f32 %v1159_v47, %v1044_v8  ;;  %v1332_v19 = vmul.f32 %v1159_v47, %v1076_v41  ;;  %v2553_v8 = vld [vmem:[%s4278_s0 + $0x25a] sm:$0xff]  ;;  %v786_v30 = vadd.f32 %v2086_v38, %v657_v60  ;;  %v413_v12 = vadd.f32 %v2566_v3, %v284_v15  ;;  %v2631_v60 = vld [vmem:[%s4278_s0 + $0x1d1] sm:$0xff]  ;;  %v2638_v63 = vld [vmem:[%s4278_s0 + $0x22] sm:$0xff] }
  0x5e   :  { %4438 = vst [vmem:[#allocation40_spill] sm:$0xff] %v2553_v8  ;;  %v316_v32 = vadd.f32 %v2553_v8, %v188_v50  ;;  %v1365_v50 = vld [vmem:[%s4279_s2 + $0x28] sm:$0xff]  ;;  %v145_v29 = vadd.f32 %v2617_v16, %v2583_v40  ;;  %v2661_v15 = vld [vmem:[%s4278_s0 + $0x272] sm:$0xff] }
  0x5f   :  { %v1428_v41 = vadd.f32 %v1364_v10, %v1300_v24  ;;  %v1460_v0 = vadd.f32 %v1396_v62, %v1332_v19  ;;  %v914_v20 = vadd.f32 %v2098_v42, %v786_v30  ;;  %v2592_v19 = vadd.f32 %v2185_v1, %v2153_v57  ;;  %v2607_v47 = vld [vmem:[%s4278_s0 + $0xc1] sm:$0xff]  ;;  %4444 = vst [vmem:[#allocation46_spill] sm:$0xff] %v2661_v15 }
  0x60   :  { %v946_v24 = vadd.f32 %v2103_v43, %v818_v37  ;;  %v559_v10 = vadd.f32 %v431_v17, %v2308_v54  ;;  %v655_v62 = vadd.f32 %v527_v23, %v2444_v5  ;;  %4441 = vst [vmem:[#allocation43_spill] sm:$0xff] %v2607_v47  ;;  %v2621_v54 = vadd.f32 %v2202_v6, %v2169_v61  ;;  %v15_v3 = vld [vmem:[%s4278_s0 + $0x8] sm:$0xff] }
  0x61   :  { %1493 = vst.msk [vmem:[%s4280_s3 + $0x20] sm:$0xff] %vm1488_vm0, %v1428_v41  ;;  %v2624_v5 = vadd.f32 %v2158_v58, %v914_v20  ;;  %v445_v2 = vadd.f32 %v2571_v18, %v316_v32  ;;  %v2643_v41 = vld [vmem:[%s4278_s0 + $0x1d2] sm:$0xff]  ;;  %v2656_v20 = vld [vmem:[%s4278_s0 + $0xc2] sm:$0xff]  ;;  %v177_v32 = vadd.f32 %v2631_v60, %v2588_v53 }
  0x62   :  { %1525 = vst.msk [vmem:[%s4280_s3 + $0x120] sm:$0xff] %vm1488_vm0, %v1460_v0  ;;  %v1397_v0 = vld [vmem:[%s4279_s2 + $0x128] sm:$0xff]  ;;  %v2649_v37 = vadd.f32 %v2163_v59, %v946_v24  ;;  %v687_v17 = vadd.f32 %v559_v10, %v2460_v55  ;;  %v784_v23 = vadd.f32 %v655_v62, %v2041_v25  ;;  %v541_v55 = vadd.f32 %v2607_v47, %v413_v12  ;;  %v1763_v10 = vld [vmem:[%s4278_s0 + $0xd8] sm:$0xff] }
  0x63   :  { %4443 = vst [vmem:[#allocation45_spill] sm:$0xff] %v2656_v20  ;;  %v573_v25 = vadd.f32 %v2612_v14, %v445_v2  ;;  %v1795_v62 = vld [vmem:[%s4278_s0 + $0x288] sm:$0xff]  ;;  %v273_v12 = vadd.f32 %v2638_v63, %v145_v29  ;;  %v305_v2 = vadd.f32 %v2643_v41, %v177_v32  ;;  %v111_v47 = vld [vmem:[%s4278_s0 + $0x1b9] sm:$0xff] }
  0x64   :  { %v1164_v30 = vpop.permute.xlu2 %1163  ;;  %v79_v14 = vld [vmem:[%s4278_s0 + $0x9] sm:$0xff] }
  0x65   :  { %v1301_v24 = vmul.f32 %v1164_v30, %v2448_v36  ;;  %v1333_v18 = vmul.f32 %v1164_v30, %v2477_v7  ;;  %v816_v36 = vadd.f32 %v687_v17, %v2051_v27  ;;  %v912_v7 = vadd.f32 %v784_v23, %v2046_v26  ;;  %v47_v30 = vld [vmem:[%s4278_s0 + $0x1b8] sm:$0xff]  ;;  %v1859_v23 = vld [vmem:[%s4278_s0 + $0x289] sm:$0xff] }
  0x66   :  { %v669_v26 = vadd.f32 %v2656_v20, %v541_v55  ;;  %v701_v29 = vadd.f32 %v2661_v15, %v573_v25  ;;  %v1827_v17 = vld [vmem:[%s4278_s0 + $0xd9] sm:$0xff]  ;;  %v2702_v32 = vld [vmem:[%s4278_s0 + $0xc8] sm:$0xff] }
  0x67   :  { %v1429_v8 = vadd.f32 %v1365_v50, %v1301_v24  ;;  %v1461_v27 = vadd.f32 %v1397_v0, %v1333_v18  ;;  %4445 = vst [vmem:[#allocation47_spill] sm:$0xff] %v2702_v32  ;;  %v944_v50 = vadd.f32 %v816_v36, %v2056_v28  ;;  %v2706_v18 = vadd.f32 %v912_v7, %v2065_v31  ;;  %v207_v55 = vld [vmem:[%s4278_s0 + $0xa] sm:$0xff]  ;;  %v239_v25 = vld [vmem:[%s4278_s0 + $0x1ba] sm:$0xff] }
  0x68   :  { %v402_v0 = vadd.f32 %v273_v12, %v2108_v44  ;;  %v434_v24 = vadd.f32 %v305_v2, %v2113_v45  ;;  %v2719_v15 = vld [vmem:[%s4278_s0 + $0xc9] sm:$0xff]  ;;  %v798_v28 = vadd.f32 %v1763_v10, %v669_v26  ;;  %v830_v31 = vadd.f32 %v1795_v62, %v701_v29  ;;  %v2728_v12 = vld [vmem:[%s4278_s0 + $0x278] sm:$0xff] }
  0x69   :  { %4446 = vst [vmem:[#allocation48_spill] sm:$0xff] %v2719_v15  ;;  %v143_v36 = vadd.f32 %v79_v14, %v15_v3  ;;  %v175_v7 = vadd.f32 %v111_v47, %v47_v30  ;;  %v2733_v2 = vld [vmem:[%s4278_s0 + $0x279] sm:$0xff]  ;;  %v2738_v20 = vld [vmem:[%s4278_s0 + $0xca] sm:$0xff]  ;;  %v159_v62 = vadd.f32 %v2719_v15, %v2702_v32 }
  0x6a   :  { %1494 = vst.msk [vmem:[%s4280_s3 + $0x28] sm:$0xff] %vm1488_vm0, %v1429_v8  ;;  %v2745_v8 = vadd.f32 %v944_v50, %v2073_v33  ;;  %v1891_v3 = vld [vmem:[%s4278_s0 + $0xda] sm:$0xff]  ;;  %v1923_v47 = vld [vmem:[%s4278_s0 + $0x28a] sm:$0xff]  ;;  %v530_v14 = vadd.f32 %v402_v0, %v2118_v46  ;;  %v562_v10 = vadd.f32 %v434_v24, %v2127_v49  ;;  %v926_v30 = vadd.f32 %v1827_v17, %v798_v28 }
  0x6b   :  { %1526 = vst.msk [vmem:[%s4280_s3 + $0x128] sm:$0xff] %vm1488_vm0, %v1461_v27  ;;  %v1368_v33 = vld [vmem:[%s4279_s2 + $0x40] sm:$0xff]  ;;  %v958_v27 = vadd.f32 %v1859_v23, %v830_v31  ;;  %v271_v26 = vadd.f32 %v207_v55, %v143_v36  ;;  %v303_v29 = vadd.f32 %v239_v25, %v175_v7  ;;  %v191_v15 = vadd.f32 %v2733_v2, %v2728_v12 }
  0x6c   :  { %v1400_v50 = vld [vmem:[%s4279_s2 + $0x140] sm:$0xff]  ;;  %v1179_v56 = vpop.permute.xlu2 %1178  ;;  %v658_v0 = vadd.f32 %v530_v14, %v2134_v51  ;;  %v690_v24 = vadd.f32 %v562_v10, %v2139_v52  ;;  %v287_v17 = vadd.f32 %v2738_v20, %v159_v62  ;;  %v2780_v28 = vadd.f32 %v1891_v3, %v926_v30  ;;  %v2791_v62 = vld [vmem:[%s4278_s0 + $0x290] sm:$0xff] }
  0x6d   :  { %v2770_v32 = vld [vmem:[%s4278_s0 + $0x27a] sm:$0xff]  ;;  %v1304_v55 = vmul.f32 %v1179_v56, %v2491_v34  ;;  %v1336_v25 = vmul.f32 %v1179_v56, %v2494_v4  ;;  %v2782_v31 = vadd.f32 %v1923_v47, %v958_v27  ;;  %v400_v14 = vadd.f32 %v271_v26, %v2583_v40  ;;  %v2807_v30 = vld [vmem:[%s4278_s0 + $0x291] sm:$0xff] }
  0x6e   :  { %v2776_v23 = vld [vmem:[%s4278_s0 + $0xe0] sm:$0xff]  ;;  %v787_v36 = vadd.f32 %v2153_v57, %v658_v0  ;;  %v819_v7 = vadd.f32 %v2169_v61, %v690_v24  ;;  %v432_v10 = vadd.f32 %v303_v29, %v2588_v53  ;;  %v319_v57 = vadd.f32 %v2770_v32, %v191_v15  ;;  %v4447_v0 = vld [vmem:[#allocation8_spill] sm:$0xff]  ;;  %v4448_v24 = vld [vmem:[#allocation9_spill] sm:$0xff] }
  0x6f   :  { %v2796_v56 = vld [vmem:[%s4278_s0 + $0xe1] sm:$0xff]  ;;  %v1432_v34 = vadd.f32 %v1368_v33, %v1304_v55  ;;  %v1464_v4 = vadd.f32 %v1400_v50, %v1336_v25  ;;  %v416_v61 = vadd.f32 %v2776_v23, %v287_v17  ;;  %v528_v3 = vadd.f32 %v400_v14, %v2617_v16  ;;  %v1362_v25 = vld [vmem:[%s4279_s2 + $0x10] sm:$0xff] }
  0x70   :  { %v915_v40 = vadd.f32 %v2185_v1, %v787_v36  ;;  %v947_v53 = vadd.f32 %v2202_v6, %v819_v7  ;;  %v560_v47 = vadd.f32 %v432_v10, %v2631_v60  ;;  %v2812_v33 = vld [vmem:[%s4278_s0 + $0xe2] sm:$0xff]  ;;  %v448_v1 = vadd.f32 %v2791_v62, %v319_v57  ;;  %v1394_v57 = vld [vmem:[%s4279_s2 + $0x110] sm:$0xff] }
  0x71   :  { %1497 = vst.msk [vmem:[%s4280_s3 + $0x40] sm:$0xff] %vm1488_vm0, %v1432_v34  ;;  %v544_v6 = vadd.f32 %v2796_v56, %v416_v61  ;;  %v277_v16 = vadd.f32 %v2209_v9, %v2592_v19  ;;  %v309_v60 = vadd.f32 %v2225_v13, %v2621_v54  ;;  %v656_v26 = vadd.f32 %v528_v3, %v2638_v63  ;;  %v2839_v19 = vld [vmem:[%s4278_s0 + $0x292] sm:$0xff] }
  0x72   :  { %1529 = vst.msk [vmem:[%s4280_s3 + $0x140] sm:$0xff] %vm1488_vm0, %v1464_v4  ;;  %v2829_v15 = vadd.f32 %v2209_v9, %v915_v40  ;;  %v2832_v27 = vadd.f32 %v2225_v13, %v947_v53  ;;  %v688_v29 = vadd.f32 %v560_v47, %v2643_v41  ;;  %v1766_v54 = vld [vmem:[%s4278_s0 + $0xf8] sm:$0xff]  ;;  %v576_v50 = vadd.f32 %v2807_v30, %v448_v1  ;;  %v1798_v53 = vld [vmem:[%s4278_s0 + $0x2a8] sm:$0xff] }
  0x73   :  { %v672_v9 = vadd.f32 %v2812_v33, %v544_v6  ;;  %v406_v13 = vadd.f32 %v4447_v0, %v277_v16  ;;  %v438_v17 = vadd.f32 %v4448_v24, %v309_v60  ;;  %v1371_v63 = vld [vmem:[%s4279_s2 + $0x58] sm:$0xff]  ;;  %v785_v36 = vadd.f32 %v656_v26, %v2108_v44  ;;  %v1360_v44 = vld [vmem:[%s4279_s2] sm:$0xff] }
  0x74   :  { %v1403_v41 = vld [vmem:[%s4279_s2 + $0x158] sm:$0xff]  ;;  %v1194_v55 = vpop.permute.xlu2 %1193  ;;  %v817_v7 = vadd.f32 %v688_v29, %v2113_v45  ;;  %v148_v14 = vadd.f32 %v2098_v42, %v2086_v38  ;;  %v180_v10 = vadd.f32 %v2103_v43, %v2091_v39  ;;  %v1392_v38 = vld [vmem:[%s4279_s2 + $0x100] sm:$0xff]  ;;  %v704_v39 = vadd.f32 %v2839_v19, %v576_v50 }
  0x75   :  { %v1307_v34 = vmul.f32 %v1194_v55, %v2555_v22  ;;  %v1339_v4 = vmul.f32 %v1194_v55, %v2558_v35  ;;  %v1149_v61 = vpop.permute.xlu1 %1148  ;;  %v1139_v42 = vpop.permute.xlu0 %1138  ;;  %v801_v43 = vadd.f32 %v1766_v54, %v672_v9  ;;  %v1830_v3 = vld [vmem:[%s4278_s0 + $0xf9] sm:$0xff]  ;;  %v913_v6 = vadd.f32 %v785_v36, %v2118_v46  ;;  %v2911_v54 = vld [vmem:[%s4278_s0 + $0x2a1] sm:$0xff] }
  0x76   :  { %v1298_v45 = vmul.f32 %v1149_v61, %v2624_v5  ;;  %v1330_v22 = vmul.f32 %v1149_v61, %v2649_v37  ;;  %v1296_v35 = vmul.f32 %v1139_v42, %v2706_v18  ;;  %v1328_v40 = vmul.f32 %v1139_v42, %v2745_v8  ;;  %v1862_v37 = vld [vmem:[%s4278_s0 + $0x2a9] sm:$0xff]  ;;  %v1894_v18 = vld [vmem:[%s4278_s0 + $0xfa] sm:$0xff] }
  0x77   :  { %v1435_v47 = vadd.f32 %v1371_v63, %v1307_v34  ;;  %v1467_v1 = vadd.f32 %v1403_v41, %v1339_v4  ;;  %v945_v5 = vadd.f32 %v817_v7, %v2127_v49  ;;  %v2896_v8 = vld [vmem:[%s4278_s0 + $0xf0] sm:$0xff]  ;;  %v2901_v46 = vld [vmem:[%s4278_s0 + $0x2a0] sm:$0xff]  ;;  %v1041_v50 = vadd.f32 %v913_v6, %v2134_v51 }
  0x78   :  { %v1426_v16 = vadd.f32 %v1362_v25, %v1298_v45  ;;  %v1458_v60 = vadd.f32 %v1394_v57, %v1330_v22  ;;  %v1424_v26 = vadd.f32 %v1360_v44, %v1296_v35  ;;  %v1456_v29 = vadd.f32 %v1392_v38, %v1328_v40  ;;  %v2906_v49 = vld [vmem:[%s4278_s0 + $0xf1] sm:$0xff]  ;;  %v4450_v25 = vld [vmem:[#allocation23_spill] sm:$0xff]  ;;  %v4453_v42 = vld [vmem:[#allocation2_spill] sm:$0xff] }
  0x79   :  { %1500 = vst.msk [vmem:[%s4280_s3 + $0x58] sm:$0xff] %vm1488_vm0, %v1435_v47  ;;  %v1073_v9 = vadd.f32 %v945_v5, %v2139_v52  ;;  %v833_v0 = vadd.f32 %v1798_v53, %v704_v39  ;;  %v929_v24 = vadd.f32 %v1830_v3, %v801_v43  ;;  %v1926_v63 = vld [vmem:[%s4278_s0 + $0x2aa] sm:$0xff]  ;;  %v566_v36 = vadd.f32 %v4450_v25, %v438_v17  ;;  %v2933_v52 = vld [vmem:[%s4278_s0 + $0xf2] sm:$0xff] }
  0x7a   :  { %1532 = vst.msk [vmem:[%s4280_s3 + $0x158] sm:$0xff] %vm1488_vm0, %v1467_v1  ;;  %v4449_v41 = vld [vmem:[#allocation12_spill] sm:$0xff]  ;;  %v276_v7 = vadd.f32 %v2158_v58, %v148_v14  ;;  %v308_v51 = vadd.f32 %v2163_v59, %v180_v10  ;;  %v194_v58 = vadd.f32 %v2911_v54, %v2901_v46  ;;  %v1363_v10 = vld [vmem:[%s4279_s2 + $0x18] sm:$0xff]  ;;  %v4454_v43 = vld [vmem:[#allocation3_spill] sm:$0xff] }
  0x7b   :  { %v534_v55 = vadd.f32 %v4449_v41, %v406_v13  ;;  %1491 = vst.msk [vmem:[%s4280_s3 + $0x10] sm:$0xff] %vm1488_vm0, %v1426_v16  ;;  %v961_v34 = vadd.f32 %v1862_v37, %v833_v0  ;;  %v2939_v4 = vadd.f32 %v1894_v18, %v929_v24  ;;  %v162_v13 = vadd.f32 %v2906_v49, %v2896_v8  ;;  %v1374_v59 = vld [vmem:[%s4279_s2 + $0x70] sm:$0xff]  ;;  %v4452_v44 = vld [vmem:[#allocation29_spill] sm:$0xff]  ;;  %v1361_v3 = vld [vmem:[%s4279_s2 + $0x8] sm:$0xff] }
  0x7c   :  { %1523 = vst.msk [vmem:[%s4280_s3 + $0x110] sm:$0xff] %vm1488_vm0, %v1458_v60  ;;  %v1406_v17 = vld [vmem:[%s4279_s2 + $0x170] sm:$0xff]  ;;  %v1209_v14 = vpop.permute.xlu2 %1208  ;;  %v694_v38 = vadd.f32 %v4452_v44, %v566_v36  ;;  %v405_v39 = vadd.f32 %v4453_v42, %v276_v7  ;;  %v437_v45 = vadd.f32 %v4454_v43, %v308_v51  ;;  %v1395_v40 = vld [vmem:[%s4279_s2 + $0x118] sm:$0xff]  ;;  %v1393_v47 = vld [vmem:[%s4279_s2 + $0x108] sm:$0xff] }
  0x7d   :  { %v4451_v57 = vld [vmem:[#allocation24_spill] sm:$0xff]  ;;  %1489 = vst.msk [vmem:[%s4280_s3] sm:$0xff] %vm1488_vm0, %v1424_v26  ;;  %v1310_v22 = vmul.f32 %v1209_v14, %v2780_v28  ;;  %v1342_v35 = vmul.f32 %v1209_v14, %v2782_v31  ;;  %v1154_v53 = vpop.permute.xlu1 %1153  ;;  %v1144_v1 = vpop.permute.xlu0 %1143  ;;  %v1089_v6 = vadd.f32 %v1926_v63, %v961_v34  ;;  %v290_v5 = vadd.f32 %v2933_v52, %v162_v13  ;;  %v4455_v26 = vld [vmem:[#allocation17_spill] sm:$0xff]  ;;  %v4456_v24 = vld [vmem:[#allocation18_spill] sm:$0xff] }
  0x7e   :  { %v662_v61 = vadd.f32 %v4451_v57, %v534_v55  ;;  %1521 = vst.msk [vmem:[%s4280_s3 + $0x100] sm:$0xff] %vm1488_vm0, %v1456_v29  ;;  %v1299_v28 = vmul.f32 %v1154_v53, %v2829_v15  ;;  %v1331_v31 = vmul.f32 %v1154_v53, %v2832_v27  ;;  %v1297_v37 = vmul.f32 %v1144_v1, %v1041_v50  ;;  %v2989_v63 = vld [vmem:[%s4278_s0 + $0x2a2] sm:$0xff]  ;;  %v4458_v36 = vld [vmem:[#allocation20_spill] sm:$0xff]  ;;  %v4460_v13 = vld [vmem:[#allocation5_spill] sm:$0xff] }
  0x7f   :  { %v1329_v18 = vmul.f32 %v1144_v1, %v1073_v9  ;;  %v1438_v16 = vadd.f32 %v1374_v59, %v1310_v22  ;;  %v1470_v60 = vadd.f32 %v1406_v17, %v1342_v35  ;;  %v823_v41 = vadd.f32 %v694_v38, %v4456_v24  ;;  %v2994_v29 = vld [vmem:[%s4278_s0 + $0x108] sm:$0xff]  ;;  %v4459_v51 = vld [vmem:[#allocation4_spill] sm:$0xff]  ;;  %v3007_v17 = vld [vmem:[%s4278_s0 + $0x2b8] sm:$0xff] }
  0x80   :  { %v791_v0 = vadd.f32 %v662_v61, %v4455_v26  ;;  %v1427_v15 = vadd.f32 %v1363_v10, %v1299_v28  ;;  %v1459_v27 = vadd.f32 %v1395_v40, %v1331_v31  ;;  %v1425_v50 = vadd.f32 %v1361_v3, %v1297_v37  ;;  %v4457_v55 = vld [vmem:[#allocation19_spill] sm:$0xff]  ;;  %v4461_v61 = vld [vmem:[#allocation10_spill] sm:$0xff]  ;;  %v4462_v44 = vld [vmem:[#allocation13_spill] sm:$0xff] }
  0x81   :  { %v1457_v9 = vadd.f32 %v1393_v47, %v1329_v18  ;;  %1503 = vst.msk [vmem:[%s4280_s3 + $0x70] sm:$0xff] %vm1488_vm0, %v1438_v16  ;;  %v951_v7 = vadd.f32 %v823_v41, %v4458_v36  ;;  %v533_v34 = vadd.f32 %v4459_v51, %v405_v39  ;;  %v565_v59 = vadd.f32 %v4460_v13, %v437_v45  ;;  %v3012_v14 = vld [vmem:[%s4278_s0 + $0x109] sm:$0xff]  ;;  %v4464_v39 = vld [vmem:[#allocation14_spill] sm:$0xff]  ;;  %v4465_v45 = vld [vmem:[#allocation21_spill] sm:$0xff] }
  0x82   :  { %v919_v25 = vadd.f32 %v791_v0, %v4457_v55  ;;  %1535 = vst.msk [vmem:[%s4280_s3 + $0x170] sm:$0xff] %vm1488_vm0, %v1470_v60  ;;  %v322_v10 = vadd.f32 %v2989_v63, %v194_v58  ;;  %v419_v57 = vadd.f32 %v2994_v29, %v290_v5  ;;  %v152_v38 = vadd.f32 %v4462_v44, %v4461_v61  ;;  %v4463_v42 = vld [vmem:[#allocation11_spill] sm:$0xff]  ;;  %v4466_v35 = vld [vmem:[#allocation22_spill] sm:$0xff]  ;;  %v1367_v18 = vld [vmem:[%s4279_s2 + $0x38] sm:$0xff] }
  0x83   :  { %v184_v43 = vadd.f32 %v4464_v39, %v4463_v42  ;;  %1492 = vst.msk [vmem:[%s4280_s3 + $0x18] sm:$0xff] %vm1488_vm0, %v1427_v15  ;;  %v1079_v40 = vadd.f32 %v951_v7, %v4466_v35  ;;  %v4467_v53 = vld [vmem:[#allocation6_spill] sm:$0xff]  ;;  %v4468_v58 = vld [vmem:[#allocation7_spill] sm:$0xff]  ;;  %v4470_v15 = vld [vmem:[#allocation16_spill] sm:$0xff] }
  0x84   :  { %v1047_v22 = vadd.f32 %v919_v25, %v4465_v45  ;;  %v661_v3 = vadd.f32 %v4467_v53, %v533_v34  ;;  %v693_v47 = vadd.f32 %v4468_v58, %v565_v59  ;;  %v3035_v1 = vld [vmem:[%s4278_s0 + $0x2b9] sm:$0xff]  ;;  %v3040_v5 = vld [vmem:[%s4278_s0 + $0x10a] sm:$0xff]  ;;  %1524 = vst.msk [vmem:[%s4280_s3 + $0x118] sm:$0xff] %vm1488_vm0, %v1459_v27  ;;  %v1224_v37 = vpop.permute.xlu2 %1223  ;;  %v451_v16 = vadd.f32 %v3007_v17, %v322_v10 }
  0x85   :  { %v1377_v28 = vld [vmem:[%s4279_s2 + $0x88] sm:$0xff]  ;;  %v547_v60 = vadd.f32 %v3012_v14, %v419_v57  ;;  %v312_v27 = vadd.f32 %v4470_v15, %v184_v43  ;;  %1490 = vst.msk [vmem:[%s4280_s3 + $0x8] sm:$0xff] %vm1488_vm0, %v1425_v50  ;;  %v1313_v25 = vmul.f32 %v1224_v37, %v2939_v4  ;;  %v1345_v7 = vmul.f32 %v1224_v37, %v1089_v6  ;;  %v1399_v51 = vld [vmem:[%s4279_s2 + $0x138] sm:$0xff]  ;;  %v1174_v34 = vpop.permute.xlu1 %1173  ;;  %v3077_v50 = vld [vmem:[%s4278_s0 + $0x120] sm:$0xff] }
  0x86   :  { %v1409_v31 = vld [vmem:[%s4279_s2 + $0x188] sm:$0xff]  ;;  %v790_v13 = vadd.f32 %v4461_v61, %v661_v3  ;;  %v822_v59 = vadd.f32 %v4463_v42, %v693_v47  ;;  %v3072_v10 = vld [vmem:[%s4278_s0 + $0x2ba] sm:$0xff]  ;;  %4472 = vst [vmem:[#allocation9_spill] sm:$0xff] %v3077_v50  ;;  %v1303_v4 = vmul.f32 %v1174_v34, %v1047_v22  ;;  %v1335_v6 = vmul.f32 %v1174_v34, %v1079_v40 }
  0x87   :  { %v4469_v0 = vld [vmem:[#allocation15_spill] sm:$0xff]  ;;  %4471 = vst [vmem:[#allocation8_spill] sm:$0xff] %v3072_v10  ;;  %v579_v57 = vadd.f32 %v3035_v1, %v451_v16  ;;  %v675_v61 = vadd.f32 %v3040_v5, %v547_v60  ;;  %v1441_v43 = vadd.f32 %v1377_v28, %v1313_v25  ;;  %v1473_v22 = vadd.f32 %v1409_v31, %v1345_v7  ;;  %v55_v3 = vld [vmem:[%s4278_s0 + $0x218] sm:$0xff]  ;;  %v1169_v28 = vpop.permute.xlu0 %1168  ;;  %v4477_v7 = vld [vmem:[#allocation26_spill] sm:$0xff] }
  0x88   :  { %v280_v41 = vadd.f32 %v4469_v0, %v152_v38  ;;  %1522 = vst.msk [vmem:[%s4280_s3 + $0x108] sm:$0xff] %vm1488_vm0, %v1457_v9  ;;  %v3088_v38 = vld [vmem:[%s4278_s0 + $0x2d0] sm:$0xff]  ;;  %v3093_v42 = vld [vmem:[%s4278_s0 + $0x121] sm:$0xff]  ;;  %v918_v40 = vadd.f32 %v4462_v44, %v790_v13  ;;  %v950_v53 = vadd.f32 %v4464_v39, %v822_v59  ;;  %v119_v47 = vld [vmem:[%s4278_s0 + $0x219] sm:$0xff]  ;;  %v1431_v37 = vadd.f32 %v1367_v18, %v1303_v4 }
  0x89   :  { %4473 = vst [vmem:[#allocation12_spill] sm:$0xff] %v3088_v38  ;;  %v23_v9 = vld [vmem:[%s4278_s0 + $0x68] sm:$0xff]  ;;  %v1463_v16 = vadd.f32 %v1399_v51, %v1335_v6  ;;  %v707_v31 = vadd.f32 %v3072_v10, %v579_v57  ;;  %v804_v44 = vadd.f32 %v3077_v50, %v675_v61  ;;  %v3114_v39 = vld [vmem:[%s4278_s0 + $0x2d1] sm:$0xff]  ;;  %v247_v4 = vld [vmem:[%s4278_s0 + $0x21a] sm:$0xff]  ;;  %v183_v57 = vadd.f32 %v119_v47, %v55_v3 }
  0x8a   :  { %4474 = vst [vmem:[#allocation23_spill] sm:$0xff] %v3093_v42  ;;  %v87_v58 = vld [vmem:[%s4278_s0 + $0x69] sm:$0xff]  ;;  %v1046_v60 = vadd.f32 %v4469_v0, %v918_v40  ;;  %v1078_v18 = vadd.f32 %v4470_v15, %v950_v53  ;;  %v409_v51 = vadd.f32 %v4477_v7, %v280_v41  ;;  %v4480_v40 = vld [vmem:[#allocation30_spill] sm:$0xff] }
  0x8b   :  { %4475 = vst [vmem:[#allocation24_spill] sm:$0xff] %v3114_v39  ;;  %v3125_v25 = vld [vmem:[%s4278_s0 + $0x122] sm:$0xff]  ;;  %v215_v59 = vld [vmem:[%s4278_s0 + $0x6a] sm:$0xff]  ;;  %v836_v15 = vadd.f32 %v3088_v38, %v707_v31  ;;  %v151_v6 = vadd.f32 %v87_v58, %v23_v9  ;;  %v3433_v10 = vld [vmem:[%s4278_s0 + $0x13a] sm:$0xff] }
  0x8c   :  { %1506 = vst.msk [vmem:[%s4280_s3 + $0x88] sm:$0xff] %vm1488_vm0, %v1441_v43  ;;  %v4478_v34 = vld [vmem:[#allocation27_spill] sm:$0xff]  ;;  %v1366_v0 = vld [vmem:[%s4279_s2 + $0x30] sm:$0xff]  ;;  %v1302_v61 = vmul.f32 %v1169_v28, %v1046_v60  ;;  %v1334_v43 = vmul.f32 %v1169_v28, %v1078_v18  ;;  %v537_v53 = vadd.f32 %v4480_v40, %v409_v51  ;;  %v1239_v3 = vpop.permute.xlu2 %1238  ;;  %v311_v28 = vadd.f32 %v247_v4, %v183_v57  ;;  %v4483_v4 = vld [vmem:[#allocation34_spill] sm:$0xff] }
  0x8d   :  { %4476 = vst [vmem:[#allocation29_spill] sm:$0xff] %v3125_v25  ;;  %v441_v13 = vadd.f32 %v4478_v34, %v312_v27  ;;  %v1398_v41 = vld [vmem:[%s4279_s2 + $0x130] sm:$0xff]  ;;  %v932_v27 = vadd.f32 %v3093_v42, %v804_v44  ;;  %v4481_v7 = vld [vmem:[#allocation31_spill] sm:$0xff]  ;;  %v964_v58 = vadd.f32 %v3114_v39, %v836_v15  ;;  %v3172_v44 = vld [vmem:[%s4278_s0 + $0x2c0] sm:$0xff] }
  0x8e   :  { %1538 = vst.msk [vmem:[%s4280_s3 + $0x188] sm:$0xff] %vm1488_vm0, %v1473_v22  ;;  %v3154_v22 = vld [vmem:[%s4278_s0 + $0x2d2] sm:$0xff]  ;;  %v1430_v18 = vadd.f32 %v1366_v0, %v1302_v61  ;;  %v1462_v51 = vadd.f32 %v1398_v41, %v1334_v43  ;;  %v1380_v34 = vld [vmem:[%s4279_s2 + $0xa0] sm:$0xff]  ;;  %v440_v40 = vadd.f32 %v311_v28, %v4456_v24 }
  0x8f   :  { %1496 = vst.msk [vmem:[%s4280_s3 + $0x38] sm:$0xff] %vm1488_vm0, %v1431_v37  ;;  %v569_v31 = vadd.f32 %v4481_v7, %v441_v13  ;;  %v3161_v9 = vld [vmem:[%s4278_s0 + $0x110] sm:$0xff]  ;;  %v1060_v47 = vadd.f32 %v3125_v25, %v932_v27  ;;  %v279_v37 = vadd.f32 %v215_v59, %v151_v6  ;;  %v4482_v13 = vld [vmem:[#allocation33_spill] sm:$0xff]  ;;  %v1092_v27 = vadd.f32 %v3154_v22, %v964_v58  ;;  %v3200_v41 = vld [vmem:[%s4278_s0 + $0x2c2] sm:$0xff] }
  0x90   :  { %4479 = vst [vmem:[#allocation2_spill] sm:$0xff] %v3154_v22  ;;  %v3177_v60 = vld [vmem:[%s4278_s0 + $0x111] sm:$0xff]  ;;  %v665_v59 = vadd.f32 %v4482_v13, %v537_v53  ;;  %v568_v28 = vadd.f32 %v440_v40, %v4458_v36  ;;  %v59_v36 = vld [vmem:[%s4278_s0 + $0x248] sm:$0xff]  ;;  %v1189_v40 = vpop.permute.xlu1 %1188  ;;  %v3315_v42 = vld [vmem:[%s4278_s0 + $0x260] sm:$0xff] }
  0x91   :  { %1528 = vst.msk [vmem:[%s4280_s3 + $0x138] sm:$0xff] %vm1488_vm0, %v1463_v16  ;;  %v3182_v16 = vld [vmem:[%s4278_s0 + $0x2c1] sm:$0xff]  ;;  %v697_v15 = vadd.f32 %v4483_v4, %v569_v31  ;;  %v1316_v6 = vmul.f32 %v1239_v3, %v1060_v47  ;;  %v408_v57 = vadd.f32 %v279_v37, %v4455_v26  ;;  %v3195_v0 = vld [vmem:[%s4278_s0 + $0x112] sm:$0xff]  ;;  %v165_v43 = vadd.f32 %v3177_v60, %v3161_v9 }
  0x92   :  { %4484 = vst [vmem:[#allocation3_spill] sm:$0xff] %v3195_v0  ;;  %v1412_v26 = vld [vmem:[%s4279_s2 + $0x1a0] sm:$0xff]  ;;  %v794_v24 = vadd.f32 %v665_v59, %v2507_v11  ;;  %v197_v53 = vadd.f32 %v3182_v16, %v3172_v44  ;;  %v27_v7 = vld [vmem:[%s4278_s0 + $0x98] sm:$0xff]  ;;  %v1348_v58 = vmul.f32 %v1239_v3, %v1092_v27  ;;  %v4492_v22 = vld [vmem:[#allocation40_spill] sm:$0xff] }
  0x93   :  { %4485 = vst [vmem:[#allocation17_spill] sm:$0xff] %v3200_v41  ;;  %v826_v61 = vadd.f32 %v697_v15, %v2513_v21  ;;  %v91_v31 = vld [vmem:[%s4278_s0 + $0x99] sm:$0xff]  ;;  %v1444_v47 = vadd.f32 %v1380_v34, %v1316_v6  ;;  %v536_v37 = vadd.f32 %v408_v57, %v4457_v55  ;;  %v293_v3 = vadd.f32 %v3195_v0, %v165_v43  ;;  %v123_v34 = vld [vmem:[%s4278_s0 + $0x249] sm:$0xff]  ;;  %v3320_v38 = vld [vmem:[%s4278_s0 + $0xb1] sm:$0xff] }
  0x94   :  { %1495 = vst.msk [vmem:[%s4280_s3 + $0x30] sm:$0xff] %vm1488_vm0, %v1430_v18  ;;  %v3230_v18 = vld [vmem:[%s4278_s0 + $0x128] sm:$0xff]  ;;  %v3235_v13 = vld [vmem:[%s4278_s0 + $0x2d8] sm:$0xff]  ;;  %v4488_v59 = vld [vmem:[#allocation38_spill] sm:$0xff]  ;;  %v325_v55 = vadd.f32 %v3200_v41, %v197_v53  ;;  %v1476_v27 = vadd.f32 %v1412_v26, %v1348_v58  ;;  %v155_v53 = vadd.f32 %v91_v31, %v27_v7 }
  0x95   :  { %1527 = vst.msk [vmem:[%s4280_s3 + $0x130] sm:$0xff] %vm1488_vm0, %v1462_v51  ;;  %v922_v4 = vadd.f32 %v794_v24, %v4488_v59  ;;  %v954_v51 = vadd.f32 %v826_v61, %v2523_v48  ;;  %v219_v15 = vld [vmem:[%s4278_s0 + $0x9a] sm:$0xff]  ;;  %v1370_v6 = vld [vmem:[%s4279_s2 + $0x50] sm:$0xff]  ;;  %v664_v24 = vadd.f32 %v536_v37, %v4465_v45  ;;  %v696_v61 = vadd.f32 %v568_v28, %v4466_v35  ;;  %v4491_v58 = vld [vmem:[#allocation39_spill] sm:$0xff] }
  0x96   :  { %4486 = vst [vmem:[#allocation18_spill] sm:$0xff] %v3230_v18  ;;  %v1402_v57 = vld [vmem:[%s4279_s2 + $0x150] sm:$0xff]  ;;  %v3270_v43 = vld [vmem:[%s4278_s0 + $0x2d9] sm:$0xff]  ;;  %v422_v39 = vadd.f32 %v3230_v18, %v293_v3  ;;  %v454_v45 = vadd.f32 %v3235_v13, %v325_v55  ;;  %v283_v18 = vadd.f32 %v219_v15, %v155_v53  ;;  %v4500_v15 = vld [vmem:[#allocation35_spill] sm:$0xff] }
  0x97   :  { %4487 = vst [vmem:[#allocation19_spill] sm:$0xff] %v3235_v13  ;;  %v3265_v26 = vld [vmem:[%s4278_s0 + $0x129] sm:$0xff]  ;;  %v1082_v25 = vadd.f32 %v954_v51, %v4492_v22  ;;  %v4494_v31 = vld [vmem:[#allocation25_spill] sm:$0xff]  ;;  %v3303_v55 = vld [vmem:[%s4278_s0 + $0x140] sm:$0xff] }
  0x98   :  { %1509 = vst.msk [vmem:[%s4280_s3 + $0xa0] sm:$0xff] %vm1488_vm0, %v1444_v47  ;;  %v1050_v47 = vadd.f32 %v922_v4, %v4491_v58  ;;  %v3279_v35 = vld [vmem:[%s4278_s0 + $0x12a] sm:$0xff]  ;;  %v793_v28 = vadd.f32 %v4494_v31, %v664_v24  ;;  %v3298_v3 = vld [vmem:[%s4278_s0 + $0x2da] sm:$0xff] }
  0x99   :  { %4489 = vst [vmem:[#allocation20_spill] sm:$0xff] %v3265_v26  ;;  %v251_v37 = vld [vmem:[%s4278_s0 + $0x24a] sm:$0xff]  ;;  %v1338_v31 = vmul.f32 %v1189_v40, %v1082_v25 }
  0x9a   :  { %4490 = vst [vmem:[#allocation4_spill] sm:$0xff] %v3270_v43  ;;  %v3287_v7 = vld [vmem:[%s4278_s0 + $0xb0] sm:$0xff]  ;;  %v1306_v24 = vmul.f32 %v1189_v40, %v1050_v47  ;;  %v58_v47 = vld [vmem:[%s4278_s0 + $0x240] sm:$0xff] }
  0x9b   :  { %4493 = vst [vmem:[#allocation5_spill] sm:$0xff] %v3279_v35  ;;  %v4495_v4 = vld [vmem:[#allocation28_spill] sm:$0xff]  ;;  %v412_v53 = vadd.f32 %v3287_v7, %v283_v18  ;;  %v1466_v41 = vadd.f32 %v1402_v57, %v1338_v31  ;;  %v3342_v18 = vld [vmem:[%s4278_s0 + $0x141] sm:$0xff]  ;;  %v4503_v31 = vld [vmem:[#allocation37_spill] sm:$0xff] }
  0x9c   :  { %1541 = vst.msk [vmem:[%s4280_s3 + $0x1a0] sm:$0xff] %vm1488_vm0, %v1476_v27  ;;  %v825_v51 = vadd.f32 %v4495_v4, %v696_v61  ;;  %v3308_v13 = vld [vmem:[%s4278_s0 + $0x2f0] sm:$0xff]  ;;  %v187_v27 = vadd.f32 %v123_v34, %v59_v36  ;;  %v550_v61 = vadd.f32 %v3265_v26, %v422_v39  ;;  %v582_v4 = vadd.f32 %v3270_v43, %v454_v45  ;;  %v122_v43 = vld [vmem:[%s4278_s0 + $0x241] sm:$0xff] }
  0x9d   :  { %4496 = vst [vmem:[#allocation10_spill] sm:$0xff] %v3298_v3  ;;  %v26_v36 = vld [vmem:[%s4278_s0 + $0x90] sm:$0xff]  ;;  %v1434_v26 = vadd.f32 %v1370_v6, %v1306_v24  ;;  %v186_v0 = vadd.f32 %v122_v43, %v58_v47 }
  0x9e   :  { %4497 = vst [vmem:[#allocation13_spill] sm:$0xff] %v3303_v55  ;;  %v4499_v34 = vld [vmem:[#allocation32_spill] sm:$0xff]  ;;  %v953_v39 = vadd.f32 %v4500_v15, %v825_v51  ;;  %v315_v40 = vadd.f32 %v251_v37, %v187_v27  ;;  %v678_v51 = vadd.f32 %v3279_v35, %v550_v61  ;;  %v710_v37 = vadd.f32 %v3298_v3, %v582_v4  ;;  %v3347_v27 = vld [vmem:[%s4278_s0 + $0x261] sm:$0xff] }
  0x9f   :  { %4498 = vst [vmem:[#allocation11_spill] sm:$0xff] %v3308_v13  ;;  %v921_v25 = vadd.f32 %v4499_v34, %v793_v28  ;;  %v90_v45 = vld [vmem:[%s4278_s0 + $0x91] sm:$0xff]  ;;  %v1184_v28 = vpop.permute.xlu0 %1183  ;;  %v540_v15 = vadd.f32 %v3320_v38, %v412_v53  ;;  %v250_v35 = vld [vmem:[%s4278_s0 + $0x242] sm:$0xff] }
  0xa0   :  { %4501 = vst [vmem:[#allocation14_spill] sm:$0xff] %v3342_v18  ;;  %v3352_v6 = vld [vmem:[%s4278_s0 + $0xb2] sm:$0xff]  ;;  %v1081_v61 = vadd.f32 %v4503_v31, %v953_v39  ;;  %v444_v34 = vadd.f32 %v3315_v42, %v315_v40  ;;  %v1401_v39 = vld [vmem:[%s4279_s2 + $0x148] sm:$0xff]  ;;  %v807_v40 = vadd.f32 %v3303_v55, %v678_v51  ;;  %v839_v53 = vadd.f32 %v3308_v13, %v710_v37 }
  0xa1   :  { %v4502_v57 = vld [vmem:[#allocation36_spill] sm:$0xff]  ;;  %1499 = vst.msk [vmem:[%s4280_s3 + $0x50] sm:$0xff] %vm1488_vm0, %v1434_v26  ;;  %v154_v31 = vadd.f32 %v90_v45, %v26_v36  ;;  %v3393_v51 = vld [vmem:[%s4278_s0 + $0x142] sm:$0xff]  ;;  %v668_v43 = vadd.f32 %v3352_v6, %v540_v15 }
  0xa2   :  { %v1049_v24 = vadd.f32 %v4502_v57, %v921_v25  ;;  %v3359_v4 = vld [vmem:[%s4278_s0 + $0x2f1] sm:$0xff]  ;;  %v1369_v25 = vld [vmem:[%s4279_s2 + $0x48] sm:$0xff]  ;;  %1531 = vst.msk [vmem:[%s4280_s3 + $0x150] sm:$0xff] %vm1488_vm0, %v1466_v41  ;;  %v1337_v50 = vmul.f32 %v1184_v28, %v1081_v61  ;;  %v572_v36 = vadd.f32 %v3347_v27, %v444_v34  ;;  %v935_v47 = vadd.f32 %v3342_v18, %v807_v40  ;;  %v3417_v34 = vld [vmem:[%s4278_s0 + $0x139] sm:$0xff] }
  0xa3   :  { %4504 = vst [vmem:[#allocation21_spill] sm:$0xff] %v3359_v4  ;;  %v218_v3 = vld [vmem:[%s4278_s0 + $0x92] sm:$0xff]  ;;  %v3384_v57 = vld [vmem:[%s4278_s0 + $0x262] sm:$0xff]  ;;  %v967_v45 = vadd.f32 %v3359_v4, %v839_v53  ;;  %v1254_v53 = vpop.permute.xlu2 %1253 }
  0xa4   :  { %v1305_v26 = vmul.f32 %v1184_v28, %v1049_v24  ;;  %4505 = vst [vmem:[#allocation22_spill] sm:$0xff] %v3393_v51  ;;  %v3398_v37 = vld [vmem:[%s4278_s0 + $0x2f2] sm:$0xff]  ;;  %v282_v28 = vadd.f32 %v218_v3, %v154_v31  ;;  %v314_v24 = vadd.f32 %v250_v35, %v186_v0  ;;  %v3412_v61 = vld [vmem:[%s4278_s0 + $0x2e8] sm:$0xff]  ;;  %v1465_v18 = vadd.f32 %v1401_v39, %v1337_v50 }
  0xa5   :  { %4506 = vst [vmem:[#allocation6_spill] sm:$0xff] %v3398_v37  ;;  %v3405_v41 = vld [vmem:[%s4278_s0 + $0x138] sm:$0xff]  ;;  %v3422_v15 = vld [vmem:[%s4278_s0 + $0x2e9] sm:$0xff]  ;;  %v700_v0 = vadd.f32 %v3384_v57, %v572_v36  ;;  %v1063_v31 = vadd.f32 %v3393_v51, %v935_v47  ;;  %v1095_v4 = vadd.f32 %v3398_v37, %v967_v45 }
  0xa6   :  { %v1433_v40 = vadd.f32 %v1369_v25, %v1305_v26  ;;  %v4507_v35 = vld [vmem:[#allocation47_spill] sm:$0xff]  ;;  %v411_v13 = vadd.f32 %v282_v28, %v2507_v11  ;;  %v443_v55 = vadd.f32 %v314_v24, %v2513_v21  ;;  %4508 = vst [vmem:[#allocation7_spill] sm:$0xff] %v3433_v10  ;;  %v1383_v11 = vld [vmem:[%s4279_s2 + $0xb8] sm:$0xff]  ;;  %v4510_v39 = vld [vmem:[#allocation48_spill] sm:$0xff]  ;;  %v168_v36 = vadd.f32 %v3417_v34, %v3405_v41  ;;  %v1204_v28 = vpop.permute.xlu1 %1203 }
  0xa7   :  { %v797_v3 = vadd.f32 %v668_v43, %v4507_v35  ;;  %v3438_v50 = vld [vmem:[%s4278_s0 + $0x2ea] sm:$0xff]  ;;  %v1415_v21 = vld [vmem:[%s4279_s2 + $0x1b8] sm:$0xff]  ;;  %v829_v25 = vadd.f32 %v700_v0, %v2728_v12  ;;  %v200_v43 = vadd.f32 %v3422_v15, %v3412_v61  ;;  %1530 = vst.msk [vmem:[%s4280_s3 + $0x148] sm:$0xff] %vm1488_vm0, %v1465_v18  ;;  %v1319_v47 = vmul.f32 %v1254_v53, %v1063_v31  ;;  %v30_v18 = vld [vmem:[%s4278_s0 + $0xc0] sm:$0xff] }
  0xa8   :  { %4509 = vst [vmem:[#allocation15_spill] sm:$0xff] %v3438_v50  ;;  %v1351_v45 = vmul.f32 %v1254_v53, %v1095_v4  ;;  %v539_v24 = vadd.f32 %v411_v13, %v4488_v59  ;;  %v3465_v0 = vld [vmem:[%s4278_s0 + $0x150] sm:$0xff]  ;;  %v94_v53 = vld [vmem:[%s4278_s0 + $0xc1] sm:$0xff] }
  0xa9   :  { %1498 = vst.msk [vmem:[%s4280_s3 + $0x48] sm:$0xff] %vm1488_vm0, %v1433_v40  ;;  %v925_v26 = vadd.f32 %v797_v3, %v4510_v39  ;;  %v571_v40 = vadd.f32 %v443_v55, %v2523_v48  ;;  %v3470_v3 = vld [vmem:[%s4278_s0 + $0x300] sm:$0xff]  ;;  %v957_v4 = vadd.f32 %v829_v25, %v2733_v2  ;;  %v296_v48 = vadd.f32 %v3433_v10, %v168_v36  ;;  %v62_v55 = vld [vmem:[%s4278_s0 + $0x270] sm:$0xff]  ;;  %v3540_v10 = vld [vmem:[%s4278_s0 + $0xd8] sm:$0xff] }
  0xaa   :  { %4511 = vst [vmem:[#allocation16_spill] sm:$0xff] %v3465_v0  ;;  %v328_v59 = vadd.f32 %v3438_v50, %v200_v43  ;;  %v126_v31 = vld [vmem:[%s4278_s0 + $0x271] sm:$0xff]  ;;  %v1447_v37 = vadd.f32 %v1383_v11, %v1319_v47  ;;  %v1479_v25 = vadd.f32 %v1415_v21, %v1351_v45  ;;  %v667_v36 = vadd.f32 %v539_v24, %v4491_v58  ;;  %v3501_v50 = vld [vmem:[%s4278_s0 + $0x301] sm:$0xff] }
  0xab   :  { %4512 = vst [vmem:[#allocation26_spill] sm:$0xff] %v3470_v3  ;;  %v1053_v13 = vadd.f32 %v925_v26, %v2738_v20  ;;  %v1373_v26 = vld [vmem:[%s4279_s2 + $0x68] sm:$0xff]  ;;  %v699_v43 = vadd.f32 %v571_v40, %v4492_v22  ;;  %v3496_v51 = vld [vmem:[%s4278_s0 + $0x151] sm:$0xff]  ;;  %v1085_v11 = vadd.f32 %v957_v4, %v2770_v32  ;;  %v425_v47 = vadd.f32 %v3465_v0, %v296_v48 }
  0xac   :  { %v457_v45 = vadd.f32 %v3470_v3, %v328_v59  ;;  %v222_v22 = vld [vmem:[%s4278_s0 + $0xc2] sm:$0xff]  ;;  %v254_v58 = vld [vmem:[%s4278_s0 + $0x272] sm:$0xff]  ;;  %1512 = vst.msk [vmem:[%s4280_s3 + $0xb8] sm:$0xff] %vm1488_vm0, %v1447_v37  ;;  %v158_v0 = vadd.f32 %v94_v53, %v30_v18  ;;  %v190_v37 = vadd.f32 %v126_v31, %v62_v55 }
  0xad   :  { %v1309_v21 = vmul.f32 %v1204_v28, %v1053_v13  ;;  %v1405_v24 = vld [vmem:[%s4279_s2 + $0x168] sm:$0xff]  ;;  %v4513_v40 = vld [vmem:[#allocation41_spill] sm:$0xff]  ;;  %v4514_v13 = vld [vmem:[#allocation42_spill] sm:$0xff]  ;;  %1544 = vst.msk [vmem:[%s4280_s3 + $0x1b8] sm:$0xff] %vm1488_vm0, %v1479_v25 }
  0xae   :  { %v796_v4 = vadd.f32 %v4513_v40, %v667_v36  ;;  %v828_v48 = vadd.f32 %v4514_v13, %v699_v43  ;;  %v3524_v59 = vld [vmem:[%s4278_s0 + $0x152] sm:$0xff]  ;;  %v3529_v3 = vld [vmem:[%s4278_s0 + $0x302] sm:$0xff]  ;;  %v1341_v36 = vmul.f32 %v1204_v28, %v1085_v11  ;;  %v553_v43 = vadd.f32 %v3496_v51, %v425_v47 }
  0xaf   :  { %4515 = vst [vmem:[#allocation27_spill] sm:$0xff] %v3524_v59  ;;  %v1437_v40 = vadd.f32 %v1373_v26, %v1309_v21  ;;  %v585_v13 = vadd.f32 %v3501_v50, %v457_v45  ;;  %v3545_v18 = vld [vmem:[%s4278_s0 + $0x288] sm:$0xff]  ;;  %v4518_v31 = vld [vmem:[#allocation44_spill] sm:$0xff]  ;;  %v3557_v26 = vld [vmem:[%s4278_s0 + $0x318] sm:$0xff]  ;;  %v286_v11 = vadd.f32 %v222_v22, %v158_v0  ;;  %v318_v21 = vadd.f32 %v254_v58, %v190_v37  ;;  %v1199_v45 = vpop.permute.xlu0 %1198 }
  0xb0   :  { %4516 = vst [vmem:[#allocation30_spill] sm:$0xff] %v3529_v3  ;;  %v4517_v55 = vld [vmem:[#allocation43_spill] sm:$0xff]  ;;  %v956_v25 = vadd.f32 %v4518_v31, %v828_v48  ;;  %v1469_v47 = vadd.f32 %v1405_v24, %v1341_v36  ;;  %v157_v22 = vadd.f32 %v3320_v38, %v3287_v7  ;;  %v1372_v58 = vld [vmem:[%s4279_s2 + $0x60] sm:$0xff]  ;;  %v4521_v24 = vld [vmem:[#allocation45_spill] sm:$0xff] }
  0xb1   :  { %v924_v53 = vadd.f32 %v4517_v55, %v796_v4  ;;  %v3552_v28 = vld [vmem:[%s4278_s0 + $0x168] sm:$0xff]  ;;  %4520 = vst [vmem:[#allocation33_spill] sm:$0xff] %v3557_v26  ;;  %v681_v4 = vadd.f32 %v3524_v59, %v553_v43  ;;  %v713_v48 = vadd.f32 %v3529_v3, %v585_v13  ;;  %v3568_v55 = vld [vmem:[%s4278_s0 + $0xd9] sm:$0xff]  ;;  %v415_v38 = vadd.f32 %v3540_v10, %v286_v11 }
  0xb2   :  { %4519 = vst [vmem:[#allocation31_spill] sm:$0xff] %v3552_v28  ;;  %v3573_v0 = vld [vmem:[%s4278_s0 + $0x289] sm:$0xff]  ;;  %v4522_v36 = vld [vmem:[#allocation46_spill] sm:$0xff]  ;;  %v447_v7 = vadd.f32 %v3545_v18, %v318_v21  ;;  %v189_v21 = vadd.f32 %v3347_v27, %v3315_v42  ;;  %v3631_v42 = vld [vmem:[%s4278_s0 + $0x158] sm:$0xff] }
  0xb3   :  { %1502 = vst.msk [vmem:[%s4280_s3 + $0x68] sm:$0xff] %vm1488_vm0, %v1437_v40  ;;  %v1052_v37 = vadd.f32 %v4521_v24, %v924_v53  ;;  %v1084_v40 = vadd.f32 %v4522_v36, %v956_v25  ;;  %v3585_v43 = vld [vmem:[%s4278_s0 + $0x169] sm:$0xff]  ;;  %v3590_v13 = vld [vmem:[%s4278_s0 + $0x319] sm:$0xff]  ;;  %v810_v31 = vadd.f32 %v3552_v28, %v681_v4  ;;  %v842_v25 = vadd.f32 %v3557_v26, %v713_v48 }
  0xb4   :  { %4523 = vst [vmem:[#allocation34_spill] sm:$0xff] %v3585_v43  ;;  %v1404_v53 = vld [vmem:[%s4279_s2 + $0x160] sm:$0xff]  ;;  %v3611_v11 = vld [vmem:[%s4278_s0 + $0x28a] sm:$0xff]  ;;  %v543_v26 = vadd.f32 %v3568_v55, %v415_v38  ;;  %v575_v28 = vadd.f32 %v3573_v0, %v447_v7 }
  0xb5   :  { %4524 = vst [vmem:[#allocation38_spill] sm:$0xff] %v3590_v13  ;;  %v3606_v24 = vld [vmem:[%s4278_s0 + $0xda] sm:$0xff]  ;;  %v1308_v36 = vmul.f32 %v1199_v45, %v1052_v37  ;;  %v1340_v3 = vmul.f32 %v1199_v45, %v1084_v40  ;;  %v3619_v4 = vld [vmem:[%s4278_s0 + $0x16a] sm:$0xff]  ;;  %v938_v27 = vadd.f32 %v3585_v43, %v810_v31  ;;  %v317_v45 = vadd.f32 %v3384_v57, %v189_v21  ;;  %v1269_v57 = vpop.permute.xlu2 %1268 }
  0xb6   :  { %1534 = vst.msk [vmem:[%s4280_s3 + $0x168] sm:$0xff] %vm1488_vm0, %v1469_v47  ;;  %v285_v47 = vadd.f32 %v3352_v6, %v157_v22  ;;  %v3624_v48 = vld [vmem:[%s4278_s0 + $0x31a] sm:$0xff]  ;;  %v970_v6 = vadd.f32 %v3590_v13, %v842_v25  ;;  %v3640_v37 = vld [vmem:[%s4278_s0 + $0x308] sm:$0xff]  ;;  %v703_v25 = vadd.f32 %v3611_v11, %v575_v28 }
  0xb7   :  { %4525 = vst [vmem:[#allocation39_spill] sm:$0xff] %v3619_v4  ;;  %v3645_v40 = vld [vmem:[%s4278_s0 + $0x159] sm:$0xff]  ;;  %v3650_v38 = vld [vmem:[%s4278_s0 + $0x309] sm:$0xff]  ;;  %v1436_v7 = vadd.f32 %v1372_v58, %v1308_v36  ;;  %v1468_v31 = vadd.f32 %v1404_v53, %v1340_v3  ;;  %v1066_v21 = vadd.f32 %v3619_v4, %v938_v27  ;;  %v446_v13 = vadd.f32 %v317_v45, %v2728_v12 }
  0xb8   :  { %4526 = vst [vmem:[#allocation40_spill] sm:$0xff] %v3624_v48  ;;  %v414_v22 = vadd.f32 %v285_v47, %v4507_v35  ;;  %v671_v35 = vadd.f32 %v3606_v24, %v543_v26  ;;  %v1098_v47 = vadd.f32 %v3624_v48, %v970_v6  ;;  %v3661_v59 = vld [vmem:[%s4278_s0 + $0x15a] sm:$0xff]  ;;  %v3666_v3 = vld [vmem:[%s4278_s0 + $0x30a] sm:$0xff]  ;;  %v832_v26 = vadd.f32 %v703_v25, %v2901_v46 }
  0xb9   :  { %1501 = vst.msk [vmem:[%s4280_s3 + $0x60] sm:$0xff] %vm1488_vm0, %v1436_v7  ;;  %v1386_v12 = vld [vmem:[%s4279_s2 + $0xd0] sm:$0xff]  ;;  %v171_v58 = vadd.f32 %v3645_v40, %v3631_v42  ;;  %v203_v53 = vadd.f32 %v3650_v38, %v3640_v37  ;;  %v1322_v36 = vmul.f32 %v1269_v57, %v1066_v21  ;;  %v574_v6 = vadd.f32 %v446_v13, %v2733_v2  ;;  %v3698_v7 = vld [vmem:[%s4278_s0 + $0x320] sm:$0xff]  ;;  %v3769_v4 = vld [vmem:[%s4278_s0 + $0xf8] sm:$0xff] }
  0xba   :  { %v542_v43 = vadd.f32 %v414_v22, %v4510_v39  ;;  %v1418_v39 = vld [vmem:[%s4279_s2 + $0x1d0] sm:$0xff]  ;;  %v800_v28 = vadd.f32 %v671_v35, %v2896_v8  ;;  %1533 = vst.msk [vmem:[%s4280_s3 + $0x160] sm:$0xff] %vm1488_vm0, %v1468_v31  ;;  %v1354_v27 = vmul.f32 %v1269_v57, %v1098_v47  ;;  %v33_v31 = vld [vmem:[%s4278_s0 + $0xe0] sm:$0xff]  ;;  %v960_v2 = vadd.f32 %v832_v26, %v2911_v54 }
  0xbb   :  { %v3693_v22 = vld [vmem:[%s4278_s0 + $0x170] sm:$0xff]  ;;  %4528 = vst [vmem:[#allocation28_spill] sm:$0xff] %v3698_v7  ;;  %v97_v35 = vld [vmem:[%s4278_s0 + $0xe1] sm:$0xff]  ;;  %v1450_v21 = vadd.f32 %v1386_v12, %v1322_v36  ;;  %v702_v26 = vadd.f32 %v574_v6, %v2770_v32 }
  0xbc   :  { %v670_v45 = vadd.f32 %v542_v43, %v2738_v20  ;;  %4527 = vst [vmem:[#allocation25_spill] sm:$0xff] %v3693_v22  ;;  %v928_v57 = vadd.f32 %v800_v28, %v2906_v49  ;;  %v299_v20 = vadd.f32 %v3661_v59, %v171_v58  ;;  %v331_v43 = vadd.f32 %v3666_v3, %v203_v53  ;;  %v65_v13 = vld [vmem:[%s4278_s0 + $0x290] sm:$0xff]  ;;  %v1219_v28 = vpop.permute.xlu1 %1218  ;;  %v3726_v48 = vld [vmem:[%s4278_s0 + $0x321] sm:$0xff] }
  0xbd   :  { %v129_v25 = vld [vmem:[%s4278_s0 + $0x291] sm:$0xff]  ;;  %v1482_v47 = vadd.f32 %v1418_v39, %v1354_v27  ;;  %v1376_v12 = vld [vmem:[%s4279_s2 + $0x80] sm:$0xff]  ;;  %v1088_v32 = vadd.f32 %v960_v2, %v2989_v63  ;;  %1515 = vst.msk [vmem:[%s4280_s3 + $0xd0] sm:$0xff] %vm1488_vm0, %v1450_v21 }
  0xbe   :  { %v799_v58 = vadd.f32 %v2776_v23, %v670_v45  ;;  %v3721_v53 = vld [vmem:[%s4278_s0 + $0x171] sm:$0xff]  ;;  %v1056_v39 = vadd.f32 %v928_v57, %v2933_v52  ;;  %v428_v23 = vadd.f32 %v3693_v22, %v299_v20  ;;  %v460_v36 = vadd.f32 %v3698_v7, %v331_v43  ;;  %v225_v27 = vld [vmem:[%s4278_s0 + $0xe2] sm:$0xff] }
  0xbf   :  { %v257_v6 = vld [vmem:[%s4278_s0 + $0x292] sm:$0xff]  ;;  %v1408_v45 = vld [vmem:[%s4279_s2 + $0x180] sm:$0xff]  ;;  %v831_v57 = vadd.f32 %v2791_v62, %v702_v26  ;;  %v161_v7 = vadd.f32 %v97_v35, %v33_v31  ;;  %v193_v21 = vadd.f32 %v129_v25, %v65_v13  ;;  %1547 = vst.msk [vmem:[%s4280_s3 + $0x1d0] sm:$0xff] %vm1488_vm0, %v1482_v47  ;;  %v1344_v26 = vmul.f32 %v1219_v28, %v1088_v32  ;;  %v3774_v31 = vld [vmem:[%s4278_s0 + $0x2a8] sm:$0xff] }
  0xc0   :  { %v927_v2 = vadd.f32 %v2796_v56, %v799_v58  ;;  %v3753_v20 = vld [vmem:[%s4278_s0 + $0x172] sm:$0xff]  ;;  %v3758_v43 = vld [vmem:[%s4278_s0 + $0x322] sm:$0xff]  ;;  %v1312_v62 = vmul.f32 %v1219_v28, %v1056_v39  ;;  %v1214_v56 = vpop.permute.xlu0 %1213  ;;  %v556_v58 = vadd.f32 %v3721_v53, %v428_v23  ;;  %v588_v22 = vadd.f32 %v3726_v48, %v460_v36 }
  0xc1   :  { %v959_v13 = vadd.f32 %v2807_v30, %v831_v57  ;;  %v3781_v25 = vld [vmem:[%s4278_s0 + $0x188] sm:$0xff]  ;;  %v3786_v47 = vld [vmem:[%s4278_s0 + $0x338] sm:$0xff]  ;;  %v289_v28 = vadd.f32 %v225_v27, %v161_v7  ;;  %v321_v39 = vadd.f32 %v257_v6, %v193_v21  ;;  %v1472_v23 = vadd.f32 %v1408_v45, %v1344_v26 }
  0xc2   :  { %v1055_v35 = vadd.f32 %v2812_v33, %v927_v2  ;;  %v1440_v32 = vadd.f32 %v1376_v12, %v1312_v62  ;;  %v1375_v30 = vld [vmem:[%s4279_s2 + $0x78] sm:$0xff]  ;;  %v684_v33 = vadd.f32 %v3753_v20, %v556_v58  ;;  %v716_v36 = vadd.f32 %v3758_v43, %v588_v22  ;;  %v3801_v7 = vld [vmem:[%s4278_s0 + $0x2a9] sm:$0xff] }
  0xc3   :  { %v3796_v57 = vld [vmem:[%s4278_s0 + $0xf9] sm:$0xff]  ;;  %v1087_v12 = vadd.f32 %v2839_v19, %v959_v13  ;;  %v3807_v6 = vld [vmem:[%s4278_s0 + $0x189] sm:$0xff]  ;;  %v418_v45 = vadd.f32 %v3769_v4, %v289_v28  ;;  %v450_v2 = vadd.f32 %v3774_v31, %v321_v39  ;;  %v160_v13 = vadd.f32 %v3568_v55, %v3540_v10  ;;  %1537 = vst.msk [vmem:[%s4280_s3 + $0x180] sm:$0xff] %vm1488_vm0, %v1472_v23 }
  0xc4   :  { %v1311_v27 = vmul.f32 %v1214_v56, %v1055_v35  ;;  %v3812_v22 = vld [vmem:[%s4278_s0 + $0x339] sm:$0xff]  ;;  %1505 = vst.msk [vmem:[%s4280_s3 + $0x80] sm:$0xff] %vm1488_vm0, %v1440_v32  ;;  %v813_v21 = vadd.f32 %v3781_v25, %v684_v33  ;;  %v845_v62 = vadd.f32 %v3786_v47, %v716_v36  ;;  %v3833_v58 = vld [vmem:[%s4278_s0 + $0x2aa] sm:$0xff]  ;;  %v192_v35 = vadd.f32 %v3573_v0, %v3545_v18  ;;  %v1284_v36 = vpop.permute.xlu2 %1283 }
  0xc5   :  { %4529 = vst [vmem:[#allocation32_spill] sm:$0xff] %v3812_v22  ;;  %v1407_v19 = vld [vmem:[%s4279_s2 + $0x178] sm:$0xff]  ;;  %v1343_v28 = vmul.f32 %v1214_v56, %v1087_v12  ;;  %v3846_v32 = vld [vmem:[%s4278_s0 + $0x18a] sm:$0xff]  ;;  %v546_v10 = vadd.f32 %v3796_v57, %v418_v45  ;;  %v578_v18 = vadd.f32 %v3801_v7, %v450_v2  ;;  %v288_v56 = vadd.f32 %v3606_v24, %v160_v13 }
  0xc6   :  { %v3828_v26 = vld [vmem:[%s4278_s0 + $0xfa] sm:$0xff]  ;;  %v1439_v39 = vadd.f32 %v1375_v30, %v1311_v27  ;;  %4530 = vst [vmem:[#allocation35_spill] sm:$0xff] %v3846_v32  ;;  %v941_v55 = vadd.f32 %v3807_v6, %v813_v21  ;;  %v973_v0 = vadd.f32 %v3812_v22, %v845_v62  ;;  %v320_v23 = vadd.f32 %v3611_v11, %v192_v35  ;;  %v1389_v21 = vld [vmem:[%s4279_s2 + $0xe8] sm:$0xff] }
  0xc7   :  { %v3851_v33 = vld [vmem:[%s4278_s0 + $0x33a] sm:$0xff]  ;;  %v1471_v30 = vadd.f32 %v1407_v19, %v1343_v28  ;;  %v674_v12 = vadd.f32 %v3828_v26, %v546_v10  ;;  %v706_v27 = vadd.f32 %v3833_v58, %v578_v18  ;;  %v164_v45 = vadd.f32 %v3012_v14, %v2994_v29  ;;  %v1421_v62 = vld [vmem:[%s4279_s2 + $0x1e8] sm:$0xff]  ;;  %v1234_v10 = vpop.permute.xlu1 %1233 }
  0xc8   :  { %4531 = vst [vmem:[#allocation36_spill] sm:$0xff] %v3851_v33  ;;  %v1069_v2 = vadd.f32 %v3846_v32, %v941_v55  ;;  %v1101_v24 = vadd.f32 %v3851_v33, %v973_v0  ;;  %v417_v11 = vadd.f32 %v288_v56, %v2896_v8  ;;  %v449_v19 = vadd.f32 %v320_v23, %v2901_v46  ;;  %v4532_v23 = vld [vmem:[#allocation8_spill] sm:$0xff] }
  0xc9   :  { %1504 = vst.msk [vmem:[%s4280_s3 + $0x78] sm:$0xff] %vm1488_vm0, %v1439_v39  ;;  %v803_v13 = vadd.f32 %v674_v12, %v3161_v9  ;;  %v835_v35 = vadd.f32 %v706_v27, %v3172_v44  ;;  %v196_v8 = vadd.f32 %v3035_v1, %v3007_v17  ;;  %v292_v46 = vadd.f32 %v3040_v5, %v164_v45  ;;  %v4533_v12 = vld [vmem:[#allocation9_spill] sm:$0xff] }
  0xca   :  { %1536 = vst.msk [vmem:[%s4280_s3 + $0x178] sm:$0xff] %vm1488_vm0, %v1471_v30  ;;  %v1325_v28 = vmul.f32 %v1284_v36, %v1069_v2  ;;  %v1357_v39 = vmul.f32 %v1284_v36, %v1101_v24  ;;  %v545_v18 = vadd.f32 %v417_v11, %v2906_v49  ;;  %v577_v55 = vadd.f32 %v449_v19, %v2911_v54  ;;  %v4534_v36 = vld [vmem:[#allocation3_spill] sm:$0xff]  ;;  %v4535_v24 = vld [vmem:[#allocation17_spill] sm:$0xff]  ;;  %v4536_v11 = vld [vmem:[#allocation12_spill] sm:$0xff] }
  0xcb   :  { %v931_v0 = vadd.f32 %v803_v13, %v3177_v60  ;;  %v963_v56 = vadd.f32 %v835_v35, %v3182_v16  ;;  %v324_v30 = vadd.f32 %v4532_v23, %v196_v8  ;;  %v421_v27 = vadd.f32 %v4533_v12, %v292_v46  ;;  %v4537_v19 = vld [vmem:[#allocation23_spill] sm:$0xff] }
  0xcc   :  { %v1453_v33 = vadd.f32 %v1389_v21, %v1325_v28  ;;  %v1485_v32 = vadd.f32 %v1421_v62, %v1357_v39  ;;  %v673_v22 = vadd.f32 %v545_v18, %v2933_v52  ;;  %v705_v45 = vadd.f32 %v577_v55, %v2989_v63  ;;  %v1379_v21 = vld [vmem:[%s4279_s2 + $0x98] sm:$0xff]  ;;  %v4538_v28 = vld [vmem:[#allocation24_spill] sm:$0xff] }
  0xcd   :  { %v1059_v2 = vadd.f32 %v931_v0, %v4534_v36  ;;  %v1091_v49 = vadd.f32 %v963_v56, %v4535_v24  ;;  %v453_v54 = vadd.f32 %v4536_v11, %v324_v30  ;;  %v549_v13 = vadd.f32 %v4537_v19, %v421_v27  ;;  %v1411_v52 = vld [vmem:[%s4279_s2 + $0x198] sm:$0xff]  ;;  %v4540_v0 = vld [vmem:[#allocation2_spill] sm:$0xff]  ;;  %v4543_v27 = vld [vmem:[#allocation19_spill] sm:$0xff] }
  0xce   :  { %1518 = vst.msk [vmem:[%s4280_s3 + $0xe8] sm:$0xff] %vm1488_vm0, %v1453_v33  ;;  %v802_v63 = vadd.f32 %v2994_v29, %v673_v22  ;;  %v834_v62 = vadd.f32 %v3007_v17, %v705_v45  ;;  %v163_v35 = vadd.f32 %v3796_v57, %v3769_v4  ;;  %v195_v8 = vadd.f32 %v3801_v7, %v3774_v31  ;;  %v4539_v18 = vld [vmem:[#allocation29_spill] sm:$0xff]  ;;  %v1229_v22 = vpop.permute.xlu0 %1228  ;;  %v4544_v45 = vld [vmem:[#allocation4_spill] sm:$0xff] }
  0xcf   :  { %1550 = vst.msk [vmem:[%s4280_s3 + $0x1e8] sm:$0xff] %vm1488_vm0, %v1485_v32  ;;  %v1315_v33 = vmul.f32 %v1234_v10, %v1059_v2  ;;  %v1347_v46 = vmul.f32 %v1234_v10, %v1091_v49  ;;  %v581_v39 = vadd.f32 %v4538_v28, %v453_v54  ;;  %v677_v55 = vadd.f32 %v4539_v18, %v549_v13  ;;  %v1249_v54 = vpop.permute.xlu1 %1248  ;;  %v70_v28 = vld [vmem:[%s4278_s0 + $0x2d0] sm:$0xff] }
  0xd0   :  { %v930_v29 = vadd.f32 %v3012_v14, %v802_v63  ;;  %v962_v17 = vadd.f32 %v3035_v1, %v834_v62  ;;  %v291_v4 = vadd.f32 %v3828_v26, %v163_v35  ;;  %v323_v57 = vadd.f32 %v3833_v58, %v195_v8  ;;  %v1378_v1 = vld [vmem:[%s4279_s2 + $0x90] sm:$0xff]  ;;  %v4545_v63 = vld [vmem:[#allocation7_spill] sm:$0xff]  ;;  %v4546_v35 = vld [vmem:[#allocation5_spill] sm:$0xff] }
  0xd1   :  { %v1443_v31 = vadd.f32 %v1379_v21, %v1315_v33  ;;  %v1475_v7 = vadd.f32 %v1411_v52, %v1347_v46  ;;  %v709_v56 = vadd.f32 %v4540_v0, %v581_v39  ;;  %v806_v32 = vadd.f32 %v677_v55, %v3405_v41  ;;  %v1410_v26 = vld [vmem:[%s4279_s2 + $0x190] sm:$0xff]  ;;  %v38_v21 = vld [vmem:[%s4278_s0 + $0x120] sm:$0xff]  ;;  %v4550_v0 = vld [vmem:[#allocation11_spill] sm:$0xff] }
  0xd2   :  { %v1058_v10 = vadd.f32 %v3040_v5, %v930_v29  ;;  %v1090_v30 = vadd.f32 %v4532_v23, %v962_v17  ;;  %v420_v12 = vadd.f32 %v291_v4, %v3161_v9  ;;  %v452_v14 = vadd.f32 %v323_v57, %v3172_v44  ;;  %v4541_v9 = vld [vmem:[#allocation18_spill] sm:$0xff]  ;;  %v4542_v23 = vld [vmem:[#allocation20_spill] sm:$0xff]  ;;  %v4548_v4 = vld [vmem:[#allocation15_spill] sm:$0xff] }
  0xd3   :  { %1508 = vst.msk [vmem:[%s4280_s3 + $0x98] sm:$0xff] %vm1488_vm0, %v1443_v31  ;;  %v838_v5 = vadd.f32 %v709_v56, %v3412_v61  ;;  %v934_v58 = vadd.f32 %v806_v32, %v3417_v34  ;;  %v167_v44 = vadd.f32 %v4542_v23, %v4541_v9  ;;  %v199_v2 = vadd.f32 %v4544_v45, %v4543_v27  ;;  %v4547_v33 = vld [vmem:[#allocation10_spill] sm:$0xff]  ;;  %v1382_v55 = vld [vmem:[%s4279_s2 + $0xb0] sm:$0xff] }
  0xd4   :  { %1540 = vst.msk [vmem:[%s4280_s3 + $0x198] sm:$0xff] %vm1488_vm0, %v1475_v7  ;;  %v1314_v49 = vmul.f32 %v1229_v22, %v1058_v10  ;;  %v1346_v11 = vmul.f32 %v1229_v22, %v1090_v30  ;;  %v548_v19 = vadd.f32 %v420_v12, %v3177_v60  ;;  %v580_v13 = vadd.f32 %v452_v14, %v3182_v16  ;;  %v102_v60 = vld [vmem:[%s4278_s0 + $0x121] sm:$0xff]  ;;  %v134_v16 = vld [vmem:[%s4278_s0 + $0x2d1] sm:$0xff] }
  0xd5   :  { %v966_v52 = vadd.f32 %v838_v5, %v3422_v15  ;;  %v1062_v62 = vadd.f32 %v934_v58, %v4545_v63  ;;  %v295_v8 = vadd.f32 %v4546_v35, %v167_v44  ;;  %v327_v46 = vadd.f32 %v4547_v33, %v199_v2  ;;  %v4549_v7 = vld [vmem:[#allocation13_spill] sm:$0xff]  ;;  %v230_v32 = vld [vmem:[%s4278_s0 + $0x122] sm:$0xff] }
  0xd6   :  { %v1442_v39 = vadd.f32 %v1378_v1, %v1314_v49  ;;  %v1474_v18 = vadd.f32 %v1410_v26, %v1346_v11  ;;  %v676_v29 = vadd.f32 %v548_v19, %v4534_v36  ;;  %v708_v17 = vadd.f32 %v580_v13, %v4535_v24  ;;  %v262_v10 = vld [vmem:[%s4278_s0 + $0x2d2] sm:$0xff]  ;;  %v4551_v5 = vld [vmem:[#allocation14_spill] sm:$0xff]  ;;  %v1244_v13 = vpop.permute.xlu0 %1243 }
  0xd7   :  { %v1094_v57 = vadd.f32 %v966_v52, %v4548_v4  ;;  %v1318_v31 = vmul.f32 %v1249_v54, %v1062_v62  ;;  %v424_v22 = vadd.f32 %v4549_v7, %v295_v8  ;;  %v456_v56 = vadd.f32 %v4550_v0, %v327_v46  ;;  %v1414_v36 = vld [vmem:[%s4279_s2 + $0x1b0] sm:$0xff]  ;;  %v4552_v44 = vld [vmem:[#allocation21_spill] sm:$0xff]  ;;  %v4554_v52 = vld [vmem:[#allocation6_spill] sm:$0xff] }
  0xd8   :  { %1507 = vst.msk [vmem:[%s4280_s3 + $0x90] sm:$0xff] %vm1488_vm0, %v1442_v39  ;;  %v805_v24 = vadd.f32 %v4541_v9, %v676_v29  ;;  %v837_v30 = vadd.f32 %v4543_v27, %v708_v17  ;;  %v166_v12 = vadd.f32 %v102_v60, %v38_v21  ;;  %v198_v14 = vadd.f32 %v134_v16, %v70_v28  ;;  %v4553_v21 = vld [vmem:[#allocation22_spill] sm:$0xff]  ;;  %v4555_v8 = vld [vmem:[#allocation16_spill] sm:$0xff]  ;;  %v1381_v16 = vld [vmem:[%s4279_s2 + $0xa8] sm:$0xff] }
  0xd9   :  { %1539 = vst.msk [vmem:[%s4280_s3 + $0x190] sm:$0xff] %vm1488_vm0, %v1474_v18  ;;  %v1350_v1 = vmul.f32 %v1249_v54, %v1094_v57  ;;  %v1446_v26 = vadd.f32 %v1382_v55, %v1318_v31  ;;  %v552_v58 = vadd.f32 %v4551_v5, %v424_v22  ;;  %v584_v2 = vadd.f32 %v4552_v44, %v456_v56  ;;  %v1413_v39 = vld [vmem:[%s4279_s2 + $0x1a8] sm:$0xff]  ;;  %v1264_v57 = vpop.permute.xlu1 %1263  ;;  %v41_v22 = vld [vmem:[%s4278_s0 + $0x140] sm:$0xff]  ;;  %v4560_v44 = vld [vmem:[#allocation33_spill] sm:$0xff] }
  0xda   :  { %v933_v49 = vadd.f32 %v4542_v23, %v805_v24  ;;  %v965_v11 = vadd.f32 %v4544_v45, %v837_v30  ;;  %v294_v9 = vadd.f32 %v230_v32, %v166_v12  ;;  %v326_v19 = vadd.f32 %v262_v10, %v198_v14  ;;  %v4557_v18 = vld [vmem:[#allocation27_spill] sm:$0xff]  ;;  %v4558_v32 = vld [vmem:[#allocation30_spill] sm:$0xff]  ;;  %v73_v30 = vld [vmem:[%s4278_s0 + $0x2f0] sm:$0xff] }
  0xdb   :  { %v1478_v27 = vadd.f32 %v1414_v36, %v1350_v1  ;;  %1511 = vst.msk [vmem:[%s4280_s3 + $0xb0] sm:$0xff] %vm1488_vm0, %v1446_v26  ;;  %v680_v54 = vadd.f32 %v4553_v21, %v552_v58  ;;  %v712_v62 = vadd.f32 %v4554_v52, %v584_v2  ;;  %v170_v46 = vadd.f32 %v3496_v51, %v4555_v8  ;;  %v4559_v36 = vld [vmem:[#allocation31_spill] sm:$0xff]  ;;  %v4071_v21 = vld [vmem:[%s4278_s0 + $0x180] sm:$0xff] }
  0xdc   :  { %v1061_v23 = vadd.f32 %v4546_v35, %v933_v49  ;;  %v1093_v45 = vadd.f32 %v4547_v33, %v965_v11  ;;  %v423_v28 = vadd.f32 %v294_v9, %v3405_v41  ;;  %v455_v60 = vadd.f32 %v326_v19, %v3412_v61  ;;  %v4556_v41 = vld [vmem:[#allocation26_spill] sm:$0xff]  ;;  %v265_v19 = vld [vmem:[%s4278_s0 + $0x2f2] sm:$0xff] }
  0xdd   :  { %1543 = vst.msk [vmem:[%s4280_s3 + $0x1b0] sm:$0xff] %vm1488_vm0, %v1478_v27  ;;  %v809_v35 = vadd.f32 %v680_v54, %v3631_v42  ;;  %v841_v33 = vadd.f32 %v712_v62, %v3640_v37  ;;  %v202_v61 = vadd.f32 %v3501_v50, %v4556_v41  ;;  %v298_v55 = vadd.f32 %v4557_v18, %v170_v46  ;;  %v4561_v49 = vld [vmem:[#allocation34_spill] sm:$0xff] }
  0xde   :  { %v1317_v29 = vmul.f32 %v1244_v13, %v1061_v23  ;;  %v1349_v17 = vmul.f32 %v1244_v13, %v1093_v45  ;;  %v551_v31 = vadd.f32 %v423_v28, %v3417_v34  ;;  %v583_v7 = vadd.f32 %v455_v60, %v3422_v15  ;;  %v105_v34 = vld [vmem:[%s4278_s0 + $0x141] sm:$0xff]  ;;  %v137_v15 = vld [vmem:[%s4278_s0 + $0x2f1] sm:$0xff] }
  0xdf   :  { %v937_v0 = vadd.f32 %v809_v35, %v3645_v40  ;;  %v969_v56 = vadd.f32 %v841_v33, %v3650_v38  ;;  %v330_v10 = vadd.f32 %v4558_v32, %v202_v61  ;;  %v427_v24 = vadd.f32 %v4559_v36, %v298_v55  ;;  %v233_v9 = vld [vmem:[%s4278_s0 + $0x142] sm:$0xff] }
  0xe0   :  { %v1445_v12 = vadd.f32 %v1381_v16, %v1317_v29  ;;  %v1477_v14 = vadd.f32 %v1413_v39, %v1349_v17  ;;  %v679_v1 = vadd.f32 %v551_v31, %v4545_v63  ;;  %v711_v26 = vadd.f32 %v583_v7, %v4548_v4  ;;  %v1385_v63 = vld [vmem:[%s4279_s2 + $0xc8] sm:$0xff]  ;;  %v4562_v23 = vld [vmem:[#allocation38_spill] sm:$0xff]  ;;  %v4084_v39 = vld [vmem:[%s4278_s0 + $0x330] sm:$0xff]  ;;  %v1259_v29 = vpop.permute.xlu0 %1258 }
  0xe1   :  { %v1065_v5 = vadd.f32 %v937_v0, %v3661_v59  ;;  %v1097_v58 = vadd.f32 %v969_v56, %v3666_v3  ;;  %v459_v2 = vadd.f32 %v4560_v44, %v330_v10  ;;  %v555_v11 = vadd.f32 %v4561_v49, %v427_v24  ;;  %v1417_v4 = vld [vmem:[%s4279_s2 + $0x1c8] sm:$0xff]  ;;  %v4564_v17 = vld [vmem:[#allocation40_spill] sm:$0xff] }
  0xe2   :  { %1510 = vst.msk [vmem:[%s4280_s3 + $0xa8] sm:$0xff] %vm1488_vm0, %v1445_v12  ;;  %v808_v27 = vadd.f32 %v4555_v8, %v679_v1  ;;  %v840_v13 = vadd.f32 %v4556_v41, %v711_v26  ;;  %v169_v54 = vadd.f32 %v105_v34, %v41_v22  ;;  %v201_v52 = vadd.f32 %v137_v15, %v73_v30  ;;  %v4563_v28 = vld [vmem:[#allocation39_spill] sm:$0xff]  ;;  %v4098_v7 = vld [vmem:[%s4278_s0 + $0x331] sm:$0xff]  ;;  %v1279_v12 = vpop.permute.xlu1 %1278 }
  0xe3   :  { %1542 = vst.msk [vmem:[%s4280_s3 + $0x1a8] sm:$0xff] %vm1488_vm0, %v1477_v14  ;;  %v1321_v62 = vmul.f32 %v1264_v57, %v1065_v5  ;;  %v1353_v46 = vmul.f32 %v1264_v57, %v1097_v58  ;;  %v587_v45 = vadd.f32 %v4562_v23, %v459_v2  ;;  %v683_v8 = vadd.f32 %v4563_v28, %v555_v11  ;;  %v4089_v35 = vld [vmem:[%s4278_s0 + $0x181] sm:$0xff]  ;;  %v4566_v24 = vld [vmem:[#allocation28_spill] sm:$0xff]  ;;  %v76_v11 = vld [vmem:[%s4278_s0 + $0x318] sm:$0xff] }
  0xe4   :  { %v936_v60 = vadd.f32 %v3496_v51, %v808_v27  ;;  %v968_v16 = vadd.f32 %v3501_v50, %v840_v13  ;;  %v297_v33 = vadd.f32 %v233_v9, %v169_v54  ;;  %v329_v41 = vadd.f32 %v265_v19, %v201_v52  ;;  %v4103_v22 = vld [vmem:[%s4278_s0 + $0x182] sm:$0xff]  ;;  %v4130_v14 = vld [vmem:[%s4278_s0 + $0x332] sm:$0xff]  ;;  %v268_v23 = vld [vmem:[%s4278_s0 + $0x31a] sm:$0xff] }
  0xe5   :  { %v1449_v61 = vadd.f32 %v1385_v63, %v1321_v62  ;;  %v1481_v55 = vadd.f32 %v1417_v4, %v1353_v46  ;;  %v715_v57 = vadd.f32 %v4564_v17, %v587_v45  ;;  %v812_v51 = vadd.f32 %v4071_v21, %v683_v8  ;;  %v44_v5 = vld [vmem:[%s4278_s0 + $0x168] sm:$0xff]  ;;  %v1388_v63 = vld [vmem:[%s4279_s2 + $0xe0] sm:$0xff] }
  0xe6   :  { %v1064_v50 = vadd.f32 %v4557_v18, %v936_v60  ;;  %v1096_v31 = vadd.f32 %v4558_v32, %v968_v16  ;;  %v426_v0 = vadd.f32 %v297_v33, %v3631_v42  ;;  %v458_v56 = vadd.f32 %v329_v41, %v3640_v37  ;;  %v1384_v18 = vld [vmem:[%s4279_s2 + $0xc0] sm:$0xff]  ;;  %v4565_v42 = vld [vmem:[#allocation25_spill] sm:$0xff]  ;;  %v236_v46 = vld [vmem:[%s4278_s0 + $0x16a] sm:$0xff] }
  0xe7   :  { %1514 = vst.msk [vmem:[%s4280_s3 + $0xc8] sm:$0xff] %vm1488_vm0, %v1449_v61  ;;  %v1416_v32 = vld [vmem:[%s4279_s2 + $0x1c0] sm:$0xff]  ;;  %v844_v10 = vadd.f32 %v4084_v39, %v715_v57  ;;  %v940_v36 = vadd.f32 %v4089_v35, %v812_v51  ;;  %v173_v37 = vadd.f32 %v3721_v53, %v4565_v42  ;;  %v205_v30 = vadd.f32 %v3726_v48, %v4566_v24  ;;  %v4567_v16 = vld [vmem:[#allocation32_spill] sm:$0xff] }
  0xe8   :  { %1546 = vst.msk [vmem:[%s4280_s3 + $0x1c8] sm:$0xff] %vm1488_vm0, %v1481_v55  ;;  %v1320_v34 = vmul.f32 %v1259_v29, %v1064_v50  ;;  %v1352_v15 = vmul.f32 %v1259_v29, %v1096_v31  ;;  %v554_v1 = vadd.f32 %v426_v0, %v3645_v40  ;;  %v586_v26 = vadd.f32 %v458_v56, %v3650_v38  ;;  %v108_v40 = vld [vmem:[%s4278_s0 + $0x169] sm:$0xff]  ;;  %v140_v38 = vld [vmem:[%s4278_s0 + $0x319] sm:$0xff] }
  0xe9   :  { %v972_v58 = vadd.f32 %v4098_v7, %v844_v10  ;;  %v1068_v44 = vadd.f32 %v4103_v22, %v940_v36  ;;  %v301_v2 = vadd.f32 %v3753_v20, %v173_v37  ;;  %v333_v49 = vadd.f32 %v3758_v43, %v205_v30  ;;  %v1780_v55 = vld [vmem:[%s4278_s0 + $0x1a0] sm:$0xff]  ;;  %v1812_v29 = vld [vmem:[%s4278_s0 + $0x350] sm:$0xff] }
  0xea   :  { %v1448_v9 = vadd.f32 %v1384_v18, %v1320_v34  ;;  %v1480_v19 = vadd.f32 %v1416_v32, %v1352_v15  ;;  %v682_v4 = vadd.f32 %v554_v1, %v3661_v59  ;;  %v714_v27 = vadd.f32 %v586_v26, %v3666_v3  ;;  %v1420_v59 = vld [vmem:[%s4279_s2 + $0x1e0] sm:$0xff]  ;;  %v1876_v32 = vld [vmem:[%s4278_s0 + $0x351] sm:$0xff] }
  0xeb   :  { %v1100_v13 = vadd.f32 %v4130_v14, %v972_v58  ;;  %v1324_v54 = vmul.f32 %v1279_v12, %v1068_v44  ;;  %v430_v52 = vadd.f32 %v3781_v25, %v301_v2  ;;  %v462_v62 = vadd.f32 %v3786_v47, %v333_v49  ;;  %v1844_v18 = vld [vmem:[%s4278_s0 + $0x1a1] sm:$0xff]  ;;  %v1779_v26 = vld [vmem:[%s4278_s0 + $0x198] sm:$0xff]  ;;  %v1294_v2 = vpop.permute.xlu1 %1293 }
  0xec   :  { %1513 = vst.msk [vmem:[%s4280_s3 + $0xc0] sm:$0xff] %vm1488_vm0, %v1448_v9  ;;  %v811_v3 = vadd.f32 %v4565_v42, %v682_v4  ;;  %v843_v25 = vadd.f32 %v4566_v24, %v714_v27  ;;  %v172_v47 = vadd.f32 %v108_v40, %v44_v5  ;;  %v204_v45 = vadd.f32 %v140_v38, %v76_v11  ;;  %v1811_v5 = vld [vmem:[%s4278_s0 + $0x348] sm:$0xff]  ;;  %v1907_v27 = vld [vmem:[%s4278_s0 + $0x19a] sm:$0xff] }
  0xed   :  { %1545 = vst.msk [vmem:[%s4280_s3 + $0x1c0] sm:$0xff] %vm1488_vm0, %v1480_v19  ;;  %v1356_v28 = vmul.f32 %v1279_v12, %v1100_v13  ;;  %v1452_v8 = vadd.f32 %v1388_v63, %v1324_v54  ;;  %v558_v60 = vadd.f32 %v3807_v6, %v430_v52  ;;  %v590_v33 = vadd.f32 %v4567_v16, %v462_v62  ;;  %v1274_v6 = vpop.permute.xlu0 %1273  ;;  %v1875_v38 = vld [vmem:[%s4278_s0 + $0x349] sm:$0xff] }
  0xee   :  { %v939_v41 = vadd.f32 %v3721_v53, %v811_v3  ;;  %v971_v61 = vadd.f32 %v3726_v48, %v843_v25  ;;  %v300_v17 = vadd.f32 %v236_v46, %v172_v47  ;;  %v332_v57 = vadd.f32 %v268_v23, %v204_v45  ;;  %v4568_v53 = vld [vmem:[#allocation35_spill] sm:$0xff]  ;;  %v4569_v48 = vld [vmem:[#allocation36_spill] sm:$0xff] }
  0xef   :  { %v1484_v51 = vadd.f32 %v1420_v59, %v1356_v28  ;;  %1517 = vst.msk [vmem:[%s4280_s3 + $0xe0] sm:$0xff] %vm1488_vm0, %v1452_v8  ;;  %v686_v50 = vadd.f32 %v4568_v53, %v558_v60  ;;  %v718_v31 = vadd.f32 %v4569_v48, %v590_v33  ;;  %v1939_v13 = vld [vmem:[%s4278_s0 + $0x34a] sm:$0xff] }
  0xf0   :  { %v1067_v0 = vadd.f32 %v3753_v20, %v939_v41  ;;  %v1099_v56 = vadd.f32 %v3758_v43, %v971_v61  ;;  %v429_v10 = vadd.f32 %v4071_v21, %v300_v17  ;;  %v461_v36 = vadd.f32 %v4084_v39, %v332_v57  ;;  %v1387_v20 = vld [vmem:[%s4279_s2 + $0xd8] sm:$0xff]  ;;  %v1908_v21 = vld [vmem:[%s4278_s0 + $0x1a2] sm:$0xff]  ;;  %v1390_v25 = vld [vmem:[%s4279_s2 + $0xf0] sm:$0xff] }
  0xf1   :  { %1549 = vst.msk [vmem:[%s4280_s3 + $0x1e0] sm:$0xff] %vm1488_vm0, %v1484_v51  ;;  %v1419_v43 = vld [vmem:[%s4279_s2 + $0x1d8] sm:$0xff]  ;;  %v815_v42 = vadd.f32 %v1780_v55, %v686_v50  ;;  %v847_v37 = vadd.f32 %v1812_v29, %v718_v31  ;;  %v1422_v47 = vld [vmem:[%s4279_s2 + $0x1f0] sm:$0xff] }
  0xf2   :  { %v1323_v24 = vmul.f32 %v1274_v6, %v1067_v0  ;;  %v1355_v30 = vmul.f32 %v1274_v6, %v1099_v56  ;;  %v1940_v39 = vld [vmem:[%s4278_s0 + $0x352] sm:$0xff]  ;;  %v557_v34 = vadd.f32 %v4089_v35, %v429_v10  ;;  %v589_v15 = vadd.f32 %v4098_v7, %v461_v36 }
  0xf3   :  { %v943_v12 = vadd.f32 %v1844_v18, %v815_v42  ;;  %v975_v1 = vadd.f32 %v1876_v32, %v847_v37  ;;  %v1843_v7 = vld [vmem:[%s4278_s0 + $0x199] sm:$0xff] }
  0xf4   :  { %v1451_v58 = vadd.f32 %v1387_v20, %v1323_v24  ;;  %v1483_v44 = vadd.f32 %v1419_v43, %v1355_v30  ;;  %v685_v49 = vadd.f32 %v4103_v22, %v557_v34  ;;  %v717_v11 = vadd.f32 %v4130_v14, %v589_v15  ;;  %v1391_v22 = vld [vmem:[%s4279_s2 + $0xf8] sm:$0xff] }
  0xf5   :  { %v1071_v35 = vadd.f32 %v1908_v21, %v943_v12  ;;  %v1103_v40 = vadd.f32 %v1940_v39, %v975_v1  ;;  %v1423_v14 = vld [vmem:[%s4279_s2 + $0x1f8] sm:$0xff]  ;;  %v1289_v23 = vpop.permute.xlu0 %1288 }
  0xf6   :  { %1516 = vst.msk [vmem:[%s4280_s3 + $0xd8] sm:$0xff] %vm1488_vm0, %v1451_v58  ;;  %v814_v9 = vadd.f32 %v1779_v26, %v685_v49  ;;  %v846_v19 = vadd.f32 %v1811_v5, %v717_v11 }
  0xf7   :  { %1548 = vst.msk [vmem:[%s4280_s3 + $0x1d8] sm:$0xff] %vm1488_vm0, %v1483_v44  ;;  %v1327_v63 = vmul.f32 %v1294_v2, %v1071_v35  ;;  %v1359_v4 = vmul.f32 %v1294_v2, %v1103_v40 }
  0xf8   :  { %v942_v54 = vadd.f32 %v1843_v7, %v814_v9  ;;  %v974_v52 = vadd.f32 %v1875_v38, %v846_v19 }
  0xf9   :  { %v1455_v62 = vadd.f32 %v1391_v22, %v1327_v63  ;;  %v1487_v46 = vadd.f32 %v1423_v14, %v1359_v4 }
  0xfa   :  { %v1070_v59 = vadd.f32 %v1907_v27, %v942_v54  ;;  %v1102_v3 = vadd.f32 %v1939_v13, %v974_v52 }
  0xfb   :  { %1520 = vst.msk [vmem:[%s4280_s3 + $0xf8] sm:$0xff] %vm1488_vm0, %v1455_v62 }
  0xfc   :  { %1552 = vst.msk [vmem:[%s4280_s3 + $0x1f8] sm:$0xff] %vm1488_vm0, %v1487_v46  ;;  %v1326_v45 = vmul.f32 %v1289_v23, %v1070_v59  ;;  %v1358_v28 = vmul.f32 %v1289_v23, %v1102_v3 }
  0xfe   :  { %v1454_v8 = vadd.f32 %v1390_v25, %v1326_v45  ;;  %v1486_v60 = vadd.f32 %v1422_v47, %v1358_v28 }
 0x100   :  { %1519 = vst.msk [vmem:[%s4280_s3 + $0xf0] sm:$0xff] %vm1488_vm0, %v1454_v8 }
 0x101   :  { %1551 = vst.msk [vmem:[%s4280_s3 + $0x1f0] sm:$0xff] %vm1488_vm0, %v1486_v60 }

// kernel: backbone_nb201_forward.33
= control target key start
LH: loop header
LB: loop body
LE: loop exit
PB: predicated region body
PF: predicated region fallthrough
CT: control target
= control target key end

     0   :  { %v96_v1 = vmov 0   ;;  %vm23_vm0 = vcmask 261120   ;;  %s158_s0 = inlined_call_operand.vmem [shape: f32[32,128], index: 0, kind: input, shape index: {}]   ;;  %s159_s2 = inlined_call_operand.vmem [shape: f32[16,1], index: 2, kind: input, shape index: {}]   ;;  %s160_s3 = inlined_call_operand.vmem [shape: f32[16,1], index: 3, kind: input, shape index: {}]   ;;  %s161_s1 = inlined_call_operand.vmem [shape: f32[16,32], index: 1, kind: input, shape index: {}]   ;;  %s162_s4 = inlined_call_operand.vmem [shape: f32[16,128], index: 4, kind: output, shape index: {}]  }
   0x1   :  { %v20_v0 = vld [vmem:[%s158_s0 + $0x18] sm:$0xff]  ;;  %94 = vset.pattern.permute.xlu0 %v96_v1  ;;  %v53_v2 = vld [vmem:[%s159_s2] sm:$0xff]  ;;  %v19_v3 = vld [vmem:[%s158_s0 + $0x10] sm:$0xff]  ;;  %95 = vset.pattern.permute.xlu1 %v96_v1 }
   0x2   :  { %42 = vmatpush.msra.mxu0 %v20_v0  ;;  %89 = vmatpush.msra.mxu1 %v20_v0  ;;  %v67_v4 = vld [vmem:[%s160_s3] sm:$0xff]  ;;  %v18_v5 = vld [vmem:[%s158_s0 + $0x8] sm:$0xff] }
   0x3   :  { %57 = vperm.xlu0 %94, %v53_v2   ;;  %71 = vperm.xlu1 %95, %v67_v4   ;;  %v17_v6 = vld [vmem:[%s158_s0] sm:$0xff]  ;;  %v22_v8 = vld [vmem:[%s161_s1 + $0x8] sm:$0xff] }
   0x4   :  { %43 = vmatpush.msra.mxu0 %v19_v3  ;;  %90 = vmatpush.msra.mxu1 %v19_v3  ;;  %v21_v7 = vld [vmem:[%s161_s1] sm:$0xff]  ;;  %v54_v9 = vld [vmem:[%s159_s2 + $0x8] sm:$0xff] }
   0x5   :  { %v68_v10 = vld [vmem:[%s160_s3 + $0x8] sm:$0xff] }
   0x6   :  { %44 = vmatpush.msra.mxu0 %v18_v5  ;;  %91 = vmatpush.msra.mxu1 %v18_v5 }
   0x8   :  { %45 = vmatpush.msra.mxu0 %v17_v6  ;;  %92 = vmatpush.msra.mxu1 %v17_v6 }
   0x9   :  { %87 = vmatmul.msk.f32.vlgmr.msra.gmra.mxu0 %vm23_vm0, %v21_v7  ;;  %88 = vmatmul.msk.f32.vlgmr.msra.gmra.mxu1 %vm23_vm0, %v22_v8 }
   0xb   :  { %62 = vperm.xlu0 %94, %v54_v9   ;;  %76 = vperm.xlu1 %95, %v68_v10  }
  0x75   :  { %v58_v11 = vpop.permute.xlu0 %57  ;;  %v72_v12 = vpop.permute.xlu1 %71 }
  0x7d   :  { %v63_v13 = vpop.permute.xlu0 %62  ;;  %v77_v18 = vpop.permute.xlu1 %76 }
  0x86   :  { %v47_v14 = vpop.f32.mrf.mxu0  ;;  %v50_v15 = vpop.f32.mrf.mxu1 }
  0x87   :  { %v65_v16 = vmul.f32 %v58_v11, %v47_v14  ;;  %v66_v17 = vmul.f32 %v63_v13, %v50_v15 }
  0x89   :  { %v79_v19 = vadd.f32 %v72_v12, %v65_v16  ;;  %v80_v20 = vadd.f32 %v77_v18, %v66_v17 }
  0x8b   :  { %81 = vst [vmem:[%s162_s4] sm:$0xff] %v79_v19 }
  0x8c   :  { %82 = vst [vmem:[%s162_s4 + $0x8] sm:$0xff] %v80_v20 }

// kernel: backbone_nb201_forward.32
= control target key start
LH: loop header
LB: loop body
LE: loop exit
PB: predicated region body
PF: predicated region fallthrough
CT: control target
= control target key end

     0   :  { %v115_v3 = vmov 0   ;;  %vm37_vm0 = vcmask 588800   ;;  %s192_s0 = inlined_call_operand.vmem [shape: f32[72,128], index: 0, kind: input, shape index: {}]   ;;  %s193_s2 = inlined_call_operand.vmem [shape: f32[16,1], index: 2, kind: input, shape index: {}]   ;;  %s194_s3 = inlined_call_operand.vmem [shape: f32[16,1], index: 3, kind: input, shape index: {}]   ;;  %s195_s1 = inlined_call_operand.vmem [shape: f32[16,72], index: 1, kind: input, shape index: {}]   ;;  %s196_s4 = inlined_call_operand.vmem [shape: f32[16,128], index: 4, kind: output, shape index: {}]  }
   0x1   :  { %v25_v0 = vld [vmem:[%s192_s0 + $0x40] sm:$0xff]  ;;  %v24_v1 = vld [vmem:[%s192_s0 + $0x38] sm:$0xff]  ;;  %v23_v2 = vld [vmem:[%s192_s0 + $0x30] sm:$0xff]  ;;  %113 = vset.pattern.permute.xlu0 %v115_v3  ;;  %114 = vset.pattern.permute.xlu1 %v115_v3 }
   0x2   :  { %v34_v4 = vmax.f32 %v25_v0, 0.0  ;;  %v33_v5 = vmax.f32 %v24_v1, 0.0  ;;  %v22_v6 = vld [vmem:[%s192_s0 + $0x28] sm:$0xff]  ;;  %v67_v7 = vld [vmem:[%s193_s2] sm:$0xff]  ;;  %v32_v9 = vmax.f32 %v23_v2, 0.0  ;;  %v20_v12 = vld [vmem:[%s192_s0 + $0x18] sm:$0xff] }
   0x3   :  { %v81_v8 = vld [vmem:[%s194_s3] sm:$0xff]  ;;  %71 = vperm.xlu0 %113, %v67_v7   ;;  %v31_v11 = vmax.f32 %v22_v6, 0.0  ;;  %v19_v14 = vld [vmem:[%s192_s0 + $0x10] sm:$0xff]  ;;  %v29_v15 = vmax.f32 %v20_v12, 0.0  ;;  %v68_v16 = vld [vmem:[%s193_s2 + $0x8] sm:$0xff] }
   0x4   :  { %51 = vmatpush.msra.mxu0 %v34_v4  ;;  %103 = vmatpush.msra.mxu1 %v34_v4  ;;  %v21_v10 = vld [vmem:[%s192_s0 + $0x20] sm:$0xff]  ;;  %v82_v17 = vld [vmem:[%s194_s3 + $0x8] sm:$0xff]  ;;  %v28_v19 = vmax.f32 %v19_v14, 0.0 }
   0x5   :  { %85 = vperm.xlu1 %114, %v81_v8   ;;  %v30_v13 = vmax.f32 %v21_v10, 0.0  ;;  %v18_v18 = vld [vmem:[%s192_s0 + $0x8] sm:$0xff]  ;;  %v17_v20 = vld [vmem:[%s192_s0] sm:$0xff] }
   0x6   :  { %52 = vmatpush.msra.mxu0 %v33_v5  ;;  %104 = vmatpush.msra.mxu1 %v33_v5  ;;  %v27_v21 = vmax.f32 %v18_v18, 0.0  ;;  %v26_v22 = vmax.f32 %v17_v20, 0.0  ;;  %v35_v23 = vld [vmem:[%s195_s1] sm:$0xff]  ;;  %v36_v24 = vld [vmem:[%s195_s1 + $0x8] sm:$0xff] }
   0x8   :  { %53 = vmatpush.msra.mxu0 %v32_v9  ;;  %105 = vmatpush.msra.mxu1 %v32_v9 }
   0xa   :  { %54 = vmatpush.msra.mxu0 %v31_v11  ;;  %106 = vmatpush.msra.mxu1 %v31_v11 }
   0xb   :  { %76 = vperm.xlu0 %113, %v68_v16  }
   0xc   :  { %55 = vmatpush.msra.mxu0 %v30_v13  ;;  %107 = vmatpush.msra.mxu1 %v30_v13 }
   0xd   :  { %90 = vperm.xlu1 %114, %v82_v17  }
   0xe   :  { %56 = vmatpush.msra.mxu0 %v29_v15  ;;  %108 = vmatpush.msra.mxu1 %v29_v15 }
  0x10   :  { %57 = vmatpush.msra.mxu0 %v28_v19  ;;  %109 = vmatpush.msra.mxu1 %v28_v19 }
  0x12   :  { %58 = vmatpush.msra.mxu0 %v27_v21  ;;  %110 = vmatpush.msra.mxu1 %v27_v21 }
  0x14   :  { %59 = vmatpush.msra.mxu0 %v26_v22  ;;  %111 = vmatpush.msra.mxu1 %v26_v22 }
  0x15   :  { %101 = vmatmul.msk.f32.vlgmr.msra.gmra.mxu0 %vm37_vm0, %v35_v23  ;;  %102 = vmatmul.msk.f32.vlgmr.msra.gmra.mxu1 %vm37_vm0, %v36_v24 }
  0x75   :  { %v72_v25 = vpop.permute.xlu0 %71 }
  0x77   :  { %v86_v26 = vpop.permute.xlu1 %85 }
  0x7d   :  { %v77_v27 = vpop.permute.xlu0 %76 }
  0x7f   :  { %v91_v32 = vpop.permute.xlu1 %90 }
  0x92   :  { %v61_v28 = vpop.f32.mrf.mxu0  ;;  %v64_v29 = vpop.f32.mrf.mxu1 }
  0x93   :  { %v79_v30 = vmul.f32 %v72_v25, %v61_v28  ;;  %v80_v31 = vmul.f32 %v77_v27, %v64_v29 }
  0x95   :  { %v93_v33 = vadd.f32 %v86_v26, %v79_v30  ;;  %v94_v34 = vadd.f32 %v91_v32, %v80_v31 }
  0x97   :  { %95 = vst [vmem:[%s196_s4] sm:$0xff] %v93_v33 }
  0x98   :  { %96 = vst [vmem:[%s196_s4 + $0x8] sm:$0xff] %v94_v34 }

// kernel: backbone_nb201_forward.34
= control target key start
LH: loop header
LB: loop body
LE: loop exit
PB: predicated region body
PF: predicated region fallthrough
CT: control target
= control target key end

     0   :  { %v172_v17 = vmov 0   ;;  %vm60_vm0 = vcmask 130048   ;;  %s295_s0 = inlined_call_operand.vmem [shape: f32[144,128], index: 0, kind: input, shape index: {}]   ;;  %s296_s2 = inlined_call_operand.vmem [shape: f32[16,1], index: 2, kind: input, shape index: {}]   ;;  %s297_s1 = inlined_call_operand.vmem [shape: f32[16,144], index: 1, kind: input, shape index: {}]   ;;  %s298_s3 = inlined_call_operand.vmem [shape: f32[16,1], index: 3, kind: input, shape index: {}]   ;;  %s299_s4 = inlined_call_operand.vmem [shape: f32[16,128], index: 4, kind: input, shape index: {}]   ;;  %s300_s5 = inlined_call_operand.vmem [shape: f32[16,128], index: 5, kind: output, shape index: {}]  }
   0x1   :  { %v35_v0 = vld [vmem:[%s295_s0 + $0x78] sm:$0xff]  ;;  %v34_v1 = vld [vmem:[%s295_s0 + $0x70] sm:$0xff]  ;;  %v33_v2 = vld [vmem:[%s295_s0 + $0x68] sm:$0xff]  ;;  %170 = vset.pattern.permute.xlu0 %v172_v17  ;;  %171 = vset.pattern.permute.xlu1 %v172_v17 }
   0x2   :  { %v53_v3 = vmax.f32 %v35_v0, 0.0  ;;  %v52_v4 = vmax.f32 %v34_v1, 0.0  ;;  %v32_v5 = vld [vmem:[%s295_s0 + $0x60] sm:$0xff]  ;;  %v51_v6 = vmax.f32 %v33_v2, 0.0  ;;  %v31_v7 = vld [vmem:[%s295_s0 + $0x58] sm:$0xff]  ;;  %v37_v8 = vld [vmem:[%s295_s0 + $0x88] sm:$0xff] }
   0x3   :  { %v50_v9 = vmax.f32 %v32_v5, 0.0  ;;  %v55_v10 = vmax.f32 %v37_v8, 0.0  ;;  %v36_v11 = vld [vmem:[%s295_s0 + $0x80] sm:$0xff]  ;;  %v30_v12 = vld [vmem:[%s295_s0 + $0x50] sm:$0xff]  ;;  %v49_v14 = vmax.f32 %v31_v7, 0.0  ;;  %v29_v16 = vld [vmem:[%s295_s0 + $0x48] sm:$0xff] }
   0x4   :  { %67 = vmatpush.msra.mxu0 %v53_v3  ;;  %153 = vmatpush.msra.mxu2 %v53_v3  ;;  %v54_v13 = vmax.f32 %v36_v11, 0.0  ;;  %v113_v15 = vld [vmem:[%s296_s2] sm:$0xff]  ;;  %v48_v18 = vmax.f32 %v30_v12, 0.0  ;;  %v57_v19 = vld [vmem:[%s297_s1 + $0x8] sm:$0xff]  ;;  %v47_v21 = vmax.f32 %v29_v16, 0.0  ;;  %v27_v23 = vld [vmem:[%s295_s0 + $0x38] sm:$0xff] }
   0x5   :  { %104 = vmatpush.msra.mxu1 %v55_v10  ;;  %v28_v20 = vld [vmem:[%s295_s0 + $0x40] sm:$0xff]  ;;  %117 = vperm.xlu0 %170, %v113_v15   ;;  %v26_v25 = vld [vmem:[%s295_s0 + $0x30] sm:$0xff]  ;;  %v45_v26 = vmax.f32 %v27_v23, 0.0  ;;  %v114_v27 = vld [vmem:[%s296_s2 + $0x8] sm:$0xff] }
   0x6   :  { %68 = vmatpush.msra.mxu0 %v52_v4  ;;  %154 = vmatpush.msra.mxu2 %v52_v4  ;;  %v127_v22 = vld [vmem:[%s298_s3] sm:$0xff]  ;;  %v46_v24 = vmax.f32 %v28_v20, 0.0  ;;  %v25_v28 = vld [vmem:[%s295_s0 + $0x28] sm:$0xff]  ;;  %v44_v29 = vmax.f32 %v26_v25, 0.0  ;;  %v59_v30 = vld [vmem:[%s297_s1 + $0x18] sm:$0xff] }
   0x7   :  { %105 = vmatpush.msra.mxu1 %v54_v13  ;;  %131 = vperm.xlu1 %171, %v127_v22   ;;  %v24_v31 = vld [vmem:[%s295_s0 + $0x20] sm:$0xff]  ;;  %v43_v32 = vmax.f32 %v25_v28, 0.0  ;;  %v128_v33 = vld [vmem:[%s298_s3 + $0x8] sm:$0xff]  ;;  %v23_v34 = vld [vmem:[%s295_s0 + $0x18] sm:$0xff] }
   0x8   :  { %69 = vmatpush.msra.mxu0 %v51_v6  ;;  %155 = vmatpush.msra.mxu2 %v51_v6  ;;  %v42_v35 = vmax.f32 %v24_v31, 0.0  ;;  %v22_v36 = vld [vmem:[%s295_s0 + $0x10] sm:$0xff]  ;;  %v41_v37 = vmax.f32 %v23_v34, 0.0  ;;  %v21_v38 = vld [vmem:[%s295_s0 + $0x8] sm:$0xff]  ;;  %v20_v40 = vld [vmem:[%s295_s0] sm:$0xff] }
   0x9   :  { %151 = vmatmul.msk.f32.vlgmr.msra.gmra.mxu1 %vm60_vm0, %v57_v19  ;;  %v40_v39 = vmax.f32 %v22_v36, 0.0  ;;  %v39_v41 = vmax.f32 %v21_v38, 0.0  ;;  %v38_v42 = vmax.f32 %v20_v40, 0.0  ;;  %v56_v43 = vld [vmem:[%s297_s1] sm:$0xff]  ;;  %v58_v44 = vld [vmem:[%s297_s1 + $0x10] sm:$0xff]  ;;  %v142_v60 = vld [vmem:[%s299_s4 + $0x8] sm:$0xff] }
   0xa   :  { %70 = vmatpush.msra.mxu0 %v50_v9  ;;  %156 = vmatpush.msra.mxu2 %v50_v9  ;;  %v141_v51 = vld [vmem:[%s299_s4] sm:$0xff] }
   0xc   :  { %71 = vmatpush.msra.mxu0 %v49_v14  ;;  %157 = vmatpush.msra.mxu2 %v49_v14 }
   0xd   :  { %122 = vperm.xlu0 %170, %v114_v27  }
   0xe   :  { %72 = vmatpush.msra.mxu0 %v48_v18  ;;  %158 = vmatpush.msra.mxu2 %v48_v18 }
   0xf   :  { %136 = vperm.xlu1 %171, %v128_v33  }
  0x10   :  { %73 = vmatpush.msra.mxu0 %v47_v21  ;;  %159 = vmatpush.msra.mxu2 %v47_v21 }
  0x11   :  { %152 = vmatmul.msk.f32.gmra.mxu1 %vm60_vm0, %v59_v30 }
  0x12   :  { %74 = vmatpush.msra.mxu0 %v46_v24  ;;  %160 = vmatpush.msra.mxu2 %v46_v24 }
  0x14   :  { %75 = vmatpush.msra.mxu0 %v45_v26  ;;  %161 = vmatpush.msra.mxu2 %v45_v26 }
  0x16   :  { %76 = vmatpush.msra.mxu0 %v44_v29  ;;  %162 = vmatpush.msra.mxu2 %v44_v29 }
  0x18   :  { %77 = vmatpush.msra.mxu0 %v43_v32  ;;  %163 = vmatpush.msra.mxu2 %v43_v32 }
  0x1a   :  { %78 = vmatpush.msra.mxu0 %v42_v35  ;;  %164 = vmatpush.msra.mxu2 %v42_v35 }
  0x1c   :  { %79 = vmatpush.msra.mxu0 %v41_v37  ;;  %165 = vmatpush.msra.mxu2 %v41_v37 }
  0x1e   :  { %80 = vmatpush.msra.mxu0 %v40_v39  ;;  %166 = vmatpush.msra.mxu2 %v40_v39 }
  0x20   :  { %81 = vmatpush.msra.mxu0 %v39_v41  ;;  %167 = vmatpush.msra.mxu2 %v39_v41 }
  0x22   :  { %82 = vmatpush.msra.mxu0 %v38_v42  ;;  %168 = vmatpush.msra.mxu2 %v38_v42 }
  0x23   :  { %83 = vmatmul.f32.vlgmr.msra.gmra.mxu0 %v56_v43  ;;  %86 = vmatmul.f32.vlgmr.msra.gmra.mxu2 %v58_v44 }
  0x77   :  { %v118_v46 = vpop.permute.xlu0 %117 }
  0x79   :  { %v132_v47 = vpop.permute.xlu1 %131 }
  0x7f   :  { %v123_v57 = vpop.permute.xlu0 %122 }
  0x81   :  { %v137_v59 = vpop.permute.xlu1 %136 }
  0x86   :  { %v107_v45 = vpop.f32.mrf.mxu1 }
  0x8e   :  { %v110_v52 = vpop.f32.mrf.mxu1 }
  0xa0   :  { %v84_v48 = vpop.f32.mrf.mxu0 }
  0xa1   :  { %v108_v49 = vadd.f32 %v107_v45, %v84_v48 }
  0xa3   :  { %v125_v50 = vmul.f32 %v118_v46, %v108_v49 }
  0xa5   :  { %v139_v53 = vadd.f32 %v132_v47, %v125_v50 }
  0xa6   :  { %v87_v54 = vpop.f32.mrf.mxu2 }
  0xa7   :  { %v143_v55 = vadd.f32 %v141_v51, %v139_v53  ;;  %v111_v56 = vadd.f32 %v110_v52, %v87_v54 }
  0xa9   :  { %145 = vst [vmem:[%s300_s5] sm:$0xff] %v143_v55  ;;  %v126_v58 = vmul.f32 %v123_v57, %v111_v56 }
  0xab   :  { %v140_v61 = vadd.f32 %v137_v59, %v126_v58 }
  0xad   :  { %v144_v62 = vadd.f32 %v142_v60, %v140_v61 }
  0xaf   :  { %146 = vst [vmem:[%s300_s5 + $0x8] sm:$0xff] %v144_v62 }

// kernel: backbone_nb201_forward.35
= control target key start
LH: loop header
LB: loop body
LE: loop exit
PB: predicated region body
PF: predicated region fallthrough
CT: control target
= control target key end

     0   :  { %v236_v3 = vmov 0   ;;  %vm61_vm0 = vcmask 130048   ;;  %s380_s0 = inlined_call_operand.vmem [shape: f32[144,128], index: 0, kind: input, shape index: {}]   ;;  %s381_s1 = inlined_call_operand.vmem [shape: f32[32,144], index: 1, kind: input, shape index: {}]   ;;  %s382_s2 = inlined_call_operand.vmem [shape: f32[32,1], index: 2, kind: input, shape index: {}]   ;;  %s383_s3 = inlined_call_operand.vmem [shape: f32[32,1], index: 3, kind: input, shape index: {}]   ;;  %s384_s4 = inlined_call_operand.vmem [shape: f32[32,128], index: 4, kind: output, shape index: {}]  }
   0x1   :  { %v32_v0 = vld [vmem:[%s380_s0 + $0x78] sm:$0xff]  ;;  %v31_v1 = vld [vmem:[%s380_s0 + $0x70] sm:$0xff]  ;;  %v30_v2 = vld [vmem:[%s380_s0 + $0x68] sm:$0xff]  ;;  %234 = vset.pattern.permute.xlu1 %v236_v3  ;;  %233 = vset.pattern.permute.xlu0 %v236_v3 }
   0x2   :  { %v50_v4 = vmax.f32 %v32_v0, 0.0  ;;  %v49_v5 = vmax.f32 %v31_v1, 0.0  ;;  %235 = vset.pattern.permute.xlu2 %v236_v3  ;;  %v29_v6 = vld [vmem:[%s380_s0 + $0x60] sm:$0xff]  ;;  %v48_v7 = vmax.f32 %v30_v2, 0.0  ;;  %v34_v8 = vld [vmem:[%s380_s0 + $0x88] sm:$0xff]  ;;  %v28_v9 = vld [vmem:[%s380_s0 + $0x58] sm:$0xff] }
   0x3   :  { %v52_v10 = vmax.f32 %v34_v8, 0.0  ;;  %v33_v11 = vld [vmem:[%s380_s0 + $0x80] sm:$0xff]  ;;  %v47_v12 = vmax.f32 %v29_v6, 0.0  ;;  %v27_v14 = vld [vmem:[%s380_s0 + $0x50] sm:$0xff]  ;;  %v46_v15 = vmax.f32 %v28_v9, 0.0  ;;  %v54_v16 = vld [vmem:[%s381_s1 + $0x8] sm:$0xff] }
   0x4   :  { %74 = vmatpush.msra.mxu0 %v50_v4  ;;  %200 = vmatpush.msra.mxu2 %v50_v4  ;;  %v51_v13 = vmax.f32 %v33_v11, 0.0  ;;  %v26_v17 = vld [vmem:[%s380_s0 + $0x48] sm:$0xff]  ;;  %v45_v18 = vmax.f32 %v27_v14, 0.0  ;;  %v134_v19 = vld [vmem:[%s382_s2 + $0x10] sm:$0xff]  ;;  %v25_v20 = vld [vmem:[%s380_s0 + $0x40] sm:$0xff] }
   0x5   :  { %201 = vmatpush.msra.mxu3 %v50_v4  ;;  %117 = vmatpush.msra.mxu1 %v52_v10  ;;  %v44_v21 = vmax.f32 %v26_v17, 0.0  ;;  %v132_v22 = vld [vmem:[%s382_s2] sm:$0xff]  ;;  %v24_v23 = vld [vmem:[%s380_s0 + $0x38] sm:$0xff]  ;;  %v43_v24 = vmax.f32 %v25_v20, 0.0  ;;  %v23_v26 = vld [vmem:[%s380_s0 + $0x30] sm:$0xff] }
   0x6   :  { %75 = vmatpush.msra.mxu0 %v49_v5  ;;  %202 = vmatpush.msra.mxu2 %v49_v5  ;;  %v160_v25 = vld [vmem:[%s383_s3] sm:$0xff]  ;;  %v42_v27 = vmax.f32 %v24_v23, 0.0  ;;  %v56_v28 = vld [vmem:[%s381_s1 + $0x18] sm:$0xff]  ;;  %v22_v29 = vld [vmem:[%s380_s0 + $0x28] sm:$0xff]  ;;  %v41_v30 = vmax.f32 %v23_v26, 0.0 }
   0x7   :  { %203 = vmatpush.msra.mxu3 %v49_v5  ;;  %118 = vmatpush.msra.mxu1 %v51_v13  ;;  %v135_v31 = vld [vmem:[%s382_s2 + $0x18] sm:$0xff]  ;;  %v21_v32 = vld [vmem:[%s380_s0 + $0x20] sm:$0xff]  ;;  %v40_v33 = vmax.f32 %v22_v29, 0.0  ;;  %v133_v34 = vld [vmem:[%s382_s2 + $0x8] sm:$0xff] }
   0x8   :  { %76 = vmatpush.msra.mxu0 %v48_v7  ;;  %204 = vmatpush.msra.mxu2 %v48_v7  ;;  %v20_v35 = vld [vmem:[%s380_s0 + $0x18] sm:$0xff]  ;;  %v39_v36 = vmax.f32 %v21_v32, 0.0  ;;  %v161_v37 = vld [vmem:[%s383_s3 + $0x8] sm:$0xff]  ;;  %v19_v38 = vld [vmem:[%s380_s0 + $0x10] sm:$0xff] }
   0x9   :  { %205 = vmatpush.msra.mxu3 %v48_v7  ;;  %196 = vmatmul.msk.f32.vlgmr.msra.gmra.mxu1 %vm61_vm0, %v54_v16  ;;  %v38_v39 = vmax.f32 %v20_v35, 0.0  ;;  %v58_v40 = vld [vmem:[%s381_s1 + $0x28] sm:$0xff]  ;;  %v37_v42 = vmax.f32 %v19_v38, 0.0  ;;  %v163_v43 = vld [vmem:[%s383_s3 + $0x18] sm:$0xff]  ;;  %v17_v44 = vld [vmem:[%s380_s0] sm:$0xff] }
   0xa   :  { %77 = vmatpush.msra.mxu0 %v47_v12  ;;  %206 = vmatpush.msra.mxu2 %v47_v12  ;;  %v18_v41 = vld [vmem:[%s380_s0 + $0x8] sm:$0xff]  ;;  %v162_v46 = vld [vmem:[%s383_s3 + $0x10] sm:$0xff]  ;;  %v35_v47 = vmax.f32 %v17_v44, 0.0  ;;  %v53_v48 = vld [vmem:[%s381_s1] sm:$0xff] }
   0xb   :  { %207 = vmatpush.msra.mxu3 %v47_v12  ;;  %148 = vperm.xlu1 %234, %v134_v19   ;;  %v36_v45 = vmax.f32 %v18_v41, 0.0  ;;  %v55_v49 = vld [vmem:[%s381_s1 + $0x10] sm:$0xff]  ;;  %v57_v50 = vld [vmem:[%s381_s1 + $0x20] sm:$0xff]  ;;  %v60_v51 = vld [vmem:[%s381_s1 + $0x38] sm:$0xff] }
   0xc   :  { %78 = vmatpush.msra.mxu0 %v46_v15  ;;  %208 = vmatpush.msra.mxu2 %v46_v15  ;;  %v59_v52 = vld [vmem:[%s381_s1 + $0x30] sm:$0xff] }
   0xd   :  { %209 = vmatpush.msra.mxu3 %v46_v15  ;;  %138 = vperm.xlu0 %233, %v132_v22  }
   0xe   :  { %79 = vmatpush.msra.mxu0 %v45_v18  ;;  %210 = vmatpush.msra.mxu2 %v45_v18 }
   0xf   :  { %211 = vmatpush.msra.mxu3 %v45_v18  ;;  %166 = vperm.xlu2 %235, %v160_v25  }
  0x10   :  { %80 = vmatpush.msra.mxu0 %v44_v21  ;;  %212 = vmatpush.msra.mxu2 %v44_v21 }
  0x11   :  { %213 = vmatpush.msra.mxu3 %v44_v21  ;;  %197 = vmatmul.msk.f32.gmra.mxu1 %vm61_vm0, %v56_v28 }
  0x12   :  { %81 = vmatpush.msra.mxu0 %v43_v24  ;;  %214 = vmatpush.msra.mxu2 %v43_v24 }
  0x13   :  { %215 = vmatpush.msra.mxu3 %v43_v24  ;;  %153 = vperm.xlu1 %234, %v135_v31  }
  0x14   :  { %82 = vmatpush.msra.mxu0 %v42_v27  ;;  %216 = vmatpush.msra.mxu2 %v42_v27 }
  0x15   :  { %217 = vmatpush.msra.mxu3 %v42_v27  ;;  %143 = vperm.xlu0 %233, %v133_v34  }
  0x16   :  { %83 = vmatpush.msra.mxu0 %v41_v30  ;;  %218 = vmatpush.msra.mxu2 %v41_v30 }
  0x17   :  { %219 = vmatpush.msra.mxu3 %v41_v30  ;;  %171 = vperm.xlu2 %235, %v161_v37  }
  0x18   :  { %84 = vmatpush.msra.mxu0 %v40_v33  ;;  %220 = vmatpush.msra.mxu2 %v40_v33 }
  0x19   :  { %221 = vmatpush.msra.mxu3 %v40_v33  ;;  %198 = vmatmul.msk.f32.gmra.mxu1 %vm61_vm0, %v58_v40 }
  0x1a   :  { %85 = vmatpush.msra.mxu0 %v39_v36  ;;  %222 = vmatpush.msra.mxu2 %v39_v36 }
  0x1b   :  { %223 = vmatpush.msra.mxu3 %v39_v36  ;;  %181 = vperm.xlu1 %234, %v163_v43  }
  0x1c   :  { %86 = vmatpush.msra.mxu0 %v38_v39  ;;  %224 = vmatpush.msra.mxu2 %v38_v39 }
  0x1d   :  { %225 = vmatpush.msra.mxu3 %v38_v39  ;;  %176 = vperm.xlu0 %233, %v162_v46  }
  0x1e   :  { %87 = vmatpush.msra.mxu0 %v37_v42  ;;  %226 = vmatpush.msra.mxu2 %v37_v42 }
  0x1f   :  { %227 = vmatpush.msra.mxu3 %v37_v42 }
  0x20   :  { %88 = vmatpush.msra.mxu0 %v36_v45  ;;  %228 = vmatpush.msra.mxu2 %v36_v45 }
  0x21   :  { %229 = vmatpush.msra.mxu3 %v36_v45  ;;  %199 = vmatmul.msk.f32.gmra.mxu1 %vm61_vm0, %v60_v51 }
  0x22   :  { %89 = vmatpush.msra.mxu0 %v35_v47  ;;  %230 = vmatpush.msra.mxu2 %v35_v47 }
  0x23   :  { %231 = vmatpush.msra.mxu3 %v35_v47  ;;  %90 = vmatmul.f32.vlgmr.msra.gmra.mxu0 %v53_v48 }
  0x24   :  { %93 = vmatmul.f32.vlgmr.msra.gmra.mxu2 %v55_v49  ;;  %96 = vmatmul.f32.vlgmr.msra.gmra.mxu3 %v57_v50 }
  0x2c   :  { %99 = vmatmul.f32.gmra.mxu3 %v59_v52 }
  0x69   :  { %v167_v57 = vpop.permute.xlu2 %166 }
  0x71   :  { %v172_v5 = vpop.permute.xlu2 %171 }
  0x7d   :  { %v149_v56 = vpop.permute.xlu1 %148 }
  0x7f   :  { %v139_v54 = vpop.permute.xlu0 %138 }
  0x85   :  { %v154_v4 = vpop.permute.xlu1 %153 }
  0x86   :  { %v120_v53 = vpop.f32.mrf.mxu1 }
  0x87   :  { %v144_v59 = vpop.permute.xlu0 %143 }
  0x8d   :  { %v182_v15 = vpop.permute.xlu1 %181 }
  0x8e   :  { %v123_v55 = vpop.f32.mrf.mxu1 }
  0x8f   :  { %v177_v8 = vpop.permute.xlu0 %176 }
  0x96   :  { %v126_v62 = vpop.f32.mrf.mxu1 }
  0x9e   :  { %v129_v11 = vpop.f32.mrf.mxu1 }
  0xa0   :  { %v91_v58 = vpop.f32.mrf.mxu0 }
  0xa1   :  { %v121_v60 = vadd.f32 %v120_v53, %v91_v58 }
  0xa3   :  { %v156_v61 = vmul.f32 %v139_v54, %v121_v60 }
  0xa5   :  { %v184_v63 = vadd.f32 %v167_v57, %v156_v61 }
  0xa7   :  { %188 = vst [vmem:[%s384_s4] sm:$0xff] %v184_v63  ;;  %v94_v0 = vpop.f32.mrf.mxu2  ;;  %v97_v1 = vpop.f32.mrf.mxu3 }
  0xa8   :  { %v124_v2 = vadd.f32 %v123_v55, %v94_v0  ;;  %v127_v3 = vadd.f32 %v126_v62, %v97_v1 }
  0xaa   :  { %v158_v6 = vmul.f32 %v149_v56, %v127_v3  ;;  %v157_v7 = vmul.f32 %v144_v59, %v124_v2 }
  0xac   :  { %v186_v9 = vadd.f32 %v177_v8, %v158_v6  ;;  %v185_v10 = vadd.f32 %v172_v5, %v157_v7 }
  0xae   :  { %190 = vst [vmem:[%s384_s4 + $0x10] sm:$0xff] %v186_v9 }
  0xaf   :  { %189 = vst [vmem:[%s384_s4 + $0x8] sm:$0xff] %v185_v10  ;;  %v100_v12 = vpop.f32.mrf.mxu3 }
  0xb0   :  { %v130_v13 = vadd.f32 %v129_v11, %v100_v12 }
  0xb2   :  { %v159_v14 = vmul.f32 %v154_v4, %v130_v13 }
  0xb4   :  { %v187_v16 = vadd.f32 %v182_v15, %v159_v14 }
  0xb6   :  { %191 = vst [vmem:[%s384_s4 + $0x18] sm:$0xff] %v187_v16 }

// kernel: backbone_nb201_forward.37
= control target key start
LH: loop header
LB: loop body
LE: loop exit
PB: predicated region body
PF: predicated region fallthrough
CT: control target
= control target key end

     0   :  { %v165_v17 = vmov 0   ;;  %vm57_vm0 = vcmask 130048   ;;  %s277_s0 = inlined_call_operand.vmem [shape: f32[144,128], index: 0, kind: input, shape index: {}]   ;;  %s278_s2 = inlined_call_operand.vmem [shape: f32[16,1], index: 2, kind: input, shape index: {}]   ;;  %s279_s1 = inlined_call_operand.vmem [shape: f32[16,144], index: 1, kind: input, shape index: {}]   ;;  %s280_s3 = inlined_call_operand.vmem [shape: f32[16,1], index: 3, kind: input, shape index: {}]   ;;  %s281_s4 = inlined_call_operand.vmem [shape: f32[16,128], index: 4, kind: output, shape index: {}]  }
   0x1   :  { %v32_v0 = vld [vmem:[%s277_s0 + $0x78] sm:$0xff]  ;;  %v31_v1 = vld [vmem:[%s277_s0 + $0x70] sm:$0xff]  ;;  %v30_v2 = vld [vmem:[%s277_s0 + $0x68] sm:$0xff]  ;;  %163 = vset.pattern.permute.xlu0 %v165_v17  ;;  %164 = vset.pattern.permute.xlu1 %v165_v17 }
   0x2   :  { %v50_v3 = vmax.f32 %v32_v0, 0.0  ;;  %v49_v4 = vmax.f32 %v31_v1, 0.0  ;;  %v29_v5 = vld [vmem:[%s277_s0 + $0x60] sm:$0xff]  ;;  %v48_v6 = vmax.f32 %v30_v2, 0.0  ;;  %v28_v7 = vld [vmem:[%s277_s0 + $0x58] sm:$0xff]  ;;  %v34_v8 = vld [vmem:[%s277_s0 + $0x88] sm:$0xff] }
   0x3   :  { %v47_v9 = vmax.f32 %v29_v5, 0.0  ;;  %v52_v10 = vmax.f32 %v34_v8, 0.0  ;;  %v33_v11 = vld [vmem:[%s277_s0 + $0x80] sm:$0xff]  ;;  %v27_v12 = vld [vmem:[%s277_s0 + $0x50] sm:$0xff]  ;;  %v46_v14 = vmax.f32 %v28_v7, 0.0  ;;  %v26_v16 = vld [vmem:[%s277_s0 + $0x48] sm:$0xff] }
   0x4   :  { %64 = vmatpush.msra.mxu0 %v50_v3  ;;  %146 = vmatpush.msra.mxu2 %v50_v3  ;;  %v51_v13 = vmax.f32 %v33_v11, 0.0  ;;  %v110_v15 = vld [vmem:[%s278_s2] sm:$0xff]  ;;  %v45_v18 = vmax.f32 %v27_v12, 0.0  ;;  %v54_v19 = vld [vmem:[%s279_s1 + $0x8] sm:$0xff]  ;;  %v44_v21 = vmax.f32 %v26_v16, 0.0  ;;  %v24_v23 = vld [vmem:[%s277_s0 + $0x38] sm:$0xff] }
   0x5   :  { %101 = vmatpush.msra.mxu1 %v52_v10  ;;  %v25_v20 = vld [vmem:[%s277_s0 + $0x40] sm:$0xff]  ;;  %114 = vperm.xlu0 %163, %v110_v15   ;;  %v23_v25 = vld [vmem:[%s277_s0 + $0x30] sm:$0xff]  ;;  %v42_v26 = vmax.f32 %v24_v23, 0.0  ;;  %v111_v27 = vld [vmem:[%s278_s2 + $0x8] sm:$0xff] }
   0x6   :  { %65 = vmatpush.msra.mxu0 %v49_v4  ;;  %147 = vmatpush.msra.mxu2 %v49_v4  ;;  %v124_v22 = vld [vmem:[%s280_s3] sm:$0xff]  ;;  %v43_v24 = vmax.f32 %v25_v20, 0.0  ;;  %v22_v28 = vld [vmem:[%s277_s0 + $0x28] sm:$0xff]  ;;  %v41_v29 = vmax.f32 %v23_v25, 0.0  ;;  %v56_v30 = vld [vmem:[%s279_s1 + $0x18] sm:$0xff] }
   0x7   :  { %102 = vmatpush.msra.mxu1 %v51_v13  ;;  %128 = vperm.xlu1 %164, %v124_v22   ;;  %v21_v31 = vld [vmem:[%s277_s0 + $0x20] sm:$0xff]  ;;  %v40_v32 = vmax.f32 %v22_v28, 0.0  ;;  %v125_v33 = vld [vmem:[%s280_s3 + $0x8] sm:$0xff]  ;;  %v20_v34 = vld [vmem:[%s277_s0 + $0x18] sm:$0xff] }
   0x8   :  { %66 = vmatpush.msra.mxu0 %v48_v6  ;;  %148 = vmatpush.msra.mxu2 %v48_v6  ;;  %v39_v35 = vmax.f32 %v21_v31, 0.0  ;;  %v19_v36 = vld [vmem:[%s277_s0 + $0x10] sm:$0xff]  ;;  %v38_v37 = vmax.f32 %v20_v34, 0.0  ;;  %v18_v38 = vld [vmem:[%s277_s0 + $0x8] sm:$0xff]  ;;  %v17_v40 = vld [vmem:[%s277_s0] sm:$0xff] }
   0x9   :  { %144 = vmatmul.msk.f32.vlgmr.msra.gmra.mxu1 %vm57_vm0, %v54_v19  ;;  %v37_v39 = vmax.f32 %v19_v36, 0.0  ;;  %v36_v41 = vmax.f32 %v18_v38, 0.0  ;;  %v35_v42 = vmax.f32 %v17_v40, 0.0  ;;  %v53_v43 = vld [vmem:[%s279_s1] sm:$0xff]  ;;  %v55_v44 = vld [vmem:[%s279_s1 + $0x10] sm:$0xff] }
   0xa   :  { %67 = vmatpush.msra.mxu0 %v47_v9  ;;  %149 = vmatpush.msra.mxu2 %v47_v9 }
   0xc   :  { %68 = vmatpush.msra.mxu0 %v46_v14  ;;  %150 = vmatpush.msra.mxu2 %v46_v14 }
   0xd   :  { %119 = vperm.xlu0 %163, %v111_v27  }
   0xe   :  { %69 = vmatpush.msra.mxu0 %v45_v18  ;;  %151 = vmatpush.msra.mxu2 %v45_v18 }
   0xf   :  { %133 = vperm.xlu1 %164, %v125_v33  }
  0x10   :  { %70 = vmatpush.msra.mxu0 %v44_v21  ;;  %152 = vmatpush.msra.mxu2 %v44_v21 }
  0x11   :  { %145 = vmatmul.msk.f32.gmra.mxu1 %vm57_vm0, %v56_v30 }
  0x12   :  { %71 = vmatpush.msra.mxu0 %v43_v24  ;;  %153 = vmatpush.msra.mxu2 %v43_v24 }
  0x14   :  { %72 = vmatpush.msra.mxu0 %v42_v26  ;;  %154 = vmatpush.msra.mxu2 %v42_v26 }
  0x16   :  { %73 = vmatpush.msra.mxu0 %v41_v29  ;;  %155 = vmatpush.msra.mxu2 %v41_v29 }
  0x18   :  { %74 = vmatpush.msra.mxu0 %v40_v32  ;;  %156 = vmatpush.msra.mxu2 %v40_v32 }
  0x1a   :  { %75 = vmatpush.msra.mxu0 %v39_v35  ;;  %157 = vmatpush.msra.mxu2 %v39_v35 }
  0x1c   :  { %76 = vmatpush.msra.mxu0 %v38_v37  ;;  %158 = vmatpush.msra.mxu2 %v38_v37 }
  0x1e   :  { %77 = vmatpush.msra.mxu0 %v37_v39  ;;  %159 = vmatpush.msra.mxu2 %v37_v39 }
  0x20   :  { %78 = vmatpush.msra.mxu0 %v36_v41  ;;  %160 = vmatpush.msra.mxu2 %v36_v41 }
  0x22   :  { %79 = vmatpush.msra.mxu0 %v35_v42  ;;  %161 = vmatpush.msra.mxu2 %v35_v42 }
  0x23   :  { %80 = vmatmul.f32.vlgmr.msra.gmra.mxu0 %v53_v43  ;;  %83 = vmatmul.f32.vlgmr.msra.gmra.mxu2 %v55_v44 }
  0x77   :  { %v115_v46 = vpop.permute.xlu0 %114 }
  0x79   :  { %v129_v47 = vpop.permute.xlu1 %128 }
  0x7f   :  { %v120_v55 = vpop.permute.xlu0 %119 }
  0x81   :  { %v134_v57 = vpop.permute.xlu1 %133 }
  0x86   :  { %v104_v45 = vpop.f32.mrf.mxu1 }
  0x8e   :  { %v107_v51 = vpop.f32.mrf.mxu1 }
  0xa0   :  { %v81_v48 = vpop.f32.mrf.mxu0 }
  0xa1   :  { %v105_v49 = vadd.f32 %v104_v45, %v81_v48 }
  0xa3   :  { %v122_v50 = vmul.f32 %v115_v46, %v105_v49 }
  0xa5   :  { %v136_v52 = vadd.f32 %v129_v47, %v122_v50 }
  0xa6   :  { %v84_v53 = vpop.f32.mrf.mxu2 }
  0xa7   :  { %138 = vst [vmem:[%s281_s4] sm:$0xff] %v136_v52  ;;  %v108_v54 = vadd.f32 %v107_v51, %v84_v53 }
  0xa9   :  { %v123_v56 = vmul.f32 %v120_v55, %v108_v54 }
  0xab   :  { %v137_v58 = vadd.f32 %v134_v57, %v123_v56 }
  0xad   :  { %139 = vst [vmem:[%s281_s4 + $0x8] sm:$0xff] %v137_v58 }

// kernel: backbone_nb201_forward.36
= control target key start
LH: loop header
LB: loop body
LE: loop exit
PB: predicated region body
PF: predicated region fallthrough
CT: control target
= control target key end

     0   :  { %v505_v0 = vmov 0   ;;  %vm384_vm0 = vcmask 130048   ;;  %s1038_s1 = inlined_call_operand.vmem [shape: f32[1,8,8,1], index: 1, kind: input, shape index: {}]   ;;  %s1039_s0 = inlined_call_operand.vmem [shape: f32[2,10,10,16], index: 0, kind: input, shape index: {}]   ;;  %s1040_s2 = inlined_call_operand.vmem [shape: f32[2,8,8,16], index: 2, kind: input, shape index: {}]   ;;  %s1041_s3 = inlined_call_operand.vmem [shape: f32[2,8,8,16], index: 3, kind: output, shape index: {}]  }
   0x1   :  { %503 = vset.pattern.permute.xlu1 %v505_v0  ;;  %502 = vset.pattern.permute.xlu0 %v505_v0  ;;  %v290_v1 = vld [vmem:[%s1038_s1 + $0x10] sm:$0xff]  ;;  %v288_v2 = vld [vmem:[%s1038_s1] sm:$0xff]  ;;  %v291_v4 = vld [vmem:[%s1038_s1 + $0x18] sm:$0xff] }
   0x2   :  { %308 = vperm.xlu1 %503, %v290_v1   ;;  %298 = vperm.xlu0 %502, %v288_v2   ;;  %v292_v3 = vld [vmem:[%s1038_s1 + $0x20] sm:$0xff]  ;;  %v289_v5 = vld [vmem:[%s1038_s1 + $0x8] sm:$0xff]  ;;  %v295_v7 = vld [vmem:[%s1038_s1 + $0x38] sm:$0xff] }
   0x3   :  { %504 = vset.pattern.permute.xlu2 %v505_v0  ;;  %v293_v6 = vld [vmem:[%s1038_s1 + $0x28] sm:$0xff]  ;;  %v294_v8 = vld [vmem:[%s1038_s1 + $0x30] sm:$0xff]  ;;  %v553_v9 = vld [vmem:[%s1039_s0 + $0x40] sm:$0xff] }
   0x4   :  { %318 = vperm.xlu2 %504, %v292_v3   ;;  %v558_v10 = vld [vmem:[%s1039_s0 + $0xe0] sm:$0xff]  ;;  %v589_v19 = vld [vmem:[%s1039_s0 + $0x50] sm:$0xff] }
   0x5   :  { %v563_v11 = vld [vmem:[%s1039_s0 + $0x41] sm:$0xff]  ;;  %v594_v20 = vld [vmem:[%s1039_s0 + $0xf0] sm:$0xff] }
   0x6   :  { %v568_v12 = vld [vmem:[%s1039_s0 + $0xe1] sm:$0xff]  ;;  %v50_v13 = vadd.f32 %v563_v11, %v553_v9  ;;  %v601_v23 = vld [vmem:[%s1039_s0 + $0x51] sm:$0xff] }
   0x7   :  { %v58_v14 = vadd.f32 %v568_v12, %v558_v10  ;;  %v577_v15 = vld [vmem:[%s1039_s0 + $0x42] sm:$0xff]  ;;  %v606_v24 = vld [vmem:[%s1039_s0 + $0xf1] sm:$0xff]  ;;  %v51_v36 = vadd.f32 %v601_v23, %v589_v19 }
   0x8   :  { %v582_v16 = vld [vmem:[%s1039_s0 + $0xe2] sm:$0xff]  ;;  %v82_v17 = vadd.f32 %v577_v15, %v50_v13  ;;  %v613_v27 = vld [vmem:[%s1039_s0 + $0x52] sm:$0xff]  ;;  %v59_v41 = vadd.f32 %v606_v24, %v594_v20 }
   0x9   :  { %v90_v18 = vadd.f32 %v582_v16, %v58_v14  ;;  %v618_v28 = vld [vmem:[%s1039_s0 + $0xf2] sm:$0xff]  ;;  %v623_v29 = vld [vmem:[%s1039_s0 + $0x20] sm:$0xff]  ;;  %v83_v46 = vadd.f32 %v613_v27, %v51_v36 }
   0xa   :  { %313 = vperm.xlu1 %503, %v291_v4   ;;  %303 = vperm.xlu0 %502, %v289_v5   ;;  %v115_v21 = vadd.f32 %v589_v19, %v82_v17  ;;  %1043 = vst [vmem:[#allocation2_spill] sm:$0xff] %v618_v28  ;;  %v628_v30 = vld [vmem:[%s1039_s0 + $0x21] sm:$0xff]  ;;  %v91_v51 = vadd.f32 %v618_v28, %v59_v41  ;;  %v713_v61 = vld [vmem:[%s1039_s0 + $0x30] sm:$0xff] }
   0xb   :  { %v123_v22 = vadd.f32 %v594_v20, %v90_v18  ;;  %v635_v33 = vld [vmem:[%s1039_s0 + $0xc0] sm:$0xff]  ;;  %v48_v38 = vadd.f32 %v628_v30, %v623_v29  ;;  %v727_v3 = vld [vmem:[%s1039_s0 + $0xd0] sm:$0xff] }
   0xc   :  { %323 = vperm.xlu2 %504, %v293_v6   ;;  %v147_v25 = vadd.f32 %v601_v23, %v115_v21  ;;  %v640_v34 = vld [vmem:[%s1039_s0 + $0xc1] sm:$0xff]  ;;  %v405_v5 = vld [vmem:[%s1039_s0 + $0x10] sm:$0xff] }
   0xd   :  { %v155_v26 = vadd.f32 %v606_v24, %v123_v22  ;;  %v645_v35 = vld [vmem:[%s1039_s0 + $0x60] sm:$0xff]  ;;  %v56_v42 = vadd.f32 %v640_v34, %v635_v33  ;;  %v743_v13 = vld [vmem:[%s1039_s0 + $0xd1] sm:$0xff] }
   0xe   :  { %v179_v31 = vadd.f32 %v613_v27, %v147_v25  ;;  %v652_v37 = vld [vmem:[%s1039_s0 + $0x100] sm:$0xff]  ;;  %v116_v53 = vadd.f32 %v645_v35, %v83_v46  ;;  %v421_v18 = vld [vmem:[%s1039_s0 + $0x11] sm:$0xff]  ;;  %v57_v36 = vadd.f32 %v743_v13, %v727_v3 }
   0xf   :  { %v187_v32 = vadd.f32 %v618_v28, %v155_v26  ;;  %v659_v39 = vld [vmem:[%s1039_s0 + $0x22] sm:$0xff]  ;;  %v124_v59 = vadd.f32 %v652_v37, %v91_v51  ;;  %v413_v25 = vld [vmem:[%s1039_s0 + $0xb0] sm:$0xff] }
  0x10   :  { %v14_v40 = vld [vmem:[%s1039_s0] sm:$0xff]  ;;  %v212_v47 = vadd.f32 %v645_v35, %v179_v31  ;;  %v80_v56 = vadd.f32 %v659_v39, %v48_v38  ;;  %v756_v26 = vld [vmem:[%s1039_s0 + $0x70] sm:$0xff]  ;;  %v47_v38 = vadd.f32 %v421_v18, %v405_v5 }
  0x11   :  { %v22_v43 = vld [vmem:[%s1039_s0 + $0xa0] sm:$0xff]  ;;  %v220_v48 = vadd.f32 %v652_v37, %v187_v32  ;;  %v761_v31 = vld [vmem:[%s1039_s0 + $0x110] sm:$0xff] }
  0x12   :  { %333 = vperm.xlu1 %503, %v295_v7   ;;  %328 = vperm.xlu0 %502, %v294_v8   ;;  %v30_v44 = vld [vmem:[%s1039_s0 + $0x1] sm:$0xff]  ;;  %v113_v7 = vadd.f32 %v713_v61, %v80_v56  ;;  %v738_v8 = vld [vmem:[%s1039_s0 + $0x31] sm:$0xff] }
  0x13   :  { %v38_v45 = vld [vmem:[%s1039_s0 + $0xa1] sm:$0xff]  ;;  %v46_v57 = vadd.f32 %v30_v44, %v14_v40  ;;  %v49_v32 = vadd.f32 %v738_v8, %v713_v61  ;;  %v786_v51 = vld [vmem:[%s1039_s0 + $0xd2] sm:$0xff] }
  0x14   :  { %v683_v49 = vld [vmem:[%s1039_s0 + $0x61] sm:$0xff]  ;;  %v54_v58 = vadd.f32 %v38_v45, %v22_v43 }
  0x15   :  { %v688_v50 = vld [vmem:[%s1039_s0 + $0xc2] sm:$0xff]  ;;  %v148_v0 = vadd.f32 %v683_v49, %v116_v53  ;;  %v244_v1 = vadd.f32 %v683_v49, %v212_v47  ;;  %v145_v47 = vadd.f32 %v738_v8, %v113_v7 }
  0x16   :  { %v694_v52 = vld [vmem:[%s1039_s0 + $0x101] sm:$0xff]  ;;  %v88_v60 = vadd.f32 %v688_v50, %v56_v42  ;;  %v429_v42 = vld [vmem:[%s1039_s0 + $0xb1] sm:$0xff] }
  0x17   :  { %v700_v54 = vld [vmem:[%s1039_s0 + $0x62] sm:$0xff]  ;;  %v252_v2 = vadd.f32 %v694_v52, %v220_v48  ;;  %v156_v4 = vadd.f32 %v694_v52, %v124_v59  ;;  %v55_v46 = vadd.f32 %v429_v42, %v413_v25  ;;  %v781_v48 = vld [vmem:[%s1039_s0 + $0x32] sm:$0xff] }
  0x18   :  { %v705_v55 = vld [vmem:[%s1039_s0 + $0x102] sm:$0xff]  ;;  %v180_v6 = vadd.f32 %v700_v54, %v148_v0  ;;  %v121_v22 = vadd.f32 %v727_v3, %v88_v60  ;;  %v276_v40 = vadd.f32 %v700_v54, %v244_v1  ;;  %v81_v0 = vadd.f32 %v781_v48, %v49_v32 }
  0x19   :  { %v62_v62 = vld [vmem:[%s1039_s0 + $0x2] sm:$0xff]  ;;  %v188_v21 = vadd.f32 %v705_v55, %v156_v4  ;;  %v284_v41 = vadd.f32 %v705_v55, %v252_v2  ;;  %v89_v1 = vadd.f32 %v786_v51, %v57_v36  ;;  %v177_v32 = vadd.f32 %v781_v48, %v145_v47 }
  0x1a   :  { %v70_v63 = vld [vmem:[%s1039_s0 + $0xa2] sm:$0xff]  ;;  %v78_v14 = vadd.f32 %v62_v62, %v46_v57  ;;  %v213_v43 = vadd.f32 %v756_v26, %v180_v6  ;;  %v437_v57 = vld [vmem:[%s1039_s0 + $0x12] sm:$0xff]  ;;  %v153_v60 = vadd.f32 %v743_v13, %v121_v22 }
  0x1b   :  { %v86_v17 = vadd.f32 %v70_v63, %v54_v58  ;;  %v221_v44 = vadd.f32 %v761_v31, %v188_v21  ;;  %v356_v45 = vld [vmem:[%s1040_s2 + $0x20] sm:$0xff]  ;;  %v798_v62 = vld [vmem:[%s1039_s0 + $0x71] sm:$0xff]  ;;  %v79_v2 = vadd.f32 %v437_v57, %v47_v38 }
  0x1c   :  { %v111_v53 = vadd.f32 %v405_v5, %v78_v14  ;;  %v364_v58 = vld [vmem:[%s1040_s2 + $0x60] sm:$0xff]  ;;  %v803_v63 = vld [vmem:[%s1039_s0 + $0x111] sm:$0xff]  ;;  %v245_v7 = vadd.f32 %v798_v62, %v213_v43  ;;  %v185_v36 = vadd.f32 %v786_v51, %v153_v60  ;;  %v122_v43 = vadd.f32 %v89_v1, %v558_v10  ;;  %v357_v1 = vld [vmem:[%s1040_s2 + $0x28] sm:$0xff] }
  0x1d   :  { %v119_v56 = vadd.f32 %v413_v25, %v86_v17  ;;  %v445_v6 = vld [vmem:[%s1039_s0 + $0xb2] sm:$0xff]  ;;  %v253_v14 = vadd.f32 %v803_v63, %v221_v44  ;;  %v112_v44 = vadd.f32 %v79_v2, %v623_v29  ;;  %v61_v47 = vadd.f32 %v803_v63, %v761_v31  ;;  %v365_v2 = vld [vmem:[%s1040_s2 + $0x68] sm:$0xff] }
  0x1e   :  { %v87_v17 = vadd.f32 %v445_v6, %v55_v46  ;;  %v143_v25 = vadd.f32 %v421_v18, %v111_v53  ;;  %v817_v38 = vld [vmem:[%s1039_s0 + $0x72] sm:$0xff]  ;;  %v52_v53 = vadd.f32 %v683_v49, %v645_v35  ;;  %v210_v60 = vadd.f32 %v177_v32, %v553_v9 }
  0x1f   :  { %v151_v28 = vadd.f32 %v429_v42, %v119_v56  ;;  %v277_v18 = vadd.f32 %v817_v38, %v245_v7  ;;  %v60_v56 = vadd.f32 %v694_v52, %v652_v37  ;;  %v154_v49 = vadd.f32 %v122_v43, %v568_v12 }
  0x20   :  { %v120_v46 = vadd.f32 %v87_v17, %v635_v33 }
  0x21   :  { %v92_v7 = vadd.f32 %v705_v55, %v60_v56 }
  0x5e   :  { %v319_v59 = vpop.permute.xlu2 %318 }
  0x5f   :  { %v340_v4 = vmul.f32 %v319_v59, %v276_v40  ;;  %v348_v5 = vmul.f32 %v319_v59, %v284_v41  ;;  %v822_v40 = vld [vmem:[%s1039_s0 + $0x112] sm:$0xff]  ;;  %v114_v41 = vadd.f32 %v81_v0, %v553_v9  ;;  %v183_v59 = vadd.f32 %v445_v6, %v151_v28 }
  0x60   :  { %v285_v42 = vadd.f32 %v822_v40, %v253_v14  ;;  %v218_v0 = vadd.f32 %v185_v36, %v558_v10  ;;  %v144_v28 = vadd.f32 %v112_v44, %v628_v30  ;;  %v152_v10 = vadd.f32 %v120_v46, %v640_v34 }
  0x61   :  { %v372_v21 = vadd.f32 %v356_v45, %v340_v4  ;;  %v380_v22 = vadd.f32 %v364_v58, %v348_v5  ;;  %v53_v45 = vadd.f32 %v798_v62, %v756_v26  ;;  %v175_v58 = vadd.f32 %v437_v57, %v143_v25  ;;  %v863_v5 = vld [vmem:[%s1039_s0 + $0x80] sm:$0xff] }
  0x62   :  { %v146_v35 = vadd.f32 %v114_v41, %v563_v11  ;;  %v93_v57 = vadd.f32 %v822_v40, %v61_v47  ;;  %v84_v6 = vadd.f32 %v700_v54, %v52_v53  ;;  %v216_v17 = vadd.f32 %v183_v59, %v635_v33  ;;  %v420_v25 = vld [vmem:[%s1039_s0 + $0x120] sm:$0xff] }
  0x63   :  { %389 = vst.msk [vmem:[%s1041_s3 + $0x20] sm:$0xff] %vm384_vm0, %v372_v21  ;;  %v85_v9 = vadd.f32 %v817_v38, %v53_v45  ;;  %v208_v14 = vadd.f32 %v175_v58, %v623_v29  ;;  %v186_v54 = vadd.f32 %v154_v49, %v582_v16  ;;  %v176_v55 = vadd.f32 %v144_v28, %v659_v39  ;;  %v888_v41 = vld [vmem:[%s1039_s0 + $0x81] sm:$0xff] }
  0x64   :  { %397 = vst.msk [vmem:[%s1041_s3 + $0x60] sm:$0xff] %vm384_vm0, %v380_v22  ;;  %v178_v32 = vadd.f32 %v146_v35, %v577_v15  ;;  %v184_v33 = vadd.f32 %v152_v10, %v688_v50  ;;  %v126_v36 = vadd.f32 %v420_v25, %v93_v57  ;;  %v117_v43 = vadd.f32 %v756_v26, %v84_v6  ;;  %v436_v47 = vld [vmem:[%s1039_s0 + $0x121] sm:$0xff] }
  0x65   :  { %v118_v29 = vadd.f32 %v863_v5, %v85_v9  ;;  %v250_v44 = vadd.f32 %v218_v0, %v568_v12  ;;  %v240_v45 = vadd.f32 %v208_v14, %v628_v30  ;;  %v248_v46 = vadd.f32 %v216_v17, %v640_v34  ;;  %v907_v12 = vld [vmem:[%s1039_s0 + $0x82] sm:$0xff] }
  0x66   :  { %v324_v4 = vpop.permute.xlu2 %323  ;;  %v211_v53 = vadd.f32 %v589_v19, %v178_v32  ;;  %v219_v56 = vadd.f32 %v594_v20, %v186_v54  ;;  %v209_v26 = vadd.f32 %v713_v61, %v176_v55  ;;  %v158_v58 = vadd.f32 %v436_v47, %v126_v36  ;;  %v352_v0 = vld [vmem:[%s1040_s2] sm:$0xff]  ;;  %v476_v55 = vld [vmem:[%s1039_s0 + $0x91] sm:$0xff] }
  0x67   :  { %v341_v37 = vmul.f32 %v324_v4, %v277_v18  ;;  %v349_v52 = vmul.f32 %v324_v4, %v285_v42  ;;  %v125_v18 = vadd.f32 %v761_v31, %v92_v7  ;;  %v242_v42 = vadd.f32 %v210_v60, %v563_v11  ;;  %v354_v60 = vld [vmem:[%s1040_s2 + $0x10] sm:$0xff] }
  0x68   :  { %v150_v31 = vadd.f32 %v888_v41, %v118_v29  ;;  %v217_v11 = vadd.f32 %v727_v3, %v184_v33  ;;  %v149_v30 = vadd.f32 %v798_v62, %v117_v43  ;;  %v282_v20 = vadd.f32 %v250_v44, %v582_v16  ;;  %v918_v3 = vld [vmem:[%s1039_s0 + $0x122] sm:$0xff] }
  0x69   :  { %v373_v21 = vadd.f32 %v357_v1, %v341_v37  ;;  %v381_v22 = vadd.f32 %v365_v2, %v349_v52  ;;  %v157_v34 = vadd.f32 %v803_v63, %v125_v18  ;;  %v274_v19 = vadd.f32 %v242_v42, %v577_v15  ;;  %v360_v37 = vld [vmem:[%s1040_s2 + $0x40] sm:$0xff] }
  0x6a   :  { %v272_v61 = vadd.f32 %v240_v45, %v659_v39  ;;  %v280_v59 = vadd.f32 %v248_v46, %v688_v50  ;;  %v243_v62 = vadd.f32 %v601_v23, %v211_v53  ;;  %v251_v63 = vadd.f32 %v606_v24, %v219_v56  ;;  %v362_v39 = vld [vmem:[%s1040_s2 + $0x50] sm:$0xff]  ;;  %v361_v45 = vld [vmem:[%s1040_s2 + $0x48] sm:$0xff] }
  0x6b   :  { %390 = vst.msk [vmem:[%s1041_s3 + $0x28] sm:$0xff] %vm384_vm0, %v373_v21  ;;  %v241_v15 = vadd.f32 %v738_v8, %v209_v26  ;;  %v182_v16 = vadd.f32 %v907_v12, %v150_v31  ;;  %v249_v2 = vadd.f32 %v743_v13, %v217_v11  ;;  %v190_v23 = vadd.f32 %v918_v3, %v158_v58  ;;  %v460_v24 = vld [vmem:[%s1039_s0 + $0x90] sm:$0xff]  ;;  %v1044_v21 = vld [vmem:[#allocation2_spill] sm:$0xff] }
  0x6c   :  { %398 = vst.msk [vmem:[%s1041_s3 + $0x68] sm:$0xff] %vm384_vm0, %v381_v22  ;;  %v181_v8 = vadd.f32 %v817_v38, %v149_v30  ;;  %v189_v4 = vadd.f32 %v822_v40, %v157_v34  ;;  %v468_v13 = vld [vmem:[%s1039_s0 + $0x130] sm:$0xff]  ;;  %v275_v17 = vadd.f32 %v613_v27, %v243_v62  ;;  %v283_v22 = vadd.f32 %v1044_v21, %v251_v63  ;;  %v355_v27 = vld [vmem:[%s1040_s2 + $0x18] sm:$0xff] }
  0x6d   :  { %v215_v6 = vadd.f32 %v460_v24, %v182_v16  ;;  %v223_v38 = vadd.f32 %v468_v13, %v190_v23  ;;  %v273_v32 = vadd.f32 %v781_v48, %v241_v15  ;;  %v281_v54 = vadd.f32 %v786_v51, %v249_v2  ;;  %v363_v48 = vld [vmem:[%s1040_s2 + $0x58] sm:$0xff]  ;;  %v366_v63 = vld [vmem:[%s1040_s2 + $0x70] sm:$0xff] }
  0x6e   :  { %v214_v40 = vadd.f32 %v863_v5, %v181_v8  ;;  %v222_v14 = vadd.f32 %v420_v25, %v189_v4  ;;  %v484_v5 = vld [vmem:[%s1039_s0 + $0x131] sm:$0xff]  ;;  %v353_v25 = vld [vmem:[%s1040_s2 + $0x8] sm:$0xff] }
  0x6f   :  { %v247_v33 = vadd.f32 %v476_v55, %v215_v6  ;;  %v255_v36 = vadd.f32 %v484_v5, %v223_v38  ;;  %v492_v56 = vld [vmem:[%s1039_s0 + $0x92] sm:$0xff] }
  0x70   :  { %v246_v43 = vadd.f32 %v888_v41, %v214_v40  ;;  %v254_v18 = vadd.f32 %v436_v47, %v222_v14  ;;  %v500_v26 = vld [vmem:[%s1039_s0 + $0x132] sm:$0xff] }
  0x71   :  { %v279_v58 = vadd.f32 %v492_v56, %v247_v33  ;;  %v287_v30 = vadd.f32 %v500_v26, %v255_v36 }
  0x72   :  { %v278_v34 = vadd.f32 %v907_v12, %v246_v43  ;;  %v359_v12 = vld [vmem:[%s1040_s2 + $0x38] sm:$0xff] }
  0x74   :  { %v309_v50 = vpop.permute.xlu1 %308  ;;  %v299_v1 = vpop.permute.xlu0 %298 }
  0x75   :  { %v338_v35 = vmul.f32 %v309_v50, %v274_v19  ;;  %v346_v49 = vmul.f32 %v309_v50, %v282_v20  ;;  %v336_v52 = vmul.f32 %v299_v1, %v272_v61  ;;  %v344_v28 = vmul.f32 %v299_v1, %v280_v59  ;;  %v367_v20 = vld [vmem:[%s1040_s2 + $0x78] sm:$0xff]  ;;  %v358_v59 = vld [vmem:[%s1040_s2 + $0x30] sm:$0xff] }
  0x76   :  { %v286_v19 = vadd.f32 %v918_v3, %v254_v18 }
  0x77   :  { %v370_v9 = vadd.f32 %v354_v60, %v338_v35  ;;  %v378_v10 = vadd.f32 %v362_v39, %v346_v49  ;;  %v368_v57 = vadd.f32 %v352_v0, %v336_v52  ;;  %v376_v7 = vadd.f32 %v360_v37, %v344_v28 }
  0x79   :  { %387 = vst.msk [vmem:[%s1041_s3 + $0x10] sm:$0xff] %vm384_vm0, %v370_v9 }
  0x7a   :  { %395 = vst.msk [vmem:[%s1041_s3 + $0x50] sm:$0xff] %vm384_vm0, %v378_v10 }
  0x7b   :  { %385 = vst.msk [vmem:[%s1041_s3] sm:$0xff] %vm384_vm0, %v368_v57 }
  0x7c   :  { %393 = vst.msk [vmem:[%s1041_s3 + $0x40] sm:$0xff] %vm384_vm0, %v376_v7  ;;  %v314_v51 = vpop.permute.xlu1 %313  ;;  %v304_v29 = vpop.permute.xlu0 %303 }
  0x7d   :  { %v339_v42 = vmul.f32 %v314_v51, %v275_v17  ;;  %v347_v44 = vmul.f32 %v314_v51, %v283_v22  ;;  %v337_v46 = vmul.f32 %v304_v29, %v273_v32  ;;  %v345_v53 = vmul.f32 %v304_v29, %v281_v54 }
  0x7f   :  { %v371_v31 = vadd.f32 %v355_v27, %v339_v42  ;;  %v379_v11 = vadd.f32 %v363_v48, %v347_v44  ;;  %v369_v41 = vadd.f32 %v353_v25, %v337_v46  ;;  %v377_v47 = vadd.f32 %v361_v45, %v345_v53 }
  0x81   :  { %388 = vst.msk [vmem:[%s1041_s3 + $0x18] sm:$0xff] %vm384_vm0, %v371_v31 }
  0x82   :  { %396 = vst.msk [vmem:[%s1041_s3 + $0x58] sm:$0xff] %vm384_vm0, %v379_v11 }
  0x83   :  { %386 = vst.msk [vmem:[%s1041_s3 + $0x8] sm:$0xff] %vm384_vm0, %v369_v41 }
  0x84   :  { %394 = vst.msk [vmem:[%s1041_s3 + $0x48] sm:$0xff] %vm384_vm0, %v377_v47  ;;  %v334_v61 = vpop.permute.xlu1 %333  ;;  %v329_v3 = vpop.permute.xlu0 %328 }
  0x85   :  { %v343_v60 = vmul.f32 %v334_v61, %v279_v58  ;;  %v351_v62 = vmul.f32 %v334_v61, %v287_v30  ;;  %v342_v15 = vmul.f32 %v329_v3, %v278_v34  ;;  %v350_v16 = vmul.f32 %v329_v3, %v286_v19 }
  0x87   :  { %v375_v39 = vadd.f32 %v359_v12, %v343_v60  ;;  %v383_v50 = vadd.f32 %v367_v20, %v351_v62  ;;  %v374_v0 = vadd.f32 %v358_v59, %v342_v15  ;;  %v382_v1 = vadd.f32 %v366_v63, %v350_v16 }
  0x89   :  { %392 = vst.msk [vmem:[%s1041_s3 + $0x38] sm:$0xff] %vm384_vm0, %v375_v39 }
  0x8a   :  { %400 = vst.msk [vmem:[%s1041_s3 + $0x78] sm:$0xff] %vm384_vm0, %v383_v50 }
  0x8b   :  { %391 = vst.msk [vmem:[%s1041_s3 + $0x30] sm:$0xff] %vm384_vm0, %v374_v0 }
  0x8c   :  { %399 = vst.msk [vmem:[%s1041_s3 + $0x70] sm:$0xff] %vm384_vm0, %v382_v1 }

// kernel: backbone_nb201_forward.42
= control target key start
LH: loop header
LB: loop body
LE: loop exit
PB: predicated region body
PF: predicated region fallthrough
CT: control target
= control target key end

     0   :  { %v168_v1 = vmov 0   ;;  %vm29_vm0 = vcmask 523264   ;;  %vm127_vm1 = vcmask 261120   ;;  %s269_s0 = inlined_call_operand.vmem [shape: f32[64,32], index: 0, kind: input, shape index: {}]   ;;  %s270_s2 = inlined_call_operand.vmem [shape: f32[32,1], index: 2, kind: input, shape index: {}]   ;;  %s271_s1 = inlined_call_operand.vmem [shape: f32[32,64], index: 1, kind: input, shape index: {}]   ;;  %s272_s3 = inlined_call_operand.vmem [shape: f32[32,1], index: 3, kind: input, shape index: {}]   ;;  %s273_s4 = inlined_call_operand.vmem [shape: f32[32,32], index: 4, kind: output, shape index: {}]  }
   0x1   :  { %v24_v0 = vld [vmem:[%s269_s0 + $0x38] sm:$0xff]  ;;  %166 = vset.pattern.permute.xlu1 %v168_v1  ;;  %165 = vset.pattern.permute.xlu0 %v168_v1  ;;  %v73_v2 = vld [vmem:[%s270_s2 + $0x10] sm:$0xff]  ;;  %v71_v3 = vld [vmem:[%s270_s2] sm:$0xff] }
   0x2   :  { %50 = vmatpush.msra.mxu0 %v24_v0  ;;  %140 = vmatpush.msra.mxu1 %v24_v0  ;;  %v23_v4 = vld [vmem:[%s269_s0 + $0x30] sm:$0xff]  ;;  %v22_v5 = vld [vmem:[%s269_s0 + $0x28] sm:$0xff]  ;;  %v21_v6 = vld [vmem:[%s269_s0 + $0x20] sm:$0xff] }
   0x3   :  { %141 = vmatpush.msra.mxu2 %v24_v0  ;;  %142 = vmatpush.msra.mxu3 %v24_v0  ;;  %v20_v7 = vld [vmem:[%s269_s0 + $0x18] sm:$0xff]  ;;  %v72_v9 = vld [vmem:[%s270_s2 + $0x8] sm:$0xff]  ;;  %v19_v10 = vld [vmem:[%s269_s0 + $0x10] sm:$0xff] }
   0x4   :  { %87 = vperm.xlu1 %166, %v73_v2   ;;  %77 = vperm.xlu0 %165, %v71_v3   ;;  %v74_v8 = vld [vmem:[%s270_s2 + $0x18] sm:$0xff]  ;;  %v18_v11 = vld [vmem:[%s269_s0 + $0x8] sm:$0xff]  ;;  %v17_v12 = vld [vmem:[%s269_s0] sm:$0xff] }
   0x5   :  { %51 = vmatpush.msra.mxu0 %v23_v4  ;;  %143 = vmatpush.msra.mxu1 %v23_v4  ;;  %v25_v13 = vld [vmem:[%s271_s1] sm:$0xff]  ;;  %v26_v14 = vld [vmem:[%s271_s1 + $0x8] sm:$0xff]  ;;  %v27_v15 = vld [vmem:[%s271_s1 + $0x10] sm:$0xff] }
   0x6   :  { %144 = vmatpush.msra.mxu2 %v23_v4  ;;  %145 = vmatpush.msra.mxu3 %v23_v4  ;;  %v28_v16 = vld [vmem:[%s271_s1 + $0x18] sm:$0xff]  ;;  %v101_v18 = vld [vmem:[%s272_s3 + $0x10] sm:$0xff]  ;;  %v99_v19 = vld [vmem:[%s272_s3] sm:$0xff] }
   0x7   :  { %52 = vmatpush.msra.mxu0 %v22_v5  ;;  %146 = vmatpush.msra.mxu1 %v22_v5  ;;  %v102_v17 = vld [vmem:[%s272_s3 + $0x18] sm:$0xff]  ;;  %v100_v20 = vld [vmem:[%s272_s3 + $0x8] sm:$0xff] }
   0x8   :  { %147 = vmatpush.msra.mxu2 %v22_v5  ;;  %148 = vmatpush.msra.mxu3 %v22_v5 }
   0x9   :  { %53 = vmatpush.msra.mxu0 %v21_v6  ;;  %149 = vmatpush.msra.mxu1 %v21_v6 }
   0xa   :  { %150 = vmatpush.msra.mxu2 %v21_v6  ;;  %151 = vmatpush.msra.mxu3 %v21_v6 }
   0xb   :  { %54 = vmatpush.msra.mxu0 %v20_v7  ;;  %152 = vmatpush.msra.mxu1 %v20_v7 }
   0xc   :  { %153 = vmatpush.msra.mxu2 %v20_v7  ;;  %154 = vmatpush.msra.mxu3 %v20_v7 }
   0xd   :  { %92 = vperm.xlu1 %166, %v74_v8   ;;  %82 = vperm.xlu0 %165, %v72_v9  }
   0xe   :  { %55 = vmatpush.msra.mxu0 %v19_v10  ;;  %155 = vmatpush.msra.mxu1 %v19_v10 }
   0xf   :  { %156 = vmatpush.msra.mxu2 %v19_v10  ;;  %157 = vmatpush.msra.mxu3 %v19_v10 }
  0x10   :  { %56 = vmatpush.msra.mxu0 %v18_v11  ;;  %158 = vmatpush.msra.mxu1 %v18_v11 }
  0x11   :  { %159 = vmatpush.msra.mxu2 %v18_v11  ;;  %160 = vmatpush.msra.mxu3 %v18_v11 }
  0x12   :  { %57 = vmatpush.msra.mxu0 %v17_v12  ;;  %161 = vmatpush.msra.mxu1 %v17_v12 }
  0x13   :  { %162 = vmatpush.msra.mxu2 %v17_v12  ;;  %163 = vmatpush.msra.mxu3 %v17_v12 }
  0x14   :  { %136 = vmatmul.msk.f32.vlgmr.msra.gmra.mxu0 %vm29_vm0, %v25_v13  ;;  %137 = vmatmul.msk.f32.vlgmr.msra.gmra.mxu1 %vm29_vm0, %v26_v14 }
  0x15   :  { %138 = vmatmul.msk.f32.vlgmr.msra.gmra.mxu2 %vm29_vm0, %v27_v15  ;;  %139 = vmatmul.msk.f32.vlgmr.msra.gmra.mxu3 %vm29_vm0, %v28_v16 }
  0x16   :  { %120 = vperm.xlu1 %166, %v102_v17   ;;  %115 = vperm.xlu0 %165, %v101_v18  }
  0x17   :  { %167 = vset.pattern.permute.xlu2 %v168_v1 }
  0x18   :  { %105 = vperm.xlu2 %167, %v99_v19  }
  0x20   :  { %110 = vperm.xlu2 %167, %v100_v20  }
  0x72   :  { %v106_v23 = vpop.permute.xlu2 %105 }
  0x76   :  { %v88_v21 = vpop.permute.xlu1 %87  ;;  %v78_v22 = vpop.permute.xlu0 %77 }
  0x7a   :  { %v111_v30 = vpop.permute.xlu2 %110 }
  0x7f   :  { %v93_v24 = vpop.permute.xlu1 %92  ;;  %v83_v25 = vpop.permute.xlu0 %82 }
  0x88   :  { %v121_v37 = vpop.permute.xlu1 %120  ;;  %v116_v38 = vpop.permute.xlu0 %115 }
  0x91   :  { %v59_v26 = vpop.f32.mrf.mxu0  ;;  %v62_v27 = vpop.f32.mrf.mxu1 }
  0x92   :  { %v95_v28 = vmul.f32 %v78_v22, %v59_v26  ;;  %v96_v29 = vmul.f32 %v83_v25, %v62_v27 }
  0x94   :  { %v123_v31 = vadd.f32 %v106_v23, %v95_v28  ;;  %v124_v32 = vadd.f32 %v111_v30, %v96_v29 }
  0x96   :  { %128 = vst.msk [vmem:[%s273_s4] sm:$0xff] %vm127_vm1, %v123_v31 }
  0x97   :  { %129 = vst.msk [vmem:[%s273_s4 + $0x8] sm:$0xff] %vm127_vm1, %v124_v32 }
  0x98   :  { %v65_v33 = vpop.f32.mrf.mxu2  ;;  %v68_v34 = vpop.f32.mrf.mxu3 }
  0x99   :  { %v97_v35 = vmul.f32 %v88_v21, %v65_v33  ;;  %v98_v36 = vmul.f32 %v93_v24, %v68_v34 }
  0x9b   :  { %v125_v39 = vadd.f32 %v116_v38, %v97_v35  ;;  %v126_v40 = vadd.f32 %v121_v37, %v98_v36 }
  0x9d   :  { %130 = vst.msk [vmem:[%s273_s4 + $0x10] sm:$0xff] %vm127_vm1, %v125_v39 }
  0x9e   :  { %131 = vst.msk [vmem:[%s273_s4 + $0x18] sm:$0xff] %vm127_vm1, %v126_v40 }

// kernel: backbone_nb201_forward.41
= control target key start
LH: loop header
LB: loop body
LE: loop exit
PB: predicated region body
PF: predicated region fallthrough
CT: control target
= control target key end

     0   :  { %v237_v3 = vmov 0   ;;  %vm61_vm0 = vcmask 130048   ;;  %vm188_vm1 = vcmask 261120   ;;  %s385_s0 = inlined_call_operand.vmem [shape: f32[144,32], index: 0, kind: input, shape index: {}]   ;;  %s386_s1 = inlined_call_operand.vmem [shape: f32[32,144], index: 1, kind: input, shape index: {}]   ;;  %s387_s2 = inlined_call_operand.vmem [shape: f32[32,1], index: 2, kind: input, shape index: {}]   ;;  %s388_s3 = inlined_call_operand.vmem [shape: f32[32,1], index: 3, kind: input, shape index: {}]   ;;  %s389_s4 = inlined_call_operand.vmem [shape: f32[32,32], index: 4, kind: output, shape index: {}]  }
   0x1   :  { %v32_v0 = vld [vmem:[%s385_s0 + $0x78] sm:$0xff]  ;;  %v31_v1 = vld [vmem:[%s385_s0 + $0x70] sm:$0xff]  ;;  %v30_v2 = vld [vmem:[%s385_s0 + $0x68] sm:$0xff]  ;;  %235 = vset.pattern.permute.xlu1 %v237_v3  ;;  %234 = vset.pattern.permute.xlu0 %v237_v3 }
   0x2   :  { %v50_v4 = vmax.f32 %v32_v0, 0.0  ;;  %v49_v5 = vmax.f32 %v31_v1, 0.0  ;;  %236 = vset.pattern.permute.xlu2 %v237_v3  ;;  %v29_v6 = vld [vmem:[%s385_s0 + $0x60] sm:$0xff]  ;;  %v48_v7 = vmax.f32 %v30_v2, 0.0  ;;  %v34_v8 = vld [vmem:[%s385_s0 + $0x88] sm:$0xff]  ;;  %v28_v9 = vld [vmem:[%s385_s0 + $0x58] sm:$0xff] }
   0x3   :  { %v52_v10 = vmax.f32 %v34_v8, 0.0  ;;  %v33_v11 = vld [vmem:[%s385_s0 + $0x80] sm:$0xff]  ;;  %v47_v12 = vmax.f32 %v29_v6, 0.0  ;;  %v27_v14 = vld [vmem:[%s385_s0 + $0x50] sm:$0xff]  ;;  %v46_v15 = vmax.f32 %v28_v9, 0.0  ;;  %v54_v16 = vld [vmem:[%s386_s1 + $0x8] sm:$0xff] }
   0x4   :  { %74 = vmatpush.msra.mxu0 %v50_v4  ;;  %201 = vmatpush.msra.mxu2 %v50_v4  ;;  %v51_v13 = vmax.f32 %v33_v11, 0.0  ;;  %v26_v17 = vld [vmem:[%s385_s0 + $0x48] sm:$0xff]  ;;  %v45_v18 = vmax.f32 %v27_v14, 0.0  ;;  %v134_v19 = vld [vmem:[%s387_s2 + $0x10] sm:$0xff]  ;;  %v25_v20 = vld [vmem:[%s385_s0 + $0x40] sm:$0xff] }
   0x5   :  { %202 = vmatpush.msra.mxu3 %v50_v4  ;;  %117 = vmatpush.msra.mxu1 %v52_v10  ;;  %v44_v21 = vmax.f32 %v26_v17, 0.0  ;;  %v132_v22 = vld [vmem:[%s387_s2] sm:$0xff]  ;;  %v24_v23 = vld [vmem:[%s385_s0 + $0x38] sm:$0xff]  ;;  %v43_v24 = vmax.f32 %v25_v20, 0.0  ;;  %v23_v26 = vld [vmem:[%s385_s0 + $0x30] sm:$0xff] }
   0x6   :  { %75 = vmatpush.msra.mxu0 %v49_v5  ;;  %203 = vmatpush.msra.mxu2 %v49_v5  ;;  %v160_v25 = vld [vmem:[%s388_s3] sm:$0xff]  ;;  %v42_v27 = vmax.f32 %v24_v23, 0.0  ;;  %v56_v28 = vld [vmem:[%s386_s1 + $0x18] sm:$0xff]  ;;  %v22_v29 = vld [vmem:[%s385_s0 + $0x28] sm:$0xff]  ;;  %v41_v30 = vmax.f32 %v23_v26, 0.0 }
   0x7   :  { %204 = vmatpush.msra.mxu3 %v49_v5  ;;  %118 = vmatpush.msra.mxu1 %v51_v13  ;;  %v135_v31 = vld [vmem:[%s387_s2 + $0x18] sm:$0xff]  ;;  %v21_v32 = vld [vmem:[%s385_s0 + $0x20] sm:$0xff]  ;;  %v40_v33 = vmax.f32 %v22_v29, 0.0  ;;  %v133_v34 = vld [vmem:[%s387_s2 + $0x8] sm:$0xff] }
   0x8   :  { %76 = vmatpush.msra.mxu0 %v48_v7  ;;  %205 = vmatpush.msra.mxu2 %v48_v7  ;;  %v20_v35 = vld [vmem:[%s385_s0 + $0x18] sm:$0xff]  ;;  %v39_v36 = vmax.f32 %v21_v32, 0.0  ;;  %v161_v37 = vld [vmem:[%s388_s3 + $0x8] sm:$0xff]  ;;  %v19_v38 = vld [vmem:[%s385_s0 + $0x10] sm:$0xff] }
   0x9   :  { %206 = vmatpush.msra.mxu3 %v48_v7  ;;  %197 = vmatmul.msk.f32.vlgmr.msra.gmra.mxu1 %vm61_vm0, %v54_v16  ;;  %v38_v39 = vmax.f32 %v20_v35, 0.0  ;;  %v58_v40 = vld [vmem:[%s386_s1 + $0x28] sm:$0xff]  ;;  %v37_v42 = vmax.f32 %v19_v38, 0.0  ;;  %v163_v43 = vld [vmem:[%s388_s3 + $0x18] sm:$0xff]  ;;  %v17_v44 = vld [vmem:[%s385_s0] sm:$0xff] }
   0xa   :  { %77 = vmatpush.msra.mxu0 %v47_v12  ;;  %207 = vmatpush.msra.mxu2 %v47_v12  ;;  %v18_v41 = vld [vmem:[%s385_s0 + $0x8] sm:$0xff]  ;;  %v162_v46 = vld [vmem:[%s388_s3 + $0x10] sm:$0xff]  ;;  %v35_v47 = vmax.f32 %v17_v44, 0.0  ;;  %v53_v48 = vld [vmem:[%s386_s1] sm:$0xff] }
   0xb   :  { %208 = vmatpush.msra.mxu3 %v47_v12  ;;  %148 = vperm.xlu1 %235, %v134_v19   ;;  %v36_v45 = vmax.f32 %v18_v41, 0.0  ;;  %v55_v49 = vld [vmem:[%s386_s1 + $0x10] sm:$0xff]  ;;  %v57_v50 = vld [vmem:[%s386_s1 + $0x20] sm:$0xff]  ;;  %v60_v51 = vld [vmem:[%s386_s1 + $0x38] sm:$0xff] }
   0xc   :  { %78 = vmatpush.msra.mxu0 %v46_v15  ;;  %209 = vmatpush.msra.mxu2 %v46_v15  ;;  %v59_v52 = vld [vmem:[%s386_s1 + $0x30] sm:$0xff] }
   0xd   :  { %210 = vmatpush.msra.mxu3 %v46_v15  ;;  %138 = vperm.xlu0 %234, %v132_v22  }
   0xe   :  { %79 = vmatpush.msra.mxu0 %v45_v18  ;;  %211 = vmatpush.msra.mxu2 %v45_v18 }
   0xf   :  { %212 = vmatpush.msra.mxu3 %v45_v18  ;;  %166 = vperm.xlu2 %236, %v160_v25  }
  0x10   :  { %80 = vmatpush.msra.mxu0 %v44_v21  ;;  %213 = vmatpush.msra.mxu2 %v44_v21 }
  0x11   :  { %214 = vmatpush.msra.mxu3 %v44_v21  ;;  %198 = vmatmul.msk.f32.gmra.mxu1 %vm61_vm0, %v56_v28 }
  0x12   :  { %81 = vmatpush.msra.mxu0 %v43_v24  ;;  %215 = vmatpush.msra.mxu2 %v43_v24 }
  0x13   :  { %216 = vmatpush.msra.mxu3 %v43_v24  ;;  %153 = vperm.xlu1 %235, %v135_v31  }
  0x14   :  { %82 = vmatpush.msra.mxu0 %v42_v27  ;;  %217 = vmatpush.msra.mxu2 %v42_v27 }
  0x15   :  { %218 = vmatpush.msra.mxu3 %v42_v27  ;;  %143 = vperm.xlu0 %234, %v133_v34  }
  0x16   :  { %83 = vmatpush.msra.mxu0 %v41_v30  ;;  %219 = vmatpush.msra.mxu2 %v41_v30 }
  0x17   :  { %220 = vmatpush.msra.mxu3 %v41_v30  ;;  %171 = vperm.xlu2 %236, %v161_v37  }
  0x18   :  { %84 = vmatpush.msra.mxu0 %v40_v33  ;;  %221 = vmatpush.msra.mxu2 %v40_v33 }
  0x19   :  { %222 = vmatpush.msra.mxu3 %v40_v33  ;;  %199 = vmatmul.msk.f32.gmra.mxu1 %vm61_vm0, %v58_v40 }
  0x1a   :  { %85 = vmatpush.msra.mxu0 %v39_v36  ;;  %223 = vmatpush.msra.mxu2 %v39_v36 }
  0x1b   :  { %224 = vmatpush.msra.mxu3 %v39_v36  ;;  %181 = vperm.xlu1 %235, %v163_v43  }
  0x1c   :  { %86 = vmatpush.msra.mxu0 %v38_v39  ;;  %225 = vmatpush.msra.mxu2 %v38_v39 }
  0x1d   :  { %226 = vmatpush.msra.mxu3 %v38_v39  ;;  %176 = vperm.xlu0 %234, %v162_v46  }
  0x1e   :  { %87 = vmatpush.msra.mxu0 %v37_v42  ;;  %227 = vmatpush.msra.mxu2 %v37_v42 }
  0x1f   :  { %228 = vmatpush.msra.mxu3 %v37_v42 }
  0x20   :  { %88 = vmatpush.msra.mxu0 %v36_v45  ;;  %229 = vmatpush.msra.mxu2 %v36_v45 }
  0x21   :  { %230 = vmatpush.msra.mxu3 %v36_v45  ;;  %200 = vmatmul.msk.f32.gmra.mxu1 %vm61_vm0, %v60_v51 }
  0x22   :  { %89 = vmatpush.msra.mxu0 %v35_v47  ;;  %231 = vmatpush.msra.mxu2 %v35_v47 }
  0x23   :  { %232 = vmatpush.msra.mxu3 %v35_v47  ;;  %90 = vmatmul.f32.vlgmr.msra.gmra.mxu0 %v53_v48 }
  0x24   :  { %93 = vmatmul.f32.vlgmr.msra.gmra.mxu2 %v55_v49  ;;  %96 = vmatmul.f32.vlgmr.msra.gmra.mxu3 %v57_v50 }
  0x2c   :  { %99 = vmatmul.f32.gmra.mxu3 %v59_v52 }
  0x69   :  { %v167_v57 = vpop.permute.xlu2 %166 }
  0x71   :  { %v172_v5 = vpop.permute.xlu2 %171 }
  0x7d   :  { %v149_v56 = vpop.permute.xlu1 %148 }
  0x7f   :  { %v139_v54 = vpop.permute.xlu0 %138 }
  0x85   :  { %v154_v4 = vpop.permute.xlu1 %153 }
  0x86   :  { %v120_v53 = vpop.f32.mrf.mxu1 }
  0x87   :  { %v144_v59 = vpop.permute.xlu0 %143 }
  0x8d   :  { %v182_v15 = vpop.permute.xlu1 %181 }
  0x8e   :  { %v123_v55 = vpop.f32.mrf.mxu1 }
  0x8f   :  { %v177_v8 = vpop.permute.xlu0 %176 }
  0x96   :  { %v126_v62 = vpop.f32.mrf.mxu1 }
  0x9e   :  { %v129_v11 = vpop.f32.mrf.mxu1 }
  0xa0   :  { %v91_v58 = vpop.f32.mrf.mxu0 }
  0xa1   :  { %v121_v60 = vadd.f32 %v120_v53, %v91_v58 }
  0xa3   :  { %v156_v61 = vmul.f32 %v139_v54, %v121_v60 }
  0xa5   :  { %v184_v63 = vadd.f32 %v167_v57, %v156_v61 }
  0xa7   :  { %189 = vst.msk [vmem:[%s389_s4] sm:$0xff] %vm188_vm1, %v184_v63  ;;  %v94_v0 = vpop.f32.mrf.mxu2  ;;  %v97_v1 = vpop.f32.mrf.mxu3 }
  0xa8   :  { %v124_v2 = vadd.f32 %v123_v55, %v94_v0  ;;  %v127_v3 = vadd.f32 %v126_v62, %v97_v1 }
  0xaa   :  { %v158_v6 = vmul.f32 %v149_v56, %v127_v3  ;;  %v157_v7 = vmul.f32 %v144_v59, %v124_v2 }
  0xac   :  { %v186_v9 = vadd.f32 %v177_v8, %v158_v6  ;;  %v185_v10 = vadd.f32 %v172_v5, %v157_v7 }
  0xae   :  { %191 = vst.msk [vmem:[%s389_s4 + $0x10] sm:$0xff] %vm188_vm1, %v186_v9 }
  0xaf   :  { %190 = vst.msk [vmem:[%s389_s4 + $0x8] sm:$0xff] %vm188_vm1, %v185_v10  ;;  %v100_v12 = vpop.f32.mrf.mxu3 }
  0xb0   :  { %v130_v13 = vadd.f32 %v129_v11, %v100_v12 }
  0xb2   :  { %v159_v14 = vmul.f32 %v154_v4, %v130_v13 }
  0xb4   :  { %v187_v16 = vadd.f32 %v182_v15, %v159_v14 }
  0xb6   :  { %192 = vst.msk [vmem:[%s389_s4 + $0x18] sm:$0xff] %vm188_vm1, %v187_v16 }

// kernel: backbone_nb201_forward.43
= control target key start
LH: loop header
LB: loop body
LE: loop exit
PB: predicated region body
PF: predicated region fallthrough
CT: control target
= control target key end

     0   :  { %vm104_vm0 = vcmask 261120   ;;  %v300_v57 = vmov 0   ;;  %s531_s0 = inlined_call_operand.vmem [shape: f32[288,32], index: 0, kind: input, shape index: {}]   ;;  %s532_s1 = inlined_call_operand.vmem [shape: f32[32,288], index: 1, kind: input, shape index: {}]   ;;  %s533_s2 = inlined_call_operand.vmem [shape: f32[32,1], index: 2, kind: input, shape index: {}]   ;;  %s534_s3 = inlined_call_operand.vmem [shape: f32[32,1], index: 3, kind: input, shape index: {}]   ;;  %s535_s4 = inlined_call_operand.vmem [shape: f32[32,32], index: 4, kind: input, shape index: {}]   ;;  %s536_s5 = inlined_call_operand.vmem [shape: f32[32,32], index: 5, kind: output, shape index: {}]  }
   0x1   :  { %v35_v0 = vld [vmem:[%s531_s0 + $0x78] sm:$0xff]  ;;  %v34_v2 = vld [vmem:[%s531_s0 + $0x70] sm:$0xff]  ;;  %v33_v7 = vld [vmem:[%s531_s0 + $0x68] sm:$0xff]  ;;  %298 = vset.pattern.permute.xlu1 %v300_v57  ;;  %297 = vset.pattern.permute.xlu0 %v300_v57 }
   0x2   :  { %v51_v1 = vld [vmem:[%s531_s0 + $0xf8] sm:$0xff]  ;;  %v71_v3 = vmax.f32 %v35_v0, 0.0  ;;  %v70_v5 = vmax.f32 %v34_v2, 0.0  ;;  %v50_v6 = vld [vmem:[%s531_s0 + $0xf0] sm:$0xff]  ;;  %v49_v8 = vld [vmem:[%s531_s0 + $0xe8] sm:$0xff]  ;;  %v69_v12 = vmax.f32 %v33_v7, 0.0  ;;  %299 = vset.pattern.permute.xlu2 %v300_v57 }
   0x3   :  { %v87_v4 = vmax.f32 %v51_v1, 0.0  ;;  %v86_v9 = vmax.f32 %v50_v6, 0.0  ;;  %v32_v10 = vld [vmem:[%s531_s0 + $0x60] sm:$0xff]  ;;  %v85_v13 = vmax.f32 %v49_v8, 0.0  ;;  %v31_v14 = vld [vmem:[%s531_s0 + $0x58] sm:$0xff]  ;;  %v30_v18 = vld [vmem:[%s531_s0 + $0x50] sm:$0xff] }
   0x4   :  { %v48_v11 = vld [vmem:[%s531_s0 + $0xe0] sm:$0xff]  ;;  %117 = vmatpush.msra.mxu0 %v71_v3  ;;  %280 = vmatpush.msra.mxu3 %v71_v3  ;;  %v47_v15 = vld [vmem:[%s531_s0 + $0xd8] sm:$0xff]  ;;  %v68_v16 = vmax.f32 %v32_v10, 0.0  ;;  %v46_v19 = vld [vmem:[%s531_s0 + $0xd0] sm:$0xff]  ;;  %v67_v20 = vmax.f32 %v31_v14, 0.0  ;;  %v66_v27 = vmax.f32 %v30_v18, 0.0 }
   0x5   :  { %146 = vmatpush.msra.mxu1 %v87_v4  ;;  %v84_v17 = vmax.f32 %v48_v11, 0.0  ;;  %v83_v21 = vmax.f32 %v47_v15, 0.0  ;;  %v55_v22 = vld [vmem:[%s531_s0 + $0x118] sm:$0xff]  ;;  %v29_v23 = vld [vmem:[%s531_s0 + $0x48] sm:$0xff]  ;;  %v54_v26 = vld [vmem:[%s531_s0 + $0x110] sm:$0xff]  ;;  %v82_v28 = vmax.f32 %v46_v19, 0.0 }
   0x6   :  { %118 = vmatpush.msra.mxu0 %v70_v5  ;;  %281 = vmatpush.msra.mxu3 %v70_v5  ;;  %v45_v24 = vld [vmem:[%s531_s0 + $0xc8] sm:$0xff]  ;;  %v91_v25 = vmax.f32 %v55_v22, 0.0  ;;  %v90_v29 = vmax.f32 %v54_v26, 0.0  ;;  %v28_v31 = vld [vmem:[%s531_s0 + $0x40] sm:$0xff]  ;;  %v65_v35 = vmax.f32 %v29_v23, 0.0  ;;  %v27_v37 = vld [vmem:[%s531_s0 + $0x38] sm:$0xff] }
   0x7   :  { %147 = vmatpush.msra.mxu1 %v86_v9  ;;  %v53_v30 = vld [vmem:[%s531_s0 + $0x108] sm:$0xff]  ;;  %v44_v32 = vld [vmem:[%s531_s0 + $0xc0] sm:$0xff]  ;;  %v81_v36 = vmax.f32 %v45_v24, 0.0  ;;  %v43_v38 = vld [vmem:[%s531_s0 + $0xb8] sm:$0xff]  ;;  %v64_v40 = vmax.f32 %v28_v31, 0.0  ;;  %v63_v44 = vmax.f32 %v27_v37, 0.0 }
   0x8   :  { %119 = vmatpush.msra.mxu0 %v69_v12  ;;  %282 = vmatpush.msra.mxu3 %v69_v12  ;;  %v89_v33 = vmax.f32 %v53_v30, 0.0  ;;  %v52_v34 = vld [vmem:[%s531_s0 + $0x100] sm:$0xff]  ;;  %v80_v41 = vmax.f32 %v44_v32, 0.0  ;;  %v26_v42 = vld [vmem:[%s531_s0 + $0x30] sm:$0xff]  ;;  %v79_v45 = vmax.f32 %v43_v38, 0.0  ;;  %v25_v47 = vld [vmem:[%s531_s0 + $0x28] sm:$0xff] }
   0x9   :  { %148 = vmatpush.msra.mxu1 %v85_v13  ;;  %187 = vmatpush.msra.mxu2 %v91_v25  ;;  %v88_v39 = vmax.f32 %v52_v34, 0.0  ;;  %v42_v43 = vld [vmem:[%s531_s0 + $0xb0] sm:$0xff]  ;;  %v41_v48 = vld [vmem:[%s531_s0 + $0xa8] sm:$0xff]  ;;  %v62_v49 = vmax.f32 %v26_v42, 0.0  ;;  %v24_v51 = vld [vmem:[%s531_s0 + $0x20] sm:$0xff]  ;;  %v61_v53 = vmax.f32 %v25_v47, 0.0 }
   0xa   :  { %120 = vmatpush.msra.mxu0 %v68_v16  ;;  %283 = vmatpush.msra.mxu3 %v68_v16  ;;  %v94_v46 = vld [vmem:[%s532_s1 + $0x10] sm:$0xff]  ;;  %v78_v50 = vmax.f32 %v42_v43, 0.0  ;;  %v40_v52 = vld [vmem:[%s531_s0 + $0xa0] sm:$0xff]  ;;  %v77_v54 = vmax.f32 %v41_v48, 0.0  ;;  %v23_v55 = vld [vmem:[%s531_s0 + $0x18] sm:$0xff]  ;;  %v60_v58 = vmax.f32 %v24_v51, 0.0 }
   0xb   :  { %149 = vmatpush.msra.mxu1 %v84_v17  ;;  %188 = vmatpush.msra.mxu2 %v90_v29  ;;  %v39_v56 = vld [vmem:[%s531_s0 + $0x98] sm:$0xff]  ;;  %v76_v59 = vmax.f32 %v40_v52, 0.0  ;;  %v206_v60 = vld [vmem:[%s533_s2 + $0x10] sm:$0xff]  ;;  %v59_v63 = vmax.f32 %v23_v55, 0.0  ;;  %v97_v1 = vld [vmem:[%s532_s1 + $0x28] sm:$0xff] }
   0xc   :  { %121 = vmatpush.msra.mxu0 %v67_v20  ;;  %284 = vmatpush.msra.mxu3 %v67_v20  ;;  %v22_v61 = vld [vmem:[%s531_s0 + $0x10] sm:$0xff]  ;;  %v75_v0 = vmax.f32 %v39_v56, 0.0  ;;  %v21_v2 = vld [vmem:[%s531_s0 + $0x8] sm:$0xff]  ;;  %v204_v6 = vld [vmem:[%s533_s2] sm:$0xff] }
   0xd   :  { %150 = vmatpush.msra.mxu1 %v83_v21  ;;  %189 = vmatpush.msra.mxu2 %v89_v33  ;;  %v38_v62 = vld [vmem:[%s531_s0 + $0x90] sm:$0xff]  ;;  %v37_v3 = vld [vmem:[%s531_s0 + $0x88] sm:$0xff]  ;;  %v58_v4 = vmax.f32 %v22_v61, 0.0  ;;  %v20_v7 = vld [vmem:[%s531_s0] sm:$0xff]  ;;  %v57_v9 = vmax.f32 %v21_v2, 0.0 }
   0xe   :  { %122 = vmatpush.msra.mxu0 %v66_v27  ;;  %285 = vmatpush.msra.mxu3 %v66_v27  ;;  %v74_v5 = vmax.f32 %v38_v62, 0.0  ;;  %v36_v8 = vld [vmem:[%s531_s0 + $0x80] sm:$0xff]  ;;  %v73_v10 = vmax.f32 %v37_v3, 0.0  ;;  %v56_v11 = vmax.f32 %v20_v7, 0.0  ;;  %v207_v13 = vld [vmem:[%s533_s2 + $0x18] sm:$0xff]  ;;  %v93_v15 = vld [vmem:[%s532_s1 + $0x8] sm:$0xff] }
   0xf   :  { %151 = vmatpush.msra.mxu1 %v82_v28  ;;  %190 = vmatpush.msra.mxu2 %v88_v39  ;;  %v72_v12 = vmax.f32 %v36_v8, 0.0  ;;  %v92_v14 = vld [vmem:[%s532_s1] sm:$0xff]  ;;  %v95_v17 = vld [vmem:[%s532_s1 + $0x18] sm:$0xff]  ;;  %v205_v18 = vld [vmem:[%s533_s2 + $0x8] sm:$0xff] }
  0x10   :  { %123 = vmatpush.msra.mxu0 %v65_v35  ;;  %286 = vmatpush.msra.mxu3 %v65_v35  ;;  %v100_v16 = vld [vmem:[%s532_s1 + $0x40] sm:$0xff]  ;;  %v235_v20 = vld [vmem:[%s534_s3 + $0x18] sm:$0xff]  ;;  %v98_v23 = vld [vmem:[%s532_s1 + $0x30] sm:$0xff] }
  0x11   :  { %152 = vmatpush.msra.mxu1 %v81_v36  ;;  %276 = vmatmul.msk.f32.vlgmr.msra.gmra.mxu2 %vm104_vm0, %v94_v46  ;;  %v232_v19 = vld [vmem:[%s534_s3] sm:$0xff]  ;;  %v103_v22 = vld [vmem:[%s532_s1 + $0x58] sm:$0xff]  ;;  %v234_v24 = vld [vmem:[%s534_s3 + $0x10] sm:$0xff] }
  0x12   :  { %124 = vmatpush.msra.mxu0 %v64_v40  ;;  %287 = vmatpush.msra.mxu3 %v64_v40  ;;  %v96_v21 = vld [vmem:[%s532_s1 + $0x20] sm:$0xff]  ;;  %v233_v25 = vld [vmem:[%s534_s3 + $0x8] sm:$0xff]  ;;  %v99_v26 = vld [vmem:[%s532_s1 + $0x38] sm:$0xff] }
  0x13   :  { %153 = vmatpush.msra.mxu1 %v80_v41  ;;  %220 = vperm.xlu1 %298, %v206_v60   ;;  %v101_v27 = vld [vmem:[%s532_s1 + $0x48] sm:$0xff]  ;;  %v102_v28 = vld [vmem:[%s532_s1 + $0x50] sm:$0xff]  ;;  %v260_v38 = vld [vmem:[%s535_s4] sm:$0xff] }
  0x14   :  { %125 = vmatpush.msra.mxu0 %v63_v44  ;;  %288 = vmatpush.msra.mxu3 %v63_v44  ;;  %v262_v60 = vld [vmem:[%s535_s4 + $0x10] sm:$0xff] }
  0x15   :  { %154 = vmatpush.msra.mxu1 %v79_v45  ;;  %210 = vperm.xlu0 %297, %v204_v6   ;;  %v263_v6 = vld [vmem:[%s535_s4 + $0x18] sm:$0xff] }
  0x16   :  { %126 = vmatpush.msra.mxu0 %v62_v49  ;;  %289 = vmatpush.msra.mxu3 %v62_v49 }
  0x17   :  { %155 = vmatpush.msra.mxu1 %v78_v50  ;;  %238 = vperm.xlu2 %299, %v232_v19   ;;  %v261_v50 = vld [vmem:[%s535_s4 + $0x8] sm:$0xff] }
  0x18   :  { %127 = vmatpush.msra.mxu0 %v61_v53  ;;  %290 = vmatpush.msra.mxu3 %v61_v53 }
  0x19   :  { %156 = vmatpush.msra.mxu1 %v77_v54  ;;  %277 = vmatmul.msk.f32.gmra.mxu2 %vm104_vm0, %v97_v1 }
  0x1a   :  { %128 = vmatpush.msra.mxu0 %v60_v58  ;;  %291 = vmatpush.msra.mxu3 %v60_v58 }
  0x1b   :  { %157 = vmatpush.msra.mxu1 %v76_v59  ;;  %225 = vperm.xlu1 %298, %v207_v13  }
  0x1c   :  { %129 = vmatpush.msra.mxu0 %v59_v63  ;;  %292 = vmatpush.msra.mxu3 %v59_v63 }
  0x1d   :  { %158 = vmatpush.msra.mxu1 %v75_v0  ;;  %215 = vperm.xlu0 %297, %v205_v18  }
  0x1e   :  { %130 = vmatpush.msra.mxu0 %v58_v4  ;;  %293 = vmatpush.msra.mxu3 %v58_v4 }
  0x1f   :  { %159 = vmatpush.msra.mxu1 %v74_v5  ;;  %243 = vperm.xlu2 %299, %v233_v25  }
  0x20   :  { %131 = vmatpush.msra.mxu0 %v57_v9  ;;  %294 = vmatpush.msra.mxu3 %v57_v9 }
  0x21   :  { %160 = vmatpush.msra.mxu1 %v73_v10  ;;  %278 = vmatmul.msk.f32.gmra.mxu2 %vm104_vm0, %v100_v16 }
  0x22   :  { %132 = vmatpush.msra.mxu0 %v56_v11  ;;  %295 = vmatpush.msra.mxu3 %v56_v11 }
  0x23   :  { %161 = vmatpush.msra.mxu1 %v72_v12  ;;  %133 = vmatmul.f32.vlgmr.msra.gmra.mxu0 %v92_v14 }
  0x24   :  { %162 = vmatmul.f32.vlgmr.msra.gmra.mxu1 %v93_v15  ;;  %136 = vmatmul.f32.vlgmr.msra.gmra.mxu3 %v95_v17 }
  0x25   :  { %253 = vperm.xlu1 %298, %v235_v20   ;;  %248 = vperm.xlu0 %297, %v234_v24  }
  0x29   :  { %279 = vmatmul.msk.f32.gmra.mxu2 %vm104_vm0, %v103_v22 }
  0x2c   :  { %165 = vmatmul.f32.gmra.mxu1 %v96_v21  ;;  %139 = vmatmul.f32.gmra.mxu3 %v98_v23 }
  0x34   :  { %168 = vmatmul.f32.gmra.mxu1 %v99_v26  ;;  %142 = vmatmul.f32.gmra.mxu3 %v101_v27 }
  0x3c   :  { %171 = vmatmul.f32.gmra.mxu1 %v102_v28 }
  0x71   :  { %v239_v34 = vpop.permute.xlu2 %238 }
  0x79   :  { %v244_v47 = vpop.permute.xlu2 %243 }
  0x85   :  { %v221_v44 = vpop.permute.xlu1 %220 }
  0x87   :  { %v211_v33 = vpop.permute.xlu0 %210 }
  0x8d   :  { %v226_v57 = vpop.permute.xlu1 %225 }
  0x8f   :  { %v216_v46 = vpop.permute.xlu0 %215 }
  0x94   :  { %v192_v29 = vpop.f32.mrf.mxu2 }
  0x97   :  { %v249_v59 = vpop.permute.xlu0 %248  ;;  %v254_v5 = vpop.permute.xlu1 %253 }
  0x9c   :  { %v195_v36 = vpop.f32.mrf.mxu2 }
  0xa0   :  { %v134_v30 = vpop.f32.mrf.mxu0 }
  0xa1   :  { %v163_v31 = vpop.f32.mrf.mxu1 }
  0xa2   :  { %v164_v32 = vadd.f32 %v163_v31, %v134_v30 }
  0xa4   :  { %v193_v35 = vadd.f32 %v192_v29, %v164_v32  ;;  %v198_v49 = vpop.f32.mrf.mxu2 }
  0xa6   :  { %v228_v37 = vmul.f32 %v211_v33, %v193_v35 }
  0xa7   :  { %v137_v40 = vpop.f32.mrf.mxu3 }
  0xa8   :  { %v256_v39 = vadd.f32 %v239_v34, %v228_v37 }
  0xa9   :  { %v166_v41 = vpop.f32.mrf.mxu1 }
  0xaa   :  { %v264_v42 = vadd.f32 %v260_v38, %v256_v39  ;;  %v167_v43 = vadd.f32 %v166_v41, %v137_v40 }
  0xac   :  { %268 = vst.msk [vmem:[%s536_s5] sm:$0xff] %vm104_vm0, %v264_v42  ;;  %v196_v45 = vadd.f32 %v195_v36, %v167_v43  ;;  %v201_v62 = vpop.f32.mrf.mxu2 }
  0xae   :  { %v229_v48 = vmul.f32 %v216_v46, %v196_v45 }
  0xaf   :  { %v140_v52 = vpop.f32.mrf.mxu3 }
  0xb0   :  { %v257_v51 = vadd.f32 %v244_v47, %v229_v48 }
  0xb1   :  { %v169_v53 = vpop.f32.mrf.mxu1 }
  0xb2   :  { %v265_v54 = vadd.f32 %v261_v50, %v257_v51  ;;  %v170_v55 = vadd.f32 %v169_v53, %v140_v52 }
  0xb4   :  { %269 = vst.msk [vmem:[%s536_s5 + $0x8] sm:$0xff] %vm104_vm0, %v265_v54  ;;  %v199_v56 = vadd.f32 %v198_v49, %v170_v55 }
  0xb6   :  { %v230_v58 = vmul.f32 %v221_v44, %v199_v56 }
  0xb7   :  { %v143_v63 = vpop.f32.mrf.mxu3 }
  0xb8   :  { %v258_v61 = vadd.f32 %v249_v59, %v230_v58 }
  0xb9   :  { %v172_v0 = vpop.f32.mrf.mxu1 }
  0xba   :  { %v266_v1 = vadd.f32 %v262_v60, %v258_v61  ;;  %v173_v2 = vadd.f32 %v172_v0, %v143_v63 }
  0xbc   :  { %270 = vst.msk [vmem:[%s536_s5 + $0x10] sm:$0xff] %vm104_vm0, %v266_v1  ;;  %v202_v3 = vadd.f32 %v201_v62, %v173_v2 }
  0xbe   :  { %v231_v4 = vmul.f32 %v226_v57, %v202_v3 }
  0xc0   :  { %v259_v7 = vadd.f32 %v254_v5, %v231_v4 }
  0xc2   :  { %v267_v8 = vadd.f32 %v263_v6, %v259_v7 }
  0xc4   :  { %271 = vst.msk [vmem:[%s536_s5 + $0x18] sm:$0xff] %vm104_vm0, %v267_v8 }

// kernel: backbone_nb201_forward.45
= control target key start
LH: loop header
LB: loop body
LE: loop exit
PB: predicated region body
PF: predicated region fallthrough
CT: control target
= control target key end

     0   :  { %v264_v0 = vmov 0   ;;  %vm200_vm0 = vcmask 257024   ;;  %s569_s1 = inlined_call_operand.vmem [shape: f32[1,4,4,1], index: 1, kind: input, shape index: {}]   ;;  %s570_s0 = inlined_call_operand.vmem [shape: f32[2,6,6,32], index: 0, kind: input, shape index: {}]   ;;  %s571_s2 = inlined_call_operand.vmem [shape: f32[2,4,4,32], index: 2, kind: input, shape index: {}]   ;;  %s572_s3 = inlined_call_operand.vmem [shape: f32[2,4,4,32], index: 3, kind: output, shape index: {}]  }
   0x1   :  { %263 = vset.pattern.permute.xlu1 %v264_v0  ;;  %262 = vset.pattern.permute.xlu0 %v264_v0  ;;  %v154_v1 = vld [vmem:[%s569_s1 + $0x8] sm:$0xf]  ;;  %v152_v2 = vld [vmem:[%s569_s1] sm:$0xf]  ;;  %v155_v3 = vld [vmem:[%s569_s1 + $0xc] sm:$0xf] }
   0x2   :  { %168 = vperm.xlu1 %263, %v154_v1   ;;  %158 = vperm.xlu0 %262, %v152_v2   ;;  %v153_v4 = vld [vmem:[%s569_s1 + $0x4] sm:$0xf]  ;;  %v16_v5 = vld [vmem:[%s570_s0 + $0x10] sm:$0xf]  ;;  %v20_v6 = vld [vmem:[%s570_s0 + $0x40] sm:$0xf] }
   0x3   :  { %v24_v7 = vld [vmem:[%s570_s0 + $0x11] sm:$0xf]  ;;  %v28_v8 = vld [vmem:[%s570_s0 + $0x41] sm:$0xf]  ;;  %v17_v21 = vld [vmem:[%s570_s0 + $0x18] sm:$0xf] }
   0x4   :  { %v14_v9 = vld [vmem:[%s570_s0] sm:$0xf]  ;;  %v18_v10 = vld [vmem:[%s570_s0 + $0x30] sm:$0xf]  ;;  %v32_v13 = vadd.f32 %v24_v7, %v16_v5  ;;  %v36_v14 = vadd.f32 %v28_v8, %v20_v6  ;;  %v21_v22 = vld [vmem:[%s570_s0 + $0x48] sm:$0xf] }
   0x5   :  { %v22_v11 = vld [vmem:[%s570_s0 + $0x1] sm:$0xf]  ;;  %v26_v12 = vld [vmem:[%s570_s0 + $0x31] sm:$0xf]  ;;  %v215_v23 = vld [vmem:[%s570_s0 + $0x18] sm:$0xf] }
   0x6   :  { %v40_v15 = vld [vmem:[%s570_s0 + $0x12] sm:$0xf]  ;;  %v30_v16 = vadd.f32 %v22_v11, %v14_v9  ;;  %v34_v17 = vadd.f32 %v26_v12, %v18_v10  ;;  %v44_v18 = vld [vmem:[%s570_s0 + $0x42] sm:$0xf]  ;;  %v25_v24 = vld [vmem:[%s570_s0 + $0x19] sm:$0xf] }
   0x7   :  { %v38_v19 = vld [vmem:[%s570_s0 + $0x2] sm:$0xf]  ;;  %v42_v20 = vld [vmem:[%s570_s0 + $0x32] sm:$0xf]  ;;  %v29_v25 = vld [vmem:[%s570_s0 + $0x49] sm:$0xf]  ;;  %v48_v27 = vadd.f32 %v40_v15, %v32_v13  ;;  %v52_v28 = vadd.f32 %v44_v18, %v36_v14  ;;  %v33_v38 = vadd.f32 %v25_v24, %v17_v21 }
   0x8   :  { %v15_v26 = vld [vmem:[%s570_s0 + $0x8] sm:$0xf]  ;;  %v46_v29 = vadd.f32 %v38_v19, %v30_v16  ;;  %v50_v30 = vadd.f32 %v42_v20, %v34_v17  ;;  %v19_v31 = vld [vmem:[%s570_s0 + $0x38] sm:$0xf]  ;;  %v37_v39 = vadd.f32 %v29_v25, %v21_v22  ;;  %v216_v56 = vld [vmem:[%s570_s0 + $0x20] sm:$0xf] }
   0x9   :  { %v23_v32 = vld [vmem:[%s570_s0 + $0x9] sm:$0xf]  ;;  %v27_v33 = vld [vmem:[%s570_s0 + $0x39] sm:$0xf]  ;;  %v65_v43 = vadd.f32 %v215_v23, %v48_v27  ;;  %v220_v63 = vld [vmem:[%s570_s0 + $0x50] sm:$0xf] }
   0xa   :  { %173 = vperm.xlu1 %263, %v155_v3   ;;  %163 = vperm.xlu0 %262, %v153_v4   ;;  %v219_v34 = vld [vmem:[%s570_s0 + $0x48] sm:$0xf]  ;;  %v217_v36 = vld [vmem:[%s570_s0 + $0x38] sm:$0xf]  ;;  %v31_v41 = vadd.f32 %v23_v32, %v15_v26  ;;  %v35_v42 = vadd.f32 %v27_v33, %v19_v31  ;;  %v214_v0 = vld [vmem:[%s570_s0 + $0x10] sm:$0xf] }
   0xb   :  { %v213_v35 = vld [vmem:[%s570_s0 + $0x8] sm:$0xf]  ;;  %v223_v37 = vld [vmem:[%s570_s0 + $0x19] sm:$0xf]  ;;  %v69_v44 = vadd.f32 %v219_v34, %v52_v28  ;;  %v67_v46 = vadd.f32 %v217_v36, %v50_v30  ;;  %v218_v1 = vld [vmem:[%s570_s0 + $0x40] sm:$0xf] }
   0xc   :  { %v41_v40 = vld [vmem:[%s570_s0 + $0x1a] sm:$0xf]  ;;  %v63_v45 = vadd.f32 %v213_v35, %v46_v29  ;;  %v45_v47 = vld [vmem:[%s570_s0 + $0x4a] sm:$0xf]  ;;  %v81_v59 = vadd.f32 %v223_v37, %v65_v43  ;;  %v239_v5 = vld [vmem:[%s570_s0 + $0x20] sm:$0xf] }
   0xd   :  { %v39_v48 = vld [vmem:[%s570_s0 + $0xa] sm:$0xf]  ;;  %v43_v49 = vld [vmem:[%s570_s0 + $0x3a] sm:$0xf]  ;;  %v49_v54 = vadd.f32 %v41_v40, %v33_v38  ;;  %v53_v55 = vadd.f32 %v45_v47, %v37_v39  ;;  %v224_v8 = vld [vmem:[%s570_s0 + $0x21] sm:$0xf] }
   0xe   :  { %v227_v50 = vld [vmem:[%s570_s0 + $0x49] sm:$0xf]  ;;  %v225_v52 = vld [vmem:[%s570_s0 + $0x39] sm:$0xf]  ;;  %v47_v57 = vadd.f32 %v39_v48, %v31_v41  ;;  %v51_v58 = vadd.f32 %v43_v49, %v35_v42  ;;  %v228_v15 = vld [vmem:[%s570_s0 + $0x51] sm:$0xf] }
   0xf   :  { %v221_v51 = vld [vmem:[%s570_s0 + $0x9] sm:$0xf]  ;;  %v231_v53 = vld [vmem:[%s570_s0 + $0x1a] sm:$0xf]  ;;  %v85_v60 = vadd.f32 %v227_v50, %v69_v44  ;;  %v83_v62 = vadd.f32 %v225_v52, %v67_v46  ;;  %v66_v6 = vadd.f32 %v216_v56, %v49_v54  ;;  %v70_v7 = vadd.f32 %v220_v63, %v53_v55  ;;  %v222_v16 = vld [vmem:[%s570_s0 + $0x11] sm:$0xf] }
  0x10   :  { %v79_v61 = vadd.f32 %v221_v51, %v63_v45  ;;  %v235_v2 = vld [vmem:[%s570_s0 + $0x4a] sm:$0xf]  ;;  %v233_v4 = vld [vmem:[%s570_s0 + $0x3a] sm:$0xf]  ;;  %v64_v9 = vadd.f32 %v214_v0, %v47_v57  ;;  %v68_v10 = vadd.f32 %v218_v1, %v51_v58  ;;  %v97_v11 = vadd.f32 %v231_v53, %v81_v59  ;;  %v226_v17 = vld [vmem:[%s570_s0 + $0x41] sm:$0xf] }
  0x11   :  { %v229_v3 = vld [vmem:[%s570_s0 + $0xa] sm:$0xf]  ;;  %v101_v12 = vadd.f32 %v235_v2, %v85_v60  ;;  %v99_v14 = vadd.f32 %v233_v4, %v83_v62  ;;  %v243_v18 = vld [vmem:[%s570_s0 + $0x50] sm:$0xf]  ;;  %v241_v20 = vld [vmem:[%s570_s0 + $0x40] sm:$0xf]  ;;  %v82_v22 = vadd.f32 %v224_v8, %v66_v6  ;;  %v86_v23 = vadd.f32 %v228_v15, %v70_v7 }
  0x12   :  { %v95_v13 = vadd.f32 %v229_v3, %v79_v61  ;;  %v237_v19 = vld [vmem:[%s570_s0 + $0x10] sm:$0xf]  ;;  %v247_v21 = vld [vmem:[%s570_s0 + $0x21] sm:$0xf]  ;;  %v80_v25 = vadd.f32 %v222_v16, %v64_v9  ;;  %v84_v26 = vadd.f32 %v226_v17, %v68_v10  ;;  %v114_v27 = vadd.f32 %v239_v5, %v97_v11  ;;  %v240_v40 = vld [vmem:[%s570_s0 + $0x28] sm:$0xf] }
  0x13   :  { %v232_v24 = vld [vmem:[%s570_s0 + $0x22] sm:$0xf]  ;;  %v118_v28 = vadd.f32 %v243_v18, %v101_v12  ;;  %v116_v30 = vadd.f32 %v241_v20, %v99_v14  ;;  %v236_v31 = vld [vmem:[%s570_s0 + $0x52] sm:$0xf]  ;;  %v244_v47 = vld [vmem:[%s570_s0 + $0x58] sm:$0xf] }
  0x14   :  { %v112_v29 = vadd.f32 %v237_v19, %v95_v13  ;;  %v230_v32 = vld [vmem:[%s570_s0 + $0x12] sm:$0xf]  ;;  %v234_v33 = vld [vmem:[%s570_s0 + $0x42] sm:$0xf]  ;;  %v98_v38 = vadd.f32 %v232_v24, %v82_v22  ;;  %v102_v39 = vadd.f32 %v236_v31, %v86_v23  ;;  %v130_v43 = vadd.f32 %v247_v21, %v114_v27  ;;  %v238_v48 = vld [vmem:[%s570_s0 + $0x18] sm:$0xf] }
  0x15   :  { %v251_v34 = vld [vmem:[%s570_s0 + $0x51] sm:$0xf]  ;;  %v249_v36 = vld [vmem:[%s570_s0 + $0x41] sm:$0xf]  ;;  %v96_v41 = vadd.f32 %v230_v32, %v80_v25  ;;  %v100_v42 = vadd.f32 %v234_v33, %v84_v26  ;;  %v242_v49 = vld [vmem:[%s570_s0 + $0x48] sm:$0xf] }
  0x16   :  { %v245_v35 = vld [vmem:[%s570_s0 + $0x11] sm:$0xf]  ;;  %v255_v37 = vld [vmem:[%s570_s0 + $0x22] sm:$0xf]  ;;  %v134_v44 = vadd.f32 %v251_v34, %v118_v28  ;;  %v132_v46 = vadd.f32 %v249_v36, %v116_v30  ;;  %v115_v53 = vadd.f32 %v240_v40, %v98_v38  ;;  %v119_v54 = vadd.f32 %v244_v47, %v102_v39  ;;  %v248_v55 = vld [vmem:[%s570_s0 + $0x29] sm:$0xf] }
  0x17   :  { %v128_v45 = vadd.f32 %v245_v35, %v112_v29  ;;  %v259_v50 = vld [vmem:[%s570_s0 + $0x52] sm:$0xf]  ;;  %v257_v52 = vld [vmem:[%s570_s0 + $0x42] sm:$0xf]  ;;  %v113_v56 = vadd.f32 %v238_v48, %v96_v41  ;;  %v117_v57 = vadd.f32 %v242_v49, %v100_v42  ;;  %v146_v58 = vadd.f32 %v255_v37, %v130_v43  ;;  %v252_v62 = vld [vmem:[%s570_s0 + $0x59] sm:$0xf] }
  0x18   :  { %v253_v51 = vld [vmem:[%s570_s0 + $0x12] sm:$0xf]  ;;  %v150_v59 = vadd.f32 %v259_v50, %v134_v44  ;;  %v148_v61 = vadd.f32 %v257_v52, %v132_v46  ;;  %v246_v63 = vld [vmem:[%s570_s0 + $0x19] sm:$0xf]  ;;  %v250_v0 = vld [vmem:[%s570_s0 + $0x49] sm:$0xf]  ;;  %v131_v6 = vadd.f32 %v248_v55, %v115_v53  ;;  %v135_v7 = vadd.f32 %v252_v62, %v119_v54 }
  0x19   :  { %v144_v60 = vadd.f32 %v253_v51, %v128_v45  ;;  %v186_v1 = vld [vmem:[%s571_s2 + $0x8] sm:$0xf]  ;;  %v190_v2 = vld [vmem:[%s571_s2 + $0x18] sm:$0xf]  ;;  %v184_v4 = vld [vmem:[%s571_s2] sm:$0xf]  ;;  %v129_v8 = vadd.f32 %v246_v63, %v113_v56  ;;  %v133_v9 = vadd.f32 %v250_v0, %v117_v57 }
  0x1a   :  { %v188_v12 = vld [vmem:[%s571_s2 + $0x10] sm:$0xf]  ;;  %v256_v15 = vld [vmem:[%s570_s0 + $0x2a] sm:$0xf]  ;;  %v260_v16 = vld [vmem:[%s570_s0 + $0x5a] sm:$0xf] }
  0x1b   :  { %v254_v17 = vld [vmem:[%s570_s0 + $0x1a] sm:$0xf]  ;;  %v258_v18 = vld [vmem:[%s570_s0 + $0x4a] sm:$0xf]  ;;  %v147_v23 = vadd.f32 %v256_v15, %v131_v6  ;;  %v151_v24 = vadd.f32 %v260_v16, %v135_v7  ;;  %v185_v30 = vld [vmem:[%s571_s2 + $0x4] sm:$0xf] }
  0x1c   :  { %v145_v25 = vadd.f32 %v254_v17, %v129_v8  ;;  %v149_v26 = vadd.f32 %v258_v18, %v133_v9  ;;  %v187_v27 = vld [vmem:[%s571_s2 + $0xc] sm:$0xf]  ;;  %v191_v28 = vld [vmem:[%s571_s2 + $0x1c] sm:$0xf]  ;;  %v189_v34 = vld [vmem:[%s571_s2 + $0x14] sm:$0xf] }
  0x74   :  { %v169_v3 = vpop.permute.xlu1 %168  ;;  %v159_v5 = vpop.permute.xlu0 %158 }
  0x75   :  { %v178_v10 = vmul.f32 %v169_v3, %v146_v58  ;;  %v182_v11 = vmul.f32 %v169_v3, %v150_v59  ;;  %v176_v13 = vmul.f32 %v159_v5, %v144_v60  ;;  %v180_v14 = vmul.f32 %v159_v5, %v148_v61 }
  0x77   :  { %v194_v19 = vadd.f32 %v186_v1, %v178_v10  ;;  %v198_v20 = vadd.f32 %v190_v2, %v182_v11  ;;  %v192_v21 = vadd.f32 %v184_v4, %v176_v13  ;;  %v196_v22 = vadd.f32 %v188_v12, %v180_v14 }
  0x79   :  { %203 = vst.msk [vmem:[%s572_s3 + $0x8] sm:$0xf] %vm200_vm0, %v194_v19 }
  0x7a   :  { %207 = vst.msk [vmem:[%s572_s3 + $0x18] sm:$0xf] %vm200_vm0, %v198_v20 }
  0x7b   :  { %201 = vst.msk [vmem:[%s572_s3] sm:$0xf] %vm200_vm0, %v192_v21 }
  0x7c   :  { %205 = vst.msk [vmem:[%s572_s3 + $0x10] sm:$0xf] %vm200_vm0, %v196_v22  ;;  %v174_v29 = vpop.permute.xlu1 %173  ;;  %v164_v31 = vpop.permute.xlu0 %163 }
  0x7d   :  { %v179_v32 = vmul.f32 %v174_v29, %v147_v23  ;;  %v183_v33 = vmul.f32 %v174_v29, %v151_v24  ;;  %v177_v35 = vmul.f32 %v164_v31, %v145_v25  ;;  %v181_v36 = vmul.f32 %v164_v31, %v149_v26 }
  0x7f   :  { %v195_v37 = vadd.f32 %v187_v27, %v179_v32  ;;  %v199_v38 = vadd.f32 %v191_v28, %v183_v33  ;;  %v193_v39 = vadd.f32 %v185_v30, %v177_v35  ;;  %v197_v40 = vadd.f32 %v189_v34, %v181_v36 }
  0x81   :  { %204 = vst.msk [vmem:[%s572_s3 + $0xc] sm:$0xf] %vm200_vm0, %v195_v37 }
  0x82   :  { %208 = vst.msk [vmem:[%s572_s3 + $0x1c] sm:$0xf] %vm200_vm0, %v199_v38 }
  0x83   :  { %202 = vst.msk [vmem:[%s572_s3 + $0x4] sm:$0xf] %vm200_vm0, %v193_v39 }
  0x84   :  { %206 = vst.msk [vmem:[%s572_s3 + $0x14] sm:$0xf] %vm200_vm0, %v197_v40 }

// kernel: backbone_nb201_forward.44
= control target key start
LH: loop header
LB: loop body
LE: loop exit
PB: predicated region body
PF: predicated region fallthrough
CT: control target
= control target key end

     0   :  { %v429_v3 = vmov 0   ;;  %vm113_vm0 = vcmask 261120   ;;  %s835_s0 = inlined_call_operand.vmem [shape: f32[288,32], index: 0, kind: input, shape index: {}]   ;;  %s836_s2 = inlined_call_operand.vmem [shape: f32[64,1], index: 2, kind: input, shape index: {}]   ;;  %s837_s1 = inlined_call_operand.vmem [shape: f32[64,288], index: 1, kind: input, shape index: {}]   ;;  %s838_s3 = inlined_call_operand.vmem [shape: f32[64,1], index: 3, kind: input, shape index: {}]   ;;  %s839_s4 = inlined_call_operand.vmem [shape: f32[64,32], index: 4, kind: output, shape index: {}]  }
   0x1   :  { %v32_v0 = vld [vmem:[%s835_s0 + $0x78] sm:$0xff]  ;;  %v31_v2 = vld [vmem:[%s835_s0 + $0x70] sm:$0xff]  ;;  %426 = vset.pattern.permute.xlu0 %v429_v3  ;;  %427 = vset.pattern.permute.xlu1 %v429_v3  ;;  %v30_v8 = vld [vmem:[%s835_s0 + $0x68] sm:$0xff] }
   0x2   :  { %v461_v1 = vld [vmem:[%s835_s0 + $0xf8] sm:$0xff]  ;;  %v68_v4 = vmax.f32 %v32_v0, 0.0  ;;  %v67_v6 = vmax.f32 %v31_v2, 0.0  ;;  %v470_v7 = vld [vmem:[%s835_s0 + $0xf0] sm:$0xff]  ;;  %v478_v9 = vld [vmem:[%s835_s0 + $0xe8] sm:$0xff]  ;;  %428 = vset.pattern.permute.xlu2 %v429_v3  ;;  %v66_v12 = vmax.f32 %v30_v8, 0.0 }
   0x3   :  { %v84_v5 = vmax.f32 %v461_v1, 0.0  ;;  %v83_v10 = vmax.f32 %v470_v7, 0.0  ;;  %v29_v11 = vld [vmem:[%s835_s0 + $0x60] sm:$0xff]  ;;  %v52_v14 = vld [vmem:[%s835_s0 + $0x118] sm:$0xff]  ;;  %v82_v15 = vmax.f32 %v478_v9, 0.0  ;;  %v51_v18 = vld [vmem:[%s835_s0 + $0x110] sm:$0xff] }
   0x4   :  { %138 = vmatpush.msra.mxu0 %v68_v4  ;;  %393 = vmatpush.msra.mxu3 %v68_v4  ;;  %v487_v13 = vld [vmem:[%s835_s0 + $0xe0] sm:$0xff]  ;;  %v28_v16 = vld [vmem:[%s835_s0 + $0x58] sm:$0xff]  ;;  %v88_v17 = vmax.f32 %v52_v14, 0.0  ;;  %v65_v19 = vmax.f32 %v29_v11, 0.0  ;;  %v87_v21 = vmax.f32 %v51_v18, 0.0  ;;  %v50_v22 = vld [vmem:[%s835_s0 + $0x108] sm:$0xff] }
   0x5   :  { %179 = vmatpush.msra.mxu1 %v84_v5  ;;  %v504_v20 = vld [vmem:[%s835_s0 + $0xd8] sm:$0xff]  ;;  %v81_v23 = vmax.f32 %v487_v13, 0.0  ;;  %v27_v24 = vld [vmem:[%s835_s0 + $0x50] sm:$0xff]  ;;  %v64_v25 = vmax.f32 %v28_v16, 0.0  ;;  %v261_v27 = vld [vmem:[%s836_s2] sm:$0xff]  ;;  %v86_v31 = vmax.f32 %v50_v22, 0.0 }
   0x6   :  { %139 = vmatpush.msra.mxu0 %v67_v6  ;;  %394 = vmatpush.msra.mxu3 %v67_v6  ;;  %v518_v26 = vld [vmem:[%s835_s0 + $0xd0] sm:$0xff]  ;;  %v49_v28 = vld [vmem:[%s835_s0 + $0x100] sm:$0xff]  ;;  %v80_v29 = vmax.f32 %v504_v20, 0.0  ;;  %v26_v30 = vld [vmem:[%s835_s0 + $0x48] sm:$0xff]  ;;  %v63_v32 = vmax.f32 %v27_v24, 0.0 }
   0x7   :  { %180 = vmatpush.msra.mxu1 %v83_v10  ;;  %232 = vmatpush.msra.mxu2 %v88_v17  ;;  %v535_v33 = vld [vmem:[%s835_s0 + $0xc8] sm:$0xff]  ;;  %v79_v34 = vmax.f32 %v518_v26, 0.0  ;;  %v25_v35 = vld [vmem:[%s835_s0 + $0x40] sm:$0xff]  ;;  %v85_v36 = vmax.f32 %v49_v28, 0.0  ;;  %v62_v37 = vmax.f32 %v26_v30, 0.0  ;;  %v24_v40 = vld [vmem:[%s835_s0 + $0x38] sm:$0xff] }
   0x8   :  { %140 = vmatpush.msra.mxu0 %v66_v12  ;;  %395 = vmatpush.msra.mxu3 %v66_v12  ;;  %v546_v38 = vld [vmem:[%s835_s0 + $0xc0] sm:$0xff]  ;;  %v78_v39 = vmax.f32 %v535_v33, 0.0  ;;  %v61_v41 = vmax.f32 %v25_v35, 0.0  ;;  %v557_v42 = vld [vmem:[%s835_s0 + $0xb8] sm:$0xff]  ;;  %v91_v43 = vld [vmem:[%s837_s1 + $0x10] sm:$0xff]  ;;  %v60_v46 = vmax.f32 %v24_v40, 0.0 }
   0x9   :  { %181 = vmatpush.msra.mxu1 %v82_v15  ;;  %233 = vmatpush.msra.mxu2 %v87_v21  ;;  %v77_v44 = vmax.f32 %v546_v38, 0.0  ;;  %v23_v45 = vld [vmem:[%s835_s0 + $0x30] sm:$0xff]  ;;  %v262_v48 = vld [vmem:[%s836_s2 + $0x8] sm:$0xff]  ;;  %v76_v49 = vmax.f32 %v557_v42, 0.0  ;;  %v21_v55 = vld [vmem:[%s835_s0 + $0x20] sm:$0xff] }
   0xa   :  { %141 = vmatpush.msra.mxu0 %v65_v19  ;;  %396 = vmatpush.msra.mxu3 %v65_v19  ;;  %v571_v47 = vld [vmem:[%s835_s0 + $0xb0] sm:$0xff]  ;;  %v22_v50 = vld [vmem:[%s835_s0 + $0x28] sm:$0xff]  ;;  %v59_v51 = vmax.f32 %v23_v45, 0.0  ;;  %v600_v57 = vld [vmem:[%s835_s0 + $0xa0] sm:$0xff]  ;;  %v57_v60 = vmax.f32 %v21_v55, 0.0 }
   0xb   :  { %182 = vmatpush.msra.mxu1 %v81_v23  ;;  %271 = vperm.xlu0 %426, %v261_v27   ;;  %v586_v52 = vld [vmem:[%s835_s0 + $0xa8] sm:$0xff]  ;;  %v263_v53 = vld [vmem:[%s836_s2 + $0x10] sm:$0xff]  ;;  %v75_v54 = vmax.f32 %v571_v47, 0.0  ;;  %v58_v56 = vmax.f32 %v22_v50, 0.0  ;;  %v20_v59 = vld [vmem:[%s835_s0 + $0x18] sm:$0xff]  ;;  %v73_v63 = vmax.f32 %v600_v57, 0.0 }
   0xc   :  { %142 = vmatpush.msra.mxu0 %v64_v25  ;;  %397 = vmatpush.msra.mxu3 %v64_v25  ;;  %v74_v58 = vmax.f32 %v586_v52, 0.0  ;;  %v611_v61 = vld [vmem:[%s835_s0 + $0x98] sm:$0xff]  ;;  %v94_v62 = vld [vmem:[%s837_s1 + $0x28] sm:$0xff]  ;;  %v19_v0 = vld [vmem:[%s835_s0 + $0x10] sm:$0xff]  ;;  %v56_v2 = vmax.f32 %v20_v59, 0.0 }
   0xd   :  { %183 = vmatpush.msra.mxu1 %v80_v29  ;;  %234 = vmatpush.msra.mxu2 %v86_v31  ;;  %v625_v3 = vld [vmem:[%s835_s0 + $0x90] sm:$0xff]  ;;  %v72_v6 = vmax.f32 %v611_v61, 0.0  ;;  %v18_v8 = vld [vmem:[%s835_s0 + $0x8] sm:$0xff]  ;;  %v55_v11 = vmax.f32 %v19_v0, 0.0  ;;  %v264_v14 = vld [vmem:[%s836_s2 + $0x18] sm:$0xff] }
   0xe   :  { %143 = vmatpush.msra.mxu0 %v63_v32  ;;  %398 = vmatpush.msra.mxu3 %v63_v32  ;;  %v267_v4 = vld [vmem:[%s836_s2 + $0x30] sm:$0xff]  ;;  %v640_v12 = vld [vmem:[%s835_s0 + $0x88] sm:$0xff]  ;;  %v71_v16 = vmax.f32 %v625_v3, 0.0  ;;  %v17_v17 = vld [vmem:[%s835_s0] sm:$0xff]  ;;  %v54_v18 = vmax.f32 %v18_v8, 0.0 }
   0xf   :  { %184 = vmatpush.msra.mxu1 %v79_v34  ;;  %235 = vmatpush.msra.mxu2 %v85_v36  ;;  %v654_v19 = vld [vmem:[%s835_s0 + $0x80] sm:$0xff]  ;;  %v70_v22 = vmax.f32 %v640_v12, 0.0  ;;  %v53_v24 = vmax.f32 %v17_v17, 0.0  ;;  %v90_v30 = vld [vmem:[%s837_s1 + $0x8] sm:$0xff]  ;;  %v268_v32 = vld [vmem:[%s836_s2 + $0x38] sm:$0xff] }
  0x10   :  { %144 = vmatpush.msra.mxu0 %v62_v37  ;;  %399 = vmatpush.msra.mxu3 %v62_v37  ;;  %v265_v21 = vld [vmem:[%s836_s2 + $0x20] sm:$0xff]  ;;  %v69_v27 = vmax.f32 %v654_v19, 0.0  ;;  %v318_v31 = vld [vmem:[%s838_s3 + $0x8] sm:$0xff]  ;;  %v107_v35 = vld [vmem:[%s837_s1 + $0x90] sm:$0xff] }
  0x11   :  { %185 = vmatpush.msra.mxu1 %v78_v39  ;;  %385 = vmatmul.msk.f32.vlgmr.msra.gmra.mxu2 %vm113_vm0, %v91_v43  ;;  %v97_v25 = vld [vmem:[%s837_s1 + $0x40] sm:$0xff]  ;;  %v266_v36 = vld [vmem:[%s836_s2 + $0x28] sm:$0xff]  ;;  %v100_v37 = vld [vmem:[%s837_s1 + $0x58] sm:$0xff] }
  0x12   :  { %145 = vmatpush.msra.mxu0 %v61_v41  ;;  %400 = vmatpush.msra.mxu3 %v61_v41  ;;  %v89_v28 = vld [vmem:[%s837_s1] sm:$0xff]  ;;  %v92_v1 = vld [vmem:[%s837_s1 + $0x18] sm:$0xff]  ;;  %v319_v9 = vld [vmem:[%s838_s3 + $0x10] sm:$0xff] }
  0x13   :  { %186 = vmatpush.msra.mxu1 %v77_v44  ;;  %276 = vperm.xlu0 %426, %v262_v48   ;;  %v321_v7 = vld [vmem:[%s838_s3 + $0x20] sm:$0xff]  ;;  %v95_v20 = vld [vmem:[%s837_s1 + $0x30] sm:$0xff]  ;;  %v324_v26 = vld [vmem:[%s838_s3 + $0x38] sm:$0xff] }
  0x14   :  { %146 = vmatpush.msra.mxu0 %v60_v46  ;;  %401 = vmatpush.msra.mxu3 %v60_v46  ;;  %v317_v13 = vld [vmem:[%s838_s3] sm:$0xff]  ;;  %v320_v33 = vld [vmem:[%s838_s3 + $0x18] sm:$0xff]  ;;  %v98_v38 = vld [vmem:[%s837_s1 + $0x48] sm:$0xff] }
  0x15   :  { %187 = vmatpush.msra.mxu1 %v76_v49  ;;  %281 = vperm.xlu1 %427, %v263_v53   ;;  %v323_v40 = vld [vmem:[%s838_s3 + $0x30] sm:$0xff]  ;;  %v109_v41 = vld [vmem:[%s837_s1 + $0xa0] sm:$0xff]  ;;  %v108_v42 = vld [vmem:[%s837_s1 + $0x98] sm:$0xff] }
  0x16   :  { %147 = vmatpush.msra.mxu0 %v59_v51  ;;  %402 = vmatpush.msra.mxu3 %v59_v51  ;;  %v101_v43 = vld [vmem:[%s837_s1 + $0x60] sm:$0xff]  ;;  %v112_v45 = vld [vmem:[%s837_s1 + $0xb8] sm:$0xff]  ;;  %v111_v46 = vld [vmem:[%s837_s1 + $0xb0] sm:$0xff] }
  0x17   :  { %188 = vmatpush.msra.mxu1 %v75_v54  ;;  %291 = vperm.xlu2 %428, %v265_v21   ;;  %v104_v47 = vld [vmem:[%s837_s1 + $0x78] sm:$0xff]  ;;  %v105_v48 = vld [vmem:[%s837_s1 + $0x80] sm:$0xff] }
  0x18   :  { %148 = vmatpush.msra.mxu0 %v58_v56  ;;  %403 = vmatpush.msra.mxu3 %v58_v56 }
  0x19   :  { %189 = vmatpush.msra.mxu1 %v74_v58  ;;  %386 = vmatmul.msk.f32.gmra.mxu2 %vm113_vm0, %v94_v62 }
  0x1a   :  { %149 = vmatpush.msra.mxu0 %v57_v60  ;;  %404 = vmatpush.msra.mxu3 %v57_v60 }
  0x1b   :  { %190 = vmatpush.msra.mxu1 %v73_v63  ;;  %301 = vperm.xlu0 %426, %v267_v4  }
  0x1c   :  { %150 = vmatpush.msra.mxu0 %v56_v2  ;;  %405 = vmatpush.msra.mxu3 %v56_v2 }
  0x1d   :  { %191 = vmatpush.msra.mxu1 %v72_v6  ;;  %286 = vperm.xlu1 %427, %v264_v14  }
  0x1e   :  { %151 = vmatpush.msra.mxu0 %v55_v11  ;;  %406 = vmatpush.msra.mxu3 %v55_v11 }
  0x1f   :  { %192 = vmatpush.msra.mxu1 %v71_v16  ;;  %296 = vperm.xlu2 %428, %v266_v36  }
  0x20   :  { %152 = vmatpush.msra.mxu0 %v54_v18  ;;  %407 = vmatpush.msra.mxu3 %v54_v18 }
  0x21   :  { %193 = vmatpush.msra.mxu1 %v70_v22  ;;  %387 = vmatmul.msk.f32.gmra.mxu2 %vm113_vm0, %v97_v25 }
  0x22   :  { %153 = vmatpush.msra.mxu0 %v53_v24  ;;  %408 = vmatpush.msra.mxu3 %v53_v24 }
  0x23   :  { %194 = vmatpush.msra.mxu1 %v69_v27  ;;  %154 = vmatmul.f32.vlgmr.msra.gmra.mxu0 %v89_v28 }
  0x24   :  { %409 = vmatpush.msrb.mxu3 %v84_v5  ;;  %195 = vmatmul.f32.vlgmr.msra.gmra.mxu1 %v90_v30  ;;  %v93_v5 = vld [vmem:[%s837_s1 + $0x20] sm:$0xff] }
  0x25   :  { %332 = vperm.xlu0 %426, %v318_v31   ;;  %306 = vperm.xlu1 %427, %v268_v32  }
  0x26   :  { %410 = vmatpush.msrb.mxu3 %v83_v10  ;;  %v110_v10 = vld [vmem:[%s837_s1 + $0xa8] sm:$0xff] }
  0x27   :  { %172 = vmatmul.f32.vlgmr.msra.gmra.mxu3 %v107_v35  ;;  %327 = vperm.xlu2 %428, %v317_v13  }
  0x28   :  { %411 = vmatpush.msrb.mxu3 %v82_v15  ;;  %v103_v15 = vld [vmem:[%s837_s1 + $0x70] sm:$0xff] }
  0x29   :  { %388 = vmatmul.msk.f32.gmra.mxu2 %vm113_vm0, %v100_v37 }
  0x2a   :  { %412 = vmatpush.msrb.mxu3 %v81_v23  ;;  %v96_v23 = vld [vmem:[%s837_s1 + $0x38] sm:$0xff] }
  0x2b   :  { %157 = vmatmul.f32.gmra.mxu0 %v92_v1 }
  0x2c   :  { %413 = vmatpush.msrb.mxu3 %v80_v29  ;;  %198 = vmatmul.f32.gmra.mxu1 %v93_v5  ;;  %v322_v29 = vld [vmem:[%s838_s3 + $0x28] sm:$0xff] }
  0x2d   :  { %347 = vperm.xlu0 %426, %v321_v7   ;;  %337 = vperm.xlu1 %427, %v319_v9  }
  0x2e   :  { %414 = vmatpush.msrb.mxu3 %v79_v34  ;;  %v106_v34 = vld [vmem:[%s837_s1 + $0x88] sm:$0xff] }
  0x2f   :  { %175 = vmatmul.f32.gmra.mxu3 %v110_v10  ;;  %342 = vperm.xlu2 %428, %v320_v33  }
  0x30   :  { %415 = vmatpush.msrb.mxu3 %v78_v39  ;;  %v99_v39 = vld [vmem:[%s837_s1 + $0x50] sm:$0xff] }
  0x31   :  { %389 = vmatmul.msk.f32.gmra.mxu2 %vm113_vm0, %v103_v15 }
  0x32   :  { %416 = vmatpush.msrb.mxu3 %v77_v44  ;;  %v102_v44 = vld [vmem:[%s837_s1 + $0x68] sm:$0xff] }
  0x33   :  { %160 = vmatmul.f32.gmra.mxu0 %v95_v20 }
  0x34   :  { %417 = vmatpush.msrb.mxu3 %v76_v49  ;;  %201 = vmatmul.f32.gmra.mxu1 %v96_v23 }
  0x35   :  { %362 = vperm.xlu0 %426, %v324_v26   ;;  %352 = vperm.xlu1 %427, %v322_v29  }
  0x36   :  { %418 = vmatpush.msrb.mxu3 %v75_v54 }
  0x37   :  { %357 = vperm.xlu2 %428, %v323_v40  }
  0x38   :  { %419 = vmatpush.msrb.mxu3 %v74_v58 }
  0x39   :  { %390 = vmatmul.msk.f32.gmra.mxu2 %vm113_vm0, %v106_v34 }
  0x3a   :  { %420 = vmatpush.msrb.mxu3 %v73_v63 }
  0x3b   :  { %163 = vmatmul.f32.gmra.mxu0 %v98_v38 }
  0x3c   :  { %421 = vmatpush.msrb.mxu3 %v72_v6  ;;  %204 = vmatmul.f32.gmra.mxu1 %v99_v39 }
  0x3e   :  { %422 = vmatpush.msrb.mxu3 %v71_v16 }
  0x40   :  { %423 = vmatpush.msrb.mxu3 %v70_v22 }
  0x41   :  { %391 = vmatmul.msk.f32.gmra.mxu2 %vm113_vm0, %v109_v41 }
  0x42   :  { %424 = vmatpush.msrb.mxu3 %v69_v27 }
  0x43   :  { %213 = vmatmul.f32.vlgmr.msrb.gmra.mxu3 %v108_v42  ;;  %166 = vmatmul.f32.gmra.mxu0 %v101_v43 }
  0x44   :  { %207 = vmatmul.f32.gmra.mxu1 %v102_v44 }
  0x49   :  { %392 = vmatmul.msk.f32.gmra.mxu2 %vm113_vm0, %v112_v45 }
  0x4b   :  { %216 = vmatmul.f32.gmra.mxu3 %v111_v46  ;;  %169 = vmatmul.f32.gmra.mxu0 %v104_v47 }
  0x4c   :  { %210 = vmatmul.f32.gmra.mxu1 %v105_v48 }
  0x71   :  { %v292_v50 = vpop.permute.xlu2 %291 }
  0x79   :  { %v297_v55 = vpop.permute.xlu2 %296 }
  0x7d   :  { %v272_v49 = vpop.permute.xlu0 %271 }
  0x81   :  { %v328_v0 = vpop.permute.xlu2 %327 }
  0x85   :  { %v277_v53 = vpop.permute.xlu0 %276 }
  0x87   :  { %v282_v52 = vpop.permute.xlu1 %281 }
  0x89   :  { %v343_v7 = vpop.permute.xlu2 %342 }
  0x8d   :  { %v302_v62 = vpop.permute.xlu0 %301 }
  0x8f   :  { %v287_v59 = vpop.permute.xlu1 %286 }
  0x91   :  { %v358_v44 = vpop.permute.xlu2 %357 }
  0x94   :  { %v237_v51 = vpop.f32.mrf.mxu2 }
  0x97   :  { %v307_v12 = vpop.permute.xlu1 %306  ;;  %v333_v16 = vpop.permute.xlu0 %332 }
  0x9c   :  { %v240_v54 = vpop.f32.mrf.mxu2 }
  0x9f   :  { %v338_v28 = vpop.permute.xlu1 %337  ;;  %v348_v33 = vpop.permute.xlu0 %347 }
  0xa0   :  { %v155_v56 = vpop.f32.mrf.mxu0 }
  0xa1   :  { %v196_v57 = vpop.f32.mrf.mxu1 }
  0xa2   :  { %v197_v58 = vadd.f32 %v196_v57, %v155_v56 }
  0xa4   :  { %v238_v60 = vadd.f32 %v237_v51, %v197_v58  ;;  %v243_v61 = vpop.f32.mrf.mxu2 }
  0xa6   :  { %v309_v63 = vmul.f32 %v272_v49, %v238_v60 }
  0xa7   :  { %v363_v56 = vpop.permute.xlu0 %362 }
  0xa8   :  { %v365_v2 = vadd.f32 %v328_v0, %v309_v63  ;;  %v158_v3 = vpop.f32.mrf.mxu0 }
  0xa9   :  { %v199_v4 = vpop.f32.mrf.mxu1 }
  0xaa   :  { %373 = vst.msk [vmem:[%s839_s4] sm:$0xff] %vm113_vm0, %v365_v2  ;;  %v200_v6 = vadd.f32 %v199_v4, %v158_v3  ;;  %v173_v22 = vpop.f32.mrf.mxu3 }
  0xac   :  { %v241_v8 = vadd.f32 %v240_v54, %v200_v6  ;;  %v246_v11 = vpop.f32.mrf.mxu2 }
  0xae   :  { %v310_v14 = vmul.f32 %v277_v53, %v241_v8 }
  0xb0   :  { %v366_v17 = vadd.f32 %v333_v16, %v310_v14  ;;  %v161_v18 = vpop.f32.mrf.mxu0 }
  0xb1   :  { %v202_v19 = vpop.f32.mrf.mxu1 }
  0xb2   :  { %374 = vst.msk [vmem:[%s839_s4 + $0x8] sm:$0xff] %vm113_vm0, %v366_v17  ;;  %v203_v21 = vadd.f32 %v202_v19, %v161_v18  ;;  %v176_v37 = vpop.f32.mrf.mxu3 }
  0xb4   :  { %v244_v24 = vadd.f32 %v243_v61, %v203_v21  ;;  %v249_v25 = vpop.f32.mrf.mxu2 }
  0xb6   :  { %v311_v27 = vmul.f32 %v282_v52, %v244_v24 }
  0xb8   :  { %v367_v30 = vadd.f32 %v338_v28, %v311_v27  ;;  %v164_v31 = vpop.f32.mrf.mxu0 }
  0xb9   :  { %v205_v32 = vpop.f32.mrf.mxu1 }
  0xba   :  { %375 = vst.msk [vmem:[%s839_s4 + $0x10] sm:$0xff] %vm113_vm0, %v367_v30  ;;  %v206_v35 = vadd.f32 %v205_v32, %v164_v31 }
  0xbc   :  { %v247_v36 = vadd.f32 %v246_v11, %v206_v35  ;;  %v252_v1 = vpop.f32.mrf.mxu2 }
  0xbe   :  { %v312_v5 = vmul.f32 %v287_v59, %v247_v36 }
  0xc0   :  { %v368_v9 = vadd.f32 %v343_v7, %v312_v5  ;;  %v167_v10 = vpop.f32.mrf.mxu0 }
  0xc1   :  { %v208_v13 = vpop.f32.mrf.mxu1 }
  0xc2   :  { %376 = vst.msk [vmem:[%s839_s4 + $0x18] sm:$0xff] %vm113_vm0, %v368_v9  ;;  %v209_v15 = vadd.f32 %v208_v13, %v167_v10 }
  0xc4   :  { %v250_v20 = vadd.f32 %v249_v25, %v209_v15  ;;  %v255_v23 = vpop.f32.mrf.mxu2 }
  0xc6   :  { %v313_v26 = vmul.f32 %v292_v50, %v250_v20  ;;  %v214_v29 = vpop.f32.mrf.mxu3  ;;  %v353_v50 = vpop.permute.xlu1 %352 }
  0xc7   :  { %v215_v34 = vadd.f32 %v214_v29, %v173_v22 }
  0xc8   :  { %v369_v38 = vadd.f32 %v348_v33, %v313_v26  ;;  %v170_v39 = vpop.f32.mrf.mxu0 }
  0xc9   :  { %v256_v40 = vadd.f32 %v255_v23, %v215_v34  ;;  %v211_v41 = vpop.f32.mrf.mxu1 }
  0xca   :  { %377 = vst.msk [vmem:[%s839_s4 + $0x20] sm:$0xff] %vm113_vm0, %v369_v38  ;;  %v212_v42 = vadd.f32 %v211_v41, %v170_v39 }
  0xcb   :  { %v315_v43 = vmul.f32 %v302_v62, %v256_v40 }
  0xcc   :  { %v253_v45 = vadd.f32 %v252_v1, %v212_v42  ;;  %v258_v49 = vpop.f32.mrf.mxu2 }
  0xcd   :  { %v371_v46 = vadd.f32 %v358_v44, %v315_v43 }
  0xce   :  { %v314_v47 = vmul.f32 %v297_v55, %v253_v45  ;;  %v217_v48 = vpop.f32.mrf.mxu3 }
  0xcf   :  { %379 = vst.msk [vmem:[%s839_s4 + $0x30] sm:$0xff] %vm113_vm0, %v371_v46  ;;  %v218_v51 = vadd.f32 %v217_v48, %v176_v37 }
  0xd0   :  { %v370_v52 = vadd.f32 %v353_v50, %v314_v47 }
  0xd1   :  { %v259_v53 = vadd.f32 %v258_v49, %v218_v51 }
  0xd2   :  { %378 = vst.msk [vmem:[%s839_s4 + $0x28] sm:$0xff] %vm113_vm0, %v370_v52 }
  0xd3   :  { %v316_v54 = vmul.f32 %v307_v12, %v259_v53 }
  0xd5   :  { %v372_v57 = vadd.f32 %v363_v56, %v316_v54 }
  0xd7   :  { %380 = vst.msk [vmem:[%s839_s4 + $0x38] sm:$0xff] %vm113_vm0, %v372_v57 }

// kernel: backbone_nb201_forward.46
= control target key start
LH: loop header
LB: loop body
LE: loop exit
PB: predicated region body
PF: predicated region fallthrough
CT: control target
= control target key end

     0   :  { %vm101_vm0 = vcmask 261120   ;;  %v289_v57 = vmov 0   ;;  %s503_s0 = inlined_call_operand.vmem [shape: f32[288,32], index: 0, kind: input, shape index: {}]   ;;  %s504_s1 = inlined_call_operand.vmem [shape: f32[32,288], index: 1, kind: input, shape index: {}]   ;;  %s505_s2 = inlined_call_operand.vmem [shape: f32[32,1], index: 2, kind: input, shape index: {}]   ;;  %s506_s3 = inlined_call_operand.vmem [shape: f32[32,1], index: 3, kind: input, shape index: {}]   ;;  %s507_s4 = inlined_call_operand.vmem [shape: f32[32,32], index: 4, kind: output, shape index: {}]  }
   0x1   :  { %v32_v0 = vld [vmem:[%s503_s0 + $0x78] sm:$0xff]  ;;  %v31_v2 = vld [vmem:[%s503_s0 + $0x70] sm:$0xff]  ;;  %v30_v7 = vld [vmem:[%s503_s0 + $0x68] sm:$0xff]  ;;  %287 = vset.pattern.permute.xlu1 %v289_v57  ;;  %286 = vset.pattern.permute.xlu0 %v289_v57 }
   0x2   :  { %v48_v1 = vld [vmem:[%s503_s0 + $0xf8] sm:$0xff]  ;;  %v68_v3 = vmax.f32 %v32_v0, 0.0  ;;  %v67_v5 = vmax.f32 %v31_v2, 0.0  ;;  %v47_v6 = vld [vmem:[%s503_s0 + $0xf0] sm:$0xff]  ;;  %v46_v8 = vld [vmem:[%s503_s0 + $0xe8] sm:$0xff]  ;;  %v66_v12 = vmax.f32 %v30_v7, 0.0  ;;  %288 = vset.pattern.permute.xlu2 %v289_v57 }
   0x3   :  { %v84_v4 = vmax.f32 %v48_v1, 0.0  ;;  %v83_v9 = vmax.f32 %v47_v6, 0.0  ;;  %v29_v10 = vld [vmem:[%s503_s0 + $0x60] sm:$0xff]  ;;  %v82_v13 = vmax.f32 %v46_v8, 0.0  ;;  %v28_v14 = vld [vmem:[%s503_s0 + $0x58] sm:$0xff]  ;;  %v27_v18 = vld [vmem:[%s503_s0 + $0x50] sm:$0xff] }
   0x4   :  { %v45_v11 = vld [vmem:[%s503_s0 + $0xe0] sm:$0xff]  ;;  %114 = vmatpush.msra.mxu0 %v68_v3  ;;  %269 = vmatpush.msra.mxu3 %v68_v3  ;;  %v44_v15 = vld [vmem:[%s503_s0 + $0xd8] sm:$0xff]  ;;  %v65_v16 = vmax.f32 %v29_v10, 0.0  ;;  %v43_v19 = vld [vmem:[%s503_s0 + $0xd0] sm:$0xff]  ;;  %v64_v20 = vmax.f32 %v28_v14, 0.0  ;;  %v63_v27 = vmax.f32 %v27_v18, 0.0 }
   0x5   :  { %143 = vmatpush.msra.mxu1 %v84_v4  ;;  %v81_v17 = vmax.f32 %v45_v11, 0.0  ;;  %v80_v21 = vmax.f32 %v44_v15, 0.0  ;;  %v52_v22 = vld [vmem:[%s503_s0 + $0x118] sm:$0xff]  ;;  %v26_v23 = vld [vmem:[%s503_s0 + $0x48] sm:$0xff]  ;;  %v51_v26 = vld [vmem:[%s503_s0 + $0x110] sm:$0xff]  ;;  %v79_v28 = vmax.f32 %v43_v19, 0.0 }
   0x6   :  { %115 = vmatpush.msra.mxu0 %v67_v5  ;;  %270 = vmatpush.msra.mxu3 %v67_v5  ;;  %v42_v24 = vld [vmem:[%s503_s0 + $0xc8] sm:$0xff]  ;;  %v88_v25 = vmax.f32 %v52_v22, 0.0  ;;  %v87_v29 = vmax.f32 %v51_v26, 0.0  ;;  %v25_v31 = vld [vmem:[%s503_s0 + $0x40] sm:$0xff]  ;;  %v62_v35 = vmax.f32 %v26_v23, 0.0  ;;  %v24_v37 = vld [vmem:[%s503_s0 + $0x38] sm:$0xff] }
   0x7   :  { %144 = vmatpush.msra.mxu1 %v83_v9  ;;  %v50_v30 = vld [vmem:[%s503_s0 + $0x108] sm:$0xff]  ;;  %v41_v32 = vld [vmem:[%s503_s0 + $0xc0] sm:$0xff]  ;;  %v78_v36 = vmax.f32 %v42_v24, 0.0  ;;  %v40_v38 = vld [vmem:[%s503_s0 + $0xb8] sm:$0xff]  ;;  %v61_v40 = vmax.f32 %v25_v31, 0.0  ;;  %v60_v44 = vmax.f32 %v24_v37, 0.0 }
   0x8   :  { %116 = vmatpush.msra.mxu0 %v66_v12  ;;  %271 = vmatpush.msra.mxu3 %v66_v12  ;;  %v86_v33 = vmax.f32 %v50_v30, 0.0  ;;  %v49_v34 = vld [vmem:[%s503_s0 + $0x100] sm:$0xff]  ;;  %v77_v41 = vmax.f32 %v41_v32, 0.0  ;;  %v23_v42 = vld [vmem:[%s503_s0 + $0x30] sm:$0xff]  ;;  %v76_v45 = vmax.f32 %v40_v38, 0.0  ;;  %v22_v47 = vld [vmem:[%s503_s0 + $0x28] sm:$0xff] }
   0x9   :  { %145 = vmatpush.msra.mxu1 %v82_v13  ;;  %184 = vmatpush.msra.mxu2 %v88_v25  ;;  %v85_v39 = vmax.f32 %v49_v34, 0.0  ;;  %v39_v43 = vld [vmem:[%s503_s0 + $0xb0] sm:$0xff]  ;;  %v38_v48 = vld [vmem:[%s503_s0 + $0xa8] sm:$0xff]  ;;  %v59_v49 = vmax.f32 %v23_v42, 0.0  ;;  %v21_v51 = vld [vmem:[%s503_s0 + $0x20] sm:$0xff]  ;;  %v58_v53 = vmax.f32 %v22_v47, 0.0 }
   0xa   :  { %117 = vmatpush.msra.mxu0 %v65_v16  ;;  %272 = vmatpush.msra.mxu3 %v65_v16  ;;  %v91_v46 = vld [vmem:[%s504_s1 + $0x10] sm:$0xff]  ;;  %v75_v50 = vmax.f32 %v39_v43, 0.0  ;;  %v37_v52 = vld [vmem:[%s503_s0 + $0xa0] sm:$0xff]  ;;  %v74_v54 = vmax.f32 %v38_v48, 0.0  ;;  %v20_v55 = vld [vmem:[%s503_s0 + $0x18] sm:$0xff]  ;;  %v57_v58 = vmax.f32 %v21_v51, 0.0 }
   0xb   :  { %146 = vmatpush.msra.mxu1 %v81_v17  ;;  %185 = vmatpush.msra.mxu2 %v87_v29  ;;  %v36_v56 = vld [vmem:[%s503_s0 + $0x98] sm:$0xff]  ;;  %v73_v59 = vmax.f32 %v37_v52, 0.0  ;;  %v203_v60 = vld [vmem:[%s505_s2 + $0x10] sm:$0xff]  ;;  %v56_v63 = vmax.f32 %v20_v55, 0.0  ;;  %v94_v1 = vld [vmem:[%s504_s1 + $0x28] sm:$0xff] }
   0xc   :  { %118 = vmatpush.msra.mxu0 %v64_v20  ;;  %273 = vmatpush.msra.mxu3 %v64_v20  ;;  %v19_v61 = vld [vmem:[%s503_s0 + $0x10] sm:$0xff]  ;;  %v72_v0 = vmax.f32 %v36_v56, 0.0  ;;  %v18_v2 = vld [vmem:[%s503_s0 + $0x8] sm:$0xff]  ;;  %v201_v6 = vld [vmem:[%s505_s2] sm:$0xff] }
   0xd   :  { %147 = vmatpush.msra.mxu1 %v80_v21  ;;  %186 = vmatpush.msra.mxu2 %v86_v33  ;;  %v35_v62 = vld [vmem:[%s503_s0 + $0x90] sm:$0xff]  ;;  %v34_v3 = vld [vmem:[%s503_s0 + $0x88] sm:$0xff]  ;;  %v55_v4 = vmax.f32 %v19_v61, 0.0  ;;  %v17_v7 = vld [vmem:[%s503_s0] sm:$0xff]  ;;  %v54_v9 = vmax.f32 %v18_v2, 0.0 }
   0xe   :  { %119 = vmatpush.msra.mxu0 %v63_v27  ;;  %274 = vmatpush.msra.mxu3 %v63_v27  ;;  %v71_v5 = vmax.f32 %v35_v62, 0.0  ;;  %v33_v8 = vld [vmem:[%s503_s0 + $0x80] sm:$0xff]  ;;  %v70_v10 = vmax.f32 %v34_v3, 0.0  ;;  %v53_v11 = vmax.f32 %v17_v7, 0.0  ;;  %v204_v13 = vld [vmem:[%s505_s2 + $0x18] sm:$0xff]  ;;  %v90_v15 = vld [vmem:[%s504_s1 + $0x8] sm:$0xff] }
   0xf   :  { %148 = vmatpush.msra.mxu1 %v79_v28  ;;  %187 = vmatpush.msra.mxu2 %v85_v39  ;;  %v69_v12 = vmax.f32 %v33_v8, 0.0  ;;  %v89_v14 = vld [vmem:[%s504_s1] sm:$0xff]  ;;  %v92_v17 = vld [vmem:[%s504_s1 + $0x18] sm:$0xff]  ;;  %v202_v18 = vld [vmem:[%s505_s2 + $0x8] sm:$0xff] }
  0x10   :  { %120 = vmatpush.msra.mxu0 %v62_v35  ;;  %275 = vmatpush.msra.mxu3 %v62_v35  ;;  %v97_v16 = vld [vmem:[%s504_s1 + $0x40] sm:$0xff]  ;;  %v232_v20 = vld [vmem:[%s506_s3 + $0x18] sm:$0xff]  ;;  %v95_v23 = vld [vmem:[%s504_s1 + $0x30] sm:$0xff] }
  0x11   :  { %149 = vmatpush.msra.mxu1 %v78_v36  ;;  %265 = vmatmul.msk.f32.vlgmr.msra.gmra.mxu2 %vm101_vm0, %v91_v46  ;;  %v229_v19 = vld [vmem:[%s506_s3] sm:$0xff]  ;;  %v100_v22 = vld [vmem:[%s504_s1 + $0x58] sm:$0xff]  ;;  %v231_v24 = vld [vmem:[%s506_s3 + $0x10] sm:$0xff] }
  0x12   :  { %121 = vmatpush.msra.mxu0 %v61_v40  ;;  %276 = vmatpush.msra.mxu3 %v61_v40  ;;  %v93_v21 = vld [vmem:[%s504_s1 + $0x20] sm:$0xff]  ;;  %v230_v25 = vld [vmem:[%s506_s3 + $0x8] sm:$0xff]  ;;  %v96_v26 = vld [vmem:[%s504_s1 + $0x38] sm:$0xff] }
  0x13   :  { %150 = vmatpush.msra.mxu1 %v77_v41  ;;  %217 = vperm.xlu1 %287, %v203_v60   ;;  %v98_v27 = vld [vmem:[%s504_s1 + $0x48] sm:$0xff]  ;;  %v99_v28 = vld [vmem:[%s504_s1 + $0x50] sm:$0xff] }
  0x14   :  { %122 = vmatpush.msra.mxu0 %v60_v44  ;;  %277 = vmatpush.msra.mxu3 %v60_v44 }
  0x15   :  { %151 = vmatpush.msra.mxu1 %v76_v45  ;;  %207 = vperm.xlu0 %286, %v201_v6  }
  0x16   :  { %123 = vmatpush.msra.mxu0 %v59_v49  ;;  %278 = vmatpush.msra.mxu3 %v59_v49 }
  0x17   :  { %152 = vmatpush.msra.mxu1 %v75_v50  ;;  %235 = vperm.xlu2 %288, %v229_v19  }
  0x18   :  { %124 = vmatpush.msra.mxu0 %v58_v53  ;;  %279 = vmatpush.msra.mxu3 %v58_v53 }
  0x19   :  { %153 = vmatpush.msra.mxu1 %v74_v54  ;;  %266 = vmatmul.msk.f32.gmra.mxu2 %vm101_vm0, %v94_v1 }
  0x1a   :  { %125 = vmatpush.msra.mxu0 %v57_v58  ;;  %280 = vmatpush.msra.mxu3 %v57_v58 }
  0x1b   :  { %154 = vmatpush.msra.mxu1 %v73_v59  ;;  %222 = vperm.xlu1 %287, %v204_v13  }
  0x1c   :  { %126 = vmatpush.msra.mxu0 %v56_v63  ;;  %281 = vmatpush.msra.mxu3 %v56_v63 }
  0x1d   :  { %155 = vmatpush.msra.mxu1 %v72_v0  ;;  %212 = vperm.xlu0 %286, %v202_v18  }
  0x1e   :  { %127 = vmatpush.msra.mxu0 %v55_v4  ;;  %282 = vmatpush.msra.mxu3 %v55_v4 }
  0x1f   :  { %156 = vmatpush.msra.mxu1 %v71_v5  ;;  %240 = vperm.xlu2 %288, %v230_v25  }
  0x20   :  { %128 = vmatpush.msra.mxu0 %v54_v9  ;;  %283 = vmatpush.msra.mxu3 %v54_v9 }
  0x21   :  { %157 = vmatpush.msra.mxu1 %v70_v10  ;;  %267 = vmatmul.msk.f32.gmra.mxu2 %vm101_vm0, %v97_v16 }
  0x22   :  { %129 = vmatpush.msra.mxu0 %v53_v11  ;;  %284 = vmatpush.msra.mxu3 %v53_v11 }
  0x23   :  { %158 = vmatpush.msra.mxu1 %v69_v12  ;;  %130 = vmatmul.f32.vlgmr.msra.gmra.mxu0 %v89_v14 }
  0x24   :  { %159 = vmatmul.f32.vlgmr.msra.gmra.mxu1 %v90_v15  ;;  %133 = vmatmul.f32.vlgmr.msra.gmra.mxu3 %v92_v17 }
  0x25   :  { %250 = vperm.xlu1 %287, %v232_v20   ;;  %245 = vperm.xlu0 %286, %v231_v24  }
  0x29   :  { %268 = vmatmul.msk.f32.gmra.mxu2 %vm101_vm0, %v100_v22 }
  0x2c   :  { %162 = vmatmul.f32.gmra.mxu1 %v93_v21  ;;  %136 = vmatmul.f32.gmra.mxu3 %v95_v23 }
  0x34   :  { %165 = vmatmul.f32.gmra.mxu1 %v96_v26  ;;  %139 = vmatmul.f32.gmra.mxu3 %v98_v27 }
  0x3c   :  { %168 = vmatmul.f32.gmra.mxu1 %v99_v28 }
  0x71   :  { %v236_v34 = vpop.permute.xlu2 %235 }
  0x79   :  { %v241_v45 = vpop.permute.xlu2 %240 }
  0x85   :  { %v218_v42 = vpop.permute.xlu1 %217 }
  0x87   :  { %v208_v33 = vpop.permute.xlu0 %207 }
  0x8d   :  { %v223_v53 = vpop.permute.xlu1 %222 }
  0x8f   :  { %v213_v44 = vpop.permute.xlu0 %212 }
  0x94   :  { %v189_v29 = vpop.f32.mrf.mxu2 }
  0x97   :  { %v246_v55 = vpop.permute.xlu0 %245  ;;  %v251_v63 = vpop.permute.xlu1 %250 }
  0x9c   :  { %v192_v36 = vpop.f32.mrf.mxu2 }
  0xa0   :  { %v131_v30 = vpop.f32.mrf.mxu0 }
  0xa1   :  { %v160_v31 = vpop.f32.mrf.mxu1 }
  0xa2   :  { %v161_v32 = vadd.f32 %v160_v31, %v131_v30 }
  0xa4   :  { %v190_v35 = vadd.f32 %v189_v29, %v161_v32  ;;  %v195_v47 = vpop.f32.mrf.mxu2 }
  0xa6   :  { %v225_v37 = vmul.f32 %v208_v33, %v190_v35 }
  0xa7   :  { %v134_v39 = vpop.f32.mrf.mxu3 }
  0xa8   :  { %v253_v38 = vadd.f32 %v236_v34, %v225_v37 }
  0xa9   :  { %v163_v40 = vpop.f32.mrf.mxu1 }
  0xaa   :  { %257 = vst.msk [vmem:[%s507_s4] sm:$0xff] %vm101_vm0, %v253_v38  ;;  %v164_v41 = vadd.f32 %v163_v40, %v134_v39 }
  0xac   :  { %v193_v43 = vadd.f32 %v192_v36, %v164_v41  ;;  %v198_v57 = vpop.f32.mrf.mxu2 }
  0xae   :  { %v226_v46 = vmul.f32 %v213_v44, %v193_v43 }
  0xaf   :  { %v137_v49 = vpop.f32.mrf.mxu3 }
  0xb0   :  { %v254_v48 = vadd.f32 %v241_v45, %v226_v46 }
  0xb1   :  { %v166_v50 = vpop.f32.mrf.mxu1 }
  0xb2   :  { %258 = vst.msk [vmem:[%s507_s4 + $0x8] sm:$0xff] %vm101_vm0, %v254_v48  ;;  %v167_v51 = vadd.f32 %v166_v50, %v137_v49 }
  0xb4   :  { %v196_v52 = vadd.f32 %v195_v47, %v167_v51 }
  0xb6   :  { %v227_v54 = vmul.f32 %v218_v42, %v196_v52 }
  0xb7   :  { %v140_v58 = vpop.f32.mrf.mxu3 }
  0xb8   :  { %v255_v56 = vadd.f32 %v246_v55, %v227_v54 }
  0xb9   :  { %v169_v59 = vpop.f32.mrf.mxu1 }
  0xba   :  { %259 = vst.msk [vmem:[%s507_s4 + $0x10] sm:$0xff] %vm101_vm0, %v255_v56  ;;  %v170_v60 = vadd.f32 %v169_v59, %v140_v58 }
  0xbc   :  { %v199_v61 = vadd.f32 %v198_v57, %v170_v60 }
  0xbe   :  { %v228_v62 = vmul.f32 %v223_v53, %v199_v61 }
  0xc0   :  { %v256_v0 = vadd.f32 %v251_v63, %v228_v62 }
  0xc2   :  { %260 = vst.msk [vmem:[%s507_s4 + $0x18] sm:$0xff] %vm101_vm0, %v256_v0 }

</bundles_post_ra>
